<compile_context>
chip_gen: v6e
topology: v6e:2x2x1
jax: 0.10.0
libtpu: 0.0.40
codegen_flags: <defaults>
</compile_context>

<pallas_src>
import functools

import jax
import jax.numpy as jnp
from jax.experimental import pallas as pl
from jax.experimental.pallas import tpu as pltpu

BN_EPS = 1e-5
LANES = 128          # MXU / vreg lane width
SUBLANES_BF16 = 16   # bf16 sublane packing


def _round_up(x, m):
    return (x + m - 1) // m * m


def _vmem_capacity_bytes():
    try:
        cap = getattr(pltpu.get_tpu_info(), "vmem_capacity_bytes", None)
        if cap:
            return int(cap)
    except Exception:
        pass
    return 64 * 1024 * 1024  # conservative fallback: v7x per-TensorCore VMEM


def _estimate_vmem_bytes(th, w, hp2, wp2, cip, cop, co):
    """Rough per-grid-step VMEM footprint of the apply pass (the bigger one)."""
    blk_x = hp2 * wp2 * cip * 2          # whole padded image, bf16
    blk_w = 16 * cip * cop * 2           # 4 phases x 4 taps weight matrices
    blk_out = 4 * th * w * co * 2        # bf16 output tile (4 phases)
    blk_ab = 2 * cop * 4
    pipelined = 2 * (blk_x + blk_w + blk_out + blk_ab)   # double buffers
    taps = 9 * th * w * cip * 2          # pre-loaded shifted tap slabs
    interm = 4 * th * w * cop * 4        # f32 accumulator / affine temporaries
    return pipelined + taps + interm + (4 << 20)          # + compiler scratch


def _pick_row_tile(h, w, hp2, wp2, cip, cop, co, vmem_cap):
    """Largest divisor of H whose footprint fits ~45% of VMEM.

    TH*W must be a multiple of 8 (output block sublane rule) unless TH == H
    (full-dim block, always legal)."""
    budget = int(0.45 * vmem_cap)
    cands = [d for d in range(h, 0, -1)
             if h % d == 0 and ((d * w) % 8 == 0 or d == h)]
    for d in cands:
        if _estimate_vmem_bytes(d, w, hp2, wp2, cip, cop, co) <= budget:
            return d
    return cands[-1]


# ---------------------------------------------------------------------------
# Shared in-kernel tap gather + 4-phase matmuls.
#   out[n, co, 2u+ro, 2v+rc] = sum_{a,b,ci} x_pad[n, u+ro+a, v+rc+b, ci]
#                                          * W[ci, co, 3-ro-2a, 3-rc-2b]
# ---------------------------------------------------------------------------
def _phase_outputs(x_ref, w_ref, u0, *, th, w, cip, cop):
    """y for the 4 output-parity phases of one row tile.

    x_ref : [1, H+2, W+2, Cip] bf16  (whole padded image, resident in VMEM)
    w_ref : [4, 4, Cip, Cop]   bf16  (w_ref[2*ro+rc, 2*a+b] = W[:,:,3-ro-2a,3-rc-2b])
    Returns a list of 4 f32 arrays of shape [TH*W, Cop], indexed by 2*ro+rc.
    """
    # 9 distinct shifted tap slabs; each is reused by up to 4 (phase, tap) pairs.
    taps = {}
    for dr in range(3):
        for dc in range(3):
            slab = x_ref[0, pl.ds(u0 + dr, th), pl.ds(dc, w), :]   # [TH, W, Cip]
            taps[(dr, dc)] = slab.reshape(th * w, cip)
    outs = []
    for ro in range(2):
        for rc in range(2):
            acc = None
            for a in range(2):
                for b in range(2):
                    d = jnp.dot(taps[(ro + a, rc + b)],
                                w_ref[2 * ro + rc, 2 * a + b],
                                preferred_element_type=jnp.float32)
                    acc = d if acc is None else acc + d
            outs.append(acc)                                       # [TH*W, Cop] f32
    return outs


# ---------------------------------------------------------------------------
# Pass 1: per-(image, row-tile) partial BN statistics (sum, sum of squares).
# ---------------------------------------------------------------------------
def _stats_kernel(x_ref, w_ref, s_ref, *, th, w, cip, cop):
    u0 = pl.program_id(1) * th
    ys = _phase_outputs(x_ref, w_ref, u0, th=th, w=w, cip=cip, cop=cop)
    s = jnp.zeros((1, cop), jnp.float32)
    ss = jnp.zeros((1, cop), jnp.float32)
    for y in ys:
        s = s + jnp.sum(y, axis=0, keepdims=True)
        ss = ss + jnp.sum(y * y, axis=0, keepdims=True)
    # TODO(synk): for 4*Ci << Co configs, move these reductions onto the MXU
    # (ones-matvec / Gram-matrix trick) if pass 1 ever shows up in traces.
    s_ref[0, 0] = jnp.concatenate([s, ss], axis=0)                 # [2, Cop]


# ---------------------------------------------------------------------------
# Pass 2: recompute y, apply folded BN affine (y*a + b) + ReLU, store bf16.
# ---------------------------------------------------------------------------
def _apply_kernel(x_ref, w_ref, a_ref, b_ref, o_ref, *, th, w, cip, cop, co):
    u0 = pl.program_id(1) * th
    ys = _phase_outputs(x_ref, w_ref, u0, th=th, w=w, cip=cip, cop=cop)
    aff_a = a_ref[...]                                             # [1, Cop] f32
    aff_b = b_ref[...]
    for ph in range(4):
        ro, rc = ph // 2, ph % 2
        y = jnp.maximum(ys[ph] * aff_a + aff_b, 0.0)
        o_ref[0, ro, rc] = y[:, :co].astype(o_ref.dtype)           # [TH*W, Co]


@functools.partial(jax.jit, static_argnames=("kernel_size", "stride", "padding"))
def gblock_forward(x_nchw, w_t, gamma, beta, kernel_size=4, stride=2, padding=1):
    """GBlock forward.  x_nchw [N,Ci,H,W]; w_t = PyTorch ConvTranspose2d weight
    [Ci,Co,K,K].  Returns NCHW bf16 [N, Co, 2H, 2W]."""
    assert kernel_size == 4 and stride == 2 and padding == 1, (
        "phase decomposition is specialised to k=4, s=2, p=1")
    n, ci, h, w = x_nchw.shape
    wci, co, k, _ = w_t.shape
    assert wci == ci and k == kernel_size

    cip = _round_up(ci, SUBLANES_BF16)      # matmul contraction dim (bf16 packing)
    cop = _round_up(co, LANES)              # matmul N dim (in-VMEM only)
    hp2, wp2 = h + 2, w + 2

    # x: NCHW -> NHWC, cast to bf16 FIRST, then pad (1-pixel halo + channels).
    x_nhwc = jnp.transpose(x_nchw, (0, 2, 3, 1)).astype(jnp.bfloat16)
    x_pad = jnp.pad(x_nhwc, ((0, 0), (1, 1), (1, 1), (0, cip - ci)))

    # Per-(phase, tap) weight matrices: w_taps[2*ro+rc, 2*a+b] = W[:,:,3-ro-2a,3-rc-2b].
    wt = w_t.astype(jnp.bfloat16)
    taps = [wt[:, :, 3 - ro - 2 * a, 3 - rc - 2 * b]
            for ro in range(2) for rc in range(2)
            for a in range(2) for b in range(2)]
    w_taps = jnp.stack(taps, axis=0).reshape(4, 4, ci, co)
    w_taps = jnp.pad(w_taps, ((0, 0), (0, 0), (0, cip - ci), (0, cop - co)))
    gamma_p = jnp.pad(gamma.astype(jnp.float32), (0, cop - co))
    beta_p = jnp.pad(beta.astype(jnp.float32), (0, cop - co))

    # Tile H so the per-step footprint fits this device's VMEM.
    vmem_cap = _vmem_capacity_bytes()
    th = _pick_row_tile(h, w, hp2, wp2, cip, cop, co, vmem_cap)
    t_tiles = h // th
    est = _estimate_vmem_bytes(th, w, hp2, wp2, cip, cop, co)
    vmem_limit = int(min(0.85 * vmem_cap, max(32 << 20, 2 * est)))
    compiler_params = pltpu.CompilerParams(
        dimension_semantics=("parallel", "parallel"),
        vmem_limit_bytes=vmem_limit)

    # x block depends only on the batch axis; the weight block is grid-constant.
    # Neither is re-DMA'd across the inner row-tile axis, so no deeper
    # pl.Buffered pipelining is needed: only the small per-tile outputs stream.
    x_spec = pl.BlockSpec((1, hp2, wp2, cip), lambda nn, tt: (nn, 0, 0, 0))
    w_spec = pl.BlockSpec((4, 4, cip, cop), lambda nn, tt: (0, 0, 0, 0))

    # ---- pass 1: partial (sum, sum_sq) per channel -> global BN statistics --
    part = pl.pallas_call(
        functools.partial(_stats_kernel, th=th, w=w, cip=cip, cop=cop),
        out_shape=jax.ShapeDtypeStruct((n, t_tiles, 2, cop), jnp.float32),
        grid=(n, t_tiles),
        in_specs=[x_spec, w_spec],
        out_specs=pl.BlockSpec((1, 1, 2, cop), lambda nn, tt: (nn, tt, 0, 0)),
        compiler_params=compiler_params,
    )(x_pad, w_taps)

    count = jnp.float32(4 * n * h * w)                 # = N * (2H) * (2W)
    total = jnp.sum(part, axis=(0, 1))                 # [2, Cop]
    mean = total[0] / count
    # NOTE: E[y^2] - E[y]^2 in f32; adequate at bf16-output tolerance.
    var = jnp.maximum(total[1] / count - mean * mean, 0.0)
    inv_std = jax.lax.rsqrt(var + BN_EPS)
    aff_a = (gamma_p * inv_std).reshape(1, cop)
    aff_b = (beta_p - mean * gamma_p * inv_std).reshape(1, cop)

    # ---- pass 2: recompute y, fused affine + ReLU, bf16 phase-major output --
    out_ph = pl.pallas_call(
        functools.partial(_apply_kernel, th=th, w=w, cip=cip, cop=cop, co=co),
        out_shape=jax.ShapeDtypeStruct((n, 2, 2, h * w, co), jnp.bfloat16),
        grid=(n, t_tiles),
        in_specs=[x_spec, w_spec,
                  pl.BlockSpec((1, cop), lambda nn, tt: (0, 0)),
                  pl.BlockSpec((1, cop), lambda nn, tt: (0, 0))],
        out_specs=pl.BlockSpec((1, 2, 2, th * w, co),
                               lambda nn, tt: (nn, 0, 0, tt, 0)),
        compiler_params=compiler_params,
    )(x_pad, w_taps, aff_a, aff_b)

    # Phase interleave + NCHW relayout folded into ONE bf16 transpose.
    # TODO(synk): skip this transpose (return NHWC directly) when the consumer
    # accepts channels-last; interleave the phases in-kernel in that case.
    out = out_ph.reshape(n, 2, 2, h, w, co)
    out = jnp.transpose(out, (0, 5, 3, 1, 4, 2)).reshape(n, co, 2 * h, 2 * w)
    return out


def _reference(x_nchw, w_t, gamma, beta, stride=2, padding=1):
    """Pure-JAX reference: dilated conv == ConvTranspose2d, then BN(train)+ReLU."""
    k = w_t.shape[-1]
    w_conv = jnp.transpose(w_t[:, :, ::-1, ::-1], (1, 0, 2, 3))  # [Co, Ci, K, K]
    pp = k - 1 - padding
    y = jax.lax.conv_general_dilated(
        x_nchw, w_conv, window_strides=(1, 1),
        padding=[(pp, pp), (pp, pp)], lhs_dilation=(stride, stride),
        dimension_numbers=("NCHW", "OIHW", "NCHW"))
    mean = jnp.mean(y, axis=(0, 2, 3), keepdims=True)
    var = jnp.mean((y - mean) ** 2, axis=(0, 2, 3), keepdims=True)
    y_hat = (y - mean) * jax.lax.rsqrt(var + BN_EPS)
    y_hat = y_hat * gamma.reshape(1, -1, 1, 1) + beta.reshape(1, -1, 1, 1)
    return jnp.maximum(y_hat, 0.0)


if __name__ == "__main__":
    key = jax.random.PRNGKey(0)
    k_x, k_w, k_g, k_b = jax.random.split(key, 4)

    N, Ci, H, W = 2, 3, 16, 16          # ConvTranspose2d default in_channels=3
    Co, K, S, P = 8, 4, 2, 1            # out_channels=8 -> output 2x8x32x32

    # Pre-round x / weights to bf16-representable values so the bf16 MXU path
    # and the f32 reference see identical operands.
    x = jax.random.normal(k_x, (N, Ci, H, W), dtype=jnp.float32)
    x = x.astype(jnp.bfloat16).astype(jnp.float32)
    w_t = 0.05 * jax.random.normal(k_w, (Ci, Co, K, K), dtype=jnp.float32)
    w_t = w_t.astype(jnp.bfloat16).astype(jnp.float32)
    gamma = 1.0 + 0.1 * jax.random.normal(k_g, (Co,), dtype=jnp.float32)
    beta = 0.1 * jax.random.normal(k_b, (Co,), dtype=jnp.float32)

    out = gblock_forward(x, w_t, gamma, beta, kernel_size=K, stride=S, padding=P)
    out = jax.block_until_ready(out)
    assert out.shape == (N, Co, 2 * H, 2 * W), out.shape

    ref = jax.block_until_ready(_reference(x, w_t, gamma, beta, stride=S, padding=P))
    out_f32 = out.astype(jnp.float32)
    err = float(jnp.max(jnp.abs(out_f32 - ref)))
    # bf16 output dtype bounds the error at ~half-ulp of the output magnitude.
    assert jnp.allclose(out_f32, ref, atol=3e-2, rtol=3e-2), f"max abs err {err}"

    print("KERNEL_OK")
</pallas_src>

<mosaic_0001>
module attributes {stable_mosaic.version = 11 : i64} {
  func.func @_stats_kernel(%arg0: i32, %arg1: i32, %arg2: memref<1x18x18x16xbf16, #tpu.memory_space<vmem>>, %arg3: memref<4x4x16x128xbf16, #tpu.memory_space<vmem>>, %arg4: memref<1x1x2x128xf32, #tpu.memory_space<vmem>>) attributes {dimension_semantics = [#tpu.dimension_semantics<parallel>, #tpu.dimension_semantics<parallel>], iteration_bounds = array<i64: 2, 1>, scalar_prefetch = 0 : i64, scratch_operands = 0 : i64, tpu.core_type = #tpu.core_type<tc>, window_params = [{transform_indices = @transform_0, window_bounds = array<i64: 1, 18, 18, 16>}, {pipeline_mode = #tpu.pipeline_mode<synchronous>, transform_indices = @transform_1, window_bounds = array<i64: 4, 4, 16, 128>}, {transform_indices = @transform_2, window_bounds = array<i64: 1, 1, 2, 128>}]} {
    %c16_i32 = arith.constant 16 : i32
    %0 = arith.muli %arg1, %c16_i32 : i32
    %c0_i32 = arith.constant 0 : i32
    %1 = arith.addi %0, %c0_i32 : i32
    %c0 = arith.constant 0 : index
    %2 = arith.index_cast %1 : i32 to index
    %c0_0 = arith.constant 0 : index
    %c0_1 = arith.constant 0 : index
    %3 = vector.load %arg2[%c0, %2, %c0_0, %c0_1] : memref<1x18x18x16xbf16, #tpu.memory_space<vmem>>, vector<1x16x16x16xbf16>
    %4 = vector.shape_cast %3 : vector<1x16x16x16xbf16> to vector<16x16x16xbf16>
    %5 = vector.shape_cast %4 : vector<16x16x16xbf16> to vector<256x16xbf16>
    %c0_i32_2 = arith.constant 0 : i32
    %6 = arith.addi %0, %c0_i32_2 : i32
    %c0_3 = arith.constant 0 : index
    %7 = arith.index_cast %6 : i32 to index
    %c1 = arith.constant 1 : index
    %c0_4 = arith.constant 0 : index
    %8 = vector.load %arg2[%c0_3, %7, %c1, %c0_4] : memref<1x18x18x16xbf16, #tpu.memory_space<vmem>>, vector<1x16x16x16xbf16>
    %9 = vector.shape_cast %8 : vector<1x16x16x16xbf16> to vector<16x16x16xbf16>
    %10 = vector.shape_cast %9 : vector<16x16x16xbf16> to vector<256x16xbf16>
    %c0_i32_5 = arith.constant 0 : i32
    %11 = arith.addi %0, %c0_i32_5 : i32
    %c0_6 = arith.constant 0 : index
    %12 = arith.index_cast %11 : i32 to index
    %c2 = arith.constant 2 : index
    %c0_7 = arith.constant 0 : index
    %13 = vector.load %arg2[%c0_6, %12, %c2, %c0_7] : memref<1x18x18x16xbf16, #tpu.memory_space<vmem>>, vector<1x16x16x16xbf16>
    %14 = vector.shape_cast %13 : vector<1x16x16x16xbf16> to vector<16x16x16xbf16>
    %15 = vector.shape_cast %14 : vector<16x16x16xbf16> to vector<256x16xbf16>
    %c1_i32 = arith.constant 1 : i32
    %16 = arith.addi %0, %c1_i32 : i32
    %c0_8 = arith.constant 0 : index
    %17 = arith.index_cast %16 : i32 to index
    %c0_9 = arith.constant 0 : index
    %c0_10 = arith.constant 0 : index
    %18 = vector.load %arg2[%c0_8, %17, %c0_9, %c0_10] : memref<1x18x18x16xbf16, #tpu.memory_space<vmem>>, vector<1x16x16x16xbf16>
    %19 = vector.shape_cast %18 : vector<1x16x16x16xbf16> to vector<16x16x16xbf16>
    %20 = vector.shape_cast %19 : vector<16x16x16xbf16> to vector<256x16xbf16>
    %c1_i32_11 = arith.constant 1 : i32
    %21 = arith.addi %0, %c1_i32_11 : i32
    %c0_12 = arith.constant 0 : index
    %22 = arith.index_cast %21 : i32 to index
    %c1_13 = arith.constant 1 : index
    %c0_14 = arith.constant 0 : index
    %23 = vector.load %arg2[%c0_12, %22, %c1_13, %c0_14] : memref<1x18x18x16xbf16, #tpu.memory_space<vmem>>, vector<1x16x16x16xbf16>
    %24 = vector.shape_cast %23 : vector<1x16x16x16xbf16> to vector<16x16x16xbf16>
    %25 = vector.shape_cast %24 : vector<16x16x16xbf16> to vector<256x16xbf16>
    %c1_i32_15 = arith.constant 1 : i32
    %26 = arith.addi %0, %c1_i32_15 : i32
    %c0_16 = arith.constant 0 : index
    %27 = arith.index_cast %26 : i32 to index
    %c2_17 = arith.constant 2 : index
    %c0_18 = arith.constant 0 : index
    %28 = vector.load %arg2[%c0_16, %27, %c2_17, %c0_18] : memref<1x18x18x16xbf16, #tpu.memory_space<vmem>>, vector<1x16x16x16xbf16>
    %29 = vector.shape_cast %28 : vector<1x16x16x16xbf16> to vector<16x16x16xbf16>
    %30 = vector.shape_cast %29 : vector<16x16x16xbf16> to vector<256x16xbf16>
    %c2_i32 = arith.constant 2 : i32
    %31 = arith.addi %0, %c2_i32 : i32
    %c0_19 = arith.constant 0 : index
    %32 = arith.index_cast %31 : i32 to index
    %c0_20 = arith.constant 0 : index
    %c0_21 = arith.constant 0 : index
    %33 = vector.load %arg2[%c0_19, %32, %c0_20, %c0_21] : memref<1x18x18x16xbf16, #tpu.memory_space<vmem>>, vector<1x16x16x16xbf16>
    %34 = vector.shape_cast %33 : vector<1x16x16x16xbf16> to vector<16x16x16xbf16>
    %35 = vector.shape_cast %34 : vector<16x16x16xbf16> to vector<256x16xbf16>
    %c2_i32_22 = arith.constant 2 : i32
    %36 = arith.addi %0, %c2_i32_22 : i32
    %c0_23 = arith.constant 0 : index
    %37 = arith.index_cast %36 : i32 to index
    %c1_24 = arith.constant 1 : index
    %c0_25 = arith.constant 0 : index
    %38 = vector.load %arg2[%c0_23, %37, %c1_24, %c0_25] : memref<1x18x18x16xbf16, #tpu.memory_space<vmem>>, vector<1x16x16x16xbf16>
    %39 = vector.shape_cast %38 : vector<1x16x16x16xbf16> to vector<16x16x16xbf16>
    %40 = vector.shape_cast %39 : vector<16x16x16xbf16> to vector<256x16xbf16>
    %c2_i32_26 = arith.constant 2 : i32
    %41 = arith.addi %0, %c2_i32_26 : i32
    %c0_27 = arith.constant 0 : index
    %42 = arith.index_cast %41 : i32 to index
    %c2_28 = arith.constant 2 : index
    %c0_29 = arith.constant 0 : index
    %43 = vector.load %arg2[%c0_27, %42, %c2_28, %c0_29] : memref<1x18x18x16xbf16, #tpu.memory_space<vmem>>, vector<1x16x16x16xbf16>
    %44 = vector.shape_cast %43 : vector<1x16x16x16xbf16> to vector<16x16x16xbf16>
    %45 = vector.shape_cast %44 : vector<16x16x16xbf16> to vector<256x16xbf16>
    %c0_30 = arith.constant 0 : index
    %c0_31 = arith.constant 0 : index
    %c0_32 = arith.constant 0 : index
    %c0_33 = arith.constant 0 : index
    %46 = vector.load %arg3[%c0_30, %c0_31, %c0_32, %c0_33] : memref<4x4x16x128xbf16, #tpu.memory_space<vmem>>, vector<1x1x16x128xbf16>
    %47 = vector.shape_cast %46 : vector<1x1x16x128xbf16> to vector<16x128xbf16>
    %cst = arith.constant dense<0.000000e+00> : vector<256x128xf32>
    %48 = tpu.matmul %5, %47, %cst {dimension_numbers = #tpu.dot_dimension_numbers<[1], [0], [0], [1], [0, 0, 1, 1], [], []>} : vector<256x16xbf16>, vector<16x128xbf16>, vector<256x128xf32> -> vector<256x128xf32>
    %c0_34 = arith.constant 0 : index
    %c1_35 = arith.constant 1 : index
    %c0_36 = arith.constant 0 : index
    %c0_37 = arith.constant 0 : index
    %49 = vector.load %arg3[%c0_34, %c1_35, %c0_36, %c0_37] : memref<4x4x16x128xbf16, #tpu.memory_space<vmem>>, vector<1x1x16x128xbf16>
    %50 = vector.shape_cast %49 : vector<1x1x16x128xbf16> to vector<16x128xbf16>
    %cst_38 = arith.constant dense<0.000000e+00> : vector<256x128xf32>
    %51 = tpu.matmul %10, %50, %cst_38 {dimension_numbers = #tpu.dot_dimension_numbers<[1], [0], [0], [1], [0, 0, 1, 1], [], []>} : vector<256x16xbf16>, vector<16x128xbf16>, vector<256x128xf32> -> vector<256x128xf32>
    %52 = arith.addf %48, %51 : vector<256x128xf32>
    %c0_39 = arith.constant 0 : index
    %c2_40 = arith.constant 2 : index
    %c0_41 = arith.constant 0 : index
    %c0_42 = arith.constant 0 : index
    %53 = vector.load %arg3[%c0_39, %c2_40, %c0_41, %c0_42] : memref<4x4x16x128xbf16, #tpu.memory_space<vmem>>, vector<1x1x16x128xbf16>
    %54 = vector.shape_cast %53 : vector<1x1x16x128xbf16> to vector<16x128xbf16>
    %cst_43 = arith.constant dense<0.000000e+00> : vector<256x128xf32>
    %55 = tpu.matmul %20, %54, %cst_43 {dimension_numbers = #tpu.dot_dimension_numbers<[1], [0], [0], [1], [0, 0, 1, 1], [], []>} : vector<256x16xbf16>, vector<16x128xbf16>, vector<256x128xf32> -> vector<256x128xf32>
    %56 = arith.addf %52, %55 : vector<256x128xf32>
    %c0_44 = arith.constant 0 : index
    %c3 = arith.constant 3 : index
    %c0_45 = arith.constant 0 : index
    %c0_46 = arith.constant 0 : index
    %57 = vector.load %arg3[%c0_44, %c3, %c0_45, %c0_46] : memref<4x4x16x128xbf16, #tpu.memory_space<vmem>>, vector<1x1x16x128xbf16>
    %58 = vector.shape_cast %57 : vector<1x1x16x128xbf16> to vector<16x128xbf16>
    %cst_47 = arith.constant dense<0.000000e+00> : vector<256x128xf32>
    %59 = tpu.matmul %25, %58, %cst_47 {dimension_numbers = #tpu.dot_dimension_numbers<[1], [0], [0], [1], [0, 0, 1, 1], [], []>} : vector<256x16xbf16>, vector<16x128xbf16>, vector<256x128xf32> -> vector<256x128xf32>
    %60 = arith.addf %56, %59 : vector<256x128xf32>
    %c1_48 = arith.constant 1 : index
    %c0_49 = arith.constant 0 : index
    %c0_50 = arith.constant 0 : index
    %c0_51 = arith.constant 0 : index
    %61 = vector.load %arg3[%c1_48, %c0_49, %c0_50, %c0_51] : memref<4x4x16x128xbf16, #tpu.memory_space<vmem>>, vector<1x1x16x128xbf16>
    %62 = vector.shape_cast %61 : vector<1x1x16x128xbf16> to vector<16x128xbf16>
    %cst_52 = arith.constant dense<0.000000e+00> : vector<256x128xf32>
    %63 = tpu.matmul %10, %62, %cst_52 {dimension_numbers = #tpu.dot_dimension_numbers<[1], [0], [0], [1], [0, 0, 1, 1], [], []>} : vector<256x16xbf16>, vector<16x128xbf16>, vector<256x128xf32> -> vector<256x128xf32>
    %c1_53 = arith.constant 1 : index
    %c1_54 = arith.constant 1 : index
    %c0_55 = arith.constant 0 : index
    %c0_56 = arith.constant 0 : index
    %64 = vector.load %arg3[%c1_53, %c1_54, %c0_55, %c0_56] : memref<4x4x16x128xbf16, #tpu.memory_space<vmem>>, vector<1x1x16x128xbf16>
    %65 = vector.shape_cast %64 : vector<1x1x16x128xbf16> to vector<16x128xbf16>
    %cst_57 = arith.constant dense<0.000000e+00> : vector<256x128xf32>
    %66 = tpu.matmul %15, %65, %cst_57 {dimension_numbers = #tpu.dot_dimension_numbers<[1], [0], [0], [1], [0, 0, 1, 1], [], []>} : vector<256x16xbf16>, vector<16x128xbf16>, vector<256x128xf32> -> vector<256x128xf32>
    %67 = arith.addf %63, %66 : vector<256x128xf32>
    %c1_58 = arith.constant 1 : index
    %c2_59 = arith.constant 2 : index
    %c0_60 = arith.constant 0 : index
    %c0_61 = arith.constant 0 : index
    %68 = vector.load %arg3[%c1_58, %c2_59, %c0_60, %c0_61] : memref<4x4x16x128xbf16, #tpu.memory_space<vmem>>, vector<1x1x16x128xbf16>
    %69 = vector.shape_cast %68 : vector<1x1x16x128xbf16> to vector<16x128xbf16>
    %cst_62 = arith.constant dense<0.000000e+00> : vector<256x128xf32>
    %70 = tpu.matmul %25, %69, %cst_62 {dimension_numbers = #tpu.dot_dimension_numbers<[1], [0], [0], [1], [0, 0, 1, 1], [], []>} : vector<256x16xbf16>, vector<16x128xbf16>, vector<256x128xf32> -> vector<256x128xf32>
    %71 = arith.addf %67, %70 : vector<256x128xf32>
    %c1_63 = arith.constant 1 : index
    %c3_64 = arith.constant 3 : index
    %c0_65 = arith.constant 0 : index
    %c0_66 = arith.constant 0 : index
    %72 = vector.load %arg3[%c1_63, %c3_64, %c0_65, %c0_66] : memref<4x4x16x128xbf16, #tpu.memory_space<vmem>>, vector<1x1x16x128xbf16>
    %73 = vector.shape_cast %72 : vector<1x1x16x128xbf16> to vector<16x128xbf16>
    %cst_67 = arith.constant dense<0.000000e+00> : vector<256x128xf32>
    %74 = tpu.matmul %30, %73, %cst_67 {dimension_numbers = #tpu.dot_dimension_numbers<[1], [0], [0], [1], [0, 0, 1, 1], [], []>} : vector<256x16xbf16>, vector<16x128xbf16>, vector<256x128xf32> -> vector<256x128xf32>
    %75 = arith.addf %71, %74 : vector<256x128xf32>
    %c2_68 = arith.constant 2 : index
    %c0_69 = arith.constant 0 : index
    %c0_70 = arith.constant 0 : index
    %c0_71 = arith.constant 0 : index
    %76 = vector.load %arg3[%c2_68, %c0_69, %c0_70, %c0_71] : memref<4x4x16x128xbf16, #tpu.memory_space<vmem>>, vector<1x1x16x128xbf16>
    %77 = vector.shape_cast %76 : vector<1x1x16x128xbf16> to vector<16x128xbf16>
    %cst_72 = arith.constant dense<0.000000e+00> : vector<256x128xf32>
    %78 = tpu.matmul %20, %77, %cst_72 {dimension_numbers = #tpu.dot_dimension_numbers<[1], [0], [0], [1], [0, 0, 1, 1], [], []>} : vector<256x16xbf16>, vector<16x128xbf16>, vector<256x128xf32> -> vector<256x128xf32>
    %c2_73 = arith.constant 2 : index
    %c1_74 = arith.constant 1 : index
    %c0_75 = arith.constant 0 : index
    %c0_76 = arith.constant 0 : index
    %79 = vector.load %arg3[%c2_73, %c1_74, %c0_75, %c0_76] : memref<4x4x16x128xbf16, #tpu.memory_space<vmem>>, vector<1x1x16x128xbf16>
    %80 = vector.shape_cast %79 : vector<1x1x16x128xbf16> to vector<16x128xbf16>
    %cst_77 = arith.constant dense<0.000000e+00> : vector<256x128xf32>
    %81 = tpu.matmul %25, %80, %cst_77 {dimension_numbers = #tpu.dot_dimension_numbers<[1], [0], [0], [1], [0, 0, 1, 1], [], []>} : vector<256x16xbf16>, vector<16x128xbf16>, vector<256x128xf32> -> vector<256x128xf32>
    %82 = arith.addf %78, %81 : vector<256x128xf32>
    %c2_78 = arith.constant 2 : index
    %c2_79 = arith.constant 2 : index
    %c0_80 = arith.constant 0 : index
    %c0_81 = arith.constant 0 : index
    %83 = vector.load %arg3[%c2_78, %c2_79, %c0_80, %c0_81] : memref<4x4x16x128xbf16, #tpu.memory_space<vmem>>, vector<1x1x16x128xbf16>
    %84 = vector.shape_cast %83 : vector<1x1x16x128xbf16> to vector<16x128xbf16>
    %cst_82 = arith.constant dense<0.000000e+00> : vector<256x128xf32>
    %85 = tpu.matmul %35, %84, %cst_82 {dimension_numbers = #tpu.dot_dimension_numbers<[1], [0], [0], [1], [0, 0, 1, 1], [], []>} : vector<256x16xbf16>, vector<16x128xbf16>, vector<256x128xf32> -> vector<256x128xf32>
    %86 = arith.addf %82, %85 : vector<256x128xf32>
    %c2_83 = arith.constant 2 : index
    %c3_84 = arith.constant 3 : index
    %c0_85 = arith.constant 0 : index
    %c0_86 = arith.constant 0 : index
    %87 = vector.load %arg3[%c2_83, %c3_84, %c0_85, %c0_86] : memref<4x4x16x128xbf16, #tpu.memory_space<vmem>>, vector<1x1x16x128xbf16>
    %88 = vector.shape_cast %87 : vector<1x1x16x128xbf16> to vector<16x128xbf16>
    %cst_87 = arith.constant dense<0.000000e+00> : vector<256x128xf32>
    %89 = tpu.matmul %40, %88, %cst_87 {dimension_numbers = #tpu.dot_dimension_numbers<[1], [0], [0], [1], [0, 0, 1, 1], [], []>} : vector<256x16xbf16>, vector<16x128xbf16>, vector<256x128xf32> -> vector<256x128xf32>
    %90 = arith.addf %86, %89 : vector<256x128xf32>
    %c3_88 = arith.constant 3 : index
    %c0_89 = arith.constant 0 : index
    %c0_90 = arith.constant 0 : index
    %c0_91 = arith.constant 0 : index
    %91 = vector.load %arg3[%c3_88, %c0_89, %c0_90, %c0_91] : memref<4x4x16x128xbf16, #tpu.memory_space<vmem>>, vector<1x1x16x128xbf16>
    %92 = vector.shape_cast %91 : vector<1x1x16x128xbf16> to vector<16x128xbf16>
    %cst_92 = arith.constant dense<0.000000e+00> : vector<256x128xf32>
    %93 = tpu.matmul %25, %92, %cst_92 {dimension_numbers = #tpu.dot_dimension_numbers<[1], [0], [0], [1], [0, 0, 1, 1], [], []>} : vector<256x16xbf16>, vector<16x128xbf16>, vector<256x128xf32> -> vector<256x128xf32>
    %c3_93 = arith.constant 3 : index
    %c1_94 = arith.constant 1 : index
    %c0_95 = arith.constant 0 : index
    %c0_96 = arith.constant 0 : index
    %94 = vector.load %arg3[%c3_93, %c1_94, %c0_95, %c0_96] : memref<4x4x16x128xbf16, #tpu.memory_space<vmem>>, vector<1x1x16x128xbf16>
    %95 = vector.shape_cast %94 : vector<1x1x16x128xbf16> to vector<16x128xbf16>
    %cst_97 = arith.constant dense<0.000000e+00> : vector<256x128xf32>
    %96 = tpu.matmul %30, %95, %cst_97 {dimension_numbers = #tpu.dot_dimension_numbers<[1], [0], [0], [1], [0, 0, 1, 1], [], []>} : vector<256x16xbf16>, vector<16x128xbf16>, vector<256x128xf32> -> vector<256x128xf32>
    %97 = arith.addf %93, %96 : vector<256x128xf32>
    %c3_98 = arith.constant 3 : index
    %c2_99 = arith.constant 2 : index
    %c0_100 = arith.constant 0 : index
    %c0_101 = arith.constant 0 : index
    %98 = vector.load %arg3[%c3_98, %c2_99, %c0_100, %c0_101] : memref<4x4x16x128xbf16, #tpu.memory_space<vmem>>, vector<1x1x16x128xbf16>
    %99 = vector.shape_cast %98 : vector<1x1x16x128xbf16> to vector<16x128xbf16>
    %cst_102 = arith.constant dense<0.000000e+00> : vector<256x128xf32>
    %100 = tpu.matmul %40, %99, %cst_102 {dimension_numbers = #tpu.dot_dimension_numbers<[1], [0], [0], [1], [0, 0, 1, 1], [], []>} : vector<256x16xbf16>, vector<16x128xbf16>, vector<256x128xf32> -> vector<256x128xf32>
    %101 = arith.addf %97, %100 : vector<256x128xf32>
    %c3_103 = arith.constant 3 : index
    %c3_104 = arith.constant 3 : index
    %c0_105 = arith.constant 0 : index
    %c0_106 = arith.constant 0 : index
    %102 = vector.load %arg3[%c3_103, %c3_104, %c0_105, %c0_106] : memref<4x4x16x128xbf16, #tpu.memory_space<vmem>>, vector<1x1x16x128xbf16>
    %103 = vector.shape_cast %102 : vector<1x1x16x128xbf16> to vector<16x128xbf16>
    %cst_107 = arith.constant dense<0.000000e+00> : vector<256x128xf32>
    %104 = tpu.matmul %45, %103, %cst_107 {dimension_numbers = #tpu.dot_dimension_numbers<[1], [0], [0], [1], [0, 0, 1, 1], [], []>} : vector<256x16xbf16>, vector<16x128xbf16>, vector<256x128xf32> -> vector<256x128xf32>
    %105 = arith.addf %101, %104 : vector<256x128xf32>
    %cst_108 = arith.constant 0.000000e+00 : f32
    %106 = vector.broadcast %cst_108 : f32 to vector<1x128xf32>
    %cst_109 = arith.constant 0.000000e+00 : f32
    %107 = vector.broadcast %cst_109 : f32 to vector<1x128xf32>
    %cst_110 = arith.constant dense<0.000000e+00> : vector<128xf32>
    %108 = vector.multi_reduction <add>, %60, %cst_110 [0] : vector<256x128xf32> to vector<128xf32>
    %109 = vector.shape_cast %108 : vector<128xf32> to vector<1x128xf32>
    %110 = arith.addf %106, %109 : vector<1x128xf32>
    %111 = arith.mulf %60, %60 : vector<256x128xf32>
    %cst_111 = arith.constant dense<0.000000e+00> : vector<128xf32>
    %112 = vector.multi_reduction <add>, %111, %cst_111 [0] : vector<256x128xf32> to vector<128xf32>
    %113 = vector.shape_cast %112 : vector<128xf32> to vector<1x128xf32>
    %114 = arith.addf %107, %113 : vector<1x128xf32>
    %cst_112 = arith.constant dense<0.000000e+00> : vector<128xf32>
    %115 = vector.multi_reduction <add>, %75, %cst_112 [0] : vector<256x128xf32> to vector<128xf32>
    %116 = vector.shape_cast %115 : vector<128xf32> to vector<1x128xf32>
    %117 = arith.addf %110, %116 : vector<1x128xf32>
    %118 = arith.mulf %75, %75 : vector<256x128xf32>
    %cst_113 = arith.constant dense<0.000000e+00> : vector<128xf32>
    %119 = vector.multi_reduction <add>, %118, %cst_113 [0] : vector<256x128xf32> to vector<128xf32>
    %120 = vector.shape_cast %119 : vector<128xf32> to vector<1x128xf32>
    %121 = arith.addf %114, %120 : vector<1x128xf32>
    %cst_114 = arith.constant dense<0.000000e+00> : vector<128xf32>
    %122 = vector.multi_reduction <add>, %90, %cst_114 [0] : vector<256x128xf32> to vector<128xf32>
    %123 = vector.shape_cast %122 : vector<128xf32> to vector<1x128xf32>
    %124 = arith.addf %117, %123 : vector<1x128xf32>
    %125 = arith.mulf %90, %90 : vector<256x128xf32>
    %cst_115 = arith.constant dense<0.000000e+00> : vector<128xf32>
    %126 = vector.multi_reduction <add>, %125, %cst_115 [0] : vector<256x128xf32> to vector<128xf32>
    %127 = vector.shape_cast %126 : vector<128xf32> to vector<1x128xf32>
    %128 = arith.addf %121, %127 : vector<1x128xf32>
    %cst_116 = arith.constant dense<0.000000e+00> : vector<128xf32>
    %129 = vector.multi_reduction <add>, %105, %cst_116 [0] : vector<256x128xf32> to vector<128xf32>
    %130 = vector.shape_cast %129 : vector<128xf32> to vector<1x128xf32>
    %131 = arith.addf %124, %130 : vector<1x128xf32>
    %132 = arith.mulf %105, %105 : vector<256x128xf32>
    %cst_117 = arith.constant dense<0.000000e+00> : vector<128xf32>
    %133 = vector.multi_reduction <add>, %132, %cst_117 [0] : vector<256x128xf32> to vector<128xf32>
    %134 = vector.shape_cast %133 : vector<128xf32> to vector<1x128xf32>
    %135 = arith.addf %128, %134 : vector<1x128xf32>
    %136 = tpu.concatenate %131, %135 in 0 : vector<1x128xf32>, vector<1x128xf32> -> vector<2x128xf32>
    %c0_118 = arith.constant 0 : index
    %c0_119 = arith.constant 0 : index
    %c0_120 = arith.constant 0 : index
    %c0_121 = arith.constant 0 : index
    %137 = vector.load %arg4[%c0_118, %c0_119, %c0_120, %c0_121] : memref<1x1x2x128xf32, #tpu.memory_space<vmem>>, vector<1x1x2x128xf32>
    %138 = vector.shape_cast %137 : vector<1x1x2x128xf32> to vector<2x128xf32>
    %139 = vector.shape_cast %136 : vector<2x128xf32> to vector<1x1x2x128xf32>
    tpu.vector_store %arg4[%c0_118, %c0_119, %c0_120, %c0_121], %139 {strides = array<i32>} : memref<1x1x2x128xf32, #tpu.memory_space<vmem>>, vector<1x1x2x128xf32>,
    return
  }
  func.func @transform_0(%arg0: i32, %arg1: i32) -> (i32, i32, i32, i32) {
    %c0_i32 = arith.constant 0 : i32
    %c0_i32_0 = arith.constant 0 : i32
    %c0_i32_1 = arith.constant 0 : i32
    %c0_i32_2 = arith.constant 0 : i32
    return %arg0, %c0_i32, %c0_i32_0, %c0_i32_1 : i32, i32, i32, i32
  }
  func.func @transform_1(%arg0: i32, %arg1: i32) -> (i32, i32, i32, i32) {
    %c0_i32 = arith.constant 0 : i32
    %c0_i32_0 = arith.constant 0 : i32
    %c0_i32_1 = arith.constant 0 : i32
    %c0_i32_2 = arith.constant 0 : i32
    %c0_i32_3 = arith.constant 0 : i32
    return %c0_i32, %c0_i32_0, %c0_i32_1, %c0_i32_2 : i32, i32, i32, i32
  }
  func.func @transform_2(%arg0: i32, %arg1: i32) -> (i32, i32, i32, i32) {
    %c0_i32 = arith.constant 0 : i32
    %c0_i32_0 = arith.constant 0 : i32
    %c0_i32_1 = arith.constant 0 : i32
    return %arg0, %arg1, %c0_i32, %c0_i32_0 : i32, i32, i32, i32
  }
}

module attributes {stable_mosaic.version = 11 : i64} {
  func.func @_apply_kernel(%arg0: i32, %arg1: i32, %arg2: memref<1x18x18x16xbf16, #tpu.memory_space<vmem>>, %arg3: memref<4x4x16x128xbf16, #tpu.memory_space<vmem>>, %arg4: memref<1x128xf32, #tpu.memory_space<vmem>>, %arg5: memref<1x128xf32, #tpu.memory_space<vmem>>, %arg6: memref<1x2x2x256x8xbf16, #tpu.memory_space<vmem>>) attributes {dimension_semantics = [#tpu.dimension_semantics<parallel>, #tpu.dimension_semantics<parallel>], iteration_bounds = array<i64: 2, 1>, scalar_prefetch = 0 : i64, scratch_operands = 0 : i64, tpu.core_type = #tpu.core_type<tc>, window_params = [{transform_indices = @transform_0, window_bounds = array<i64: 1, 18, 18, 16>}, {pipeline_mode = #tpu.pipeline_mode<synchronous>, transform_indices = @transform_1, window_bounds = array<i64: 4, 4, 16, 128>}, {pipeline_mode = #tpu.pipeline_mode<synchronous>, transform_indices = @transform_2, window_bounds = array<i64: 1, 128>}, {pipeline_mode = #tpu.pipeline_mode<synchronous>, transform_indices = @transform_3, window_bounds = array<i64: 1, 128>}, {transform_indices = @transform_4, window_bounds = array<i64: 1, 2, 2, 256, 8>}]} {
    %c16_i32 = arith.constant 16 : i32
    %0 = arith.muli %arg1, %c16_i32 : i32
    %c0_i32 = arith.constant 0 : i32
    %1 = arith.addi %0, %c0_i32 : i32
    %c0 = arith.constant 0 : index
    %2 = arith.index_cast %1 : i32 to index
    %c0_0 = arith.constant 0 : index
    %c0_1 = arith.constant 0 : index
    %3 = vector.load %arg2[%c0, %2, %c0_0, %c0_1] : memref<1x18x18x16xbf16, #tpu.memory_space<vmem>>, vector<1x16x16x16xbf16>
    %4 = vector.shape_cast %3 : vector<1x16x16x16xbf16> to vector<16x16x16xbf16>
    %5 = vector.shape_cast %4 : vector<16x16x16xbf16> to vector<256x16xbf16>
    %c0_i32_2 = arith.constant 0 : i32
    %6 = arith.addi %0, %c0_i32_2 : i32
    %c0_3 = arith.constant 0 : index
    %7 = arith.index_cast %6 : i32 to index
    %c1 = arith.constant 1 : index
    %c0_4 = arith.constant 0 : index
    %8 = vector.load %arg2[%c0_3, %7, %c1, %c0_4] : memref<1x18x18x16xbf16, #tpu.memory_space<vmem>>, vector<1x16x16x16xbf16>
    %9 = vector.shape_cast %8 : vector<1x16x16x16xbf16> to vector<16x16x16xbf16>
    %10 = vector.shape_cast %9 : vector<16x16x16xbf16> to vector<256x16xbf16>
    %c0_i32_5 = arith.constant 0 : i32
    %11 = arith.addi %0, %c0_i32_5 : i32
    %c0_6 = arith.constant 0 : index
    %12 = arith.index_cast %11 : i32 to index
    %c2 = arith.constant 2 : index
    %c0_7 = arith.constant 0 : index
    %13 = vector.load %arg2[%c0_6, %12, %c2, %c0_7] : memref<1x18x18x16xbf16, #tpu.memory_space<vmem>>, vector<1x16x16x16xbf16>
    %14 = vector.shape_cast %13 : vector<1x16x16x16xbf16> to vector<16x16x16xbf16>
    %15 = vector.shape_cast %14 : vector<16x16x16xbf16> to vector<256x16xbf16>
    %c1_i32 = arith.constant 1 : i32
    %16 = arith.addi %0, %c1_i32 : i32
    %c0_8 = arith.constant 0 : index
    %17 = arith.index_cast %16 : i32 to index
    %c0_9 = arith.constant 0 : index
    %c0_10 = arith.constant 0 : index
    %18 = vector.load %arg2[%c0_8, %17, %c0_9, %c0_10] : memref<1x18x18x16xbf16, #tpu.memory_space<vmem>>, vector<1x16x16x16xbf16>
    %19 = vector.shape_cast %18 : vector<1x16x16x16xbf16> to vector<16x16x16xbf16>
    %20 = vector.shape_cast %19 : vector<16x16x16xbf16> to vector<256x16xbf16>
    %c1_i32_11 = arith.constant 1 : i32
    %21 = arith.addi %0, %c1_i32_11 : i32
    %c0_12 = arith.constant 0 : index
    %22 = arith.index_cast %21 : i32 to index
    %c1_13 = arith.constant 1 : index
    %c0_14 = arith.constant 0 : index
    %23 = vector.load %arg2[%c0_12, %22, %c1_13, %c0_14] : memref<1x18x18x16xbf16, #tpu.memory_space<vmem>>, vector<1x16x16x16xbf16>
    %24 = vector.shape_cast %23 : vector<1x16x16x16xbf16> to vector<16x16x16xbf16>
    %25 = vector.shape_cast %24 : vector<16x16x16xbf16> to vector<256x16xbf16>
    %c1_i32_15 = arith.constant 1 : i32
    %26 = arith.addi %0, %c1_i32_15 : i32
    %c0_16 = arith.constant 0 : index
    %27 = arith.index_cast %26 : i32 to index
    %c2_17 = arith.constant 2 : index
    %c0_18 = arith.constant 0 : index
    %28 = vector.load %arg2[%c0_16, %27, %c2_17, %c0_18] : memref<1x18x18x16xbf16, #tpu.memory_space<vmem>>, vector<1x16x16x16xbf16>
    %29 = vector.shape_cast %28 : vector<1x16x16x16xbf16> to vector<16x16x16xbf16>
    %30 = vector.shape_cast %29 : vector<16x16x16xbf16> to vector<256x16xbf16>
    %c2_i32 = arith.constant 2 : i32
    %31 = arith.addi %0, %c2_i32 : i32
    %c0_19 = arith.constant 0 : index
    %32 = arith.index_cast %31 : i32 to index
    %c0_20 = arith.constant 0 : index
    %c0_21 = arith.constant 0 : index
    %33 = vector.load %arg2[%c0_19, %32, %c0_20, %c0_21] : memref<1x18x18x16xbf16, #tpu.memory_space<vmem>>, vector<1x16x16x16xbf16>
    %34 = vector.shape_cast %33 : vector<1x16x16x16xbf16> to vector<16x16x16xbf16>
    %35 = vector.shape_cast %34 : vector<16x16x16xbf16> to vector<256x16xbf16>
    %c2_i32_22 = arith.constant 2 : i32
    %36 = arith.addi %0, %c2_i32_22 : i32
    %c0_23 = arith.constant 0 : index
    %37 = arith.index_cast %36 : i32 to index
    %c1_24 = arith.constant 1 : index
    %c0_25 = arith.constant 0 : index
    %38 = vector.load %arg2[%c0_23, %37, %c1_24, %c0_25] : memref<1x18x18x16xbf16, #tpu.memory_space<vmem>>, vector<1x16x16x16xbf16>
    %39 = vector.shape_cast %38 : vector<1x16x16x16xbf16> to vector<16x16x16xbf16>
    %40 = vector.shape_cast %39 : vector<16x16x16xbf16> to vector<256x16xbf16>
    %c2_i32_26 = arith.constant 2 : i32
    %41 = arith.addi %0, %c2_i32_26 : i32
    %c0_27 = arith.constant 0 : index
    %42 = arith.index_cast %41 : i32 to index
    %c2_28 = arith.constant 2 : index
    %c0_29 = arith.constant 0 : index
    %43 = vector.load %arg2[%c0_27, %42, %c2_28, %c0_29] : memref<1x18x18x16xbf16, #tpu.memory_space<vmem>>, vector<1x16x16x16xbf16>
    %44 = vector.shape_cast %43 : vector<1x16x16x16xbf16> to vector<16x16x16xbf16>
    %45 = vector.shape_cast %44 : vector<16x16x16xbf16> to vector<256x16xbf16>
    %c0_30 = arith.constant 0 : index
    %c0_31 = arith.constant 0 : index
    %c0_32 = arith.constant 0 : index
    %c0_33 = arith.constant 0 : index
    %46 = vector.load %arg3[%c0_30, %c0_31, %c0_32, %c0_33] : memref<4x4x16x128xbf16, #tpu.memory_space<vmem>>, vector<1x1x16x128xbf16>
    %47 = vector.shape_cast %46 : vector<1x1x16x128xbf16> to vector<16x128xbf16>
    %cst = arith.constant dense<0.000000e+00> : vector<256x128xf32>
    %48 = tpu.matmul %5, %47, %cst {dimension_numbers = #tpu.dot_dimension_numbers<[1], [0], [0], [1], [0, 0, 1, 1], [], []>} : vector<256x16xbf16>, vector<16x128xbf16>, vector<256x128xf32> -> vector<256x128xf32>
    %c0_34 = arith.constant 0 : index
    %c1_35 = arith.constant 1 : index
    %c0_36 = arith.constant 0 : index
    %c0_37 = arith.constant 0 : index
    %49 = vector.load %arg3[%c0_34, %c1_35, %c0_36, %c0_37] : memref<4x4x16x128xbf16, #tpu.memory_space<vmem>>, vector<1x1x16x128xbf16>
    %50 = vector.shape_cast %49 : vector<1x1x16x128xbf16> to vector<16x128xbf16>
    %cst_38 = arith.constant dense<0.000000e+00> : vector<256x128xf32>
    %51 = tpu.matmul %10, %50, %cst_38 {dimension_numbers = #tpu.dot_dimension_numbers<[1], [0], [0], [1], [0, 0, 1, 1], [], []>} : vector<256x16xbf16>, vector<16x128xbf16>, vector<256x128xf32> -> vector<256x128xf32>
    %52 = arith.addf %48, %51 : vector<256x128xf32>
    %c0_39 = arith.constant 0 : index
    %c2_40 = arith.constant 2 : index
    %c0_41 = arith.constant 0 : index
    %c0_42 = arith.constant 0 : index
    %53 = vector.load %arg3[%c0_39, %c2_40, %c0_41, %c0_42] : memref<4x4x16x128xbf16, #tpu.memory_space<vmem>>, vector<1x1x16x128xbf16>
    %54 = vector.shape_cast %53 : vector<1x1x16x128xbf16> to vector<16x128xbf16>
    %cst_43 = arith.constant dense<0.000000e+00> : vector<256x128xf32>
    %55 = tpu.matmul %20, %54, %cst_43 {dimension_numbers = #tpu.dot_dimension_numbers<[1], [0], [0], [1], [0, 0, 1, 1], [], []>} : vector<256x16xbf16>, vector<16x128xbf16>, vector<256x128xf32> -> vector<256x128xf32>
    %56 = arith.addf %52, %55 : vector<256x128xf32>
    %c0_44 = arith.constant 0 : index
    %c3 = arith.constant 3 : index
    %c0_45 = arith.constant 0 : index
    %c0_46 = arith.constant 0 : index
    %57 = vector.load %arg3[%c0_44, %c3, %c0_45, %c0_46] : memref<4x4x16x128xbf16, #tpu.memory_space<vmem>>, vector<1x1x16x128xbf16>
    %58 = vector.shape_cast %57 : vector<1x1x16x128xbf16> to vector<16x128xbf16>
    %cst_47 = arith.constant dense<0.000000e+00> : vector<256x128xf32>
    %59 = tpu.matmul %25, %58, %cst_47 {dimension_numbers = #tpu.dot_dimension_numbers<[1], [0], [0], [1], [0, 0, 1, 1], [], []>} : vector<256x16xbf16>, vector<16x128xbf16>, vector<256x128xf32> -> vector<256x128xf32>
    %60 = arith.addf %56, %59 : vector<256x128xf32>
    %c1_48 = arith.constant 1 : index
    %c0_49 = arith.constant 0 : index
    %c0_50 = arith.constant 0 : index
    %c0_51 = arith.constant 0 : index
    %61 = vector.load %arg3[%c1_48, %c0_49, %c0_50, %c0_51] : memref<4x4x16x128xbf16, #tpu.memory_space<vmem>>, vector<1x1x16x128xbf16>
    %62 = vector.shape_cast %61 : vector<1x1x16x128xbf16> to vector<16x128xbf16>
    %cst_52 = arith.constant dense<0.000000e+00> : vector<256x128xf32>
    %63 = tpu.matmul %10, %62, %cst_52 {dimension_numbers = #tpu.dot_dimension_numbers<[1], [0], [0], [1], [0, 0, 1, 1], [], []>} : vector<256x16xbf16>, vector<16x128xbf16>, vector<256x128xf32> -> vector<256x128xf32>
    %c1_53 = arith.constant 1 : index
    %c1_54 = arith.constant 1 : index
    %c0_55 = arith.constant 0 : index
    %c0_56 = arith.constant 0 : index
    %64 = vector.load %arg3[%c1_53, %c1_54, %c0_55, %c0_56] : memref<4x4x16x128xbf16, #tpu.memory_space<vmem>>, vector<1x1x16x128xbf16>
    %65 = vector.shape_cast %64 : vector<1x1x16x128xbf16> to vector<16x128xbf16>
    %cst_57 = arith.constant dense<0.000000e+00> : vector<256x128xf32>
    %66 = tpu.matmul %15, %65, %cst_57 {dimension_numbers = #tpu.dot_dimension_numbers<[1], [0], [0], [1], [0, 0, 1, 1], [], []>} : vector<256x16xbf16>, vector<16x128xbf16>, vector<256x128xf32> -> vector<256x128xf32>
    %67 = arith.addf %63, %66 : vector<256x128xf32>
    %c1_58 = arith.constant 1 : index
    %c2_59 = arith.constant 2 : index
    %c0_60 = arith.constant 0 : index
    %c0_61 = arith.constant 0 : index
    %68 = vector.load %arg3[%c1_58, %c2_59, %c0_60, %c0_61] : memref<4x4x16x128xbf16, #tpu.memory_space<vmem>>, vector<1x1x16x128xbf16>
    %69 = vector.shape_cast %68 : vector<1x1x16x128xbf16> to vector<16x128xbf16>
    %cst_62 = arith.constant dense<0.000000e+00> : vector<256x128xf32>
    %70 = tpu.matmul %25, %69, %cst_62 {dimension_numbers = #tpu.dot_dimension_numbers<[1], [0], [0], [1], [0, 0, 1, 1], [], []>} : vector<256x16xbf16>, vector<16x128xbf16>, vector<256x128xf32> -> vector<256x128xf32>
    %71 = arith.addf %67, %70 : vector<256x128xf32>
    %c1_63 = arith.constant 1 : index
    %c3_64 = arith.constant 3 : index
    %c0_65 = arith.constant 0 : index
    %c0_66 = arith.constant 0 : index
    %72 = vector.load %arg3[%c1_63, %c3_64, %c0_65, %c0_66] : memref<4x4x16x128xbf16, #tpu.memory_space<vmem>>, vector<1x1x16x128xbf16>
    %73 = vector.shape_cast %72 : vector<1x1x16x128xbf16> to vector<16x128xbf16>
    %cst_67 = arith.constant dense<0.000000e+00> : vector<256x128xf32>
    %74 = tpu.matmul %30, %73, %cst_67 {dimension_numbers = #tpu.dot_dimension_numbers<[1], [0], [0], [1], [0, 0, 1, 1], [], []>} : vector<256x16xbf16>, vector<16x128xbf16>, vector<256x128xf32> -> vector<256x128xf32>
    %75 = arith.addf %71, %74 : vector<256x128xf32>
    %c2_68 = arith.constant 2 : index
    %c0_69 = arith.constant 0 : index
    %c0_70 = arith.constant 0 : index
    %c0_71 = arith.constant 0 : index
    %76 = vector.load %arg3[%c2_68, %c0_69, %c0_70, %c0_71] : memref<4x4x16x128xbf16, #tpu.memory_space<vmem>>, vector<1x1x16x128xbf16>
    %77 = vector.shape_cast %76 : vector<1x1x16x128xbf16> to vector<16x128xbf16>
    %cst_72 = arith.constant dense<0.000000e+00> : vector<256x128xf32>
    %78 = tpu.matmul %20, %77, %cst_72 {dimension_numbers = #tpu.dot_dimension_numbers<[1], [0], [0], [1], [0, 0, 1, 1], [], []>} : vector<256x16xbf16>, vector<16x128xbf16>, vector<256x128xf32> -> vector<256x128xf32>
    %c2_73 = arith.constant 2 : index
    %c1_74 = arith.constant 1 : index
    %c0_75 = arith.constant 0 : index
    %c0_76 = arith.constant 0 : index
    %79 = vector.load %arg3[%c2_73, %c1_74, %c0_75, %c0_76] : memref<4x4x16x128xbf16, #tpu.memory_space<vmem>>, vector<1x1x16x128xbf16>
    %80 = vector.shape_cast %79 : vector<1x1x16x128xbf16> to vector<16x128xbf16>
    %cst_77 = arith.constant dense<0.000000e+00> : vector<256x128xf32>
    %81 = tpu.matmul %25, %80, %cst_77 {dimension_numbers = #tpu.dot_dimension_numbers<[1], [0], [0], [1], [0, 0, 1, 1], [], []>} : vector<256x16xbf16>, vector<16x128xbf16>, vector<256x128xf32> -> vector<256x128xf32>
    %82 = arith.addf %78, %81 : vector<256x128xf32>
    %c2_78 = arith.constant 2 : index
    %c2_79 = arith.constant 2 : index
    %c0_80 = arith.constant 0 : index
    %c0_81 = arith.constant 0 : index
    %83 = vector.load %arg3[%c2_78, %c2_79, %c0_80, %c0_81] : memref<4x4x16x128xbf16, #tpu.memory_space<vmem>>, vector<1x1x16x128xbf16>
    %84 = vector.shape_cast %83 : vector<1x1x16x128xbf16> to vector<16x128xbf16>
    %cst_82 = arith.constant dense<0.000000e+00> : vector<256x128xf32>
    %85 = tpu.matmul %35, %84, %cst_82 {dimension_numbers = #tpu.dot_dimension_numbers<[1], [0], [0], [1], [0, 0, 1, 1], [], []>} : vector<256x16xbf16>, vector<16x128xbf16>, vector<256x128xf32> -> vector<256x128xf32>
    %86 = arith.addf %82, %85 : vector<256x128xf32>
    %c2_83 = arith.constant 2 : index
    %c3_84 = arith.constant 3 : index
    %c0_85 = arith.constant 0 : index
    %c0_86 = arith.constant 0 : index
    %87 = vector.load %arg3[%c2_83, %c3_84, %c0_85, %c0_86] : memref<4x4x16x128xbf16, #tpu.memory_space<vmem>>, vector<1x1x16x128xbf16>
    %88 = vector.shape_cast %87 : vector<1x1x16x128xbf16> to vector<16x128xbf16>
    %cst_87 = arith.constant dense<0.000000e+00> : vector<256x128xf32>
    %89 = tpu.matmul %40, %88, %cst_87 {dimension_numbers = #tpu.dot_dimension_numbers<[1], [0], [0], [1], [0, 0, 1, 1], [], []>} : vector<256x16xbf16>, vector<16x128xbf16>, vector<256x128xf32> -> vector<256x128xf32>
    %90 = arith.addf %86, %89 : vector<256x128xf32>
    %c3_88 = arith.constant 3 : index
    %c0_89 = arith.constant 0 : index
    %c0_90 = arith.constant 0 : index
    %c0_91 = arith.constant 0 : index
    %91 = vector.load %arg3[%c3_88, %c0_89, %c0_90, %c0_91] : memref<4x4x16x128xbf16, #tpu.memory_space<vmem>>, vector<1x1x16x128xbf16>
    %92 = vector.shape_cast %91 : vector<1x1x16x128xbf16> to vector<16x128xbf16>
    %cst_92 = arith.constant dense<0.000000e+00> : vector<256x128xf32>
    %93 = tpu.matmul %25, %92, %cst_92 {dimension_numbers = #tpu.dot_dimension_numbers<[1], [0], [0], [1], [0, 0, 1, 1], [], []>} : vector<256x16xbf16>, vector<16x128xbf16>, vector<256x128xf32> -> vector<256x128xf32>
    %c3_93 = arith.constant 3 : index
    %c1_94 = arith.constant 1 : index
    %c0_95 = arith.constant 0 : index
    %c0_96 = arith.constant 0 : index
    %94 = vector.load %arg3[%c3_93, %c1_94, %c0_95, %c0_96] : memref<4x4x16x128xbf16, #tpu.memory_space<vmem>>, vector<1x1x16x128xbf16>
    %95 = vector.shape_cast %94 : vector<1x1x16x128xbf16> to vector<16x128xbf16>
    %cst_97 = arith.constant dense<0.000000e+00> : vector<256x128xf32>
    %96 = tpu.matmul %30, %95, %cst_97 {dimension_numbers = #tpu.dot_dimension_numbers<[1], [0], [0], [1], [0, 0, 1, 1], [], []>} : vector<256x16xbf16>, vector<16x128xbf16>, vector<256x128xf32> -> vector<256x128xf32>
    %97 = arith.addf %93, %96 : vector<256x128xf32>
    %c3_98 = arith.constant 3 : index
    %c2_99 = arith.constant 2 : index
    %c0_100 = arith.constant 0 : index
    %c0_101 = arith.constant 0 : index
    %98 = vector.load %arg3[%c3_98, %c2_99, %c0_100, %c0_101] : memref<4x4x16x128xbf16, #tpu.memory_space<vmem>>, vector<1x1x16x128xbf16>
    %99 = vector.shape_cast %98 : vector<1x1x16x128xbf16> to vector<16x128xbf16>
    %cst_102 = arith.constant dense<0.000000e+00> : vector<256x128xf32>
    %100 = tpu.matmul %40, %99, %cst_102 {dimension_numbers = #tpu.dot_dimension_numbers<[1], [0], [0], [1], [0, 0, 1, 1], [], []>} : vector<256x16xbf16>, vector<16x128xbf16>, vector<256x128xf32> -> vector<256x128xf32>
    %101 = arith.addf %97, %100 : vector<256x128xf32>
    %c3_103 = arith.constant 3 : index
    %c3_104 = arith.constant 3 : index
    %c0_105 = arith.constant 0 : index
    %c0_106 = arith.constant 0 : index
    %102 = vector.load %arg3[%c3_103, %c3_104, %c0_105, %c0_106] : memref<4x4x16x128xbf16, #tpu.memory_space<vmem>>, vector<1x1x16x128xbf16>
    %103 = vector.shape_cast %102 : vector<1x1x16x128xbf16> to vector<16x128xbf16>
    %cst_107 = arith.constant dense<0.000000e+00> : vector<256x128xf32>
    %104 = tpu.matmul %45, %103, %cst_107 {dimension_numbers = #tpu.dot_dimension_numbers<[1], [0], [0], [1], [0, 0, 1, 1], [], []>} : vector<256x16xbf16>, vector<16x128xbf16>, vector<256x128xf32> -> vector<256x128xf32>
    %105 = arith.addf %101, %104 : vector<256x128xf32>
    %c0_108 = arith.constant 0 : index
    %c0_109 = arith.constant 0 : index
    %106 = vector.load %arg4[%c0_108, %c0_109] : memref<1x128xf32, #tpu.memory_space<vmem>>, vector<1x128xf32>
    %c0_110 = arith.constant 0 : index
    %c0_111 = arith.constant 0 : index
    %107 = vector.load %arg5[%c0_110, %c0_111] : memref<1x128xf32, #tpu.memory_space<vmem>>, vector<1x128xf32>
    %108 = vector.broadcast %106 : vector<1x128xf32> to vector<256x128xf32>
    %109 = arith.mulf %60, %108 : vector<256x128xf32>
    %110 = vector.broadcast %107 : vector<1x128xf32> to vector<256x128xf32>
    %111 = arith.addf %109, %110 : vector<256x128xf32>
    %cst_112 = arith.constant 0.000000e+00 : f32
    %112 = vector.broadcast %cst_112 : f32 to vector<256x128xf32>
    %113 = arith.maximumf %111, %112 : vector<256x128xf32>
    %114 = vector.extract_strided_slice %113 {offsets = [0, 0], sizes = [256, 8], strides = [1, 1]} : vector<256x128xf32> to vector<256x8xf32>
    %115 = arith.truncf %114 : vector<256x8xf32> to vector<256x8xbf16>
    %c0_113 = arith.constant 0 : index
    %c0_114 = arith.constant 0 : index
    %c0_115 = arith.constant 0 : index
    %c0_116 = arith.constant 0 : index
    %c0_117 = arith.constant 0 : index
    %116 = vector.load %arg6[%c0_113, %c0_114, %c0_115, %c0_116, %c0_117] : memref<1x2x2x256x8xbf16, #tpu.memory_space<vmem>>, vector<1x1x1x256x8xbf16>
    %117 = vector.shape_cast %116 : vector<1x1x1x256x8xbf16> to vector<256x8xbf16>
    %118 = vector.shape_cast %115 : vector<256x8xbf16> to vector<1x1x1x256x8xbf16>
    tpu.vector_store %arg6[%c0_113, %c0_114, %c0_115, %c0_116, %c0_117], %118 {strides = array<i32>} : memref<1x2x2x256x8xbf16, #tpu.memory_space<vmem>>, vector<1x1x1x256x8xbf16>,
    %119 = vector.broadcast %106 : vector<1x128xf32> to vector<256x128xf32>
    %120 = arith.mulf %75, %119 : vector<256x128xf32>
    %121 = vector.broadcast %107 : vector<1x128xf32> to vector<256x128xf32>
    %122 = arith.addf %120, %121 : vector<256x128xf32>
    %cst_118 = arith.constant 0.000000e+00 : f32
    %123 = vector.broadcast %cst_118 : f32 to vector<256x128xf32>
    %124 = arith.maximumf %122, %123 : vector<256x128xf32>
    %125 = vector.extract_strided_slice %124 {offsets = [0, 0], sizes = [256, 8], strides = [1, 1]} : vector<256x128xf32> to vector<256x8xf32>
    %126 = arith.truncf %125 : vector<256x8xf32> to vector<256x8xbf16>
    %c0_119 = arith.constant 0 : index
    %c0_120 = arith.constant 0 : index
    %c1_121 = arith.constant 1 : index
    %c0_122 = arith.constant 0 : index
    %c0_123 = arith.constant 0 : index
    %127 = vector.load %arg6[%c0_119, %c0_120, %c1_121, %c0_122, %c0_123] : memref<1x2x2x256x8xbf16, #tpu.memory_space<vmem>>, vector<1x1x1x256x8xbf16>
    %128 = vector.shape_cast %127 : vector<1x1x1x256x8xbf16> to vector<256x8xbf16>
    %129 = vector.shape_cast %126 : vector<256x8xbf16> to vector<1x1x1x256x8xbf16>
    tpu.vector_store %arg6[%c0_119, %c0_120, %c1_121, %c0_122, %c0_123], %129 {strides = array<i32>} : memref<1x2x2x256x8xbf16, #tpu.memory_space<vmem>>, vector<1x1x1x256x8xbf16>,
    %130 = vector.broadcast %106 : vector<1x128xf32> to vector<256x128xf32>
    %131 = arith.mulf %90, %130 : vector<256x128xf32>
    %132 = vector.broadcast %107 : vector<1x128xf32> to vector<256x128xf32>
    %133 = arith.addf %131, %132 : vector<256x128xf32>
    %cst_124 = arith.constant 0.000000e+00 : f32
    %134 = vector.broadcast %cst_124 : f32 to vector<256x128xf32>
    %135 = arith.maximumf %133, %134 : vector<256x128xf32>
    %136 = vector.extract_strided_slice %135 {offsets = [0, 0], sizes = [256, 8], strides = [1, 1]} : vector<256x128xf32> to vector<256x8xf32>
    %137 = arith.truncf %136 : vector<256x8xf32> to vector<256x8xbf16>
    %c0_125 = arith.constant 0 : index
    %c1_126 = arith.constant 1 : index
    %c0_127 = arith.constant 0 : index
    %c0_128 = arith.constant 0 : index
    %c0_129 = arith.constant 0 : index
    %138 = vector.load %arg6[%c0_125, %c1_126, %c0_127, %c0_128, %c0_129] : memref<1x2x2x256x8xbf16, #tpu.memory_space<vmem>>, vector<1x1x1x256x8xbf16>
    %139 = vector.shape_cast %138 : vector<1x1x1x256x8xbf16> to vector<256x8xbf16>
    %140 = vector.shape_cast %137 : vector<256x8xbf16> to vector<1x1x1x256x8xbf16>
    tpu.vector_store %arg6[%c0_125, %c1_126, %c0_127, %c0_128, %c0_129], %140 {strides = array<i32>} : memref<1x2x2x256x8xbf16, #tpu.memory_space<vmem>>, vector<1x1x1x256x8xbf16>,
    %141 = vector.broadcast %106 : vector<1x128xf32> to vector<256x128xf32>
    %142 = arith.mulf %105, %141 : vector<256x128xf32>
    %143 = vector.broadcast %107 : vector<1x128xf32> to vector<256x128xf32>
    %144 = arith.addf %142, %143 : vector<256x128xf32>
    %cst_130 = arith.constant 0.000000e+00 : f32
    %145 = vector.broadcast %cst_130 : f32 to vector<256x128xf32>
    %146 = arith.maximumf %144, %145 : vector<256x128xf32>
    %147 = vector.extract_strided_slice %146 {offsets = [0, 0], sizes = [256, 8], strides = [1, 1]} : vector<256x128xf32> to vector<256x8xf32>
    %148 = arith.truncf %147 : vector<256x8xf32> to vector<256x8xbf16>
    %c0_131 = arith.constant 0 : index
    %c1_132 = arith.constant 1 : index
    %c1_133 = arith.constant 1 : index
    %c0_134 = arith.constant 0 : index
    %c0_135 = arith.constant 0 : index
    %149 = vector.load %arg6[%c0_131, %c1_132, %c1_133, %c0_134, %c0_135] : memref<1x2x2x256x8xbf16, #tpu.memory_space<vmem>>, vector<1x1x1x256x8xbf16>
    %150 = vector.shape_cast %149 : vector<1x1x1x256x8xbf16> to vector<256x8xbf16>
    %151 = vector.shape_cast %148 : vector<256x8xbf16> to vector<1x1x1x256x8xbf16>
    tpu.vector_store %arg6[%c0_131, %c1_132, %c1_133, %c0_134, %c0_135], %151 {strides = array<i32>} : memref<1x2x2x256x8xbf16, #tpu.memory_space<vmem>>, vector<1x1x1x256x8xbf16>,
    return
  }
  func.func @transform_0(%arg0: i32, %arg1: i32) -> (i32, i32, i32, i32) {
    %c0_i32 = arith.constant 0 : i32
    %c0_i32_0 = arith.constant 0 : i32
    %c0_i32_1 = arith.constant 0 : i32
    %c0_i32_2 = arith.constant 0 : i32
    return %arg0, %c0_i32, %c0_i32_0, %c0_i32_1 : i32, i32, i32, i32
  }
  func.func @transform_1(%arg0: i32, %arg1: i32) -> (i32, i32, i32, i32) {
    %c0_i32 = arith.constant 0 : i32
    %c0_i32_0 = arith.constant 0 : i32
    %c0_i32_1 = arith.constant 0 : i32
    %c0_i32_2 = arith.constant 0 : i32
    %c0_i32_3 = arith.constant 0 : i32
    return %c0_i32, %c0_i32_0, %c0_i32_1, %c0_i32_2 : i32, i32, i32, i32
  }
  func.func @transform_2(%arg0: i32, %arg1: i32) -> (i32, i32) {
    %c0_i32 = arith.constant 0 : i32
    %c0_i32_0 = arith.constant 0 : i32
    %c0_i32_1 = arith.constant 0 : i32
    return %c0_i32, %c0_i32_0 : i32, i32
  }
  func.func @transform_3(%arg0: i32, %arg1: i32) -> (i32, i32) {
    %c0_i32 = arith.constant 0 : i32
    %c0_i32_0 = arith.constant 0 : i32
    %c0_i32_1 = arith.constant 0 : i32
    return %c0_i32, %c0_i32_0 : i32, i32
  }
  func.func @transform_4(%arg0: i32, %arg1: i32) -> (i32, i32, i32, i32, i32) {
    %c0_i32 = arith.constant 0 : i32
    %c0_i32_0 = arith.constant 0 : i32
    %c0_i32_1 = arith.constant 0 : i32
    %c0_i32_2 = arith.constant 0 : i32
    return %arg0, %c0_i32, %c0_i32_0, %arg1, %c0_i32_1 : i32, i32, i32, i32, i32
  }
}

</mosaic_0001>

<bundles_post_ra>
// kernel: gblock_forward.2
= control target key start
LH: loop header
LB: loop body
LE: loop exit
PB: predicated region body
PF: predicated region fallthrough
CT: control target
= control target key end

     0   :  { %s8064_s9 = smov 0   ;;  %s8066_s10 = smov 0   ;;  %s10386_s0 = inlined_call_operand.vmem [shape: bf16[2,18,18,16], index: 0, kind: input, shape index: {}]   ;;  %s10387_s1 = inlined_call_operand.vmem [shape: bf16[4,4,16,128], index: 1, kind: input, shape index: {}]   ;;  %s10388_s2 = inlined_call_operand.vmem [shape: f32[2,1,2,128], index: 2, kind: output, shape index: {}]  }
   0x1   :  { %s8068_s11 = smov 0  }
   0x2 LB: > { %s24_s12 = sadd.s32 1, %s8043_s10  ;;  %p6413_p0 = scmp.ge.s32.totalorder %s8047_s11, 1  ;;  %s8047_s11 = sphi %s8068_s11, %s12_s11   ;;  %s8043_s10 = sphi %s8066_s10, %s10670_s10   ;;  %s8039_s9 = sphi %s8064_s9, %s10669_s9  }
   0x3   : > { %p26_p1 = scmp.ge.s32.totalorder %s24_s12, 2  ;;  %p126_p2 = scmp.lt.s32.totalorder %s8047_s11, 3 }
   0x5   : > { %s10672_s12 = smov (%p26_p1, %s24_s12), 0  ;;  %p127_p3 = pnand %p6413_p0, %p126_p2 }
   0x7   : > { %130 = sbr.rel (%p127_p3) target bundleno = 779 (0x30b), region = 28 }
   0xc   : > { %v7881_v0 = vld [vmem:[%s10387_s1] sm:$0xff]   ;;  %p150_p4 = scmp.lt.s32.totalorder %s8039_s9, 1  ;;  %v7882_v1 = vld [vmem:[%s10387_s1 + $0x8] sm:$0xff]   ;;  %v8093_v2 = vld [vmem:[%s10387_s1 + $0x10] sm:$0xff]   ;;  %vm215_vm0 = vsmask.f32 3328 }
   0xd   : > { %7346 = vmatprep.subr.bf16.mxu1 %v7881_v0  ;;  %7312 = vmatprep.subr.bf16.mxu0 %v7882_v1  ;;  %v7886_v3 = vld [vmem:[%s10387_s1 + $0x18] sm:$0xff]   ;;  %vm2064_vm1 = vcmask 130048   ;;  %vm216_vm2 = vsmask.f32 7440  ;;  %v8125_v24 = vld [vmem:[%s10387_s1 + $0x20] sm:$0xff]   ;;  %vm666_vm4 = vcmask 1042432  }
   0xe   : > { %s10674_s9 = smov (!%p150_p4, %s8039_s9), 1  ;;  %7347 = vmatpush3.bf16.msra.mxu1 %v7881_v0  ;;  %7313 = vmatpush3.bf16.msra.mxu0 %v7882_v1  ;;  %vm8133_vm3 = vmor %vm215_vm0, %vm216_vm2  ;;  %vm667_vm5 = vcmask 1046532   ;;  %vm6325_vm7 = vcmask 1040384  }
   0xf   : > { %s7856_s19 = smul.u32 216, %s10674_s9  ;;  %7380 = vmatprep.subr.bf16.mxu0 %v8093_v2  ;;  %7414 = vmatprep.subr.bf16.mxu1 %v7886_v3  ;;  %vm8653_vm6 = vmor %vm666_vm4, %vm667_vm5 }
  0x11   : > { %s8103_s24 = scalar_lea.vmem %s10386_s0, %s7856_s19 }
  0x12   : > { %v167_v4 = vld [vmem:[%s8103_s24] sm:$0xf]  ;;  %v8107_v5 = vld [vmem:[%s8103_s24 + $0x4] sm:$0xf]  ;;  %v169_v6 = vld [vmem:[%s8103_s24 + $0xc] sm:$0xf] }
  0x13   : > { %v219_v7 = vshrl.u32 %v167_v4, 16  ;;  %v222_v8 = vshll.u32 %v167_v4, 16  ;;  %v232_v9 = vshrl.u32 %v8107_v5, 16  ;;  %v8112_v10 = vld [vmem:[%s8103_s24 + $0x10] sm:$0xf]  ;;  %v10390_v11 = vrot.slane %v8107_v5, 5 }
  0x14   : > { %v6627_v12 = vcombine.low %v167_v4, %v8107_v5  ;;  %v243_v13 = vshrl.u32 %v169_v6, 16  ;;  %v246_v14 = vshll.u32 %v169_v6, 16  ;;  %v199_v15 = vld [vmem:[%s8103_s24 + $0x8] sm:$0x1]  ;;  %v256_v18 = vshrl.u32 %v8112_v10, 16 }
  0x15   : > { %v221_v16 = vrot.slane %v219_v7, 4  ;;  %v224_v17 = vrot.slane %v222_v8, 5  ;;  %v6628_v21 = vcombine.low %v169_v6, %v8112_v10  ;;  %v228_v22 = vshll.u32 %v8107_v5, 16  ;;  %v200_v23 = vld [vmem:[%s8103_s24 + $0x14] sm:$0x1] }
  0x16   : > { %7348 = vmatprep.mubr.msk.bf16.mxu1 %vm2064_vm1, %v6627_v12  ;;  %v245_v19 = vrot.slane %v243_v13, 4  ;;  %v248_v20 = vrot.slane %v246_v14, 5  ;;  %v234_v26 = vrot.slane %v232_v9, 4  ;;  %v238_v27 = vshll.u32 %v199_v15, 16  ;;  %v171_v33 = vld [vmem:[%s8103_s24 + $0x18] sm:$0xf] }
  0x17   : > { %v225_v25 = vor.u32 %v224_v17, %v221_v16  ;;  %v8129_v28 = vrot.slane %v10390_v11, 4  ;;  %7349 = vmatmul.mubr.msk.bf16.vlgmr.msra.gmra.mxu1 %vm2064_vm1, %v6628_v21  ;;  %v230_v30 = vrot.slane %v228_v22, 5  ;;  %v252_v32 = vshll.u32 %v8112_v10, 16  ;;  %v172_v38 = vld [vmem:[%s8103_s24 + $0x1c] sm:$0xf]  ;;  %v8166_v16 = vld [vmem:[%s10387_s1 + $0x28] sm:$0xff]  }
  0x18   : > { %v249_v31 = vor.u32 %v248_v20, %v245_v19  ;;  %v10389_v34 = vrot.slane %v8112_v10, 5  ;;  %v258_v36 = vrot.slane %v256_v18, 4  ;;  %v262_v37 = vshll.u32 %v200_v23, 16  ;;  %7415 = vmatpush3.bf16.msra.mxu1 %v7886_v3  ;;  %v173_v43 = vld [vmem:[%s8103_s24 + $0x24] sm:$0xf] }
  0x19   : > { %v226_v35 = vrot.slane %v225_v25, 4  ;;  %v235_v39 = vor.u32 %v234_v26, %v230_v30  ;;  %v240_v40 = vrot.slane %v238_v27, 5  ;;  %v254_v42 = vrot.slane %v252_v32, 5  ;;  %7482 = vmatprep.subr.bf16.mxu1 %v8125_v24  ;;  %v174_v48 = vld [vmem:[%s8103_s24 + $0x28] sm:$0xf] }
  0x1a   : > { %v250_v41 = vrot.slane %v249_v31, 4  ;;  %v264_v45 = vrot.slane %v262_v37, 5  ;;  %v267_v46 = vshrl.u32 %v171_v33, 16  ;;  %v270_v47 = vshll.u32 %v171_v33, 16  ;;  %v201_v61 = vld [vmem:[%s8103_s24 + $0x20] sm:$0x1] }
  0x1b   : > { %v231_v44 = vsel %vm8133_vm3, %v226_v35, %v230_v30  ;;  %v236_v49 = vrot.slane %v235_v39, 4  ;;  %v259_v51 = vor.u32 %v258_v36, %v254_v42  ;;  %v280_v52 = vshrl.u32 %v172_v38, 16  ;;  %v202_v3 = vld [vmem:[%s8103_s24 + $0x2c] sm:$0x1]  ;;  %v175_v9 = vld [vmem:[%s8103_s24 + $0x30] sm:$0xf] }
  0x1c   : > { %v255_v50 = vsel %vm8133_vm3, %v250_v41, %v254_v42  ;;  %v269_v53 = vrot.slane %v267_v46, 4  ;;  %v272_v54 = vrot.slane %v270_v47, 5  ;;  %v6629_v55 = vcombine.low %v171_v33, %v172_v38  ;;  %v176_v21 = vld [vmem:[%s8103_s24 + $0x34] sm:$0xf]  ;;  %v177_v27 = vld [vmem:[%s8103_s24 + $0x3c] sm:$0xf] }
  0x1d   : > { %v291_v56 = vshrl.u32 %v173_v43, 16  ;;  %v241_v57 = vsel %vm8133_vm3, %v236_v49, %v240_v40  ;;  %v260_v58 = vrot.slane %v259_v51, 4  ;;  %v294_v59 = vshll.u32 %v173_v43, 16  ;;  %v178_v35 = vld [vmem:[%s8103_s24 + $0x40] sm:$0xf] }
  0x1e   : > { %v304_v60 = vshrl.u32 %v174_v48, 16  ;;  %v8151_v62 = vcombine.low %v231_v44, %v241_v57  ;;  %7352 = vmatprep.mubr.msk.bf16.mxu1 %vm2064_vm1, %v6629_v55  ;;  %v6630_v0 = vcombine.low %v173_v43, %v174_v48  ;;  %v273_v1 = vor.u32 %v272_v54, %v269_v53  ;;  %v203_v47 = vld [vmem:[%s8103_s24 + $0x38] sm:$0x1]  ;;  %v179_v57 = vld [vmem:[%s8103_s24 + $0x48] sm:$0xf] }
  0x1f   : > { %v293_v63 = vrot.slane %v291_v56, 4  ;;  %v265_v4 = vsel %vm8133_vm3, %v260_v58, %v264_v45  ;;  %v296_v6 = vrot.slane %v294_v59, 5  ;;  %v276_v7 = vshll.u32 %v172_v38, 16 }
  0x20   : > { %v282_v8 = vrot.slane %v280_v52, 4  ;;  %7314 = vmatprep.mubr.msk.bf16.mxu0 %vm2064_vm1, %v8151_v62  ;;  %v8160_v12 = vcombine.low %v255_v50, %v265_v4  ;;  %7353 = vmatmul.mubr.msk.bf16.gmra.mxu1 %vm2064_vm1, %v6630_v0  ;;  %v274_v13 = vrot.slane %v273_v1, 4  ;;  %v286_v14 = vshll.u32 %v201_v61, 16  ;;  %v204_v52 = vld [vmem:[%s8103_s24 + $0x44] sm:$0x1] }
  0x21   : > { %v300_v15 = vshll.u32 %v174_v48, 16  ;;  %v278_v17 = vrot.slane %v276_v7, 5  ;;  %v297_v18 = vor.u32 %v296_v6, %v293_v63  ;;  %v306_v19 = vrot.slane %v304_v60, 4  ;;  %v180_v4 = vld [vmem:[%s8103_s24 + $0x4c] sm:$0xf] }
  0x22   : > { %v310_v20 = vshll.u32 %v202_v3, 16  ;;  %7315 = vmatmul.mubr.msk.bf16.vlgmr.msra.gmra.mxu0 %vm2064_vm1, %v8160_v12  ;;  %v288_v22 = vrot.slane %v286_v14, 5  ;;  %v315_v25 = vshrl.u32 %v175_v9, 16  ;;  %v318_v26 = vshll.u32 %v175_v9, 16 }
  0x23   : > { %v302_v23 = vrot.slane %v300_v15, 5  ;;  %7381 = vmatpush3.bf16.msra.mxu0 %v8093_v2  ;;  %v279_v30 = vsel %vm8133_vm3, %v274_v13, %v278_v17  ;;  %v283_v31 = vor.u32 %v282_v8, %v278_v17  ;;  %v298_v32 = vrot.slane %v297_v18, 4  ;;  %v181_v13 = vld [vmem:[%s8103_s24 + $0x54] sm:$0xf] }
  0x24   : > { %v312_v33 = vrot.slane %v310_v20, 5  ;;  %v317_v37 = vrot.slane %v315_v25, 4  ;;  %v320_v38 = vrot.slane %v318_v26, 5  ;;  %v328_v39 = vshrl.u32 %v176_v21, 16  ;;  %7448 = vmatprep.subr.bf16.mxu0 %v8166_v16 }
  0x25   : > { %v307_v36 = vor.u32 %v306_v19, %v302_v23  ;;  %v284_v40 = vrot.slane %v283_v31, 4  ;;  %v303_v41 = vsel %vm8133_vm3, %v298_v32, %v302_v23  ;;  %v6631_v2 = vcombine.low %v175_v9, %v176_v21  ;;  %v182_v19 = vld [vmem:[%s8103_s24 + $0x58] sm:$0xf]  ;;  %v205_v31 = vld [vmem:[%s8103_s24 + $0x50] sm:$0x1] }
  0x26   : > { %v339_v42 = vshrl.u32 %v177_v27, 16  ;;  %v342_v44 = vshll.u32 %v177_v27, 16  ;;  %v352_v45 = vshrl.u32 %v178_v35, 16  ;;  %v6632_v46 = vcombine.low %v177_v27, %v178_v35 }
  0x27   : > { %v308_v43 = vrot.slane %v307_v36, 4  ;;  %v289_v48 = vsel %vm8133_vm3, %v284_v40, %v288_v22  ;;  %7356 = vmatprep.mubr.msk.bf16.mxu1 %vm2064_vm1, %v6631_v2  ;;  %v321_v50 = vor.u32 %v320_v38, %v317_v37  ;;  %v324_v51 = vshll.u32 %v176_v21, 16 }
  0x28   : > { %v341_v49 = vrot.slane %v339_v42, 4  ;;  %v8184_v53 = vcombine.low %v279_v30, %v289_v48  ;;  %v344_v55 = vrot.slane %v342_v44, 5  ;;  %7357 = vmatmul.mubr.msk.bf16.gmra.mxu1 %vm2064_vm1, %v6632_v46  ;;  %v330_v56 = vrot.slane %v328_v39, 4 }
  0x29   : > { %v313_v54 = vsel %vm8133_vm3, %v308_v43, %v312_v33  ;;  %v322_v59 = vrot.slane %v321_v50, 4  ;;  %v326_v60 = vrot.slane %v324_v51, 5  ;;  %v334_v61 = vshll.u32 %v203_v47, 16  ;;  %v184_v50 = vld [vmem:[%s8103_s24 + $0x64] sm:$0xf] }
  0x2a   : > { %v8190_v58 = vcombine.low %v303_v41, %v313_v54  ;;  %7318 = vmatprep.mubr.msk.bf16.mxu0 %vm2064_vm1, %v8184_v53  ;;  %v345_v63 = vor.u32 %v344_v55, %v341_v49  ;;  %v348_v0 = vshll.u32 %v178_v35, 16  ;;  %v354_v1 = vrot.slane %v352_v45, 4  ;;  %v206_v41 = vld [vmem:[%s8103_s24 + $0x5c] sm:$0x1]  ;;  %v183_v45 = vld [vmem:[%s8103_s24 + $0x60] sm:$0xf] }
  0x2b   : > { %v358_v3 = vshll.u32 %v204_v52, 16  ;;  %v327_v6 = vsel %vm8133_vm3, %v322_v59, %v326_v60  ;;  %v331_v7 = vor.u32 %v330_v56, %v326_v60  ;;  %v336_v8 = vrot.slane %v334_v61, 5  ;;  %v185_v61 = vld [vmem:[%s8103_s24 + $0x6c] sm:$0xf] }
  0x2c   : > { %7319 = vmatmul.mubr.msk.bf16.gmra.mxu0 %vm2064_vm1, %v8190_v58  ;;  %v363_v9 = vshrl.u32 %v179_v57, 16  ;;  %v346_v14 = vrot.slane %v345_v63, 4  ;;  %v350_v15 = vrot.slane %v348_v0, 5  ;;  %v366_v18 = vshll.u32 %v179_v57, 16 }
  0x2d   : > { %v360_v17 = vrot.slane %v358_v3, 5  ;;  %v332_v20 = vrot.slane %v331_v7, 4  ;;  %v376_v22 = vshrl.u32 %v180_v4, 16  ;;  %v6633_v23 = vcombine.low %v179_v57, %v180_v4 }
  0x2e   : > { %v365_v21 = vrot.slane %v363_v9, 4  ;;  %v351_v25 = vsel %vm8133_vm3, %v346_v14, %v350_v15  ;;  %v355_v26 = vor.u32 %v354_v1, %v350_v15  ;;  %v368_v27 = vrot.slane %v366_v18, 5 }
  0x2f   : > { %v387_v30 = vshrl.u32 %v181_v13, 16  ;;  %v337_v32 = vsel %vm8133_vm3, %v332_v20, %v336_v8  ;;  %7360 = vmatprep.mubr.msk.bf16.mxu1 %vm2064_vm1, %v6633_v23  ;;  %v390_v33 = vshll.u32 %v181_v13, 16  ;;  %v400_v35 = vshrl.u32 %v182_v19, 16 }
  0x30   : > { %v6634_v36 = vcombine.low %v181_v13, %v182_v19  ;;  %v8207_v37 = vcombine.low %v327_v6, %v337_v32  ;;  %v356_v38 = vrot.slane %v355_v26, 4  ;;  %v369_v40 = vor.u32 %v368_v27, %v365_v21 }
  0x31   : > { %v389_v39 = vrot.slane %v387_v30, 4  ;;  %v392_v2 = vrot.slane %v390_v33, 5  ;;  %v372_v42 = vshll.u32 %v180_v4, 16  ;;  %v378_v43 = vrot.slane %v376_v22, 4  ;;  %v186_v4 = vld [vmem:[%s8103_s24 + $0x70] sm:$0xf] }
  0x32   : > { %7361 = vmatmul.mubr.msk.bf16.gmra.mxu1 %vm2064_vm1, %v6634_v36  ;;  %v382_v44 = vshll.u32 %v205_v31, 16  ;;  %7322 = vmatprep.mubr.msk.bf16.mxu0 %vm2064_vm1, %v8207_v37  ;;  %v361_v46 = vsel %vm8133_vm3, %v356_v38, %v360_v17  ;;  %v370_v47 = vrot.slane %v369_v40, 4  ;;  %v396_v48 = vshll.u32 %v182_v19, 16  ;;  %v207_v22 = vld [vmem:[%s8103_s24 + $0x68] sm:$0x1] }
  0x33   : > { %v402_v49 = vrot.slane %v400_v35, 4  ;;  %v8217_v51 = vcombine.low %v351_v25, %v361_v46  ;;  %v374_v52 = vrot.slane %v372_v42, 5  ;;  %v393_v55 = vor.u32 %v392_v2, %v389_v39  ;;  %v208_v30 = vld [vmem:[%s8103_s24 + $0x74] sm:$0x1]  ;;  %v187_v36 = vld [vmem:[%s8103_s24 + $0x78] sm:$0xf] }
  0x34   : > { %v384_v54 = vrot.slane %v382_v44, 5  ;;  %v398_v56 = vrot.slane %v396_v48, 5  ;;  %v406_v57 = vshll.u32 %v206_v41, 16  ;;  %v411_v59 = vshrl.u32 %v183_v45, 16 }
  0x35   : > { %v414_v60 = vshll.u32 %v183_v45, 16  ;;  %7323 = vmatmul.mubr.msk.bf16.gmra.mxu0 %vm2064_vm1, %v8217_v51  ;;  %v375_v63 = vsel %vm8133_vm3, %v370_v47, %v374_v52  ;;  %v379_v0 = vor.u32 %v378_v43, %v374_v52  ;;  %v394_v1 = vrot.slane %v393_v55, 4 }
  0x36   : > { %v424_v3 = vshrl.u32 %v184_v50, 16  ;;  %v403_v6 = vor.u32 %v402_v49, %v398_v56  ;;  %v408_v7 = vrot.slane %v406_v57, 5  ;;  %v413_v8 = vrot.slane %v411_v59, 4  ;;  %v190_v57 = vld [vmem:[%s8103_s24 + $0x88] sm:$0xf] }
  0x37   : > { %v416_v9 = vrot.slane %v414_v60, 5  ;;  %v380_v13 = vrot.slane %v379_v0, 4  ;;  %v399_v14 = vsel %vm8133_vm3, %v394_v1, %v398_v56  ;;  %v6635_v15 = vcombine.low %v183_v45, %v184_v50  ;;  %v188_v45 = vld [vmem:[%s8103_s24 + $0x7c] sm:$0xf] }
  0x38   : > { %v435_v17 = vshrl.u32 %v185_v61, 16  ;;  %v404_v18 = vrot.slane %v403_v6, 4  ;;  %v438_v19 = vshll.u32 %v185_v61, 16  ;;  %v448_v20 = vshrl.u32 %v186_v4, 16  ;;  %v209_v6 = vld [vmem:[%s8103_s24 + $0x80] sm:$0x1] }
  0x39   : > { %v6636_v21 = vcombine.low %v185_v61, %v186_v4  ;;  %v385_v23 = vsel %vm8133_vm3, %v380_v13, %v384_v54  ;;  %7364 = vmatprep.mubr.msk.bf16.mxu1 %vm2064_vm1, %v6635_v15  ;;  %v417_v26 = vor.u32 %v416_v9, %v413_v8  ;;  %v420_v27 = vshll.u32 %v184_v50, 16  ;;  %v189_v50 = vld [vmem:[%s8103_s24 + $0x84] sm:$0xf] }
  0x3a   : > { %v437_v25 = vrot.slane %v435_v17, 4  ;;  %v8232_v31 = vcombine.low %v375_v63, %v385_v23  ;;  %v409_v32 = vsel %vm8133_vm3, %v404_v18, %v408_v7  ;;  %v440_v33 = vrot.slane %v438_v19, 5  ;;  %v210_v19 = vld [vmem:[%s8103_s24 + $0x8c] sm:$0x1] }
  0x3b   : > { %7365 = vmatmul.mubr.msk.bf16.gmra.mxu1 %vm2064_vm1, %v6636_v21  ;;  %v426_v35 = vrot.slane %v424_v3, 4  ;;  %v8238_v38 = vcombine.low %v399_v14, %v409_v32  ;;  %v418_v39 = vrot.slane %v417_v26, 4  ;;  %v422_v40 = vrot.slane %v420_v27, 5 }
  0x3c   : > { %v430_v41 = vshll.u32 %v207_v22, 16  ;;  %7326 = vmatprep.mubr.msk.bf16.mxu0 %vm2064_vm1, %v8232_v31  ;;  %v441_v2 = vor.u32 %v440_v33, %v437_v25  ;;  %v444_v42 = vshll.u32 %v186_v4, 16  ;;  %v450_v43 = vrot.slane %v448_v20, 4  ;;  %v191_v25 = vld [vmem:[%s8103_s24 + $0x90] sm:$0xf] }
  0x3d   : > { %v454_v44 = vshll.u32 %v208_v30, 16  ;;  %7327 = vmatmul.mubr.msk.bf16.gmra.mxu0 %vm2064_vm1, %v8238_v38  ;;  %v423_v46 = vsel %vm8133_vm3, %v418_v39, %v422_v40  ;;  %v427_v47 = vor.u32 %v426_v35, %v422_v40  ;;  %v459_v49 = vshrl.u32 %v187_v36, 16  ;;  %v192_v33 = vld [vmem:[%s8103_s24 + $0x94] sm:$0xf] }
  0x3e   : > { %v432_v48 = vrot.slane %v430_v41, 5  ;;  %v442_v52 = vrot.slane %v441_v2, 4  ;;  %v446_v54 = vrot.slane %v444_v42, 5  ;;  %v462_v56 = vshll.u32 %v187_v36, 16 }
  0x3f   : > { %v456_v55 = vrot.slane %v454_v44, 5  ;;  %v428_v59 = vrot.slane %v427_v47, 4  ;;  %v461_v60 = vrot.slane %v459_v49, 4  ;;  %v472_v61 = vshrl.u32 %v188_v45, 16  ;;  %v193_v44 = vld [vmem:[%s8103_s24 + $0x9c] sm:$0xf] }
  0x40   : > { %v6637_v63 = vcombine.low %v187_v36, %v188_v45  ;;  %v447_v0 = vsel %vm8133_vm3, %v442_v52, %v446_v54  ;;  %v451_v1 = vor.u32 %v450_v43, %v446_v54  ;;  %v464_v3 = vrot.slane %v462_v56, 5  ;;  %v194_v49 = vld [vmem:[%s8103_s24 + $0xa0] sm:$0xf] }
  0x41   : > { %v483_v4 = vshrl.u32 %v189_v50, 16  ;;  %v433_v7 = vsel %vm8133_vm3, %v428_v59, %v432_v48  ;;  %v486_v8 = vshll.u32 %v189_v50, 16  ;;  %v496_v9 = vshrl.u32 %v190_v57, 16 }
  0x42   : > { %7368 = vmatprep.mubr.msk.bf16.mxu1 %vm2064_vm1, %v6637_v63  ;;  %v6638_v13 = vcombine.low %v189_v50, %v190_v57  ;;  %v8255_v14 = vcombine.low %v423_v46, %v433_v7  ;;  %v452_v15 = vrot.slane %v451_v1, 4  ;;  %v465_v18 = vor.u32 %v464_v3, %v461_v60  ;;  %v211_v3 = vld [vmem:[%s8103_s24 + $0x98] sm:$0x1] }
  0x43   : > { %v485_v17 = vrot.slane %v483_v4, 4  ;;  %v488_v20 = vrot.slane %v486_v8, 5  ;;  %v468_v21 = vshll.u32 %v188_v45, 16  ;;  %v474_v22 = vrot.slane %v472_v61, 4 }
  0x44   : > { %7369 = vmatmul.mubr.msk.bf16.gmra.mxu1 %vm2064_vm1, %v6638_v13  ;;  %v478_v23 = vshll.u32 %v209_v6, 16  ;;  %7330 = vmatprep.mubr.msk.bf16.mxu0 %vm2064_vm1, %v8255_v14  ;;  %v457_v26 = vsel %vm8133_vm3, %v452_v15, %v456_v55  ;;  %v466_v27 = vrot.slane %v465_v18, 4  ;;  %v492_v30 = vshll.u32 %v190_v57, 16 }
  0x45   : > { %v498_v32 = vrot.slane %v496_v9, 4  ;;  %v8265_v35 = vcombine.low %v447_v0, %v457_v26  ;;  %v470_v36 = vrot.slane %v468_v21, 5  ;;  %v489_v40 = vor.u32 %v488_v20, %v485_v17  ;;  %v212_v9 = vld [vmem:[%s8103_s24 + $0xa4] sm:$0x1] }
  0x46   : > { %v480_v39 = vrot.slane %v478_v23, 5  ;;  %v494_v41 = vrot.slane %v492_v30, 5  ;;  %v502_v2 = vshll.u32 %v210_v19, 16  ;;  %v507_v42 = vshrl.u32 %v191_v25, 16  ;;  %v195_v19 = vld [vmem:[%s8103_s24 + $0xa8] sm:$0xf] }
  0x47   : > { %v510_v43 = vshll.u32 %v191_v25, 16  ;;  %7331 = vmatmul.mubr.msk.bf16.gmra.mxu0 %vm2064_vm1, %v8265_v35  ;;  %v471_v45 = vsel %vm8133_vm3, %v466_v27, %v470_v36  ;;  %v475_v46 = vor.u32 %v474_v22, %v470_v36  ;;  %v490_v47 = vrot.slane %v489_v40, 4 }
  0x48   : > { %v520_v48 = vshrl.u32 %v192_v33, 16  ;;  %v499_v50 = vor.u32 %v498_v32, %v494_v41  ;;  %v504_v52 = vrot.slane %v502_v2, 5  ;;  %v509_v54 = vrot.slane %v507_v42, 4  ;;  %v196_v32 = vld [vmem:[%s8103_s24 + $0xac] sm:$0xf] }
  0x49   : > { %v512_v55 = vrot.slane %v510_v43, 5  ;;  %v476_v56 = vrot.slane %v475_v46, 4  ;;  %v495_v57 = vsel %vm8133_vm3, %v490_v47, %v494_v41  ;;  %v6639_v59 = vcombine.low %v191_v25, %v192_v33  ;;  %v197_v41 = vld [vmem:[%s8103_s24 + $0xb4] sm:$0xf] }
  0x4a   : > { %v531_v60 = vshrl.u32 %v193_v44, 16  ;;  %v500_v61 = vrot.slane %v499_v50, 4  ;;  %v534_v63 = vshll.u32 %v193_v44, 16  ;;  %v544_v0 = vshrl.u32 %v194_v49, 16 }
  0x4b   : > { %v6640_v1 = vcombine.low %v193_v44, %v194_v49  ;;  %v481_v4 = vsel %vm8133_vm3, %v476_v56, %v480_v39  ;;  %7372 = vmatprep.mubr.msk.bf16.mxu1 %vm2064_vm1, %v6639_v59  ;;  %v513_v7 = vor.u32 %v512_v55, %v509_v54  ;;  %v516_v8 = vshll.u32 %v192_v33, 16  ;;  %v213_v56 = vld [vmem:[%s8103_s24 + $0xb0] sm:$0x1] }
  0x4c   : > { %v533_v6 = vrot.slane %v531_v60, 4  ;;  %v8280_v13 = vcombine.low %v471_v45, %v481_v4  ;;  %v505_v15 = vsel %vm8133_vm3, %v500_v61, %v504_v52  ;;  %v536_v17 = vrot.slane %v534_v63, 5  ;;  %v198_v45 = vld [vmem:[%s8103_s24 + $0xb8] sm:$0xf]  ;;  %v214_v63 = vld [vmem:[%s8103_s24 + $0xbc] sm:$0x1] }
  0x4d   : > { %7373 = vmatmul.mubr.msk.bf16.gmra.mxu1 %vm2064_vm1, %v6640_v1  ;;  %v522_v18 = vrot.slane %v520_v48, 4  ;;  %v8286_v20 = vcombine.low %v495_v57, %v505_v15  ;;  %v514_v21 = vrot.slane %v513_v7, 4  ;;  %v518_v22 = vrot.slane %v516_v8, 5 }
  0x4e   : > { %v526_v23 = vshll.u32 %v211_v3, 16  ;;  %7334 = vmatprep.mubr.msk.bf16.mxu0 %vm2064_vm1, %v8280_v13  ;;  %v537_v25 = vor.u32 %v536_v17, %v533_v6  ;;  %v540_v26 = vshll.u32 %v194_v49, 16  ;;  %v546_v27 = vrot.slane %v544_v0, 4  ;;  %v8307_v6 = vld [vmem:[%s8103_s24 + $0xc] sm:$0xf] }
  0x4f   : > { %v550_v30 = vshll.u32 %v212_v9, 16  ;;  %7335 = vmatmul.mubr.msk.bf16.gmra.mxu0 %vm2064_vm1, %v8286_v20  ;;  %v519_v33 = vsel %vm8133_vm3, %v514_v21, %v518_v22  ;;  %v523_v36 = vor.u32 %v522_v18, %v518_v22  ;;  %v555_v40 = vshrl.u32 %v195_v19, 16  ;;  %v6433_v22 = vld [vmem:[%s8103_s24 + $0x10] sm:$0xf] }
  0x50   : > { %v528_v39 = vrot.slane %v526_v23, 5  ;;  %v538_v2 = vrot.slane %v537_v25, 4  ;;  %v542_v42 = vrot.slane %v540_v26, 5  ;;  %v558_v44 = vshll.u32 %v195_v19, 16 }
  0x51   : > { %v552_v43 = vrot.slane %v550_v30, 5  ;;  %v524_v46 = vrot.slane %v523_v36, 4  ;;  %v557_v47 = vrot.slane %v555_v40, 4  ;;  %v568_v48 = vshrl.u32 %v196_v32, 16 }
  0x52   : > { %v6641_v49 = vcombine.low %v195_v19, %v196_v32  ;;  %v543_v50 = vsel %vm8133_vm3, %v538_v2, %v542_v42  ;;  %v547_v52 = vor.u32 %v546_v27, %v542_v42  ;;  %v560_v54 = vrot.slane %v558_v44, 5  ;;  %v6464_v2 = vld [vmem:[%s8103_s24 + $0x14] sm:$0x1] }
  0x53   : > { %v579_v55 = vshrl.u32 %v197_v41, 16  ;;  %v529_v57 = vsel %vm8133_vm3, %v524_v46, %v528_v39  ;;  %v582_v59 = vshll.u32 %v197_v41, 16  ;;  %v592_v60 = vshrl.u32 %v198_v45, 16 }
  0x54   : > { %7376 = vmatprep.mubr.msk.bf16.mxu1 %vm2064_vm1, %v6641_v49  ;;  %v6642_v61 = vcombine.low %v197_v41, %v198_v45  ;;  %v8304_v0 = vcombine.low %v519_v33, %v529_v57  ;;  %v548_v1 = vrot.slane %v547_v52, 4  ;;  %v561_v4 = vor.u32 %v560_v54, %v557_v47 }
  0x55   : > { %v581_v3 = vrot.slane %v579_v55, 4  ;;  %v584_v7 = vrot.slane %v582_v59, 5  ;;  %v564_v8 = vshll.u32 %v196_v32, 16  ;;  %v570_v9 = vrot.slane %v568_v48, 4  ;;  %v6435_v48 = vld [vmem:[%s8103_s24 + $0x1c] sm:$0xf] }
  0x56   : > { %7377 = vmatmul.mubr.msk.bf16.gmra.mxu1 %vm2064_vm1, %v6642_v61  ;;  %v574_v15 = vshll.u32 %v213_v56, 16  ;;  %7338 = vmatprep.mubr.msk.bf16.mxu0 %vm2064_vm1, %v8304_v0  ;;  %v553_v17 = vsel %vm8133_vm3, %v548_v1, %v552_v43  ;;  %v562_v18 = vrot.slane %v561_v4, 4  ;;  %v588_v19 = vshll.u32 %v198_v45, 16  ;;  %v6434_v43 = vld [vmem:[%s8103_s24 + $0x18] sm:$0xf] }
  0x57   : > { %v594_v21 = vrot.slane %v592_v60, 4  ;;  %v8315_v23 = vcombine.low %v543_v50, %v553_v17  ;;  %v566_v25 = vrot.slane %v564_v8, 5  ;;  %v585_v27 = vor.u32 %v584_v7, %v581_v3 }
  0x58   : > { %v576_v26 = vrot.slane %v574_v15, 5  ;;  %v590_v30 = vrot.slane %v588_v19, 5  ;;  %v598_v32 = vshll.u32 %v214_v63, 16  ;;  %v834_v33 = vshrl.u32 %v8307_v6, 16  ;;  %v6465_v63 = vld [vmem:[%s8103_s24 + $0x20] sm:$0x1] }
  0x59   : > { %v837_v36 = vshll.u32 %v8307_v6, 16  ;;  %7339 = vmatmul.mubr.msk.bf16.gmra.mxu0 %vm2064_vm1, %v8315_v23  ;;  %v567_v39 = vsel %vm8133_vm3, %v562_v18, %v566_v25  ;;  %v571_v40 = vor.u32 %v570_v9, %v566_v25  ;;  %v586_v41 = vrot.slane %v585_v27, 4  ;;  %v6437_v25 = vld [vmem:[%s8103_s24 + $0x28] sm:$0xf] }
  0x5a   : > { %v843_v42 = vshll.u32 %v6433_v22, 16  ;;  %v595_v44 = vor.u32 %v594_v21, %v590_v30  ;;  %v600_v45 = vrot.slane %v598_v32, 5  ;;  %v836_v46 = vrot.slane %v834_v33, 4  ;;  %v6436_v21 = vld [vmem:[%s8103_s24 + $0x24] sm:$0xf] }
  0x5b   : > { %v839_v47 = vrot.slane %v837_v36, 5  ;;  %v572_v49 = vrot.slane %v571_v40, 4  ;;  %v591_v50 = vsel %vm8133_vm3, %v586_v41, %v590_v30  ;;  %v847_v54 = vshrl.u32 %v6433_v22, 16  ;;  %v6466_v33 = vld [vmem:[%s8103_s24 + $0x2c] sm:$0x1] }
  0x5c   : > { %v845_v52 = vrot.slane %v843_v42, 5  ;;  %v596_v55 = vrot.slane %v595_v44, 4  ;;  %v853_v57 = vshll.u32 %v6464_v2, 16  ;;  %v858_v59 = vshrl.u32 %v6434_v43, 16  ;;  %v6438_v2 = vld [vmem:[%s8103_s24 + $0x30] sm:$0xf] }
  0x5d   : > { %v840_v56 = vor.u32 %v839_v47, %v836_v46  ;;  %v577_v60 = vsel %vm8133_vm3, %v572_v49, %v576_v26  ;;  %v849_v61 = vrot.slane %v847_v54, 4  ;;  %v861_v1 = vshll.u32 %v6434_v43, 16  ;;  %v6439_v47 = vld [vmem:[%s8103_s24 + $0x34] sm:$0xf] }
  0x5e   : > { %v867_v3 = vshll.u32 %v6435_v48, 16  ;;  %v8331_v4 = vcombine.low %v567_v39, %v577_v60  ;;  %v601_v7 = vsel %vm8133_vm3, %v596_v55, %v600_v45  ;;  %v855_v9 = vrot.slane %v853_v57, 5 }
  0x5f   : > { %v841_v8 = vrot.slane %v840_v56, 4  ;;  %v8335_v15 = vcombine.low %v591_v50, %v601_v7  ;;  %v850_v17 = vor.u32 %v849_v61, %v845_v52  ;;  %v860_v18 = vrot.slane %v858_v59, 4 }
  0x60   : > { %v863_v19 = vrot.slane %v861_v1, 5  ;;  %7342 = vmatprep.mubr.msk.bf16.mxu0 %vm2064_vm1, %v8331_v4  ;;  %v869_v27 = vrot.slane %v867_v3, 5  ;;  %v871_v30 = vshrl.u32 %v6435_v48, 16  ;;  %v877_v32 = vshll.u32 %v6465_v63, 16  ;;  %v6467_v63 = vld [vmem:[%s8103_s24 + $0x38] sm:$0x1] }
  0x61   : > { %v846_v26 = vsel %vm8133_vm3, %v841_v8, %v845_v52  ;;  %7343 = vmatmul.mubr.msk.bf16.gmra.mxu0 %vm2064_vm1, %v8335_v15  ;;  %v851_v36 = vrot.slane %v850_v17, 4  ;;  %v8347_v40 = vcombine.low %v8307_v6, %v6433_v22  ;;  %v8349_v41 = vcombine.low %v6434_v43, %v6435_v48 }
  0x62   : > { %v864_v39 = vor.u32 %v863_v19, %v860_v18  ;;  %v873_v42 = vrot.slane %v871_v30, 4  ;;  %v879_v44 = vrot.slane %v877_v32, 5  ;;  %v882_v45 = vshrl.u32 %v6436_v21, 16  ;;  %v6440_v18 = vld [vmem:[%s8103_s24 + $0x3c] sm:$0xf]  ;;  %v8368_v19 = vld [vmem:[%s10387_s1 + $0x30] sm:$0xff]  }
  0x63   : > { %10473 = vst [vmem:[#allocation2_spill] sm:$0xff] %v8347_v40  ;;  %10474 = vst [vmem:[#allocation3_spill] sm:$0xff] %v8349_v41  ;;  %v885_v46 = vshll.u32 %v6436_v21, 16  ;;  %v856_v49 = vsel %vm8133_vm3, %v851_v36, %v855_v9  ;;  %7382 = vmatprep.mubr.msk.bf16.mxu0 %vm2064_vm1, %v8347_v40  ;;  %v891_v52 = vshll.u32 %v6437_v25, 16  ;;  %v895_v54 = vshrl.u32 %v6437_v25, 16 }
  0x64   : > { %v865_v50 = vrot.slane %v864_v39, 4  ;;  %v8357_v6 = vcombine.low %v846_v26, %v856_v49  ;;  %v874_v22 = vor.u32 %v873_v42, %v869_v27  ;;  %v884_v43 = vrot.slane %v882_v45, 4  ;;  %v8381_v49 = vld [vmem:[%s10387_s1 + $0x38] sm:$0xff]  }
  0x65   : > { %v887_v48 = vrot.slane %v885_v46, 5  ;;  %v893_v56 = vrot.slane %v891_v52, 5  ;;  %v897_v57 = vrot.slane %v895_v54, 4  ;;  %v901_v59 = vshll.u32 %v6466_v33, 16  ;;  %v6441_v33 = vld [vmem:[%s8103_s24 + $0x40] sm:$0xf] }
  0x66   : > { %10475 = vst [vmem:[#allocation4_spill] sm:$0xff] %v8357_v6  ;;  %v870_v55 = vsel %vm8133_vm3, %v865_v50, %v869_v27  ;;  %7416 = vmatprep.mubr.msk.bf16.mxu1 %vm2064_vm1, %v8357_v6  ;;  %v875_v60 = vrot.slane %v874_v22, 4  ;;  %v906_v1 = vshrl.u32 %v6438_v2, 16  ;;  %v909_v3 = vshll.u32 %v6438_v2, 16  ;;  %v6468_v46 = vld [vmem:[%s8103_s24 + $0x44] sm:$0x1] }
  0x67   : > { %v888_v61 = vor.u32 %v887_v48, %v884_v43  ;;  %v898_v7 = vor.u32 %v897_v57, %v893_v56  ;;  %v903_v8 = vrot.slane %v901_v59, 5  ;;  %v915_v9 = vshll.u32 %v6439_v47, 16  ;;  %v6442_v22 = vld [vmem:[%s8103_s24 + $0x48] sm:$0xf]  ;;  %v6443_v59 = vld [vmem:[%s8103_s24 + $0x4c] sm:$0xf] }
  0x68   : > { %v919_v17 = vshrl.u32 %v6439_v47, 16  ;;  %v880_v26 = vsel %vm8133_vm3, %v875_v60, %v879_v44  ;;  %v908_v30 = vrot.slane %v906_v1, 4  ;;  %v911_v32 = vrot.slane %v909_v3, 5 }
  0x69   : > { %v889_v27 = vrot.slane %v888_v61, 4  ;;  %v8373_v36 = vcombine.low %v870_v55, %v880_v26  ;;  %7383 = vmatmul.mubr.msk.bf16.vlgmr.msra.gmra.mxu0 %vm2064_vm1, %v8349_v41  ;;  %v899_v39 = vrot.slane %v898_v7, 4  ;;  %v917_v42 = vrot.slane %v915_v9, 5 }
  0x6a   : > { %v921_v45 = vrot.slane %v919_v17, 4  ;;  %7449 = vmatpush3.bf16.msra.mxu0 %v8166_v16  ;;  %v912_v50 = vor.u32 %v911_v32, %v908_v30  ;;  %v925_v52 = vshll.u32 %v6467_v63, 16  ;;  %v8386_v54 = vcombine.low %v6436_v21, %v6437_v25 }
  0x6b   : > { %10476 = vst [vmem:[#allocation5_spill] sm:$0xff] %v8373_v36  ;;  %v894_v44 = vsel %vm8133_vm3, %v889_v27, %v893_v56  ;;  %7417 = vmatmul.mubr.msk.bf16.vlgmr.msra.gmra.mxu1 %vm2064_vm1, %v8373_v36  ;;  %v904_v43 = vsel %vm8133_vm3, %v899_v39, %v903_v8  ;;  %v8393_v55 = vcombine.low %v6438_v2, %v6439_v47  ;;  %v930_v16 = vshrl.u32 %v6440_v18, 16  ;;  %v6469_v2 = vld [vmem:[%s8103_s24 + $0x50] sm:$0x1] }
  0x6c   : > { %10477 = vst [vmem:[#allocation6_spill] sm:$0xff] %v8386_v54  ;;  %v922_v48 = vor.u32 %v921_v45, %v917_v42  ;;  %7516 = vmatprep.subr.bf16.mxu0 %v8368_v19  ;;  %7483 = vmatpush3.bf16.msra.mxu1 %v8125_v24  ;;  %v8397_v56 = vcombine.low %v894_v44, %v904_v43  ;;  %v913_v21 = vrot.slane %v912_v50, 4  ;;  %v927_v25 = vrot.slane %v925_v52, 5  ;;  %v6444_v50 = vld [vmem:[%s8103_s24 + $0x54] sm:$0xf] }
  0x6d   : > { %10478 = vst [vmem:[#allocation7_spill] sm:$0xff] %v8393_v55  ;;  %7386 = vmatprep.mubr.msk.bf16.mxu0 %vm2064_vm1, %v8386_v54  ;;  %v933_v57 = vshll.u32 %v6440_v18, 16  ;;  %v932_v61 = vrot.slane %v930_v16, 4  ;;  %v939_v63 = vshll.u32 %v6441_v33, 16  ;;  %v943_v1 = vshrl.u32 %v6441_v33, 16  ;;  %7550 = vmatprep.subr.bf16.mxu1 %v8381_v49 }
  0x6e   : > { %10479 = vst [vmem:[#allocation8_spill] sm:$0xff] %v8397_v56  ;;  %v923_v60 = vrot.slane %v922_v48, 4  ;;  %7420 = vmatprep.mubr.msk.bf16.mxu1 %vm2064_vm1, %v8397_v56  ;;  %v918_v24 = vsel %vm8133_vm3, %v913_v21, %v917_v42  ;;  %v949_v3 = vshll.u32 %v6468_v46, 16  ;;  %v954_v7 = vshrl.u32 %v6442_v22, 16  ;;  %v6445_v21 = vld [vmem:[%s8103_s24 + $0x58] sm:$0xf] }
  0x6f   : > { %v935_v47 = vrot.slane %v933_v57, 5  ;;  %v941_v9 = vrot.slane %v939_v63, 5  ;;  %v945_v17 = vrot.slane %v943_v1, 4  ;;  %v957_v26 = vshll.u32 %v6442_v22, 16 }
  0x70   : > { %v928_v8 = vsel %vm8133_vm3, %v923_v60, %v927_v25  ;;  %v951_v32 = vrot.slane %v949_v3, 5  ;;  %v956_v39 = vrot.slane %v954_v7, 4  ;;  %v963_v44 = vshll.u32 %v6443_v59, 16  ;;  %v6446_v3 = vld [vmem:[%s8103_s24 + $0x60] sm:$0xf] }
  0x71   : > { %v8410_v27 = vcombine.low %v918_v24, %v928_v8  ;;  %v936_v30 = vor.u32 %v935_v47, %v932_v61  ;;  %7387 = vmatmul.mubr.msk.bf16.gmra.mxu0 %vm2064_vm1, %v8393_v55  ;;  %v946_v42 = vor.u32 %v945_v17, %v941_v9  ;;  %v959_v45 = vrot.slane %v957_v26, 5  ;;  %v6447_v26 = vld [vmem:[%s8103_s24 + $0x64] sm:$0xf] }
  0x72   : > { %v967_v46 = vshrl.u32 %v6443_v59, 16  ;;  %v973_v43 = vshll.u32 %v6469_v2, 16  ;;  %v8415_v48 = vcombine.low %v6440_v18, %v6441_v33  ;;  %v8417_v16 = vcombine.low %v6442_v22, %v6443_v59  ;;  %v6470_v18 = vld [vmem:[%s8103_s24 + $0x5c] sm:$0x1] }
  0x73   : > { %10480 = vst [vmem:[#allocation9_spill] sm:$0xff] %v8410_v27  ;;  %v937_v52 = vrot.slane %v936_v30, 4  ;;  %7421 = vmatmul.mubr.msk.bf16.gmra.mxu1 %vm2064_vm1, %v8410_v27  ;;  %v947_v25 = vrot.slane %v946_v42, 4  ;;  %v960_v57 = vor.u32 %v959_v45, %v956_v39  ;;  %v965_v60 = vrot.slane %v963_v44, 5 }
  0x74   : > { %10481 = vst [vmem:[#allocation10_spill] sm:$0xff] %v8415_v48  ;;  %10482 = vst [vmem:[#allocation11_spill] sm:$0xff] %v8417_v16  ;;  %v969_v61 = vrot.slane %v967_v46, 4  ;;  %v975_v1 = vrot.slane %v973_v43, 5  ;;  %7390 = vmatprep.mubr.msk.bf16.mxu0 %vm2064_vm1, %v8415_v48  ;;  %v978_v33 = vshrl.u32 %v6444_v50, 16  ;;  %v981_v22 = vshll.u32 %v6444_v50, 16 }
  0x75   : > { %v942_v63 = vsel %vm8133_vm3, %v937_v52, %v941_v9  ;;  %v952_v59 = vsel %vm8133_vm3, %v947_v25, %v951_v32  ;;  %v961_v2 = vrot.slane %v960_v57, 4  ;;  %v987_v47 = vshll.u32 %v6445_v21, 16  ;;  %v6471_v46 = vld [vmem:[%s8103_s24 + $0x68] sm:$0x1] }
  0x76   : > { %v970_v24 = vor.u32 %v969_v61, %v965_v60  ;;  %v8430_v7 = vcombine.low %v942_v63, %v952_v59  ;;  %v980_v8 = vrot.slane %v978_v33, 4  ;;  %v983_v17 = vrot.slane %v981_v22, 5  ;;  %v6448_v59 = vld [vmem:[%s8103_s24 + $0x6c] sm:$0xf] }
  0x77   : > { %v991_v9 = vshrl.u32 %v6445_v21, 16  ;;  %v966_v30 = vsel %vm8133_vm3, %v961_v2, %v965_v60  ;;  %v989_v42 = vrot.slane %v987_v47, 5  ;;  %v997_v45 = vshll.u32 %v6470_v18, 16 }
  0x78   : > { %10483 = vst [vmem:[#allocation12_spill] sm:$0xff] %v8430_v7  ;;  %v971_v39 = vrot.slane %v970_v24, 4  ;;  %7424 = vmatprep.mubr.msk.bf16.mxu1 %vm2064_vm1, %v8430_v7  ;;  %v984_v32 = vor.u32 %v983_v17, %v980_v8  ;;  %v1002_v52 = vshrl.u32 %v6446_v3, 16  ;;  %v1005_v43 = vshll.u32 %v6446_v3, 16  ;;  %v8446_v17 = vld [vmem:[%s8103_s24 + $0x70] sm:$0xf] }
  0x79   : > { %v993_v44 = vrot.slane %v991_v9, 4  ;;  %7391 = vmatmul.mubr.msk.bf16.gmra.mxu0 %vm2064_vm1, %v8417_v16  ;;  %v999_v57 = vrot.slane %v997_v45, 5  ;;  %v1011_v60 = vshll.u32 %v6447_v26, 16  ;;  %v1015_v61 = vshrl.u32 %v6447_v26, 16 }
  0x7a   : > { %v976_v25 = vsel %vm8133_vm3, %v971_v39, %v975_v1  ;;  %v985_v18 = vrot.slane %v984_v32, 4  ;;  %v1004_v22 = vrot.slane %v1002_v52, 4  ;;  %v1007_v2 = vrot.slane %v1005_v43, 5  ;;  %v6472_v52 = vld [vmem:[%s8103_s24 + $0x74] sm:$0x1] }
  0x7b   : > { %v8442_v63 = vcombine.low %v966_v30, %v976_v25  ;;  %v994_v33 = vor.u32 %v993_v44, %v989_v42  ;;  %v1013_v24 = vrot.slane %v1011_v60, 5  ;;  %v1017_v47 = vrot.slane %v1015_v61, 4 }
  0x7c   : > { %v1021_v8 = vshll.u32 %v6471_v46, 16  ;;  %v990_v1 = vsel %vm8133_vm3, %v985_v18, %v989_v42  ;;  %v8452_v30 = vcombine.low %v6444_v50, %v6445_v21  ;;  %v8454_v39 = vcombine.low %v6446_v3, %v6447_v26  ;;  %v6450_v21 = vld [vmem:[%s8103_s24 + $0x78] sm:$0xf] }
  0x7d   : > { %7425 = vmatmul.mubr.msk.bf16.gmra.mxu1 %vm2064_vm1, %v8442_v63  ;;  %v995_v9 = vrot.slane %v994_v33, 4  ;;  %v1008_v45 = vor.u32 %v1007_v2, %v1004_v22  ;;  %v1018_v32 = vor.u32 %v1017_v47, %v1013_v24  ;;  %v1026_v46 = vshrl.u32 %v6448_v59, 16 }
  0x7e   : > { %10484 = vst [vmem:[#allocation13_spill] sm:$0xff] %v8452_v30  ;;  %10485 = vst [vmem:[#allocation14_spill] sm:$0xff] %v8454_v39  ;;  %v1023_v44 = vrot.slane %v1021_v8, 5  ;;  %7394 = vmatprep.mubr.msk.bf16.mxu0 %vm2064_vm1, %v8452_v30  ;;  %v1029_v25 = vshll.u32 %v6448_v59, 16  ;;  %v1035_v42 = vshll.u32 %v8446_v17, 16  ;;  %v1039_v50 = vshrl.u32 %v8446_v17, 16 }
  0x7f   : > { %v1000_v43 = vsel %vm8133_vm3, %v995_v9, %v999_v57  ;;  %v1009_v26 = vrot.slane %v1008_v45, 4  ;;  %v1019_v60 = vrot.slane %v1018_v32, 4  ;;  %v1028_v61 = vrot.slane %v1026_v46, 4  ;;  %v8467_v57 = vld [vmem:[%s8103_s24 + $0x7c] sm:$0xf] }
  0x80   : > { %v8464_v3 = vcombine.low %v990_v1, %v1000_v43  ;;  %v1031_v18 = vrot.slane %v1029_v25, 5  ;;  %v1037_v33 = vrot.slane %v1035_v42, 5  ;;  %v1041_v22 = vrot.slane %v1039_v50, 4  ;;  %v6473_v1 = vld [vmem:[%s8103_s24 + $0x80] sm:$0x1] }
  0x81   : > { %v1045_v2 = vshll.u32 %v6472_v52, 16  ;;  %v1014_v47 = vsel %vm8133_vm3, %v1009_v26, %v1013_v24  ;;  %v1024_v8 = vsel %vm8133_vm3, %v1019_v60, %v1023_v44  ;;  %7395 = vmatmul.mubr.msk.bf16.gmra.mxu0 %vm2064_vm1, %v8454_v39  ;;  %v1050_v9 = vshrl.u32 %v6450_v21, 16  ;;  %v8523_v30 = vld [vmem:[%s8103_s24 + $0x98] sm:$0x1] }
  0x82   : > { %7428 = vmatprep.mubr.msk.bf16.mxu1 %vm2064_vm1, %v8464_v3  ;;  %v1053_v45 = vshll.u32 %v6450_v21, 16  ;;  %v8478_v32 = vcombine.low %v1014_v47, %v1024_v8  ;;  %v1032_v52 = vor.u32 %v1031_v18, %v1028_v61  ;;  %v1042_v46 = vor.u32 %v1041_v22, %v1037_v33  ;;  %v6452_v18 = vld [vmem:[%s8103_s24 + $0x84] sm:$0xf]  ;;  %10493 = vst [vmem:[#allocation22_spill] sm:$0xff] %v8523_v30 }
  0x83   : > { %v1047_v43 = vrot.slane %v1045_v2, 5  ;;  %v1052_v25 = vrot.slane %v1050_v9, 4  ;;  %v1059_v24 = vshll.u32 %v8467_v57, 16  ;;  %v1063_v44 = vshrl.u32 %v8467_v57, 16  ;;  %v8493_v9 = vld [vmem:[%s8103_s24 + $0x88] sm:$0xf] }
  0x84   : > { %10486 = vst [vmem:[#allocation15_spill] sm:$0xff] %v8478_v32  ;;  %v1055_v42 = vrot.slane %v1053_v45, 5  ;;  %v8484_v50 = vrot.slane %v10389_v34, 4  ;;  %v1033_v26 = vrot.slane %v1032_v52, 4  ;;  %v1043_v60 = vrot.slane %v1042_v46, 4  ;;  %10488 = vst [vmem:[#allocation17_spill] sm:$0xff] %v8493_v9 }
  0x85   : > { %7429 = vmatmul.mubr.msk.bf16.gmra.mxu1 %vm2064_vm1, %v8478_v32  ;;  %v1069_v61 = vshll.u32 %v6473_v1, 16  ;;  %v1061_v2 = vrot.slane %v1059_v24, 5  ;;  %v1065_v47 = vrot.slane %v1063_v44, 4  ;;  %v8490_v8 = vcombine.low %v6448_v59, %v8446_v17  ;;  %v8496_v45 = vld [vmem:[%s8103_s24 + $0x8c] sm:$0x1] }
  0x86   : > { %v1056_v22 = vor.u32 %v1055_v42, %v1052_v25  ;;  %10489 = vst [vmem:[#allocation18_spill] sm:$0xff] %v8496_v45  ;;  %v1038_v34 = vsel %vm8133_vm3, %v1033_v26, %v1037_v33  ;;  %v1048_v52 = vsel %vm8133_vm3, %v1043_v60, %v1047_v43  ;;  %v8503_v1 = vcombine.low %v6450_v21, %v8467_v57  ;;  %v6454_v25 = vld [vmem:[%s8103_s24 + $0x90] sm:$0xf]  ;;  %v8514_v60 = vld [vmem:[%s8103_s24 + $0x94] sm:$0xf] }
  0x87   : > { %10487 = vst [vmem:[#allocation16_spill] sm:$0xff] %v8490_v8  ;;  %v1071_v46 = vrot.slane %v1069_v61, 5  ;;  %v8506_v42 = vcombine.low %v1038_v34, %v1048_v52  ;;  %v1066_v24 = vor.u32 %v1065_v47, %v1061_v2  ;;  %7398 = vmatprep.mubr.msk.bf16.mxu0 %vm2064_vm1, %v8490_v8  ;;  %v1074_v44 = vshrl.u32 %v6452_v18, 16  ;;  %10492 = vst [vmem:[#allocation21_spill] sm:$0xff] %v8514_v60 }
  0x88   : > { %10490 = vst [vmem:[#allocation19_spill] sm:$0xff] %v8503_v1  ;;  %v1057_v59 = vrot.slane %v1056_v22, 4  ;;  %v1077_v11 = vshll.u32 %v6452_v18, 16  ;;  %v1083_v33 = vshll.u32 %v8493_v9, 16  ;;  %v1087_v26 = vshrl.u32 %v8493_v9, 16 }
  0x89   : > { %10491 = vst [vmem:[#allocation20_spill] sm:$0xff] %v8506_v42  ;;  %v1093_v43 = vshll.u32 %v8496_v45, 16  ;;  %7432 = vmatprep.mubr.msk.bf16.mxu1 %vm2064_vm1, %v8506_v42  ;;  %v1067_v21 = vrot.slane %v1066_v24, 4  ;;  %7399 = vmatmul.mubr.msk.bf16.gmra.mxu0 %vm2064_vm1, %v8503_v1  ;;  %v1076_v61 = vrot.slane %v1074_v44, 4  ;;  %v1098_v22 = vshrl.u32 %v6454_v25, 16 }
  0x8a   : > { %v1062_v34 = vsel %vm8133_vm3, %v1057_v59, %v1061_v2  ;;  %v1079_v47 = vrot.slane %v1077_v11, 5  ;;  %v1085_v52 = vrot.slane %v1083_v33, 5  ;;  %v1089_v8 = vrot.slane %v1087_v26, 4  ;;  %v6456_v11 = vld [vmem:[%s8103_s24 + $0x9c] sm:$0xf] }
  0x8b   : > { %v1095_v39 = vrot.slane %v1093_v43, 5  ;;  %v1072_v16 = vsel %vm8133_vm3, %v1067_v21, %v1071_v46  ;;  %v1100_v48 = vrot.slane %v1098_v22, 4  ;;  %v1101_v55 = vshll.u32 %v6454_v25, 16  ;;  %v8533_v33 = vld [vmem:[%s8103_s24 + $0x8] sm:$0x1] }
  0x8c   : > { %v1107_v2 = vshll.u32 %v8514_v60, 16  ;;  %v8528_v59 = vcombine.low %v1062_v34, %v1072_v16  ;;  %v1080_v24 = vor.u32 %v1079_v47, %v1076_v61  ;;  %v1090_v44 = vor.u32 %v1089_v8, %v1085_v52  ;;  %v8543_v61 = vld [vmem:[%s8103_s24 + $0xa0] sm:$0xf]  ;;  %v6460_v45 = vld [vmem:[%s8103_s24 + $0xb4] sm:$0xf] }
  0x8d   : > { %v1111_v1 = vshrl.u32 %v8514_v60, 16  ;;  %v1103_v43 = vrot.slane %v1101_v55, 5  ;;  %v1117_v46 = vshll.u32 %v8523_v30, 16  ;;  %v8540_v8 = vcombine.low %v6452_v18, %v8493_v9  ;;  %10496 = vst [vmem:[#allocation25_spill] sm:$0xff] %v8543_v61  ;;  %v8549_v55 = vld [vmem:[%s8103_s24 + $0xa4] sm:$0x1] }
  0x8e   : > { %10494 = vst [vmem:[#allocation23_spill] sm:$0xff] %v8528_v59  ;;  %v1109_v54 = vrot.slane %v1107_v2, 5  ;;  %7433 = vmatmul.mubr.msk.bf16.gmra.mxu1 %vm2064_vm1, %v8528_v59  ;;  %v1081_v16 = vrot.slane %v1080_v24, 4  ;;  %v1091_v34 = vrot.slane %v1090_v44, 4  ;;  %v8546_v26 = vcombine.low %v6454_v25, %v8514_v60  ;;  %10498 = vst [vmem:[#allocation27_spill] sm:$0xff] %v8549_v55 }
  0x8f   : > { %v1113_v21 = vrot.slane %v1111_v1, 4  ;;  %10495 = vst [vmem:[#allocation24_spill] sm:$0xff] %v8540_v8  ;;  %v1104_v22 = vor.u32 %v1103_v43, %v1100_v48  ;;  %v1119_v47 = vrot.slane %v1117_v46, 5  ;;  %v1122_v2 = vshrl.u32 %v6456_v11, 16  ;;  %7402 = vmatprep.mubr.msk.bf16.mxu0 %vm2064_vm1, %v8540_v8  ;;  %v6458_v18 = vld [vmem:[%s8103_s24 + $0xa8] sm:$0xf] }
  0x90   : > { %10497 = vst [vmem:[#allocation26_spill] sm:$0xff] %v8546_v26  ;;  %v1086_v41 = vsel %vm8133_vm3, %v1081_v16, %v1085_v52  ;;  %v1096_v1 = vsel %vm8133_vm3, %v1091_v34, %v1095_v39  ;;  %v1125_v48 = vshll.u32 %v6456_v11, 16  ;;  %v1131_v46 = vshll.u32 %v8543_v61, 16  ;;  %v8584_v42 = vld [vmem:[%s8103_s24 + $0x14] sm:$0x1] }
  0x91   : > { %v1114_v24 = vor.u32 %v1113_v21, %v1109_v54  ;;  %v8558_v44 = vcombine.low %v1086_v41, %v1096_v1  ;;  %v1105_v25 = vrot.slane %v1104_v22, 4  ;;  %7403 = vmatmul.mubr.msk.bf16.gmra.mxu0 %vm2064_vm1, %v8546_v26  ;;  %v1124_v43 = vrot.slane %v1122_v2, 4  ;;  %v8566_v21 = vld [vmem:[%s8103_s24 + $0xac] sm:$0xf]  ;;  %v8573_v1 = vld [vmem:[%s8103_s24 + $0xb0] sm:$0x1] }
  0x92   : > { %v1127_v16 = vrot.slane %v1125_v48, 5  ;;  %v1135_v39 = vshrl.u32 %v8543_v61, 16  ;;  %v1141_v34 = vshll.u32 %v8549_v55, 16  ;;  %v1133_v22 = vrot.slane %v1131_v46, 5 }
  0x93   : > { %10499 = vst [vmem:[#allocation28_spill] sm:$0xff] %v8558_v44  ;;  %v1115_v52 = vrot.slane %v1114_v24, 4  ;;  %7436 = vmatprep.mubr.msk.bf16.mxu1 %vm2064_vm1, %v8558_v44  ;;  %v1110_v41 = vsel %vm8133_vm3, %v1105_v25, %v1109_v54  ;;  %v1146_v2 = vshrl.u32 %v6458_v18, 16  ;;  %v1149_v24 = vshll.u32 %v6458_v18, 16 }
  0x94   : > { %v1128_v26 = vor.u32 %v1127_v16, %v1124_v43  ;;  %v1137_v8 = vrot.slane %v1135_v39, 4  ;;  %v1143_v40 = vrot.slane %v1141_v34, 5  ;;  %v1155_v54 = vshll.u32 %v8566_v21, 16 }
  0x95   : > { %v1120_v48 = vsel %vm8133_vm3, %v1115_v52, %v1119_v47  ;;  %v1148_v44 = vrot.slane %v1146_v2, 4  ;;  %v1151_v30 = vrot.slane %v1149_v24, 5  ;;  %v1159_v59 = vshrl.u32 %v8566_v21, 16 }
  0x96   : > { %v8577_v55 = vcombine.low %v1110_v41, %v1120_v48  ;;  %v1129_v25 = vrot.slane %v1128_v26, 4  ;;  %v1138_v46 = vor.u32 %v1137_v8, %v1133_v22  ;;  %v1165_v60 = vshll.u32 %v8573_v1, 16  ;;  %v8593_v26 = vld [vmem:[%s8103_s24 + $0xb8] sm:$0xf] }
  0x97   : > { %v1152_v43 = vor.u32 %v1151_v30, %v1148_v44  ;;  %v1157_v52 = vrot.slane %v1155_v54, 5  ;;  %v8590_v16 = vcombine.low %v6456_v11, %v8543_v61  ;;  %v1161_v34 = vrot.slane %v1159_v59, 4  ;;  %v8603_v44 = vld [vmem:[%s8103_s24 + $0xbc] sm:$0x1]  ;;  %v6462_v59 = vld [vmem:[%s8103_s24 + $0xc0] sm:$0xf] }
  0x98   : > { %10500 = vst [vmem:[#allocation29_spill] sm:$0xff] %v8577_v55  ;;  %7437 = vmatmul.mubr.msk.bf16.gmra.mxu1 %vm2064_vm1, %v8577_v55  ;;  %v1134_v8 = vsel %vm8133_vm3, %v1129_v25, %v1133_v22  ;;  %v1139_v39 = vrot.slane %v1138_v46, 4  ;;  %v1167_v41 = vrot.slane %v1165_v60, 5  ;;  %v8600_v30 = vcombine.low %v6458_v18, %v8566_v21  ;;  %v8611_v25 = vld [vmem:[%s8103_s24 + $0xc4] sm:$0xf] }
  0x99   : > { %10501 = vst [vmem:[#allocation30_spill] sm:$0xff] %v8590_v16  ;;  %v1153_v2 = vrot.slane %v1152_v43, 4  ;;  %7406 = vmatprep.mubr.msk.bf16.mxu0 %vm2064_vm1, %v8590_v16  ;;  %v1170_v11 = vshrl.u32 %v6460_v45, 16  ;;  %v1173_v24 = vshll.u32 %v6460_v45, 16  ;;  %v1162_v54 = vor.u32 %v1161_v34, %v1157_v52  ;;  %v8623_v61 = vld [vmem:[%s8103_s24 + $0xc8] sm:$0x1] }
  0x9a   : > { %10502 = vst [vmem:[#allocation31_spill] sm:$0xff] %v8600_v30  ;;  %v1144_v48 = vsel %vm8133_vm3, %v1139_v39, %v1143_v40  ;;  %v1179_v22 = vshll.u32 %v8593_v26, 16  ;;  %v1183_v60 = vshrl.u32 %v8593_v26, 16  ;;  %7407 = vmatmul.mubr.msk.bf16.gmra.mxu0 %vm2064_vm1, %v8600_v30  ;;  %v1189_v16 = vshll.u32 %v8603_v44, 16 }
  0x9b   : > { %v8613_v46 = vcombine.low %v1134_v8, %v1144_v48  ;;  %v1158_v18 = vsel %vm8133_vm3, %v1153_v2, %v1157_v52  ;;  %v1172_v43 = vrot.slane %v1170_v11, 4  ;;  %v1175_v47 = vrot.slane %v1173_v24, 5 }
  0x9c   : > { %v1163_v40 = vrot.slane %v1162_v54, 4  ;;  %v1181_v39 = vrot.slane %v1179_v22, 5  ;;  %v1185_v34 = vrot.slane %v1183_v60, 4  ;;  %v1194_v8 = vshrl.u32 %v6462_v59, 16 }
  0x9d   : > { %10503 = vst [vmem:[#allocation32_spill] sm:$0xff] %v8613_v46  ;;  %7440 = vmatprep.mubr.msk.bf16.mxu1 %vm2064_vm1, %v8613_v46  ;;  %v1176_v55 = vor.u32 %v1175_v47, %v1172_v43  ;;  %v1197_v48 = vshll.u32 %v6462_v59, 16  ;;  %v1203_v52 = vshll.u32 %v8611_v25, 16  ;;  %v1191_v24 = vrot.slane %v1189_v16, 5 }
  0x9e   : > { %v1168_v2 = vsel %vm8133_vm3, %v1163_v40, %v1167_v41  ;;  %v1186_v11 = vor.u32 %v1185_v34, %v1181_v39  ;;  %v1207_v54 = vshrl.u32 %v8611_v25, 16  ;;  %v1196_v47 = vrot.slane %v1194_v8, 4  ;;  %v603_v34 = vld [vmem:[%s8103_s24 + $0xc] sm:$0xe] }
  0x9f   : > { %v8629_v22 = vcombine.low %v1158_v18, %v1168_v2  ;;  %v1177_v60 = vrot.slane %v1176_v55, 4  ;;  %v1199_v43 = vrot.slane %v1197_v48, 5  ;;  %v1205_v46 = vrot.slane %v1203_v52, 5  ;;  %v602_v18 = vld [vmem:[%s8103_s24] sm:$0xe] }
  0xa0   : > { %v1187_v30 = vrot.slane %v1186_v11, 4  ;;  %v1209_v32 = vrot.slane %v1207_v54, 4  ;;  %v1213_v9 = vshll.u32 %v8623_v61, 16  ;;  %v8637_v40 = vcombine.low %v6460_v45, %v8593_v26  ;;  %v604_v55 = vld [vmem:[%s8103_s24 + $0x18] sm:$0xe] }
  0xa1   : > { %10504 = vst [vmem:[#allocation33_spill] sm:$0xff] %v8629_v22  ;;  %7441 = vmatmul.mubr.msk.bf16.gmra.mxu1 %vm2064_vm1, %v8629_v22  ;;  %v1182_v41 = vsel %vm8133_vm3, %v1177_v60, %v1181_v39  ;;  %v1200_v16 = vor.u32 %v1199_v43, %v1196_v47  ;;  %v8645_v2 = vcombine.low %v6462_v59, %v8611_v25  ;;  %v6418_v59 = vrot.slane %v604_v55, 9 }
  0xa2   : > { %10505 = vst [vmem:[#allocation34_spill] sm:$0xff] %v8637_v40  ;;  %v1192_v8 = vsel %vm8133_vm3, %v1187_v30, %v1191_v24  ;;  %v1210_v48 = vor.u32 %v1209_v32, %v1205_v46  ;;  %v1215_v52 = vrot.slane %v1213_v9, 5  ;;  %7410 = vmatprep.mubr.msk.bf16.mxu0 %vm2064_vm1, %v8637_v40  ;;  %v10508_v32 = vmov 0  ;;  %v10537_v40 = vld [vmem:[#allocation23_spill] sm:$0xff] }
  0xa3   : > { %10506 = vst [vmem:[#allocation35_spill] sm:$0xff] %v8645_v2  ;;  %v8647_v11 = vcombine.low %v1182_v41, %v1192_v8  ;;  %v1201_v54 = vrot.slane %v1200_v16, 4  ;;  %7411 = vmatmul.mubr.msk.bf16.gmra.mxu0 %vm2064_vm1, %v8645_v2  ;;  %v10509_v32 = vsel %vm8653_vm6, 4294967295, %v10508_v32  ;;  %v6416_v9 = vrot.slane %v602_v18, 9  ;;  %v7947_v41 = vld [vmem:[%s8103_s24 + $0x1c] sm:$0xf] }
  0xa4   : > { %v1211_v45 = vrot.slane %v1210_v48, 4  ;;  %10510 = vst [vmem:[#allocation37_spill] sm:$0xff] %v10509_v32  ;;  %v6417_v30 = vrot.slane %v603_v34, 9  ;;  %v10511_v24 = vrot.slane %v8533_v33, 5  ;;  %v10512_v47 = vrot.slane %v8584_v42, 5  ;;  %v10536_v2 = vld [vmem:[#allocation25_spill] sm:$0xff] }
  0xa5   : > { %10507 = vst [vmem:[#allocation36_spill] sm:$0xff] %v8647_v11  ;;  %7444 = vmatprep.mubr.msk.bf16.mxu1 %vm2064_vm1, %v8647_v11  ;;  %v1206_v39 = vsel %vm8133_vm3, %v1201_v54, %v1205_v46  ;;  %v685_v16 = vrot.slane %v7947_v41, 5  ;;  %v10513_v46 = vrot.slane %v8107_v5, 5  ;;  %v10514_v34 = vrot.slane %v8112_v10, 5  ;;  %v7948_v42 = vld [vmem:[%s8103_s24 + $0x20] sm:$0x1] }
  0xa6   : > { %v675_v60 = vsel %vm8653_vm6, %v8129_v28, %v10511_v24  ;;  %v682_v43 = vsel %vm8653_vm6, %v8484_v50, %v10512_v47  ;;  %v1216_v18 = vsel %vm8133_vm3, %v1211_v45, %v1215_v52  ;;  %v688_v55 = vrot.slane %v7948_v42, 5  ;;  %v605_v50 = vld [vmem:[%s8103_s24 + $0x24] sm:$0xe]  ;;  %v606_v52 = vld [vmem:[%s8103_s24 + $0x30] sm:$0xe] }
  0xa7   : > { %v672_v33 = vsel %vm8653_vm6, %v6416_v9, %v10513_v46  ;;  %v679_v28 = vsel %vm8653_vm6, %v6417_v30, %v10514_v34  ;;  %v8684_v8 = vcombine.low %v1206_v39, %v1216_v18  ;;  %v686_v5 = vsel %vm8653_vm6, %v6418_v59, %v685_v16  ;;  %v7949_v9 = vld [vmem:[%s8103_s24 + $0x28] sm:$0xf]  ;;  %v7950_v24 = vld [vmem:[%s8103_s24 + $0x2c] sm:$0x1]  ;;  %v7951_v39 = vld [vmem:[%s8103_s24 + $0x34] sm:$0xf] }
  0xa8   : > { %v6734_v48 = vcombine.low %v672_v33, %v675_v60  ;;  %v6735_v54 = vcombine.low %v679_v28, %v682_v43  ;;  %v687_v45 = vrot.slane %v685_v16, 4  ;;  %v692_v10 = vrot.slane %v7949_v9, 5  ;;  %v7952_v16 = vld [vmem:[%s8103_s24 + $0x38] sm:$0x1]  ;;  %v8703_v46 = vld [vmem:[%s10387_s1 + $0x48] sm:$0xff]  }
  0xa9   : > { %10515 = vst [vmem:[#allocation38_spill] sm:$0xff] %v8684_v8  ;;  %7445 = vmatmul.mubr.msk.bf16.gmra.mxu1 %vm2064_vm1, %v8684_v8  ;;  %v6419_v30 = vrot.slane %v605_v50, 9  ;;  %v695_v47 = vrot.slane %v7950_v24, 5  ;;  %v699_v60 = vrot.slane %v7951_v39, 5  ;;  %v6420_v41 = vrot.slane %v606_v52, 9 }
  0xaa   : > { %7450 = vmatprep.mubr.msk.bf16.mxu0 %vm2064_vm1, %v6734_v48  ;;  %7484 = vmatprep.mubr.msk.bf16.mxu1 %vm2064_vm1, %v8151_v62  ;;  %v689_v59 = vsel %vm8653_vm6, %v687_v45, %v688_v55  ;;  %v694_v43 = vrot.slane %v692_v10, 4  ;;  %v702_v18 = vrot.slane %v7952_v16, 5  ;;  %v7953_v42 = vld [vmem:[%s8103_s24 + $0x40] sm:$0xf]  ;;  %v7954_v52 = vld [vmem:[%s8103_s24 + $0x4c] sm:$0xf] }
  0xab   : > { %v6736_v33 = vcombine.low %v686_v5, %v689_v59  ;;  %v701_v34 = vrot.slane %v699_v60, 4  ;;  %7451 = vmatmul.mubr.msk.bf16.vlgmr.msra.gmra.mxu0 %vm2064_vm1, %v6735_v54  ;;  %v693_v62 = vsel %vm8653_vm6, %v6419_v30, %v692_v10  ;;  %v706_v55 = vrot.slane %v7953_v42, 5  ;;  %v607_v54 = vld [vmem:[%s8103_s24 + $0x3c] sm:$0xe]  ;;  %v608_v5 = vld [vmem:[%s8103_s24 + $0x48] sm:$0xe] }
  0xac   : > { %7517 = vmatpush3.bf16.msra.mxu0 %v8368_v19  ;;  %v696_v28 = vsel %vm8653_vm6, %v694_v43, %v695_v47  ;;  %v700_v50 = vsel %vm8653_vm6, %v6420_v41, %v699_v60  ;;  %v713_v19 = vrot.slane %v7954_v52, 5  ;;  %v8724_v45 = vld [vmem:[%s10387_s1 + $0x40] sm:$0xff]   ;;  %v6421_v30 = vrot.slane %v607_v54, 9  ;;  %v7956_v43 = vld [vmem:[%s8103_s24 + $0x50] sm:$0x1] }
  0xad   : > { %7454 = vmatprep.mubr.msk.bf16.mxu0 %vm2064_vm1, %v6736_v33  ;;  %v703_v48 = vsel %vm8653_vm6, %v701_v34, %v702_v18  ;;  %7584 = vmatprep.subr.bf16.mxu0 %v8703_v46  ;;  %v6737_v9 = vcombine.low %v693_v62, %v696_v28  ;;  %v708_v24 = vrot.slane %v706_v55, 4  ;;  %v7955_v47 = vld [vmem:[%s8103_s24 + $0x44] sm:$0x1]  ;;  %v6422_v60 = vrot.slane %v608_v5, 9  ;;  %v7957_v16 = vld [vmem:[%s8103_s24 + $0x58] sm:$0xf] }
  0xae   : > { %v6738_v10 = vcombine.low %v700_v50, %v703_v48  ;;  %v709_v39 = vrot.slane %v7955_v47, 5  ;;  %v715_v59 = vrot.slane %v713_v19, 4  ;;  %v716_v41 = vrot.slane %v7956_v43, 5  ;;  %v609_v34 = vld [vmem:[%s8103_s24 + $0x54] sm:$0xe] }
  0xaf   : > { %v714_v18 = vsel %vm8653_vm6, %v6422_v60, %v713_v19  ;;  %v7958_v62 = vld [vmem:[%s8103_s24 + $0x64] sm:$0xf]  ;;  %v610_v42 = vld [vmem:[%s8103_s24 + $0x60] sm:$0xe]  ;;  %v6423_v48 = vrot.slane %v609_v34, 9 }
  0xb0   : > { %v717_v33 = vsel %vm8653_vm6, %v715_v59, %v716_v41  ;;  %v727_v28 = vrot.slane %v7958_v62, 5  ;;  %v7959_v52 = vld [vmem:[%s8103_s24 + $0x5c] sm:$0x1]  ;;  %v6424_v5 = vrot.slane %v610_v42, 9  ;;  %v7961_v47 = vld [vmem:[%s8103_s24 + $0x70] sm:$0xf] }
  0xb1   : > { %7485 = vmatmul.mubr.msk.bf16.vlgmr.msra.gmra.mxu1 %vm2064_vm1, %v8160_v12  ;;  %v707_v12 = vsel %vm8653_vm6, %v6421_v30, %v706_v55  ;;  %v6740_v55 = vcombine.low %v714_v18, %v717_v33  ;;  %v723_v19 = vrot.slane %v7959_v52, 5  ;;  %v611_v59 = vld [vmem:[%s8103_s24 + $0x6c] sm:$0xe]  ;;  %v7962_v43 = vld [vmem:[%s8103_s24 + $0x7c] sm:$0xf] }
  0xb2   : > { %7551 = vmatpush3.bf16.msra.mxu1 %v8381_v49  ;;  %7488 = vmatprep.mubr.msk.bf16.mxu1 %vm2064_vm1, %v8184_v53  ;;  %v710_v49 = vsel %vm8653_vm6, %v708_v24, %v709_v39  ;;  %v720_v53 = vrot.slane %v7957_v16, 5  ;;  %v734_v39 = vrot.slane %v7961_v47, 5  ;;  %v741_v41 = vrot.slane %v7962_v43, 5  ;;  %v7963_v33 = vld [vmem:[%s8103_s24 + $0x74] sm:$0x1] }
  0xb3   : > { %7618 = vmatprep.subr.bf16.mxu1 %v8724_v45  ;;  %7455 = vmatmul.mubr.msk.bf16.gmra.mxu0 %vm2064_vm1, %v6737_v9  ;;  %v6739_v50 = vcombine.low %v707_v12, %v710_v49  ;;  %v729_v9 = vrot.slane %v727_v28, 4  ;;  %v612_v12 = vld [vmem:[%s8103_s24 + $0x78] sm:$0xe]  ;;  %v737_v34 = vrot.slane %v7963_v33, 5  ;;  %v7964_v42 = vld [vmem:[%s8103_s24 + $0x80] sm:$0x1] }
  0xb4   : > { %7458 = vmatprep.mubr.msk.bf16.mxu0 %vm2064_vm1, %v6738_v10  ;;  %v722_v54 = vrot.slane %v720_v53, 4  ;;  %v7960_v10 = vld [vmem:[%s8103_s24 + $0x68] sm:$0x1]  ;;  %v736_v18 = vrot.slane %v734_v39, 4  ;;  %v6426_v62 = vrot.slane %v612_v12, 9 }
  0xb5   : > { %v730_v30 = vrot.slane %v7960_v10, 5  ;;  %v614_v10 = vld [vmem:[%s8103_s24 + $0x90] sm:$0xe]  ;;  %v7968_v43 = vld [vmem:[%s8103_s24 + $0x98] sm:$0x1] }
  0xb6   : > { %v724_v24 = vsel %vm8653_vm6, %v722_v54, %v723_v19  ;;  %v613_v19 = vld [vmem:[%s8103_s24 + $0x84] sm:$0xe]  ;;  %v7969_v12 = vld [vmem:[%s8103_s24 + $0xa0] sm:$0xf]  ;;  %v7970_v33 = vld [vmem:[%s8103_s24 + $0xac] sm:$0xf] }
  0xb7   : > { %v731_v60 = vsel %vm8653_vm6, %v729_v9, %v730_v30 }
  0xb9   : > { %7489 = vmatmul.mubr.msk.bf16.gmra.mxu1 %vm2064_vm1, %v8190_v58  ;;  %v721_v58 = vsel %vm8653_vm6, %v6423_v48, %v720_v53  ;;  %v6425_v53 = vrot.slane %v611_v59, 9  ;;  %v7965_v48 = vld [vmem:[%s8103_s24 + $0x88] sm:$0xf] }
  0xba   : > { %7492 = vmatprep.mubr.msk.bf16.mxu1 %vm2064_vm1, %v8207_v37  ;;  %v728_v37 = vsel %vm8653_vm6, %v6424_v5, %v727_v28  ;;  %v6741_v49 = vcombine.low %v721_v58, %v724_v24  ;;  %v743_v28 = vrot.slane %v741_v41, 4  ;;  %v748_v54 = vrot.slane %v7965_v48, 5  ;;  %v7966_v5 = vld [vmem:[%s8103_s24 + $0x94] sm:$0xf]  ;;  %v6493_v48 = vld [vmem:[%s8103_s24 + $0xa8] sm:$0xe] }
  0xbb   : > { %7459 = vmatmul.mubr.msk.bf16.gmra.mxu0 %vm2064_vm1, %v6739_v50  ;;  %v6742_v16 = vcombine.low %v728_v37, %v731_v60  ;;  %v744_v50 = vrot.slane %v7964_v42, 5  ;;  %v755_v9 = vrot.slane %v7966_v5, 5  ;;  %v6427_v24 = vrot.slane %v613_v19, 9  ;;  %v7972_v5 = vld [vmem:[%s8103_s24 + $0xb0] sm:$0x1] }
  0xbc   : > { %7462 = vmatprep.mubr.msk.bf16.mxu0 %vm2064_vm1, %v6740_v55  ;;  %v738_v55 = vsel %vm8653_vm6, %v736_v18, %v737_v34  ;;  %v750_v47 = vrot.slane %v748_v54, 4  ;;  %v6428_v60 = vrot.slane %v614_v10, 9  ;;  %v769_v34 = vrot.slane %v7970_v33, 5  ;;  %v6494_v10 = vld [vmem:[%s8103_s24 + $0xb4] sm:$0xe] }
  0xbd   : > { %v745_v52 = vsel %vm8653_vm6, %v743_v28, %v744_v50  ;;  %v757_v59 = vrot.slane %v755_v9, 4 }
  0xbe   : > { %v771_v19 = vrot.slane %v769_v34, 4 }
  0xc1   : > { %7493 = vmatmul.mubr.msk.bf16.gmra.mxu1 %vm2064_vm1, %v8217_v51  ;;  %v735_v51 = vsel %vm8653_vm6, %v6425_v53, %v734_v39  ;;  %v7967_v39 = vld [vmem:[%s8103_s24 + $0x8c] sm:$0x1]  ;;  %v756_v53 = vsel %vm8653_vm6, %v6428_v60, %v755_v9  ;;  %v772_v9 = vrot.slane %v7972_v5, 5 }
  0xc2   : > { %7496 = vmatprep.mubr.msk.bf16.mxu1 %vm2064_vm1, %v8232_v31  ;;  %v742_v31 = vsel %vm8653_vm6, %v6426_v62, %v741_v41  ;;  %v6743_v30 = vcombine.low %v735_v51, %v738_v55  ;;  %v751_v37 = vrot.slane %v7967_v39, 5  ;;  %v758_v41 = vrot.slane %v7968_v43, 5  ;;  %v616_v62 = vld [vmem:[%s8103_s24 + $0xa8] sm:$0xe]  ;;  %v7971_v51 = vld [vmem:[%s8103_s24 + $0xa4] sm:$0x1] }
  0xc3   : > { %7463 = vmatmul.mubr.msk.bf16.gmra.mxu0 %vm2064_vm1, %v6741_v49  ;;  %v6744_v58 = vcombine.low %v742_v31, %v745_v52  ;;  %v749_v49 = vsel %vm8653_vm6, %v6427_v24, %v748_v54  ;;  %v765_v55 = vrot.slane %v7971_v51, 5  ;;  %v617_v31 = vld [vmem:[%s8103_s24 + $0xb4] sm:$0xe]  ;;  %v6430_v52 = vrot.slane %v616_v62, 9 }
  0xc4   : > { %7466 = vmatprep.mubr.msk.bf16.mxu0 %vm2064_vm1, %v6742_v16  ;;  %v615_v16 = vld [vmem:[%s8103_s24 + $0x9c] sm:$0xe]  ;;  %v759_v18 = vsel %vm8653_vm6, %v757_v59, %v758_v41  ;;  %v1391_v24 = vrot.slane %v8623_v61, 5  ;;  %v6431_v39 = vrot.slane %v617_v31, 9  ;;  %v1381_v59 = vrot.slane %v8593_v26, 5 }
  0xc5   : > { %v6429_v42 = vrot.slane %v615_v16, 9  ;;  %v6746_v54 = vcombine.low %v756_v53, %v759_v18  ;;  %v6495_v61 = vld [vmem:[%s8103_s24 + $0xc0] sm:$0xe]  ;;  %v770_v43 = vsel %vm8653_vm6, %v6430_v52, %v769_v34  ;;  %v773_v41 = vsel %vm8653_vm6, %v771_v19, %v772_v9  ;;  %v7974_v26 = vld [vmem:[%s8103_s24 + $0xbc] sm:$0x1] }
  0xc6   : > { %v1383_v16 = vrot.slane %v1381_v59, 4  ;;  %v1384_v53 = vrot.slane %v8603_v44, 5  ;;  %v779_v18 = vrot.slane %v7974_v26, 5  ;;  %v6511_v34 = vrot.slane %v6495_v61, 9  ;;  %v6480_v52 = vld [vmem:[%s8103_s24 + $0xc] sm:$0xe] }
  0xc7   : > { %v1388_v62 = vrot.slane %v8611_v25, 5 }
  0xc8   : > { %v1385_v44 = vsel %vm8653_vm6, %v1383_v16, %v1384_v53 }
  0xc9   : > { %7497 = vmatmul.mubr.msk.bf16.gmra.mxu1 %vm2064_vm1, %v8238_v38  ;;  %v762_v38 = vrot.slane %v7969_v12, 5  ;;  %v1389_v25 = vsel %vm8653_vm6, %v6511_v34, %v1388_v62 }
  0xca   : > { %7500 = vmatprep.mubr.msk.bf16.mxu1 %vm2064_vm1, %v8255_v14  ;;  %v752_v14 = vsel %vm8653_vm6, %v750_v47, %v751_v37  ;;  %v7973_v37 = vld [vmem:[%s8103_s24 + $0xb8] sm:$0xf] }
  0xcb   : > { %7467 = vmatmul.mubr.msk.bf16.gmra.mxu0 %vm2064_vm1, %v6743_v30  ;;  %v6745_v28 = vcombine.low %v749_v49, %v752_v14  ;;  %v764_v50 = vrot.slane %v762_v38, 4  ;;  %v1377_v30 = vrot.slane %v8573_v1, 5  ;;  %v776_v60 = vrot.slane %v7973_v37, 5 }
  0xcc   : > { %7470 = vmatprep.mubr.msk.bf16.mxu0 %vm2064_vm1, %v6744_v58  ;;  %v6509_v58 = vrot.slane %v6493_v48, 9  ;;  %v6510_v1 = vrot.slane %v6494_v10, 9  ;;  %v1390_v48 = vrot.slane %v1388_v62, 4 }
  0xcd   : > { %v766_v47 = vsel %vm8653_vm6, %v764_v50, %v765_v55 }
  0xce   : > { %v1382_v14 = vsel %vm8653_vm6, %v6510_v1, %v1381_v59  ;;  %v1392_v19 = vsel %vm8653_vm6, %v1390_v48, %v1391_v24 }
  0xcf   : > { %v8850_v55 = vcombine.low %v1382_v14, %v1385_v44  ;;  %v8864_v10 = vcombine.low %v1389_v25, %v1392_v19  ;;  %v7981_v19 = vld [vmem:[%s8103_s24 + $0x34] sm:$0xf] }
  0xd1   : > { %7501 = vmatmul.mubr.msk.bf16.gmra.mxu1 %vm2064_vm1, %v8265_v35  ;;  %v763_v35 = vsel %vm8653_vm6, %v6429_v42, %v762_v38  ;;  %v778_v42 = vrot.slane %v776_v60, 4  ;;  %10517 = vst [vmem:[#allocation40_spill] sm:$0xff] %v8850_v55  ;;  %10518 = vst [vmem:[#allocation41_spill] sm:$0xff] %v8864_v10 }
  0xd2   : > { %7504 = vmatprep.mubr.msk.bf16.mxu1 %vm2064_vm1, %v8280_v13  ;;  %v1374_v13 = vrot.slane %v8566_v21, 5  ;;  %v6747_v38 = vcombine.low %v763_v35, %v766_v47  ;;  %v7976_v35 = vld [vmem:[%s8103_s24 + $0x14] sm:$0x1] }
  0xd3   : > { %7471 = vmatmul.mubr.msk.bf16.gmra.mxu0 %vm2064_vm1, %v6745_v28  ;;  %v6748_v28 = vcombine.low %v770_v43, %v773_v41  ;;  %v780_v5 = vsel %vm8653_vm6, %v778_v42, %v779_v18  ;;  %v1286_v47 = vrot.slane %v7976_v35, 5  ;;  %v6481_v43 = vld [vmem:[%s8103_s24 + $0x18] sm:$0xe]  ;;  %v7979_v18 = vld [vmem:[%s8103_s24 + $0x20] sm:$0x1] }
  0xd4   : > { %7474 = vmatprep.mubr.msk.bf16.mxu0 %vm2064_vm1, %v6746_v54  ;;  %v1375_v12 = vsel %vm8653_vm6, %v6509_v58, %v1374_v13  ;;  %v1376_v21 = vrot.slane %v1374_v13, 4  ;;  %v7975_v54 = vld [vmem:[%s8103_s24 + $0x10] sm:$0xf]  ;;  %v6497_v53 = vrot.slane %v6481_v43, 9  ;;  %v7980_v42 = vld [vmem:[%s8103_s24 + $0x2c] sm:$0x1] }
  0xd5   : > { %v1300_v44 = vrot.slane %v7980_v42, 5  ;;  %v7982_v35 = vld [vmem:[%s8103_s24 + $0x40] sm:$0xf] }
  0xd6   : > { %v1378_v33 = vsel %vm8653_vm6, %v1376_v21, %v1377_v30  ;;  %v6496_v30 = vrot.slane %v6480_v52, 9  ;;  %v6483_v52 = vld [vmem:[%s8103_s24 + $0x30] sm:$0xe] }
  0xd7   : > { %v7350_v49 = vpop.f32.mrf.mxu1  ;;  %v8844_v51 = vcombine.low %v1375_v12, %v1378_v33  ;;  %v7978_v12 = vld [vmem:[%s8103_s24 + $0x28] sm:$0xf] }
  0xd8   : > { %v1297_v21 = vrot.slane %v7978_v12, 5 }
  0xd9   : > { %7505 = vmatmul.mubr.msk.bf16.gmra.mxu1 %vm2064_vm1, %v8286_v20  ;;  %v2426_v50 = vpop.f32.mrf.mxu1  ;;  %10516 = vst [vmem:[#allocation39_spill] sm:$0xff] %v8844_v51  ;;  %v1283_v20 = vrot.slane %v7975_v54, 5 }
  0xda   : > { %7508 = vmatprep.mubr.msk.bf16.mxu1 %vm2064_vm1, %v8304_v0  ;;  %v777_v0 = vsel %vm8653_vm6, %v6431_v39, %v776_v60  ;;  %v7977_v39 = vld [vmem:[%s8103_s24 + $0x1c] sm:$0xf] }
  0xdb   : > { %v7351_v31 = vpop.f32.mrf.mxu1  ;;  %7475 = vmatmul.mubr.msk.bf16.gmra.mxu0 %vm2064_vm1, %v6747_v38  ;;  %v1285_v58 = vrot.slane %v1283_v20, 4  ;;  %v6749_v13 = vcombine.low %v777_v0, %v780_v5  ;;  %v1290_v37 = vrot.slane %v7977_v39, 5  ;;  %v1284_v59 = vsel %vm8653_vm6, %v6496_v30, %v1283_v20  ;;  %v6484_v39 = vld [vmem:[%s8103_s24 + $0x3c] sm:$0xe] }
  0xdc   : > { %7478 = vmatprep.mubr.msk.bf16.mxu0 %vm2064_vm1, %v6748_v28  ;;  %v1299_v28 = vrot.slane %v1297_v21, 4  ;;  %v1304_v0 = vrot.slane %v7981_v19, 5  ;;  %v7986_v19 = vld [vmem:[%s8103_s24 + $0x58] sm:$0xf] }
  0xdd   : > { %v2429_v9 = vpop.f32.mrf.mxu1  ;;  %v1287_v61 = vsel %vm8653_vm6, %v1285_v58, %v1286_v47  ;;  %v1292_v26 = vrot.slane %v1290_v37, 4  ;;  %v1291_v20 = vsel %vm8653_vm6, %v6497_v53, %v1290_v37  ;;  %v1311_v47 = vrot.slane %v7982_v35, 5 }
  0xde   : > { %v8886_v16 = vcombine.low %v1284_v59, %v1287_v61  ;;  %v1301_v30 = vsel %vm8653_vm6, %v1299_v28, %v1300_v44  ;;  %v6499_v59 = vrot.slane %v6483_v52, 9  ;;  %v1306_v12 = vrot.slane %v1304_v0, 4 }
  0xdf   : > { %v6500_v53 = vrot.slane %v6484_v39, 9 }
  0xe0   : > { %v7354_v24 = vpop.f32.mrf.mxu1  ;;  %10519 = vst [vmem:[#allocation42_spill] sm:$0xff] %v8886_v16  ;;  %v1305_v42 = vsel %vm8653_vm6, %v6499_v59, %v1304_v0  ;;  %v6486_v0 = vld [vmem:[%s8103_s24 + $0x54] sm:$0xe] }
  0xe1   : > { %7509 = vmatmul.mubr.msk.bf16.gmra.mxu1 %vm2064_vm1, %v8315_v23  ;;  %v1312_v52 = vsel %vm8653_vm6, %v6500_v53, %v1311_v47  ;;  %v6502_v53 = vrot.slane %v6486_v0, 9 }
  0xe2   : > { %7512 = vmatprep.mubr.msk.bf16.mxu1 %vm2064_vm1, %v8331_v4  ;;  %v7316_v60 = vpop.f32.mrf.mxu0  ;;  %v2442_v1 = vpop.f32.mrf.mxu1  ;;  %v6482_v4 = vld [vmem:[%s8103_s24 + $0x24] sm:$0xe] }
  0xe3   : > { %v8877_v41 = vadd.f32 %v7350_v49, %v7316_v60  ;;  %7479 = vmatmul.mubr.msk.bf16.gmra.mxu0 %vm2064_vm1, %v6749_v13  ;;  %v1293_v49 = vrot.slane %v7979_v18, 5  ;;  %v6498_v62 = vrot.slane %v6482_v4, 9 }
  0xe4   : > { %v2147_v23 = vpop.f32.mrf.mxu0  ;;  %v7355_v38 = vpop.f32.mrf.mxu1  ;;  %7518 = vmatprep.mubr.msk.bf16.mxu0 %vm2064_vm1, %v8357_v6 }
  0xe5   : > { %v8884_v14 = vadd.f32 %v2426_v50, %v2147_v23 }
  0xe6   : > { %v7317_v33 = vpop.f32.mrf.mxu0  ;;  %v2445_v34 = vpop.f32.mrf.mxu1 }
  0xe7   : > { %v8890_v25 = vadd.f32 %v7351_v31, %v7317_v33  ;;  %v1294_v31 = vsel %vm8653_vm6, %v1292_v26, %v1293_v49  ;;  %v1313_v26 = vrot.slane %v1311_v47, 4  ;;  %v8938_v33 = vld [vmem:[%s10387_s1 + $0x58] sm:$0xff]  }
  0xe8   : > { %v2150_v48 = vpop.f32.mrf.mxu0  ;;  %v8892_v50 = vpop.f32.mrf.mxu1  ;;  %v8923_v60 = vcombine.low %v1291_v20, %v1294_v31 }
  0xe9   : > { %7513 = vmatmul.mubr.msk.bf16.gmra.mxu1 %vm2064_vm1, %v8335_v15  ;;  %v8896_v54 = vadd.f32 %v2429_v9, %v2150_v48  ;;  %v8911_v15 = vld [vmem:[%s10387_s1 + $0x50] sm:$0xff]   ;;  %v1298_v9 = vsel %vm8653_vm6, %v6498_v62, %v1297_v21  ;;  %v7983_v21 = vld [vmem:[%s8103_s24 + $0x38] sm:$0x1]  ;;  %v6485_v48 = vld [vmem:[%s8103_s24 + $0x48] sm:$0xe] }
  0xea   : > { %7552 = vmatprep.mubr.msk.bf16.mxu1 %vm2064_vm1, %v8886_v16  ;;  %v8906_v5 = vpop.f32.mrf.mxu1  ;;  %10520 = vst [vmem:[#allocation43_spill] sm:$0xff] %v8923_v60  ;;  %v8928_v43 = vcombine.low %v1298_v9, %v1301_v30  ;;  %v1307_v23 = vrot.slane %v7983_v21, 5  ;;  %v1325_v9 = vrot.slane %v7986_v19, 5 }
  0xeb   : > { %7519 = vmatmul.mubr.msk.bf16.vlgmr.msra.gmra.mxu0 %vm2064_vm1, %v8373_v36 }
  0xec   : > { %v7320_v58 = vpop.f32.mrf.mxu0  ;;  %v7359_v37 = vpop.f32.mrf.mxu1  ;;  %7585 = vmatpush3.bf16.msra.mxu0 %v8703_v46  ;;  %7522 = vmatprep.mubr.msk.bf16.mxu0 %vm2064_vm1, %v8397_v56  ;;  %10521 = vst [vmem:[#allocation44_spill] sm:$0xff] %v8928_v43  ;;  %v7984_v46 = vld [vmem:[%s8103_s24 + $0x44] sm:$0x1]  ;;  %v1308_v44 = vsel %vm8653_vm6, %v1306_v12, %v1307_v23  ;;  %v1326_v19 = vsel %vm8653_vm6, %v6502_v53, %v1325_v9 }
  0xed   : > { %v8920_v13 = vadd.f32 %v7354_v24, %v7320_v58  ;;  %7652 = vmatprep.subr.bf16.mxu0 %v8911_v15  ;;  %v1314_v18 = vrot.slane %v7984_v46, 5  ;;  %v8964_v58 = vcombine.low %v1305_v42, %v1308_v44  ;;  %v7988_v46 = vld [vmem:[%s8103_s24 + $0x5c] sm:$0x1] }
  0xee   : > { %v2163_v61 = vpop.f32.mrf.mxu0  ;;  %v2461_v24 = vpop.f32.mrf.mxu1 }
  0xef   : > { %v8931_v4 = vadd.f32 %v2442_v1, %v2163_v61  ;;  %10522 = vst [vmem:[#allocation45_spill] sm:$0xff] %v8964_v58  ;;  %v7987_v61 = vld [vmem:[%s8103_s24 + $0x50] sm:$0x1] }
  0xf0   : > { %v7321_v49 = vpop.f32.mrf.mxu0  ;;  %v1321_v12 = vrot.slane %v7987_v61, 5  ;;  %v1339_v61 = vrot.slane %v8446_v17, 5 }
  0xf1   : > { %v8940_v62 = vadd.f32 %v7355_v38, %v7321_v49  ;;  %7553 = vmatmul.mubr.msk.bf16.vlgmr.msra.gmra.mxu1 %vm2064_vm1, %v8923_v60  ;;  %v7985_v38 = vld [vmem:[%s8103_s24 + $0x4c] sm:$0xf]  ;;  %v10532_v60 = vld [vmem:[#allocation18_spill] sm:$0xff] }
  0xf2   : > { %v2166_v1 = vpop.f32.mrf.mxu0  ;;  %v7362_v28 = vpop.f32.mrf.mxu1  ;;  %7619 = vmatpush3.bf16.msra.mxu1 %v8724_v45  ;;  %7556 = vmatprep.mubr.msk.bf16.mxu1 %vm2064_vm1, %v8928_v43  ;;  %v1318_v20 = vrot.slane %v7985_v38, 5  ;;  %v1315_v45 = vsel %vm8653_vm6, %v1313_v26, %v1314_v18  ;;  %v1327_v26 = vrot.slane %v1325_v9, 4  ;;  %v1328_v18 = vrot.slane %v7988_v46, 5  ;;  %v6487_v38 = vld [vmem:[%s8103_s24 + $0x60] sm:$0xe] }
  0xf3   : > { %v8953_v31 = vadd.f32 %v2445_v34, %v2166_v1  ;;  %7686 = vmatprep.subr.bf16.mxu1 %v8938_v33  ;;  %7523 = vmatmul.mubr.msk.bf16.gmra.mxu0 %vm2064_vm1, %v8410_v27  ;;  %v6501_v34 = vrot.slane %v6485_v48, 9  ;;  %v8968_v39 = vcombine.low %v1312_v52, %v1315_v45  ;;  %v7989_v52 = vld [vmem:[%s8103_s24 + $0x64] sm:$0xf] }
  0xf4   : > { %v2474_v30 = vpop.f32.mrf.mxu1  ;;  %7526 = vmatprep.mubr.msk.bf16.mxu0 %vm2064_vm1, %v8430_v7  ;;  %v1320_v59 = vrot.slane %v1318_v20, 4  ;;  %v1329_v0 = vsel %vm8653_vm6, %v1327_v26, %v1328_v18  ;;  %v7990_v26 = vld [vmem:[%s8103_s24 + $0x68] sm:$0x1] }
  0xf5   : > { %v7324_v35 = vpop.f32.mrf.mxu0  ;;  %10523 = vst [vmem:[#allocation46_spill] sm:$0xff] %v8968_v39  ;;  %v1335_v17 = vrot.slane %v7990_v26, 5 }
  0xf6   : > { %v7363_v47 = vpop.f32.mrf.mxu1  ;;  %v8972_v21 = vadd.f32 %v8892_v50, %v7324_v35  ;;  %v1319_v50 = vsel %vm8653_vm6, %v6501_v34, %v1318_v20  ;;  %v1322_v44 = vsel %vm8653_vm6, %v1320_v59, %v1321_v12  ;;  %v6503_v12 = vrot.slane %v6487_v38, 9 }
  0xf7   : > { %v2179_v23 = vpop.f32.mrf.mxu0  ;;  %v9000_v59 = vcombine.low %v1319_v50, %v1322_v44 }
  0xf8   : > { %v2477_v49 = vpop.f32.mrf.mxu1  ;;  %v8976_v1 = vadd.f32 %v8906_v5, %v2179_v23  ;;  %v1332_v5 = vrot.slane %v7989_v52, 5  ;;  %v9004_v23 = vcombine.low %v1326_v19, %v1329_v0  ;;  %v1341_v52 = vrot.slane %v1339_v61, 4 }
  0xf9   : > { %7557 = vmatmul.mubr.msk.bf16.gmra.mxu1 %vm2064_vm1, %v8964_v58  ;;  %v7325_v42 = vpop.f32.mrf.mxu0  ;;  %10524 = vst [vmem:[#allocation47_spill] sm:$0xff] %v9000_v59 }
  0xfa   : > { %7560 = vmatprep.mubr.msk.bf16.mxu1 %vm2064_vm1, %v8968_v39  ;;  %v8986_v48 = vadd.f32 %v7359_v37, %v7325_v42  ;;  %v6488_v37 = vld [vmem:[%s8103_s24 + $0x6c] sm:$0xe]  ;;  %10525 = vst [vmem:[#allocation48_spill] sm:$0xff] %v9004_v23  ;;  %v1334_v53 = vrot.slane %v1332_v5, 4 }
  0xfb   : > { %v7366_v45 = vpop.f32.mrf.mxu1  ;;  %v2182_v35 = vpop.f32.mrf.mxu0  ;;  %7527 = vmatmul.mubr.msk.bf16.gmra.mxu0 %vm2064_vm1, %v8442_v63  ;;  %v6504_v42 = vrot.slane %v6488_v37, 9 }
  0xfc   : > { %v8997_v20 = vadd.f32 %v2461_v24, %v2182_v35  ;;  %7530 = vmatprep.mubr.msk.bf16.mxu0 %vm2064_vm1, %v8464_v3  ;;  %v7991_v35 = vld [vmem:[%s8103_s24 + $0x74] sm:$0x1]  ;;  %v1336_v0 = vsel %vm8653_vm6, %v1334_v53, %v1335_v17  ;;  %v7992_v17 = vld [vmem:[%s8103_s24 + $0x80] sm:$0x1] }
  0xfd   : > { %v2490_v34 = vpop.f32.mrf.mxu1  ;;  %v7328_v9 = vpop.f32.mrf.mxu0  ;;  %v1342_v50 = vrot.slane %v7991_v35, 5 }
  0xfe   : > { %v9007_v46 = vadd.f32 %v7362_v28, %v7328_v9  ;;  %v1333_v28 = vsel %vm8653_vm6, %v6503_v12, %v1332_v5  ;;  %v1340_v9 = vsel %vm8653_vm6, %v6504_v42, %v1339_v61  ;;  %v10527_v5 = vld [vmem:[#allocation15_spill] sm:$0xff]  ;;  %v1349_v42 = vrot.slane %v7992_v17, 5 }
  0xff   : > { %v7367_v18 = vpop.f32.mrf.mxu1  ;;  %v2195_v24 = vpop.f32.mrf.mxu0  ;;  %v1343_v26 = vsel %vm8653_vm6, %v1341_v52, %v1342_v50  ;;  %v9034_v53 = vcombine.low %v1333_v28, %v1336_v0 }
 0x100   : > { %v9010_v44 = vadd.f32 %v2474_v30, %v2195_v24  ;;  %v1346_v30 = vrot.slane %v8467_v57, 5  ;;  %v6489_v24 = vld [vmem:[%s8103_s24 + $0x78] sm:$0xe]  ;;  %v10530_v57 = vld [vmem:[#allocation20_spill] sm:$0xff]  ;;  %v9039_v52 = vcombine.low %v1340_v9, %v1343_v26 }
 0x101   : > { %v2493_v38 = vpop.f32.mrf.mxu1  ;;  %7561 = vmatmul.mubr.msk.bf16.gmra.mxu1 %vm2064_vm1, %v9000_v59  ;;  %v7329_v19 = vpop.f32.mrf.mxu0  ;;  %10529 = vst [vmem:[#allocation49_spill] sm:$0xff] %v9034_v53  ;;  %v6505_v50 = vrot.slane %v6489_v24, 9 }
 0x102   : > { %7564 = vmatprep.mubr.msk.bf16.mxu1 %vm2064_vm1, %v9004_v23  ;;  %v9020_v37 = vadd.f32 %v7363_v47, %v7329_v19  ;;  %v10526_v23 = vld [vmem:[#allocation17_spill] sm:$0xff]  ;;  %v6490_v47 = vld [vmem:[%s8103_s24 + $0x84] sm:$0xe]  ;;  %10531 = vst [vmem:[#allocation50_spill] sm:$0xff] %v9039_v52  ;;  %v1348_v19 = vrot.slane %v1346_v30, 4 }
 0x103   : > { %v2198_v35 = vpop.f32.mrf.mxu0  ;;  %v1353_v59 = vrot.slane %v10526_v23, 5  ;;  %7531 = vmatmul.mubr.msk.bf16.gmra.mxu0 %vm2064_vm1, %v10527_v5  ;;  %v6506_v58 = vrot.slane %v6490_v47, 9  ;;  %v1347_v9 = vsel %vm8653_vm6, %v6505_v50, %v1346_v30  ;;  %v10539_v50 = vld [vmem:[#allocation22_spill] sm:$0xff] }
 0x104   : > { %v7370_v39 = vpop.f32.mrf.mxu1  ;;  %v9031_v12 = vadd.f32 %v2477_v49, %v2198_v35  ;;  %7534 = vmatprep.mubr.msk.bf16.mxu0 %vm2064_vm1, %v10530_v57  ;;  %v1356_v49 = vrot.slane %v10532_v60, 5  ;;  %v1350_v26 = vsel %vm8653_vm6, %v1348_v19, %v1349_v42  ;;  %v10535_v60 = vld [vmem:[#allocation21_spill] sm:$0xff]  ;;  %v1363_v19 = vrot.slane %v10539_v50, 5 }
 0x105   : > { %v1355_v43 = vrot.slane %v1353_v59, 4  ;;  %v1354_v47 = vsel %vm8653_vm6, %v6506_v58, %v1353_v59  ;;  %v6492_v42 = vld [vmem:[%s8103_s24 + $0x9c] sm:$0xe]  ;;  %v10541_v58 = vld [vmem:[#allocation28_spill] sm:$0xff] }
 0x106   : > { %10528 = vst [vmem:[#allocation17_spill] sm:$0xff] %v9031_v12  ;;  %v2506_v61 = vpop.f32.mrf.mxu1 }
 0x107   : > { %v7332_v23 = vpop.f32.mrf.mxu0  ;;  %v1357_v17 = vsel %vm8653_vm6, %v1355_v43, %v1356_v49 }
 0x108   : > { %v7371_v35 = vpop.f32.mrf.mxu1  ;;  %v9042_v16 = vadd.f32 %v7366_v45, %v7332_v23  ;;  %v1360_v45 = vrot.slane %v10535_v60, 5  ;;  %v9071_v43 = vcombine.low %v1354_v47, %v1357_v17 }
 0x109   : > { %7565 = vmatmul.mubr.msk.bf16.gmra.mxu1 %vm2064_vm1, %v9034_v53  ;;  %v2211_v28 = vpop.f32.mrf.mxu0  ;;  %v6491_v53 = vld [vmem:[%s8103_s24 + $0x90] sm:$0xe] }
 0x10a   : > { %10533 = vst [vmem:[#allocation18_spill] sm:$0xff] %v9042_v16  ;;  %v2509_v0 = vpop.f32.mrf.mxu1  ;;  %7568 = vmatprep.mubr.msk.bf16.mxu1 %vm2064_vm1, %v9039_v52  ;;  %v9052_v24 = vadd.f32 %v2490_v34, %v2211_v28  ;;  %v1367_v52 = vrot.slane %v10536_v2, 5  ;;  %v9067_v28 = vcombine.low %v1347_v9, %v1350_v26  ;;  %10542 = vst [vmem:[#allocation22_spill] sm:$0xff] %v9071_v43  ;;  %v6507_v59 = vrot.slane %v6491_v53, 9 }
 0x10b   : > { %v7333_v23 = vpop.f32.mrf.mxu0  ;;  %7535 = vmatmul.mubr.msk.bf16.gmra.mxu0 %vm2064_vm1, %v10537_v40  ;;  %v1362_v49 = vrot.slane %v1360_v45, 4  ;;  %v6508_v40 = vrot.slane %v6492_v42, 9  ;;  %v10544_v42 = vld [vmem:[#allocation29_spill] sm:$0xff] }
 0x10c   : > { %10534 = vst [vmem:[#allocation51_spill] sm:$0xff] %v9052_v24  ;;  %v9063_v30 = vadd.f32 %v7367_v18, %v7333_v23  ;;  %10540 = vst [vmem:[#allocation25_spill] sm:$0xff] %v9067_v28  ;;  %7538 = vmatprep.mubr.msk.bf16.mxu0 %vm2064_vm1, %v10541_v58  ;;  %v1369_v18 = vrot.slane %v1367_v52, 4  ;;  %v10543_v23 = vld [vmem:[#allocation27_spill] sm:$0xff]  ;;  %v1361_v53 = vsel %vm8653_vm6, %v6507_v59, %v1360_v45 }
 0x10d   : > { %v7374_v34 = vpop.f32.mrf.mxu1  ;;  %v2214_v60 = vpop.f32.mrf.mxu0  ;;  %v1368_v47 = vsel %vm8653_vm6, %v6508_v40, %v1367_v52 }
 0x10e   : > { %10538 = vst [vmem:[#allocation21_spill] sm:$0xff] %v9063_v30  ;;  %v9073_v2 = vadd.f32 %v2493_v38, %v2214_v60  ;;  %v1370_v30 = vrot.slane %v10543_v23, 5  ;;  %v1364_v38 = vsel %vm8653_vm6, %v1362_v49, %v1363_v19  ;;  %v10546_v19 = vld [vmem:[#allocation32_spill] sm:$0xff] }
 0x10f   : > { %v7336_v24 = vpop.f32.mrf.mxu0  ;;  %v2522_v16 = vpop.f32.mrf.mxu1  ;;  %v9096_v45 = vcombine.low %v1361_v53, %v1364_v38  ;;  %v9125_v38 = vld [vmem:[%s8103_s24 + $0x24] sm:$0xf] }
 0x110   : > { %v9076_v12 = vadd.f32 %v7370_v39, %v7336_v24  ;;  %v1371_v39 = vsel %vm8653_vm6, %v1369_v18, %v1370_v30  ;;  %v1473_v32 = vshll.u32 %v9125_v38, 16 }
 0x111   : > { %7569 = vmatmul.mubr.msk.bf16.gmra.mxu1 %vm2064_vm1, %v9067_v28  ;;  %v2227_v9 = vpop.f32.mrf.mxu0  ;;  %v7375_v17 = vpop.f32.mrf.mxu1  ;;  %10545 = vst [vmem:[#allocation27_spill] sm:$0xff] %v9096_v45 }
 0x112   : > { %7572 = vmatprep.mubr.msk.bf16.mxu1 %vm2064_vm1, %v9071_v43  ;;  %v9086_v26 = vadd.f32 %v2506_v61, %v2227_v9  ;;  %v9100_v61 = vcombine.low %v1368_v47, %v1371_v39  ;;  %v9120_v9 = vld [vmem:[%s8103_s24 + $0x1c] sm:$0xf] }
 0x113   : > { %v7337_v24 = vpop.f32.mrf.mxu0  ;;  %7539 = vmatmul.mubr.msk.bf16.gmra.mxu0 %vm2064_vm1, %v10544_v42  ;;  %v2525_v52 = vpop.f32.mrf.mxu1 }
 0x114   : > { %v9094_v50 = vadd.f32 %v7371_v35, %v7337_v24  ;;  %7542 = vmatprep.mubr.msk.bf16.mxu0 %vm2064_vm1, %v10546_v19  ;;  %10547 = vst [vmem:[#allocation52_spill] sm:$0xff] %v9100_v61 }
 0x115   : > { %v2230_v60 = vpop.f32.mrf.mxu0 }
 0x116   : > { %v9102_v40 = vadd.f32 %v2509_v0, %v2230_v60  ;;  %v7378_v49 = vpop.f32.mrf.mxu1  ;;  %v9115_v0 = vld [vmem:[%s8103_s24 + $0x18] sm:$0xf] }
 0x117   : > { %v1446_v39 = vshrl.u32 %v9115_v0, 16  ;;  %v1449_v24 = vshll.u32 %v9115_v0, 16 }
 0x118   : > { %v2538_v47 = vpop.f32.mrf.mxu1 }
 0x119   : > { %7573 = vmatmul.mubr.msk.bf16.gmra.mxu1 %vm2064_vm1, %v9096_v45  ;;  %v7340_v30 = vpop.f32.mrf.mxu0  ;;  %v1451_v28 = vrot.slane %v1449_v24, 5 }
 0x11a   : > { %7576 = vmatprep.mubr.msk.bf16.mxu1 %vm2064_vm1, %v9100_v61  ;;  %v9108_v35 = vadd.f32 %v7374_v34, %v7340_v30  ;;  %v1455_v30 = vshll.u32 %v9120_v9, 16  ;;  %v7379_v45 = vpop.f32.mrf.mxu1 }
 0x11b   : > { %v2243_v59 = vpop.f32.mrf.mxu0  ;;  %7543 = vmatmul.mubr.msk.bf16.gmra.mxu0 %vm2064_vm1, %v8629_v22  ;;  %v6545_v22 = vld [vmem:[%s8103_s24 + $0x2c] sm:$0x1] }
 0x11c   : > { %10548 = vst [vmem:[#allocation53_spill] sm:$0xff] %v9108_v35  ;;  %v9112_v18 = vadd.f32 %v2522_v16, %v2243_v59  ;;  %7546 = vmatprep.mubr.msk.bf16.mxu0 %vm2064_vm1, %v8647_v11  ;;  %v9130_v16 = vld [vmem:[%s8103_s24 + $0x28] sm:$0xf]  ;;  %v1459_v59 = vshrl.u32 %v9120_v9, 16  ;;  %v9161_v35 = vld [vmem:[%s8103_s24 + $0x30] sm:$0xf] }
 0x11d   : > { %v7341_v23 = vpop.f32.mrf.mxu0 }
 0x11e   : > { %10549 = vst [vmem:[#allocation54_spill] sm:$0xff] %v9112_v18  ;;  %v9122_v53 = vadd.f32 %v7375_v17, %v7341_v23  ;;  %v1470_v23 = vshrl.u32 %v9125_v38, 16  ;;  %v1475_v18 = vrot.slane %v1473_v32, 5 }
 0x11f   : > { %v2246_v34 = vpop.f32.mrf.mxu0 }
 0x120   : > { %10550 = vst [vmem:[#allocation55_spill] sm:$0xff] %v9122_v53  ;;  %v9132_v60 = vadd.f32 %v2525_v52, %v2246_v34  ;;  %v1479_v52 = vshll.u32 %v9130_v16, 16  ;;  %v1483_v34 = vshrl.u32 %v9130_v16, 16  ;;  %v9150_v53 = vrot.slane %v1455_v30, 5 }
 0x121   : > { %7577 = vmatmul.mubr.msk.bf16.gmra.mxu1 %vm2064_vm1, %v8844_v51  ;;  %v7344_v17 = vpop.f32.mrf.mxu0  ;;  %v1448_v51 = vrot.slane %v1446_v39, 4 }
 0x122   : > { %10551 = vst [vmem:[#allocation56_spill] sm:$0xff] %v9132_v60  ;;  %7580 = vmatprep.mubr.msk.bf16.mxu1 %vm2064_vm1, %v8850_v55  ;;  %v9142_v61 = vadd.f32 %v7378_v49, %v7344_v17  ;;  %v1461_v55 = vrot.slane %v1459_v59, 4  ;;  %v6544_v17 = vld [vmem:[%s8103_s24 + $0x20] sm:$0x1]  ;;  %v9158_v39 = vrot.slane %v1479_v52, 5  ;;  %v1485_v24 = vrot.slane %v1483_v34, 4 }
 0x123   : > { %v2259_v43 = vpop.f32.mrf.mxu0  ;;  %7547 = vmatmul.mubr.msk.bf16.gmra.mxu0 %vm2064_vm1, %v8684_v8  ;;  %v1452_v30 = vor.u32 %v1451_v28, %v1448_v51  ;;  %v1494_v52 = vshrl.u32 %v9161_v35, 16  ;;  %v1497_v34 = vshll.u32 %v9161_v35, 16 }
 0x124   : > { %10552 = vst [vmem:[#allocation57_spill] sm:$0xff] %v9142_v61  ;;  %v9148_v60 = vadd.f32 %v2538_v47, %v2259_v43  ;;  %7586 = vmatprep.mubr.msk.bf16.mxu0 %vm2064_vm1, %v8357_v6  ;;  %v1472_v61 = vrot.slane %v1470_v23, 4  ;;  %v2541_v43 = vpop.f32.mrf.mxu1  ;;  %v1462_v59 = vor.u32 %v1461_v55, %v9150_v53  ;;  %v1465_v6 = vshll.u32 %v6544_v17, 16  ;;  %v9177_v55 = vld [vmem:[%s10387_s1 + $0x68] sm:$0xff]  }
 0x125   : > { %v7345_v49 = vpop.f32.mrf.mxu0  ;;  %v1489_v23 = vshll.u32 %v6545_v22, 16  ;;  %v1486_v28 = vor.u32 %v1485_v24, %v9158_v39  ;;  %v9180_v22 = vld [vmem:[%s8103_s24 + $0x34] sm:$0xf] }
 0x126   : > { %10553 = vst [vmem:[#allocation58_spill] sm:$0xff] %v9148_v60  ;;  %v9155_v11 = vadd.f32 %v7379_v45, %v7345_v49  ;;  %v1476_v45 = vor.u32 %v1475_v18, %v1472_v61  ;;  %v10556_v49 = vld [vmem:[#allocation2_spill] sm:$0xff]  ;;  %v1453_v61 = vrot.slane %v1452_v30, 4 }
 0x127   : > { %v2262_v47 = vpop.f32.mrf.mxu0  ;;  %v1491_v30 = vrot.slane %v1489_v23, 5 }
 0x128   : > { %10554 = vst [vmem:[#allocation59_spill] sm:$0xff] %v9155_v11  ;;  %v9163_v60 = vadd.f32 %v2541_v43, %v2262_v47  ;;  %v1487_v11 = vrot.slane %v1486_v28, 4 }
 0x129   : > { %7581 = vmatmul.mubr.msk.bf16.gmra.mxu1 %vm2064_vm1, %v8864_v10  ;;  %v7384_v32 = vpop.f32.mrf.mxu0  ;;  %v1477_v10 = vrot.slane %v1476_v45, 4  ;;  %v1507_v45 = vshrl.u32 %v9180_v22, 16 }
 0x12a   : > { %10555 = vst [vmem:[#allocation60_spill] sm:$0xff] %v9163_v60  ;;  %7620 = vmatprep.mubr.msk.bf16.mxu1 %vm2064_vm1, %v10556_v49  ;;  %v2837_v51 = vadd.f32 %v7384_v32, %v8877_v41  ;;  %v1463_v49 = vrot.slane %v1462_v59, 4  ;;  %v1467_v41 = vrot.slane %v1465_v6, 5  ;;  %v1496_v60 = vrot.slane %v1494_v52, 4  ;;  %v9194_v59 = vld [vmem:[%s10387_s1 + $0x60] sm:$0xff]  }
 0x12b   : > { %v7418_v17 = vpop.f32.mrf.mxu1  ;;  %v2708_v43 = vpop.f32.mrf.mxu0  ;;  %7587 = vmatmul.mubr.msk.bf16.vlgmr.msra.gmra.mxu0 %vm2064_vm1, %v8373_v36  ;;  %v1503_v6 = vshll.u32 %v9180_v22, 16  ;;  %10557 = vst [vmem:[#allocation2_spill] sm:$0xff] %v9194_v59 }
 0x12c   : > { %v3135_v18 = vadd.f32 %v7418_v17, %v2837_v51  ;;  %v2835_v47 = vadd.f32 %v2708_v43, %v8884_v14  ;;  %7653 = vmatpush3.bf16.msra.mxu0 %v8911_v15  ;;  %7590 = vmatprep.mubr.msk.bf16.mxu0 %vm2064_vm1, %v8397_v56  ;;  %v1499_v51 = vrot.slane %v1497_v34, 5  ;;  %v6546_v34 = vld [vmem:[%s8103_s24 + $0x38] sm:$0x1]  ;;  %v9200_v43 = vld [vmem:[%s8103_s24 + $0x3c] sm:$0xf]  ;;  %v1492_v56 = vsel %vm8133_vm3, %v1487_v11, %v1491_v30 }
 0x12d   : > { %v3006_v32 = vpop.f32.mrf.mxu1  ;;  %v7385_v24 = vpop.f32.mrf.mxu0  ;;  %7720 = vmatprep.subr.bf16.mxu0 %v9177_v55 }
 0x12e   : > { %v3133_v17 = vadd.f32 %v3006_v32, %v2835_v47  ;;  %v2838_v36 = vadd.f32 %v7385_v24, %v8890_v25  ;;  %v10558_v25 = vld [vmem:[#allocation3_spill] sm:$0xff]  ;;  %v1458_v32 = vsel %vm8133_vm3, %v1453_v61, %v9150_v53  ;;  %v1468_v24 = vsel %vm8133_vm3, %v1463_v49, %v1467_v41 }
 0x12f   : > { %v7419_v14 = vpop.f32.mrf.mxu1  ;;  %v2711_v15 = vpop.f32.mrf.mxu0  ;;  %v9218_v53 = vrot.slane %v1503_v6, 5  ;;  %v9227_v6 = vcombine.low %v1458_v32, %v1468_v24 }
 0x130   : > { %v3136_v23 = vadd.f32 %v7419_v14, %v2838_v36  ;;  %v2836_v52 = vadd.f32 %v2711_v15, %v8896_v54  ;;  %v1482_v36 = vsel %vm8133_vm3, %v1477_v10, %v9158_v39  ;;  %v1500_v54 = vor.u32 %v1499_v51, %v1496_v60  ;;  %v10559_v14 = vld [vmem:[#allocation6_spill] sm:$0xff] }
 0x131   : > { %7621 = vmatmul.mubr.msk.bf16.vlgmr.msra.gmra.mxu1 %vm2064_vm1, %v10558_v25  ;;  %v3009_v28 = vpop.f32.mrf.mxu1  ;;  %v7388_v47 = vpop.f32.mrf.mxu0  ;;  %v5931_v61 = vmul.f32 %v3133_v17, %v3133_v17  ;;  %v1509_v10 = vrot.slane %v1507_v45, 4  ;;  %v1513_v60 = vshll.u32 %v6546_v34, 16  ;;  %10560 = vst [vmem:[#allocation3_spill] sm:$0xff] %v9227_v6  ;;  %v9229_v45 = vcombine.low %v1482_v36, %v1492_v56 }
 0x132   : > { %7687 = vmatpush3.bf16.msra.mxu1 %v8938_v33  ;;  %7624 = vmatprep.mubr.msk.bf16.mxu1 %vm2064_vm1, %v10559_v14  ;;  %v3134_v15 = vadd.f32 %v3009_v28, %v2836_v52  ;;  %v2841_v25 = vadd.f32 %v7388_v47, %v8920_v13  ;;  %v1518_v33 = vshrl.u32 %v9200_v43, 16  ;;  %v9231_v34 = vrot.slane %v1500_v54, 4 }
 0x133   : > { %v7422_v49 = vpop.f32.mrf.mxu1  ;;  %v2724_v41 = vpop.f32.mrf.mxu0  ;;  %7754 = vmatprep.subr.bf16.mxu1 %v9194_v59  ;;  %7591 = vmatmul.mubr.msk.bf16.gmra.mxu0 %vm2064_vm1, %v8410_v27  ;;  %10561 = vst [vmem:[#allocation6_spill] sm:$0xff] %v9229_v45  ;;  %v5933_v28 = vmul.f32 %v3135_v18, %v3135_v18  ;;  %v1510_v32 = vor.u32 %v1509_v10, %v9218_v53  ;;  %v9239_v56 = vrot.slane %v1513_v60, 5  ;;  %v9243_v59 = vld [vmem:[%s8103_s24 + $0x44] sm:$0x1] }
 0x134   : > { %v5893_v39 = vadd.f32 %v3134_v15, %v3133_v17  ;;  %v5932_v51 = vmul.f32 %v3134_v15, %v3134_v15  ;;  %v3139_v52 = vadd.f32 %v7422_v49, %v2841_v25  ;;  %v2839_v11 = vadd.f32 %v2724_v41, %v8931_v4  ;;  %7594 = vmatprep.mubr.msk.bf16.mxu0 %vm2064_vm1, %v8430_v7  ;;  %v9235_v4 = vld [vmem:[%s8103_s24 + $0x40] sm:$0xf] }
 0x135   : > { %v3022_v13 = vpop.f32.mrf.mxu1  ;;  %v7389_v30 = vpop.f32.mrf.mxu0  ;;  %v1521_v17 = vshll.u32 %v9200_v43, 16  ;;  %v1520_v24 = vrot.slane %v1518_v33, 4  ;;  %v5934_v36 = vmul.f32 %v3136_v23, %v3136_v23  ;;  %v1527_v60 = vshll.u32 %v9235_v4, 16 }
 0x136   : > { %v5894_v47 = vadd.f32 %v5893_v39, %v3135_v18  ;;  %v5963_v14 = vadd.f32 %v5932_v51, %v5931_v61  ;;  %v3137_v15 = vadd.f32 %v3022_v13, %v2839_v11  ;;  %v2842_v49 = vadd.f32 %v7389_v30, %v8940_v62  ;;  %v9246_v18 = vld [vmem:[%s8103_s24 + $0x48] sm:$0xf]  ;;  %v10563_v30 = vld [vmem:[#allocation10_spill] sm:$0xff] }
 0x137   : > { %v7423_v25 = vpop.f32.mrf.mxu1  ;;  %v2727_v41 = vpop.f32.mrf.mxu0  ;;  %v10562_v61 = vld [vmem:[#allocation7_spill] sm:$0xff]  ;;  %v1523_v10 = vrot.slane %v1521_v17, 5  ;;  %v1537_v17 = vshll.u32 %v9243_v59, 16  ;;  %v1545_v59 = vshll.u32 %v9246_v18, 16 }
 0x138   : > { %v5964_v54 = vadd.f32 %v5963_v14, %v5933_v28  ;;  %v5895_v7 = vadd.f32 %v5894_v47, %v3136_v23  ;;  %v2840_v27 = vadd.f32 %v2727_v41, %v8953_v31  ;;  %v5935_v39 = vmul.f32 %v3137_v15, %v3137_v15 }
 0x139   : > { %7625 = vmatmul.mubr.msk.bf16.gmra.mxu1 %vm2064_vm1, %v10562_v61  ;;  %v3025_v62 = vpop.f32.mrf.mxu1  ;;  %v3140_v51 = vadd.f32 %v7423_v25, %v2842_v49  ;;  %v7392_v11 = vpop.f32.mrf.mxu0  ;;  %v1506_v47 = vsel %vm8133_vm3, %v9231_v34, %v9218_v53  ;;  %v1531_v14 = vshrl.u32 %v9235_v4, 16  ;;  %v1542_v25 = vshrl.u32 %v9246_v18, 16 }
 0x13a   : > { %v5896_v33 = vadd.f32 %v5895_v7, %v3137_v15  ;;  %v5965_v13 = vadd.f32 %v5964_v54, %v5934_v36  ;;  %7628 = vmatprep.mubr.msk.bf16.mxu1 %vm2064_vm1, %v10563_v30  ;;  %v3138_v31 = vadd.f32 %v3025_v62, %v2840_v27  ;;  %v2845_v23 = vadd.f32 %v7392_v11, %v8972_v21 }
 0x13b   : > { %v2740_v28 = vpop.f32.mrf.mxu0  ;;  %7595 = vmatmul.mubr.msk.bf16.gmra.mxu0 %vm2064_vm1, %v8442_v63  ;;  %v1511_v53 = vrot.slane %v1510_v32, 4  ;;  %v1524_v34 = vor.u32 %v1523_v10, %v1520_v24  ;;  %v5937_v54 = vmul.f32 %v3139_v52, %v3139_v52  ;;  %v9268_v30 = vrot.slane %v1527_v60, 5 }
 0x13c   : > { %v5966_v7 = vadd.f32 %v5965_v13, %v5935_v39  ;;  %v5897_v49 = vadd.f32 %v5896_v33, %v3138_v31  ;;  %v5936_v41 = vmul.f32 %v3138_v31, %v3138_v31  ;;  %v2843_v27 = vadd.f32 %v2740_v28, %v8976_v1  ;;  %7598 = vmatprep.mubr.msk.bf16.mxu0 %vm2064_vm1, %v8464_v3 }
 0x13d   : > { %v7426_v15 = vpop.f32.mrf.mxu1  ;;  %v7393_v36 = vpop.f32.mrf.mxu0  ;;  %v9270_v1 = vrot.slane %v1531_v14, 4  ;;  %v9272_v31 = vrot.slane %v1542_v25, 4  ;;  %v1516_v60 = vsel %vm8133_vm3, %v1511_v53, %v9239_v56  ;;  %v9283_v14 = vld [vmem:[%s8103_s24 + $0x4c] sm:$0xf]  ;;  %v1547_v25 = vrot.slane %v1545_v59, 5 }
 0x13e   : > { %v3143_v21 = vadd.f32 %v7426_v15, %v2845_v23  ;;  %v5898_v61 = vadd.f32 %v5897_v49, %v3139_v52  ;;  %v5967_v39 = vadd.f32 %v5966_v7, %v5936_v41  ;;  %v2846_v11 = vadd.f32 %v7393_v36, %v8986_v48  ;;  %v10564_v52 = vld [vmem:[#allocation11_spill] sm:$0xff]  ;;  %v10565_v36 = vld [vmem:[#allocation13_spill] sm:$0xff] }
 0x13f   : > { %v3038_v62 = vpop.f32.mrf.mxu1  ;;  %v2743_v13 = vpop.f32.mrf.mxu0  ;;  %v5938_v23 = vmul.f32 %v3140_v51, %v3140_v51  ;;  %v9280_v15 = vrot.slane %v1524_v34, 4  ;;  %v9292_v53 = vrot.slane %v1537_v17, 5  ;;  %v9301_v17 = vcombine.low %v1506_v47, %v1516_v60 }
 0x140   : > { %v3141_v33 = vadd.f32 %v3038_v62, %v2843_v27  ;;  %v5968_v32 = vadd.f32 %v5967_v39, %v5937_v54  ;;  %v5899_v10 = vadd.f32 %v5898_v61, %v3140_v51  ;;  %v2844_v28 = vadd.f32 %v2743_v13, %v8997_v20 }
 0x141   : > { %v7427_v24 = vpop.f32.mrf.mxu1  ;;  %7629 = vmatmul.mubr.msk.bf16.gmra.mxu1 %vm2064_vm1, %v10564_v52  ;;  %v7396_v48 = vpop.f32.mrf.mxu0  ;;  %10566 = vst [vmem:[#allocation7_spill] sm:$0xff] %v9301_v17  ;;  %v1548_v52 = vor.u32 %v1547_v25, %v9272_v31 }
 0x142   : > { %v3144_v7 = vadd.f32 %v7427_v24, %v2846_v11  ;;  %v5900_v49 = vadd.f32 %v5899_v10, %v3141_v33  ;;  %v5939_v41 = vmul.f32 %v3141_v33, %v3141_v33  ;;  %v5969_v27 = vadd.f32 %v5968_v32, %v5938_v23  ;;  %7632 = vmatprep.mubr.msk.bf16.mxu1 %vm2064_vm1, %v10565_v36  ;;  %v6549_v36 = vld [vmem:[%s8103_s24 + $0x5c] sm:$0x1] }
 0x143   : > { %v3041_v51 = vpop.f32.mrf.mxu1  ;;  %v2849_v20 = vadd.f32 %v7396_v48, %v9007_v46  ;;  %v2756_v61 = vpop.f32.mrf.mxu0  ;;  %7599 = vmatmul.mubr.msk.bf16.gmra.mxu0 %vm2064_vm1, %v10527_v5  ;;  %v1551_v11 = vshll.u32 %v9283_v14, 16  ;;  %v1555_v46 = vshrl.u32 %v9283_v14, 16  ;;  %v5941_v48 = vmul.f32 %v3143_v21, %v3143_v21 }
 0x144   : > { %v3142_v54 = vadd.f32 %v3041_v51, %v2844_v28  ;;  %v5970_v34 = vadd.f32 %v5969_v27, %v5939_v41  ;;  %v2847_v62 = vadd.f32 %v2756_v61, %v9010_v44  ;;  %7602 = vmatprep.mubr.msk.bf16.mxu0 %vm2064_vm1, %v10530_v57  ;;  %v1534_v28 = vor.u32 %v9270_v1, %v9268_v30  ;;  %v10567_v51 = vld [vmem:[#allocation17_spill] sm:$0xff]  ;;  %v10568_v1 = vld [vmem:[#allocation14_spill] sm:$0xff]  ;;  %v10574_v44 = vld [vmem:[#allocation19_spill] sm:$0xff] }
 0x145   : > { %v7430_v59 = vpop.f32.mrf.mxu1  ;;  %v7397_v32 = vpop.f32.mrf.mxu0  ;;  %v5942_v61 = vmul.f32 %v3144_v7, %v3144_v7 }
 0x146   : > { %v5901_v33 = vadd.f32 %v5900_v49, %v3142_v54  ;;  %v5940_v13 = vmul.f32 %v3142_v54, %v3142_v54  ;;  %v3147_v23 = vadd.f32 %v7430_v59, %v2849_v20  ;;  %v2850_v10 = vadd.f32 %v7397_v32, %v9020_v37  ;;  %v6548_v59 = vld [vmem:[%s8103_s24 + $0x50] sm:$0x1]  ;;  %v10570_v32 = vld [vmem:[#allocation18_spill] sm:$0xff] }
 0x147   : > { %v3054_v24 = vpop.f32.mrf.mxu1  ;;  %v2759_v60 = vpop.f32.mrf.mxu0  ;;  %v9314_v20 = vrot.slane %v1551_v11, 5  ;;  %v1557_v54 = vrot.slane %v1555_v46, 4 }
 0x148   : > { %v5902_v49 = vadd.f32 %v5901_v33, %v3143_v21  ;;  %v5971_v41 = vadd.f32 %v5970_v34, %v5940_v13  ;;  %v3145_v47 = vadd.f32 %v3054_v24, %v2847_v62  ;;  %v2848_v37 = vadd.f32 %v2759_v60, %v10567_v51  ;;  %v9320_v62 = vld [vmem:[%s8103_s24 + $0x54] sm:$0xf]  ;;  %v10571_v51 = vld [vmem:[#allocation23_spill] sm:$0xff] }
 0x149   : > { %v7431_v27 = vpop.f32.mrf.mxu1  ;;  %7633 = vmatmul.mubr.msk.bf16.gmra.mxu1 %vm2064_vm1, %v10568_v1  ;;  %v7400_v34 = vpop.f32.mrf.mxu0  ;;  %v10569_v13 = vld [vmem:[#allocation16_spill] sm:$0xff]  ;;  %v1535_v24 = vrot.slane %v1534_v28, 4  ;;  %v9327_v60 = vrot.slane %v1548_v52, 4  ;;  %v10572_v1 = vld [vmem:[#allocation51_spill] sm:$0xff]  ;;  %v1561_v28 = vshll.u32 %v6548_v59, 16 }
 0x14a   : > { %v5972_v31 = vadd.f32 %v5971_v41, %v5941_v48  ;;  %v5903_v25 = vadd.f32 %v5902_v49, %v3144_v7  ;;  %v3148_v21 = vadd.f32 %v7431_v27, %v2850_v10  ;;  %7636 = vmatprep.mubr.msk.bf16.mxu1 %vm2064_vm1, %v10569_v13  ;;  %v2853_v11 = vadd.f32 %v7400_v34, %v10570_v32  ;;  %v9330_v27 = vld [vmem:[%s8103_s24 + $0x58] sm:$0xf] }
 0x14b   : > { %v3057_v33 = vpop.f32.mrf.mxu1  ;;  %v5943_v7 = vmul.f32 %v3145_v47, %v3145_v47  ;;  %v2772_v41 = vpop.f32.mrf.mxu0  ;;  %7603 = vmatmul.mubr.msk.bf16.gmra.mxu0 %vm2064_vm1, %v10571_v51  ;;  %v1558_v34 = vor.u32 %v1557_v54, %v9314_v20  ;;  %v1566_v32 = vshrl.u32 %v9320_v62, 16  ;;  %v1540_v54 = vsel %vm8133_vm3, %v1535_v24, %v9292_v53 }
 0x14c   : > { %v5904_v48 = vadd.f32 %v5903_v25, %v3145_v47  ;;  %v5973_v49 = vadd.f32 %v5972_v31, %v5942_v61  ;;  %v3146_v10 = vadd.f32 %v3057_v33, %v2848_v37  ;;  %v2851_v13 = vadd.f32 %v2772_v41, %v10572_v1  ;;  %7606 = vmatprep.mubr.msk.bf16.mxu0 %vm2064_vm1, %v10541_v58  ;;  %v10573_v31 = vld [vmem:[#allocation21_spill] sm:$0xff] }
 0x14d   : > { %v7401_v47 = vpop.f32.mrf.mxu0  ;;  %v1569_v37 = vshll.u32 %v9320_v62, 16  ;;  %v1554_v59 = vsel %vm8133_vm3, %v9327_v60, %v9314_v20  ;;  %v1563_v39 = vrot.slane %v1561_v28, 5  ;;  %v1568_v53 = vrot.slane %v1566_v32, 4 }
 0x14e   : > { %v5974_v46 = vadd.f32 %v5973_v49, %v5943_v7  ;;  %v5905_v52 = vadd.f32 %v5904_v48, %v3146_v10  ;;  %v5944_v25 = vmul.f32 %v3146_v10, %v3146_v10  ;;  %v7434_v61 = vpop.f32.mrf.mxu1  ;;  %v2854_v33 = vadd.f32 %v7401_v47, %v10573_v31 }
 0x14f   : > { %v1575_v48 = vshll.u32 %v9330_v27, 16  ;;  %v5945_v7 = vmul.f32 %v3147_v23, %v3147_v23  ;;  %v3151_v41 = vadd.f32 %v7434_v61, %v2853_v11  ;;  %v2775_v1 = vpop.f32.mrf.mxu0  ;;  %v1559_v31 = vrot.slane %v1558_v34, 4 }
 0x150   : > { %v5906_v49 = vadd.f32 %v5905_v52, %v3147_v23  ;;  %v5975_v10 = vadd.f32 %v5974_v46, %v5944_v25  ;;  %v3070_v56 = vpop.f32.mrf.mxu1  ;;  %v2852_v47 = vadd.f32 %v2775_v1, %v9073_v2  ;;  %v5946_v24 = vmul.f32 %v3148_v21, %v3148_v21  ;;  %v9354_v52 = vld [vmem:[%s8103_s24 + $0x60] sm:$0xf]  ;;  %v10575_v46 = vld [vmem:[#allocation24_spill] sm:$0xff] }
 0x151   : > { %7637 = vmatmul.mubr.msk.bf16.gmra.mxu1 %vm2064_vm1, %v10574_v44  ;;  %v3149_v60 = vadd.f32 %v3070_v56, %v2851_v13  ;;  %v7404_v23 = vpop.f32.mrf.mxu0  ;;  %v1571_v34 = vrot.slane %v1569_v37, 5  ;;  %v1579_v28 = vshrl.u32 %v9330_v27, 16  ;;  %v1585_v32 = vshll.u32 %v6549_v36, 16  ;;  %v9361_v56 = vld [vmem:[%s8103_s24 + $0x64] sm:$0xf] }
 0x152   : > { %v5976_v20 = vadd.f32 %v5975_v10, %v5945_v7  ;;  %v5907_v58 = vadd.f32 %v5906_v49, %v3148_v21  ;;  %v7435_v11 = vpop.f32.mrf.mxu1  ;;  %7640 = vmatprep.mubr.msk.bf16.mxu1 %vm2064_vm1, %v10575_v46  ;;  %v2857_v2 = vadd.f32 %v7404_v23, %v9076_v12  ;;  %v10576_v12 = vsel %vm8133_vm3, %v9280_v15, %v9268_v30 }
 0x153   : > { %v5947_v61 = vmul.f32 %v3149_v60, %v3149_v60  ;;  %v3152_v7 = vadd.f32 %v7435_v11, %v2854_v33  ;;  %v2788_v10 = vpop.f32.mrf.mxu0  ;;  %7607 = vmatmul.mubr.msk.bf16.gmra.mxu0 %vm2064_vm1, %v10544_v42  ;;  %v9371_v37 = vcombine.low %v10576_v12, %v1540_v54  ;;  %v1590_v36 = vshrl.u32 %v9354_v52, 16  ;;  %v10587_v42 = vld [vmem:[#allocation34_spill] sm:$0xff] }
 0x154   : > { %v5908_v25 = vadd.f32 %v5907_v58, %v3149_v60  ;;  %v5977_v44 = vadd.f32 %v5976_v20, %v5946_v24  ;;  %v3073_v21 = vpop.f32.mrf.mxu1  ;;  %v2855_v13 = vadd.f32 %v2788_v10, %v9086_v26  ;;  %v1564_v58 = vsel %vm8133_vm3, %v1559_v31, %v1563_v39  ;;  %7610 = vmatprep.mubr.msk.bf16.mxu0 %vm2064_vm1, %v10546_v19 }
 0x155   : > { %10577 = vst [vmem:[#allocation10_spill] sm:$0xff] %v9371_v37  ;;  %v3150_v49 = vadd.f32 %v3073_v21, %v2852_v47  ;;  %v7405_v1 = vpop.f32.mrf.mxu0  ;;  %v9378_v24 = vrot.slane %v1575_v48, 5  ;;  %v1593_v26 = vshll.u32 %v9354_v52, 16  ;;  %v1572_v30 = vor.u32 %v1571_v34, %v1568_v53  ;;  %v10579_v34 = vld [vmem:[#allocation26_spill] sm:$0xff]  ;;  %v9393_v21 = vld [vmem:[%s8103_s24 + $0x6c] sm:$0xf] }
 0x156   : > { %v5978_v33 = vadd.f32 %v5977_v44, %v5947_v61  ;;  %v2858_v20 = vadd.f32 %v7405_v1, %v9094_v50  ;;  %v1581_v15 = vrot.slane %v1579_v28, 4  ;;  %v1599_v54 = vshll.u32 %v9361_v56, 16 }
 0x157   : > { %v5909_v39 = vadd.f32 %v5908_v25, %v3150_v49  ;;  %v5948_v31 = vmul.f32 %v3150_v49, %v3150_v49  ;;  %v2791_v23 = vpop.f32.mrf.mxu0  ;;  %v9383_v47 = vcombine.low %v1554_v59, %v1564_v58  ;;  %v9385_v11 = vrot.slane %v1585_v32, 5  ;;  %v10580_v32 = vld [vmem:[#allocation30_spill] sm:$0xff] }
 0x158   : > { %v7438_v60 = vpop.f32.mrf.mxu1  ;;  %v2856_v48 = vadd.f32 %v2791_v23, %v9102_v40  ;;  %v1592_v50 = vrot.slane %v1590_v36, 4  ;;  %v5949_v53 = vmul.f32 %v3151_v41, %v3151_v41  ;;  %v1595_v10 = vrot.slane %v1593_v26, 5 }
 0x159   : > { %10578 = vst [vmem:[#allocation11_spill] sm:$0xff] %v9383_v47  ;;  %v3155_v46 = vadd.f32 %v7438_v60, %v2857_v2  ;;  %7641 = vmatmul.mubr.msk.bf16.gmra.mxu1 %vm2064_vm1, %v10579_v34  ;;  %v5910_v28 = vadd.f32 %v5909_v39, %v3151_v41  ;;  %v5979_v44 = vadd.f32 %v5978_v33, %v5948_v31  ;;  %v9397_v40 = vrot.slane %v1572_v30, 4  ;;  %v10581_v60 = vld [vmem:[#allocation53_spill] sm:$0xff] }
 0x15a   : > { %v3086_v25 = vpop.f32.mrf.mxu1  ;;  %7644 = vmatprep.mubr.msk.bf16.mxu1 %vm2064_vm1, %v10580_v32  ;;  %v1582_v2 = vor.u32 %v1581_v15, %v9378_v24  ;;  %v1603_v12 = vshrl.u32 %v9361_v56, 16  ;;  %v5950_v58 = vmul.f32 %v3152_v7, %v3152_v7  ;;  %v7408_v33 = vpop.f32.mrf.mxu0  ;;  %v10582_v39 = vld [vmem:[#allocation33_spill] sm:$0xff]  ;;  %v9406_v30 = vrot.slane %v1599_v54, 5  ;;  %v9409_v15 = vld [vmem:[%s8103_s24 + $0x70] sm:$0xf]  ;;  %v10584_v32 = vld [vmem:[#allocation54_spill] sm:$0xff] }
 0x15b   : > { %v3153_v59 = vadd.f32 %v3086_v25, %v2855_v13  ;;  %v5980_v36 = vadd.f32 %v5979_v44, %v5949_v53  ;;  %v5911_v41 = vadd.f32 %v5910_v28, %v3152_v7  ;;  %v2861_v13 = vadd.f32 %v7408_v33, %v10581_v60  ;;  %7611 = vmatmul.mubr.msk.bf16.gmra.mxu0 %vm2064_vm1, %v10582_v39  ;;  %v10583_v44 = vld [vmem:[#allocation36_spill] sm:$0xff]  ;;  %v6550_v33 = vld [vmem:[%s8103_s24 + $0x68] sm:$0x1] }
 0x15c   : > { %v7439_v49 = vpop.f32.mrf.mxu1  ;;  %v1614_v31 = vshrl.u32 %v9393_v21, 16  ;;  %v2804_v28 = vpop.f32.mrf.mxu0  ;;  %7614 = vmatprep.mubr.msk.bf16.mxu0 %vm2064_vm1, %v10583_v44  ;;  %v1578_v54 = vsel %vm8133_vm3, %v9397_v40, %v9378_v24  ;;  %v1605_v60 = vrot.slane %v1603_v12, 4  ;;  %v10586_v44 = vld [vmem:[#allocation31_spill] sm:$0xff]  ;;  %v1609_v12 = vshll.u32 %v6550_v33, 16 }
 0x15d   : > { %v3156_v26 = vadd.f32 %v7439_v49, %v2858_v20  ;;  %v5912_v23 = vadd.f32 %v5911_v41, %v3153_v59  ;;  %v5951_v53 = vmul.f32 %v3153_v59, %v3153_v59  ;;  %v5981_v7 = vadd.f32 %v5980_v36, %v5950_v58 }
 0x15e   : > { %v3089_v34 = vpop.f32.mrf.mxu1  ;;  %v1596_v20 = vor.u32 %v1595_v10, %v1592_v50  ;;  %v2859_v49 = vadd.f32 %v2804_v28, %v10584_v32  ;;  %v7409_v41 = vpop.f32.mrf.mxu0  ;;  %v1617_v59 = vshll.u32 %v9393_v21, 16  ;;  %v1623_v58 = vshll.u32 %v9409_v15, 16  ;;  %v10585_v50 = vld [vmem:[#allocation55_spill] sm:$0xff] }
 0x15f   : > { %v3154_v25 = vadd.f32 %v3089_v34, %v2856_v48  ;;  %v5982_v1 = vadd.f32 %v5981_v7, %v5951_v53  ;;  %v1627_v36 = vshrl.u32 %v9409_v15, 16  ;;  %v2862_v10 = vadd.f32 %v7409_v41, %v10585_v50  ;;  %v6551_v41 = vld [vmem:[%s8103_s24 + $0x74] sm:$0x1] }
 0x160   : > { %v1583_v34 = vrot.slane %v1582_v2, 4  ;;  %v5953_v28 = vmul.f32 %v3155_v46, %v3155_v46  ;;  %v2807_v24 = vpop.f32.mrf.mxu0  ;;  %v9426_v40 = vrot.slane %v1596_v20, 4  ;;  %v1616_v53 = vrot.slane %v1614_v31, 4 }
 0x161   : > { %v5913_v61 = vadd.f32 %v5912_v23, %v3154_v25  ;;  %v5952_v48 = vmul.f32 %v3154_v25, %v3154_v25  ;;  %v7442_v32 = vpop.f32.mrf.mxu1  ;;  %7645 = vmatmul.mubr.msk.bf16.gmra.mxu1 %vm2064_vm1, %v10586_v44  ;;  %v10588_v23 = vld [vmem:[#allocation56_spill] sm:$0xff]  ;;  %v1606_v50 = vor.u32 %v1605_v60, %v9406_v30  ;;  %v1619_v51 = vrot.slane %v1617_v59, 5 }
 0x162   : > { %v3159_v19 = vadd.f32 %v7442_v32, %v2861_v13  ;;  %7648 = vmatprep.mubr.msk.bf16.mxu1 %vm2064_vm1, %v10587_v42  ;;  %v2860_v25 = vadd.f32 %v2807_v24, %v10588_v23  ;;  %v9433_v57 = vrot.slane %v1623_v58, 5  ;;  %v1629_v44 = vrot.slane %v1627_v36, 4  ;;  %v10591_v24 = vld [vmem:[#allocation58_spill] sm:$0xff] }
 0x163   : > { %v5914_v7 = vadd.f32 %v5913_v61, %v3155_v46  ;;  %v5983_v39 = vadd.f32 %v5982_v1, %v5952_v48  ;;  %v3102_v2 = vpop.f32.mrf.mxu1  ;;  %v5954_v20 = vmul.f32 %v3156_v26, %v3156_v26  ;;  %v7412_v61 = vpop.f32.mrf.mxu0  ;;  %7615 = vmatmul.mubr.msk.bf16.gmra.mxu0 %vm2064_vm1, %v8684_v8  ;;  %v10589_v1 = vld [vmem:[#allocation57_spill] sm:$0xff]  ;;  %v10590_v33 = vcombine.low %v9115_v0, %v9120_v9 }
 0x164   : > { %v3157_v31 = vadd.f32 %v3102_v2, %v2859_v49  ;;  %v2865_v13 = vadd.f32 %v7412_v61, %v10589_v1  ;;  %v1588_v60 = vsel %vm8133_vm3, %v1583_v34, %v9385_v11  ;;  %v1633_v49 = vshll.u32 %v6551_v41, 16  ;;  %v10593_v41 = vld [vmem:[#allocation35_spill] sm:$0xff]  ;;  %v9479_v1 = vld [vmem:[%s10387_s1 + $0x70] sm:$0xff]  }
 0x165   : > { %v5984_v5 = vadd.f32 %v5983_v39, %v5953_v28  ;;  %v5915_v46 = vadd.f32 %v5914_v7, %v3156_v26  ;;  %v7443_v42 = vpop.f32.mrf.mxu1  ;;  %7654 = vmatprep.mubr.msk.bf16.mxu0 %vm2064_vm1, %v10590_v33  ;;  %v9445_v39 = vrot.slane %v1609_v12, 5  ;;  %v2820_v48 = vpop.f32.mrf.mxu0  ;;  %v9448_v28 = vld [vmem:[%s8103_s24 + $0x78] sm:$0xf]  ;;  %v9451_v0 = vrot.slane %v1606_v50, 4  ;;  %v10594_v50 = vld [vmem:[#allocation59_spill] sm:$0xff] }
 0x166   : > { %v5955_v59 = vmul.f32 %v3157_v31, %v3157_v31  ;;  %v3160_v36 = vadd.f32 %v7443_v42, %v2862_v10  ;;  %v2863_v7 = vadd.f32 %v2820_v48, %v10591_v24  ;;  %v1620_v9 = vor.u32 %v1619_v51, %v1616_v53  ;;  %v9474_v42 = vld [vmem:[%s8103_s24 + $0x7c] sm:$0xf] }
 0x167   : > { %v5916_v26 = vadd.f32 %v5915_v46, %v3157_v31  ;;  %v5985_v58 = vadd.f32 %v5984_v5, %v5954_v20  ;;  %v3105_v32 = vpop.f32.mrf.mxu1  ;;  %v1630_v23 = vor.u32 %v1629_v44, %v9433_v57  ;;  %v7413_v34 = vpop.f32.mrf.mxu0  ;;  %v9454_v12 = vcombine.low %v1578_v54, %v1588_v60  ;;  %v10595_v60 = vld [vmem:[#allocation60_spill] sm:$0xff]  ;;  %v6552_v5 = vld [vmem:[%s8103_s24 + $0x80] sm:$0x1] }
 0x168   : > { %v3158_v11 = vadd.f32 %v3105_v32, %v2860_v25  ;;  %v2866_v20 = vadd.f32 %v7413_v34, %v10594_v50  ;;  %v1638_v53 = vshrl.u32 %v9448_v28, 16  ;;  %v1641_v25 = vshll.u32 %v9448_v28, 16 }
 0x169   : > { %v5986_v2 = vadd.f32 %v5985_v58, %v5955_v59  ;;  %10592 = vst [vmem:[#allocation13_spill] sm:$0xff] %v9454_v12  ;;  %v7446_v10 = vpop.f32.mrf.mxu1  ;;  %7649 = vmatmul.mubr.msk.bf16.gmra.mxu1 %vm2064_vm1, %v10593_v41  ;;  %v2823_v46 = vpop.f32.mrf.mxu0  ;;  %v9471_v61 = vrot.slane %v1633_v49, 5  ;;  %v9486_v59 = vrot.slane %v1620_v9, 4  ;;  %v9488_v58 = vrot.slane %v1630_v23, 4  ;;  %v9498_v41 = vld [vmem:[%s8103_s24 + $0x88] sm:$0xf] }
 0x16a   : > { %v5917_v54 = vadd.f32 %v5916_v26, %v3158_v11  ;;  %v5956_v44 = vmul.f32 %v3158_v11, %v3158_v11  ;;  %v9467_v31 = vadd.f32 %v7446_v10, %v2865_v13  ;;  %7688 = vmatprep.mubr.msk.bf16.mxu1 %vm2064_vm1, %v9227_v6  ;;  %v2864_v26 = vadd.f32 %v2823_v46, %v10595_v60  ;;  %v9495_v10 = vld [vmem:[%s8103_s24 + $0x84] sm:$0xf]  ;;  %v9536_v13 = vld [vmem:[%s8103_s24 + $0x90] sm:$0xf] }
 0x16b   : > { %v3118_v33 = vpop.f32.mrf.mxu1  ;;  %v5957_v49 = vmul.f32 %v3159_v19, %v3159_v19  ;;  %v7452_v11 = vpop.f32.mrf.mxu0  ;;  %v10596_v34 = vcombine.low %v9125_v38, %v9130_v16  ;;  %v10597_v9 = vcombine.low %v9161_v35, %v9180_v22  ;;  %v1647_v38 = vshll.u32 %v9474_v42, 16 }
 0x16c   : > { %v5918_v48 = vadd.f32 %v5917_v54, %v3159_v19  ;;  %v5987_v32 = vadd.f32 %v5986_v2, %v5956_v44  ;;  %v3161_v24 = vadd.f32 %v3118_v33, %v2863_v7  ;;  %v9505_v19 = vrot.slane %v1638_v53, 4  ;;  %v9519_v33 = vld [vmem:[%s10387_s1 + $0x78] sm:$0xff]  }
 0x16d   : > { %7655 = vmatmul.mubr.msk.bf16.vlgmr.msra.gmra.mxu0 %vm2064_vm1, %v10596_v34  ;;  %v7447_v50 = vpop.f32.mrf.mxu1  ;;  %v9507_v7 = vrot.slane %v1641_v25, 5  ;;  %v1651_v16 = vshrl.u32 %v9474_v42, 16  ;;  %v5958_v23 = vmul.f32 %v3160_v36, %v3160_v36  ;;  %v3307_v46 = vpop.f32.mrf.mxu0  ;;  %v1662_v35 = vshrl.u32 %v9495_v10, 16 }
 0x16e   : > { %7721 = vmatpush3.bf16.msra.mxu0 %v9177_v55  ;;  %7658 = vmatprep.mubr.msk.bf16.mxu0 %vm2064_vm1, %v10597_v9  ;;  %v5988_v2 = vadd.f32 %v5987_v32, %v5957_v49  ;;  %v5919_v54 = vadd.f32 %v5918_v48, %v3160_v36  ;;  %v3164_v44 = vadd.f32 %v7447_v50, %v2866_v20  ;;  %v1665_v22 = vshll.u32 %v9495_v10, 16 }
 0x16f   : > { %7788 = vmatprep.subr.bf16.mxu0 %v9479_v1  ;;  %v3121_v55 = vpop.f32.mrf.mxu1  ;;  %v1671_v53 = vshll.u32 %v9498_v41, 16  ;;  %v1675_v25 = vshrl.u32 %v9498_v41, 16  ;;  %v5959_v36 = vmul.f32 %v3161_v24, %v3161_v24  ;;  %v7453_v48 = vpop.f32.mrf.mxu0  ;;  %v1626_v34 = vsel %vm8133_vm3, %v9486_v59, %v9433_v57 }
 0x170   : > { %v5920_v60 = vadd.f32 %v5919_v54, %v3161_v24  ;;  %v5989_v20 = vadd.f32 %v5988_v2, %v5958_v23  ;;  %v3162_v49 = vadd.f32 %v3121_v55, %v2864_v26  ;;  %v1644_v50 = vor.u32 %v9507_v7, %v9505_v19  ;;  %v10598_v55 = vld [vmem:[#allocation2_spill] sm:$0xff] }
 0x171   : > { %v7486_v32 = vpop.f32.mrf.mxu1  ;;  %7689 = vmatmul.mubr.msk.bf16.vlgmr.msra.gmra.mxu1 %vm2064_vm1, %v9229_v45  ;;  %v9529_v9 = vrot.slane %v1647_v38, 5  ;;  %v1653_v24 = vrot.slane %v1651_v16, 4  ;;  %v3310_v51 = vpop.f32.mrf.mxu0  ;;  %v1664_v57 = vrot.slane %v1662_v35, 4  ;;  %v1667_v59 = vrot.slane %v1665_v22, 5  ;;  %v6553_v35 = vld [vmem:[%s8103_s24 + $0x8c] sm:$0x1] }
 0x172   : > { %v5990_v54 = vadd.f32 %v5989_v20, %v5959_v36  ;;  %v5921_v23 = vadd.f32 %v5920_v60, %v3162_v49  ;;  %v5960_v2 = vmul.f32 %v3162_v49, %v3162_v49  ;;  %v9531_v26 = vadd.f32 %v7486_v32, %v7452_v11  ;;  %7755 = vmatpush3.bf16.msra.mxu1 %v10598_v55 }
 0x173   : > { %v3474_v45 = vpop.f32.mrf.mxu1  ;;  %7692 = vmatprep.mubr.msk.bf16.mxu1 %vm2064_vm1, %v9301_v17  ;;  %v9540_v19 = vrot.slane %v1671_v53, 5  ;;  %v1677_v7 = vrot.slane %v1675_v25, 4  ;;  %7822 = vmatprep.subr.bf16.mxu1 %v9519_v33  ;;  %v5961_v11 = vmul.f32 %v9467_v31, %v9467_v31  ;;  %v7456_v36 = vpop.f32.mrf.mxu0  ;;  %v10599_v20 = vcombine.low %v9200_v43, %v9235_v4 }
 0x174   : > { %v5922_v38 = vadd.f32 %v5921_v23, %v9467_v31  ;;  %v5991_v16 = vadd.f32 %v5990_v54, %v5960_v2  ;;  %v9546_v60 = vadd.f32 %v3474_v45, %v3307_v46  ;;  %v10600_v53 = vcombine.low %v9246_v18, %v9283_v14  ;;  %v9559_v31 = vld [vmem:[%s8103_s24 + $0x94] sm:$0xf] }
 0x175   : > { %7659 = vmatmul.mubr.msk.bf16.gmra.mxu0 %vm2064_vm1, %v10599_v20  ;;  %v7487_v22 = vpop.f32.mrf.mxu1  ;;  %v1654_v25 = vor.u32 %v1653_v24, %v9529_v9  ;;  %v1657_v49 = vshll.u32 %v6552_v5, 16  ;;  %v1686_v45 = vshrl.u32 %v9536_v13, 16  ;;  %v1689_v46 = vshll.u32 %v9536_v13, 16  ;;  %v3323_v23 = vpop.f32.mrf.mxu0 }
 0x176   : > { %7662 = vmatprep.mubr.msk.bf16.mxu0 %vm2064_vm1, %v10600_v53  ;;  %v5962_v32 = vmul.f32 %v3164_v44, %v3164_v44  ;;  %v9563_v43 = vadd.f32 %v5922_v38, %v3164_v44  ;;  %v5992_v4 = vadd.f32 %v5991_v16, %v5961_v11  ;;  %v9565_v54 = vadd.f32 %v7487_v22, %v7453_v48  ;;  %v9601_v53 = vld [vmem:[%s8103_s24 + $0x9c] sm:$0xf] }
 0x177   : > { %v3477_v2 = vpop.f32.mrf.mxu1  ;;  %v1636_v18 = vsel %vm8133_vm3, %v9488_v58, %v9471_v61  ;;  %v9571_v14 = vrot.slane %v1644_v50, 4  ;;  %v1668_v5 = vor.u32 %v1667_v59, %v1664_v57  ;;  %v1681_v24 = vshll.u32 %v6553_v35, 16  ;;  %v7457_v44 = vpop.f32.mrf.mxu0 }
 0x178   : > { %10601 = vst [vmem:[#allocation17_spill] sm:$0xff] %v9563_v43  ;;  %v9573_v55 = vadd.f32 %v5992_v4, %v5962_v32  ;;  %v9575_v20 = vadd.f32 %v3477_v2, %v3310_v51  ;;  %v1678_v48 = vor.u32 %v1677_v7, %v9540_v19  ;;  %v1695_v11 = vshll.u32 %v9559_v31, 16  ;;  %v6554_v2 = vld [vmem:[%s8103_s24 + $0x98] sm:$0x1] }
 0x179   : > { %v7490_v38 = vpop.f32.mrf.mxu1  ;;  %7693 = vmatmul.mubr.msk.bf16.gmra.mxu1 %vm2064_vm1, %v9371_v37  ;;  %v1688_v58 = vrot.slane %v1686_v45, 4  ;;  %v1691_v50 = vrot.slane %v1689_v46, 5  ;;  %v1699_v57 = vshrl.u32 %v9559_v31, 16  ;;  %v3326_v59 = vpop.f32.mrf.mxu0  ;;  %v10603_v7 = vsel %vm8133_vm3, %v9451_v0, %v9445_v39 }
 0x17a   : > { %10602 = vst [vmem:[#allocation14_spill] sm:$0xff] %v9573_v55  ;;  %v9584_v51 = vadd.f32 %v7490_v38, %v7456_v36  ;;  %7696 = vmatprep.mubr.msk.bf16.mxu1 %vm2064_vm1, %v9383_v47  ;;  %v10604_v16 = vsel %vm8133_vm3, %v9426_v40, %v9406_v30  ;;  %v1655_v22 = vrot.slane %v1654_v25, 4  ;;  %v1659_v36 = vrot.slane %v1657_v49, 5  ;;  %v9610_v30 = vld [vmem:[%s8103_s24 + $0xa0] sm:$0xf] }
 0x17b   : > { %v9598_v35 = vcombine.low %v10604_v16, %v10603_v7  ;;  %v3490_v45 = vpop.f32.mrf.mxu1  ;;  %v9603_v46 = vcombine.low %v1626_v34, %v1636_v18  ;;  %v1650_v39 = vsel %vm8133_vm3, %v9571_v14, %v9529_v9  ;;  %v1669_v0 = vrot.slane %v1668_v5, 4  ;;  %v7460_v25 = vpop.f32.mrf.mxu0  ;;  %v9624_v9 = vld [vmem:[%s8103_s24 + $0xa8] sm:$0xf] }
 0x17c   : > { %v1683_v32 = vrot.slane %v1681_v24, 5  ;;  %v9612_v40 = vadd.f32 %v3490_v45, %v3323_v23  ;;  %v10607_v49 = vcombine.low %v9320_v62, %v9330_v27  ;;  %v1679_v34 = vrot.slane %v1678_v48, 4  ;;  %v9633_v48 = vld [vmem:[%s8103_s24 + $0xac] sm:$0xf] }
 0x17d   : > { %10605 = vst [vmem:[#allocation16_spill] sm:$0xff] %v9598_v35  ;;  %10606 = vst [vmem:[#allocation18_spill] sm:$0xff] %v9603_v46  ;;  %v6886_v4 = vcombine.low %v9448_v28, %v9474_v42  ;;  %v9621_v18 = vrot.slane %v1695_v11, 5  ;;  %v7491_v14 = vpop.f32.mrf.mxu1  ;;  %v10608_v23 = vcombine.low %v9354_v52, %v9361_v56  ;;  %v1692_v5 = vor.u32 %v1691_v50, %v1688_v58  ;;  %v3339_v42 = vpop.f32.mrf.mxu0 }
 0x17e   : > { %7663 = vmatmul.mubr.msk.bf16.gmra.mxu0 %vm2064_vm1, %v10607_v49  ;;  %v1701_v62 = vrot.slane %v1699_v57, 4  ;;  %v1710_v27 = vshrl.u32 %v9601_v53, 16  ;;  %v1713_v24 = vshll.u32 %v9601_v53, 16  ;;  %v9635_v28 = vadd.f32 %v7491_v14, %v7457_v44  ;;  %v6555_v57 = vld [vmem:[%s8103_s24 + $0xa4] sm:$0x1] }
 0x17f   : > { %7666 = vmatprep.mubr.msk.bf16.mxu0 %vm2064_vm1, %v10608_v23  ;;  %v1660_v11 = vsel %vm8133_vm3, %v1655_v22, %v1659_v36  ;;  %v1719_v38 = vshll.u32 %v9610_v30, 16  ;;  %v1723_v52 = vshrl.u32 %v9610_v30, 16  ;;  %v3493_v56 = vpop.f32.mrf.mxu1  ;;  %v1674_v58 = vsel %vm8133_vm3, %v1669_v0, %v9540_v19  ;;  %v7461_v45 = vpop.f32.mrf.mxu0 }
 0x180   : > { %v1705_v50 = vshll.u32 %v6554_v2, 16  ;;  %v1734_v7 = vshrl.u32 %v9624_v9, 16  ;;  %v1737_v44 = vshll.u32 %v9624_v9, 16  ;;  %v9647_v16 = vadd.f32 %v3493_v56, %v3326_v59 }
 0x181   : > { %v1684_v22 = vsel %vm8133_vm3, %v1679_v34, %v1683_v32  ;;  %v1743_v36 = vshll.u32 %v9633_v48, 16  ;;  %v1747_v49 = vshrl.u32 %v9633_v48, 16  ;;  %v7494_v14 = vpop.f32.mrf.mxu1  ;;  %7697 = vmatmul.mubr.msk.bf16.gmra.mxu1 %vm2064_vm1, %v9454_v12  ;;  %v9655_v19 = vrot.slane %v1692_v5, 4  ;;  %v3342_v32 = vpop.f32.mrf.mxu0 }
 0x182   : > { %v1702_v0 = vor.u32 %v1701_v62, %v9621_v18  ;;  %v1712_v2 = vrot.slane %v1710_v27, 4  ;;  %v1715_v59 = vrot.slane %v1713_v24, 5  ;;  %v9658_v23 = vadd.f32 %v7494_v14, %v7460_v25  ;;  %7700 = vmatprep.mubr.msk.bf16.mxu1 %vm2064_vm1, %v9598_v35  ;;  %v9669_v25 = vld [vmem:[%s8103_s24 + $0xb4] sm:$0xf] }
 0x183   : > { %v9662_v34 = vrot.slane %v1719_v38, 5  ;;  %v1725_v56 = vrot.slane %v1723_v52, 4  ;;  %v1729_v61 = vshll.u32 %v6555_v57, 16  ;;  %v3506_v47 = vpop.f32.mrf.mxu1  ;;  %v9664_v12 = vcombine.low %v1650_v39, %v1660_v11  ;;  %v7464_v14 = vpop.f32.mrf.mxu0  ;;  %v6556_v39 = vld [vmem:[%s8103_s24 + $0xb0] sm:$0x1] }
 0x184   : > { %v6887_v5 = vcombine.low %v9495_v10, %v9498_v41  ;;  %v1736_v62 = vrot.slane %v1734_v7, 4  ;;  %v1739_v27 = vrot.slane %v1737_v44, 5  ;;  %v9671_v24 = vadd.f32 %v3506_v47, %v3339_v42  ;;  %v9690_v42 = vld [vmem:[%s8103_s24 + $0xb8] sm:$0xf] }
 0x185   : > { %10609 = vst [vmem:[#allocation51_spill] sm:$0xff] %v9664_v12  ;;  %v10610_v38 = vcombine.low %v9393_v21, %v9409_v15  ;;  %v1707_v52 = vrot.slane %v1705_v50, 5  ;;  %v9678_v11 = vrot.slane %v1743_v36, 5  ;;  %v1749_v10 = vrot.slane %v1747_v49, 4  ;;  %v7495_v41 = vpop.f32.mrf.mxu1  ;;  %v3355_v7 = vpop.f32.mrf.mxu0  ;;  %v9701_v36 = vld [vmem:[%s8103_s24 + $0xc4] sm:$0xf] }
 0x186   : > { %v9680_v57 = vcombine.low %v1674_v58, %v1684_v22  ;;  %v1698_v47 = vsel %vm8133_vm3, %v9655_v19, %v9621_v18  ;;  %v1703_v21 = vrot.slane %v1702_v0, 4  ;;  %v6888_v15 = vcombine.low %v9536_v13, %v9559_v31 }
 0x187   : > { %7667 = vmatmul.mubr.msk.bf16.gmra.mxu0 %vm2064_vm1, %v10610_v38  ;;  %v9692_v50 = vadd.f32 %v7495_v41, %v7461_v45  ;;  %v1716_v44 = vor.u32 %v1715_v59, %v1712_v2  ;;  %v1726_v58 = vor.u32 %v1725_v56, %v9662_v34  ;;  %v9695_v22 = vrot.slane %v1729_v61, 5  ;;  %v3509_v49 = vpop.f32.mrf.mxu1  ;;  %v7465_v45 = vpop.f32.mrf.mxu0 }
 0x188   : > { %7670 = vmatprep.mubr.msk.bf16.mxu0 %vm2064_vm1, %v6886_v4  ;;  %v9698_v4 = vld [vmem:[%s8103_s24 + $0xc0] sm:$0xf]  ;;  %v1740_v18 = vor.u32 %v1739_v27, %v1736_v62  ;;  %v1753_v19 = vshll.u32 %v6556_v39, 16  ;;  %v1758_v0 = vshrl.u32 %v9669_v25, 16  ;;  %v1761_v13 = vshll.u32 %v9669_v25, 16 }
 0x189   : > { %v9705_v31 = vadd.f32 %v3509_v49, %v3342_v32  ;;  %v1750_v2 = vor.u32 %v1749_v10, %v9678_v11  ;;  %v1767_v59 = vshll.u32 %v9690_v42, 16  ;;  %v1771_v61 = vshrl.u32 %v9690_v42, 16  ;;  %v7498_v56 = vpop.f32.mrf.mxu1  ;;  %7701 = vmatmul.mubr.msk.bf16.gmra.mxu1 %vm2064_vm1, %v9603_v46  ;;  %v3358_v10 = vpop.f32.mrf.mxu0 }
 0x18a   : > { %v1782_v62 = vshrl.u32 %v9698_v4, 16  ;;  %v1785_v27 = vshll.u32 %v9698_v4, 16  ;;  %v1791_v38 = vshll.u32 %v9701_v36, 16  ;;  %v1795_v32 = vshrl.u32 %v9701_v36, 16  ;;  %7704 = vmatprep.mubr.msk.bf16.mxu1 %vm2064_vm1, %v9664_v12 }
 0x18b   : > { %v9716_v39 = vadd.f32 %v7498_v56, %v7464_v14  ;;  %v1708_v41 = vsel %vm8133_vm3, %v1703_v21, %v1707_v52  ;;  %v1717_v49 = vrot.slane %v1716_v44, 4  ;;  %v1727_v46 = vrot.slane %v1726_v58, 4  ;;  %v3522_v35 = vpop.f32.mrf.mxu1  ;;  %v7468_v6 = vpop.f32.mrf.mxu0  ;;  %v6557_v56 = vld [vmem:[%s8103_s24 + $0xbc] sm:$0x1] }
 0x18c   : > { %v1741_v37 = vrot.slane %v1740_v18, 4  ;;  %v1755_v55 = vrot.slane %v1753_v19, 5  ;;  %v1760_v17 = vrot.slane %v1758_v0, 4  ;;  %v1763_v43 = vrot.slane %v1761_v13, 5  ;;  %v6558_v13 = vld [vmem:[%s8103_s24 + $0xc8] sm:$0x1] }
 0x18d   : > { %10611 = vst [vmem:[#allocation21_spill] sm:$0xff] %v9716_v39  ;;  %v9722_v8 = vadd.f32 %v3522_v35, %v3355_v7  ;;  %v1751_v14 = vrot.slane %v1750_v2, 4  ;;  %v9726_v12 = vrot.slane %v1767_v59, 5  ;;  %v1773_v39 = vrot.slane %v1771_v61, 4  ;;  %v7499_v52 = vpop.f32.mrf.mxu1  ;;  %v3371_v18 = vpop.f32.mrf.mxu0 }
 0x18e   : > { %v1784_v21 = vrot.slane %v1782_v62, 4  ;;  %v1787_v44 = vrot.slane %v1785_v27, 5  ;;  %v9729_v58 = vrot.slane %v1791_v38, 5  ;;  %v1797_v35 = vrot.slane %v1795_v32, 4 }
 0x18f   : > { %7671 = vmatmul.mubr.msk.bf16.gmra.mxu0 %vm2064_vm1, %v6887_v5  ;;  %v9731_v7 = vadd.f32 %v7499_v52, %v7465_v45  ;;  %v9733_v5 = vcombine.low %v1698_v47, %v1708_v41  ;;  %v1722_v19 = vsel %vm8133_vm3, %v1717_v49, %v9662_v34  ;;  %v6889_v0 = vcombine.low %v9601_v53, %v9610_v30  ;;  %v3525_v2 = vpop.f32.mrf.mxu1  ;;  %v9753_v34 = vld [vmem:[%s8103_s24 + $0xd0] sm:$0xf]  ;;  %v7469_v53 = vpop.f32.mrf.mxu0 }
 0x190   : > { %7674 = vmatprep.mubr.msk.bf16.mxu0 %vm2064_vm1, %v6888_v15  ;;  %v9742_v15 = vld [vmem:[%s8103_s24 + $0xcc] sm:$0xf]  ;;  %v1732_v59 = vsel %vm8133_vm3, %v1727_v46, %v9695_v22  ;;  %v1746_v47 = vsel %vm8133_vm3, %v1741_v37, %v9678_v11  ;;  %v1777_v45 = vshll.u32 %v6557_v56, 16  ;;  %v6890_v61 = vcombine.low %v9624_v9, %v9633_v48 }
 0x191   : > { %10612 = vst [vmem:[#allocation19_spill] sm:$0xff] %v9733_v5  ;;  %v9755_v62 = vadd.f32 %v3525_v2, %v3358_v10  ;;  %v1756_v30 = vsel %vm8133_vm3, %v1751_v14, %v1755_v55  ;;  %v1764_v27 = vor.u32 %v1763_v43, %v1760_v17  ;;  %v1774_v38 = vor.u32 %v1773_v39, %v9726_v12  ;;  %v7502_v46 = vpop.f32.mrf.mxu1  ;;  %v3374_v32 = vpop.f32.mrf.mxu0 }
 0x192   : > { %7705 = vmatmul.mubr.msk.bf16.gmra.mxu1 %vm2064_vm1, %v9680_v57  ;;  %v1788_v37 = vor.u32 %v1787_v44, %v1784_v21  ;;  %v1798_v11 = vor.u32 %v1797_v35, %v9729_v58  ;;  %v1801_v22 = vshll.u32 %v6558_v13, 16  ;;  %v1806_v9 = vshrl.u32 %v9742_v15, 16 }
 0x193   : > { %v9764_v48 = vadd.f32 %v7502_v46, %v7468_v6  ;;  %7708 = vmatprep.mubr.msk.bf16.mxu1 %vm2064_vm1, %v9733_v5  ;;  %v1809_v17 = vshll.u32 %v9742_v15, 16  ;;  %v1815_v43 = vshll.u32 %v9753_v34, 16  ;;  %v1819_v55 = vshrl.u32 %v9753_v34, 16  ;;  %v3538_v39 = vpop.f32.mrf.mxu1  ;;  %v7472_v14 = vpop.f32.mrf.mxu0 }
 0x194   : > { %v9771_v10 = vcombine.low %v1722_v19, %v1732_v59  ;;  %v1779_v41 = vrot.slane %v1777_v45, 5  ;;  %v9773_v49 = vadd.f32 %v3538_v39, %v3371_v18  ;;  %v9776_v6 = vcombine.low %v1746_v47, %v1756_v30 }
 0x195   : > { %v1765_v56 = vrot.slane %v1764_v27, 4  ;;  %v1775_v52 = vrot.slane %v1774_v38, 4  ;;  %v7503_v21 = vpop.f32.mrf.mxu1  ;;  %v1789_v44 = vrot.slane %v1788_v37, 4  ;;  %v1799_v35 = vrot.slane %v1798_v11, 4  ;;  %v3387_v59 = vpop.f32.mrf.mxu0 }
 0x196   : > { %v1803_v13 = vrot.slane %v1801_v22, 5  ;;  %v1808_v2 = vrot.slane %v1806_v9, 4  ;;  %v9779_v19 = vadd.f32 %v7503_v21, %v7469_v53  ;;  %v1811_v18 = vrot.slane %v1809_v17, 5 }
 0x197   : > { %7675 = vmatmul.mubr.msk.bf16.gmra.mxu0 %vm2064_vm1, %v6889_v0  ;;  %v1817_v45 = vrot.slane %v1815_v43, 5  ;;  %v1821_v46 = vrot.slane %v1819_v55, 4  ;;  %v3541_v39 = vpop.f32.mrf.mxu1  ;;  %v6559_v0 = vld [vmem:[%s8103_s24 + $0xd4] sm:$0x1]  ;;  %v7473_v47 = vpop.f32.mrf.mxu0  ;;  %v1770_v30 = vsel %vm8133_vm3, %v1765_v56, %v9726_v12  ;;  %v1780_v53 = vsel %vm8133_vm3, %v1775_v52, %v1779_v41 }
 0x198   : > { %7678 = vmatprep.mubr.msk.bf16.mxu0 %vm2064_vm1, %v6890_v61  ;;  %v9782_v5 = vadd.f32 %v3541_v39, %v3374_v32  ;;  %v6891_v61 = vcombine.low %v9669_v25, %v9690_v42  ;;  %v1794_v38 = vsel %vm8133_vm3, %v1789_v44, %v9729_v58  ;;  %v1804_v37 = vsel %vm8133_vm3, %v1799_v35, %v1803_v13 }
 0x199   : > { %v7506_v27 = vpop.f32.mrf.mxu1  ;;  %v6892_v12 = vcombine.low %v9698_v4, %v9701_v36  ;;  %v3390_v25 = vpop.f32.mrf.mxu0  ;;  %v1812_v42 = vor.u32 %v1811_v18, %v1808_v2  ;;  %v1822_v22 = vor.u32 %v1821_v46, %v1817_v45  ;;  %v1825_v9 = vshll.u32 %v6559_v0, 16 }
 0x19a   : > { %7709 = vmatmul.mubr.msk.bf16.gmra.mxu1 %vm2064_vm1, %v9771_v10  ;;  %v9800_v11 = vadd.f32 %v7506_v27, %v7472_v14  ;;  %v9807_v55 = vcombine.low %v1770_v30, %v1780_v53  ;;  %v9809_v41 = vcombine.low %v1794_v38, %v1804_v37  ;;  %v6893_v13 = vcombine.low %v9742_v15, %v9753_v34 }
 0x19b   : > { %7712 = vmatprep.mubr.msk.bf16.mxu1 %vm2064_vm1, %v9776_v6  ;;  %v3554_v32 = vpop.f32.mrf.mxu1  ;;  %v7476_v43 = vpop.f32.mrf.mxu0  ;;  %v1813_v14 = vrot.slane %v1812_v42, 4  ;;  %v1823_v56 = vrot.slane %v1822_v22, 4  ;;  %v1827_v52 = vrot.slane %v1825_v9, 5 }
 0x19c   : > { %v9804_v17 = vadd.f32 %v3554_v32, %v3387_v59 }
 0x19d   : > { %v7507_v58 = vpop.f32.mrf.mxu1  ;;  %v3403_v36 = vpop.f32.mrf.mxu0  ;;  %v1818_v18 = vsel %vm8133_vm3, %v1813_v14, %v1817_v45  ;;  %v1828_v46 = vsel %vm8133_vm3, %v1823_v56, %v1827_v52  ;;  %v10616_v14 = vld [vmem:[#allocation44_spill] sm:$0xff] }
 0x19e   : > { %v9812_v4 = vadd.f32 %v7507_v58, %v7473_v47  ;;  %v9831_v30 = vcombine.low %v1818_v18, %v1828_v46  ;;  %v10617_v46 = vld [vmem:[#allocation5_spill] sm:$0xff] }
 0x19f   : > { %7679 = vmatmul.mubr.msk.bf16.gmra.mxu0 %vm2064_vm1, %v6891_v61  ;;  %v3557_v21 = vpop.f32.mrf.mxu1  ;;  %v7477_v35 = vpop.f32.mrf.mxu0  ;;  %v10613_v61 = vld [vmem:[#allocation42_spill] sm:$0xff] }
 0x1a0   : > { %7682 = vmatprep.mubr.msk.bf16.mxu0 %vm2064_vm1, %v6892_v12  ;;  %v9814_v44 = vadd.f32 %v3557_v21, %v3390_v25  ;;  %v10614_v25 = vld [vmem:[#allocation4_spill] sm:$0xff] }
 0x1a1   : > { %v7510_v2 = vpop.f32.mrf.mxu1  ;;  %v3406_v39 = vpop.f32.mrf.mxu0 }
 0x1a2   : > { %7713 = vmatmul.mubr.msk.bf16.gmra.mxu1 %vm2064_vm1, %v9807_v55  ;;  %v9820_v59 = vadd.f32 %v7510_v2, %v7476_v43  ;;  %v10615_v43 = vld [vmem:[#allocation43_spill] sm:$0xff] }
 0x1a3   : > { %7716 = vmatprep.mubr.msk.bf16.mxu1 %vm2064_vm1, %v9809_v41  ;;  %v3570_v0 = vpop.f32.mrf.mxu1  ;;  %v7480_v15 = vpop.f32.mrf.mxu0 }
 0x1a4   : > { %v9828_v47 = vadd.f32 %v3570_v0, %v3403_v36 }
 0x1a5   : > { %v7511_v34 = vpop.f32.mrf.mxu1  ;;  %v3419_v53 = vpop.f32.mrf.mxu0 }
 0x1a6   : > { %v9835_v27 = vadd.f32 %v7511_v34, %v7477_v35 }
 0x1a7   : > { %7683 = vmatmul.mubr.msk.bf16.gmra.mxu0 %vm2064_vm1, %v6893_v13  ;;  %v3573_v45 = vpop.f32.mrf.mxu1  ;;  %v7481_v29 = vpop.f32.mrf.mxu0 }
 0x1a8   : > { %7722 = vmatprep.mubr.msk.bf16.mxu0 %vm2064_vm1, %v10613_v61  ;;  %v9837_v38 = vadd.f32 %v3573_v45, %v3406_v39 }
 0x1a9   : > { %v7514_v37 = vpop.f32.mrf.mxu1  ;;  %v3422_v42 = vpop.f32.mrf.mxu0 }
 0x1aa   : > { %7717 = vmatmul.mubr.msk.bf16.gmra.mxu1 %vm2064_vm1, %v9831_v30  ;;  %v9841_v12 = vadd.f32 %v7514_v37, %v7480_v15  ;;  %v10620_v37 = vld [vmem:[#allocation46_spill] sm:$0xff] }
 0x1ab   : > { %7756 = vmatprep.mubr.msk.bf16.mxu1 %vm2064_vm1, %v10614_v25  ;;  %v3586_v22 = vpop.f32.mrf.mxu1  ;;  %v7520_v32 = vpop.f32.mrf.mxu0 }
 0x1ac   : > { %v9845_v9 = vadd.f32 %v3586_v22, %v3419_v53  ;;  %v3773_v36 = vadd.f32 %v7520_v32, %v9531_v26  ;;  %v10619_v53 = vld [vmem:[#allocation45_spill] sm:$0xff] }
 0x1ad   : > { %v7515_v58 = vpop.f32.mrf.mxu1  ;;  %v3644_v52 = vpop.f32.mrf.mxu0 }
 0x1ae   : > { %v9853_v56 = vadd.f32 %v7515_v58, %v7481_v29  ;;  %v3771_v35 = vadd.f32 %v3644_v52, %v9546_v60 }
 0x1af   : > { %7723 = vmatmul.mubr.msk.bf16.vlgmr.msra.gmra.mxu0 %vm2064_vm1, %v10615_v43  ;;  %v3589_v21 = vpop.f32.mrf.mxu1  ;;  %v7521_v2 = vpop.f32.mrf.mxu0 }
 0x1b0   : > { %7789 = vmatpush3.bf16.msra.mxu0 %v9479_v1  ;;  %7726 = vmatprep.mubr.msk.bf16.mxu0 %vm2064_vm1, %v10616_v14  ;;  %v9856_v13 = vadd.f32 %v3589_v21, %v3422_v42  ;;  %v3774_v26 = vadd.f32 %v7521_v2, %v9565_v54  ;;  %v10618_v1 = vld [vmem:[#allocation8_spill] sm:$0xff] }
 0x1b1   : > { %v7554_v18 = vpop.f32.mrf.mxu1  ;;  %v3647_v0 = vpop.f32.mrf.mxu0  ;;  %v10622_v21 = vld [vmem:[#allocation12_spill] sm:$0xff] }
 0x1b2   : > { %7757 = vmatmul.mubr.msk.bf16.vlgmr.msra.gmra.mxu1 %vm2064_vm1, %v10617_v46  ;;  %v4071_v39 = vadd.f32 %v7554_v18, %v3773_v36  ;;  %v3772_v34 = vadd.f32 %v3647_v0, %v9575_v20  ;;  %v10621_v20 = vld [vmem:[#allocation9_spill] sm:$0xff] }
 0x1b3   : > { %7823 = vmatpush3.bf16.msra.mxu1 %v9519_v33  ;;  %7760 = vmatprep.mubr.msk.bf16.mxu1 %vm2064_vm1, %v10618_v1  ;;  %v3942_v15 = vpop.f32.mrf.mxu1  ;;  %v7524_v61 = vpop.f32.mrf.mxu0 }
 0x1b4   : > { %v4069_v60 = vadd.f32 %v3942_v15, %v3771_v35  ;;  %v3777_v29 = vadd.f32 %v7524_v61, %v9584_v51  ;;  %v10623_v15 = vld [vmem:[#allocation47_spill] sm:$0xff] }
 0x1b5   : > { %v7555_v45 = vpop.f32.mrf.mxu1  ;;  %v3660_v33 = vpop.f32.mrf.mxu0 }
 0x1b6   : > { %v4072_v54 = vadd.f32 %v7555_v45, %v3774_v26  ;;  %v3775_v42 = vadd.f32 %v3660_v33, %v9612_v40  ;;  %v6039_v36 = vmul.f32 %v4069_v60, %v4069_v60  ;;  %v6041_v40 = vmul.f32 %v4071_v39, %v4071_v39 }
 0x1b7   : > { %7727 = vmatmul.mubr.msk.bf16.gmra.mxu0 %vm2064_vm1, %v10619_v53  ;;  %v3945_v25 = vpop.f32.mrf.mxu1  ;;  %v7525_v32 = vpop.f32.mrf.mxu0 }
 0x1b8   : > { %7730 = vmatprep.mubr.msk.bf16.mxu0 %vm2064_vm1, %v10620_v37  ;;  %v4070_v22 = vadd.f32 %v3945_v25, %v3772_v34  ;;  %v3778_v58 = vadd.f32 %v7525_v32, %v9635_v28  ;;  %v6042_v61 = vmul.f32 %v4072_v54, %v4072_v54 }
 0x1b9   : > { %v7558_v43 = vpop.f32.mrf.mxu1  ;;  %v3663_v35 = vpop.f32.mrf.mxu0 }
 0x1ba   : > { %7761 = vmatmul.mubr.msk.bf16.gmra.mxu1 %vm2064_vm1, %v10621_v20  ;;  %v6001_v14 = vadd.f32 %v4070_v22, %v4069_v60  ;;  %v6040_v52 = vmul.f32 %v4070_v22, %v4070_v22  ;;  %v4075_v51 = vadd.f32 %v7558_v43, %v3777_v29  ;;  %v3776_v18 = vadd.f32 %v3663_v35, %v9647_v16  ;;  %v10624_v60 = vld [vmem:[#allocation48_spill] sm:$0xff] }
 0x1bb   : > { %7764 = vmatprep.mubr.msk.bf16.mxu1 %vm2064_vm1, %v10622_v21  ;;  %v3958_v2 = vpop.f32.mrf.mxu1  ;;  %v7528_v0 = vpop.f32.mrf.mxu0 }
 0x1bc   : > { %v6002_v46 = vadd.f32 %v6001_v14, %v4071_v39  ;;  %v6071_v26 = vadd.f32 %v6040_v52, %v6039_v36  ;;  %v4073_v1 = vadd.f32 %v3958_v2, %v3775_v42  ;;  %v3781_v34 = vadd.f32 %v7528_v0, %v9658_v23 }
 0x1bd   : > { %v7559_v28 = vpop.f32.mrf.mxu1  ;;  %v3676_v37 = vpop.f32.mrf.mxu0  ;;  %v6045_v21 = vmul.f32 %v4075_v51, %v4075_v51 }
 0x1be   : > { %v6072_v53 = vadd.f32 %v6071_v26, %v6041_v40  ;;  %v6003_v45 = vadd.f32 %v6002_v46, %v4072_v54  ;;  %v4076_v29 = vadd.f32 %v7559_v28, %v3778_v58  ;;  %v3779_v39 = vadd.f32 %v3676_v37, %v9671_v24  ;;  %v10625_v46 = vld [vmem:[#allocation49_spill] sm:$0xff] }
 0x1bf   : > { %7731 = vmatmul.mubr.msk.bf16.gmra.mxu0 %vm2064_vm1, %v10623_v15  ;;  %v3961_v16 = vpop.f32.mrf.mxu1  ;;  %v6043_v25 = vmul.f32 %v4073_v1, %v4073_v1  ;;  %v7529_v32 = vpop.f32.mrf.mxu0 }
 0x1c0   : > { %7734 = vmatprep.mubr.msk.bf16.mxu0 %vm2064_vm1, %v10624_v60  ;;  %v6004_v33 = vadd.f32 %v6003_v45, %v4073_v1  ;;  %v6073_v42 = vadd.f32 %v6072_v53, %v6042_v61  ;;  %v4074_v22 = vadd.f32 %v3961_v16, %v3776_v18  ;;  %v3782_v23 = vadd.f32 %v7529_v32, %v9692_v50  ;;  %v10626_v50 = vld [vmem:[#allocation21_spill] sm:$0xff]  ;;  %v10627_v1 = vld [vmem:[#allocation50_spill] sm:$0xff]  ;;  %v10629_v32 = vld [vmem:[#allocation20_spill] sm:$0xff] }
 0x1c1   : > { %v7562_v43 = vpop.f32.mrf.mxu1  ;;  %v3679_v58 = vpop.f32.mrf.mxu0  ;;  %v6046_v0 = vmul.f32 %v4076_v29, %v4076_v29 }
 0x1c2   : > { %7765 = vmatmul.mubr.msk.bf16.gmra.mxu1 %vm2064_vm1, %v8442_v63  ;;  %v6074_v20 = vadd.f32 %v6073_v42, %v6043_v25  ;;  %v6005_v36 = vadd.f32 %v6004_v33, %v4074_v22  ;;  %v6044_v14 = vmul.f32 %v4074_v22, %v4074_v22  ;;  %v4079_v54 = vadd.f32 %v7562_v43, %v3781_v34 }
 0x1c3   : > { %7768 = vmatprep.mubr.msk.bf16.mxu1 %vm2064_vm1, %v8464_v3  ;;  %v3974_v24 = vpop.f32.mrf.mxu1  ;;  %v3780_v52 = vadd.f32 %v3679_v58, %v9705_v31  ;;  %v7532_v40 = vpop.f32.mrf.mxu0 }
 0x1c4   : > { %v6006_v35 = vadd.f32 %v6005_v36, %v4075_v51  ;;  %v6075_v2 = vadd.f32 %v6074_v20, %v6044_v14  ;;  %v4077_v18 = vadd.f32 %v3974_v24, %v3779_v39  ;;  %v3785_v26 = vadd.f32 %v7532_v40, %v10626_v50  ;;  %v10628_v39 = vld [vmem:[#allocation15_spill] sm:$0xff] }
 0x1c5   : > { %v7563_v63 = vpop.f32.mrf.mxu1  ;;  %v3692_v34 = vpop.f32.mrf.mxu0  ;;  %v6049_v20 = vmul.f32 %v4079_v54, %v4079_v54 }
 0x1c6   : > { %v6076_v3 = vadd.f32 %v6075_v2, %v6045_v21  ;;  %v6007_v15 = vadd.f32 %v6006_v35, %v4076_v29  ;;  %v4080_v28 = vadd.f32 %v7563_v63, %v3782_v23  ;;  %v3783_v51 = vadd.f32 %v3692_v34, %v9722_v8  ;;  %v10631_v35 = vld [vmem:[#allocation22_spill] sm:$0xff]  ;;  %v10632_v34 = vld [vmem:[#allocation23_spill] sm:$0xff] }
 0x1c7   : > { %7735 = vmatmul.mubr.msk.bf16.gmra.mxu0 %vm2064_vm1, %v10625_v46  ;;  %v3977_v31 = vpop.f32.mrf.mxu1  ;;  %v6047_v61 = vmul.f32 %v4077_v18, %v4077_v18  ;;  %v7533_v37 = vpop.f32.mrf.mxu0 }
 0x1c8   : > { %7738 = vmatprep.mubr.msk.bf16.mxu0 %vm2064_vm1, %v10627_v1  ;;  %v6008_v60 = vadd.f32 %v6007_v15, %v4077_v18  ;;  %v6077_v53 = vadd.f32 %v6076_v3, %v6046_v0  ;;  %v4078_v45 = vadd.f32 %v3977_v31, %v3780_v52  ;;  %v3786_v33 = vadd.f32 %v7533_v37, %v9731_v7  ;;  %v10630_v52 = vld [vmem:[#allocation25_spill] sm:$0xff] }
 0x1c9   : > { %v7566_v16 = vpop.f32.mrf.mxu1  ;;  %v3695_v43 = vpop.f32.mrf.mxu0  ;;  %v6050_v2 = vmul.f32 %v4080_v28, %v4080_v28 }
 0x1ca   : > { %7769 = vmatmul.mubr.msk.bf16.gmra.mxu1 %vm2064_vm1, %v10628_v39  ;;  %v6078_v25 = vadd.f32 %v6077_v53, %v6047_v61  ;;  %v6009_v42 = vadd.f32 %v6008_v60, %v4078_v45  ;;  %v6048_v22 = vmul.f32 %v4078_v45, %v4078_v45  ;;  %v4083_v29 = vadd.f32 %v7566_v16, %v3785_v26  ;;  %v10633_v61 = vld [vmem:[#allocation28_spill] sm:$0xff] }
 0x1cb   : > { %7772 = vmatprep.mubr.msk.bf16.mxu1 %vm2064_vm1, %v10629_v32  ;;  %v3990_v8 = vpop.f32.mrf.mxu1  ;;  %v3784_v23 = vadd.f32 %v3695_v43, %v9755_v62  ;;  %v7536_v24 = vpop.f32.mrf.mxu0  ;;  %v10635_v32 = vld [vmem:[#allocation52_spill] sm:$0xff]  ;;  %v7993_v43 = vld [vmem:[%s8103_s24 + $0x1c] sm:$0xf] }
 0x1cc   : > { %v6010_v36 = vadd.f32 %v6009_v42, %v4079_v54  ;;  %v6079_v14 = vadd.f32 %v6078_v25, %v6048_v22  ;;  %v4081_v58 = vadd.f32 %v3990_v8, %v3783_v51  ;;  %v3789_v21 = vadd.f32 %v7536_v24, %v9764_v48  ;;  %v10634_v42 = vld [vmem:[#allocation27_spill] sm:$0xff] }
 0x1cd   : > { %v7567_v7 = vpop.f32.mrf.mxu1  ;;  %v3708_v63 = vpop.f32.mrf.mxu0  ;;  %v6053_v37 = vmul.f32 %v4083_v29, %v4083_v29  ;;  %v1895_v8 = vrot.slane %v7993_v43, 5 }
 0x1ce   : > { %v6080_v18 = vadd.f32 %v6079_v14, %v6049_v20  ;;  %v6011_v40 = vadd.f32 %v6010_v36, %v4080_v28  ;;  %v4084_v46 = vadd.f32 %v7567_v7, %v3786_v33  ;;  %v3787_v54 = vadd.f32 %v3708_v63, %v9773_v49  ;;  %v6560_v14 = vld [vmem:[%s8103_s24 + $0x18] sm:$0xe] }
 0x1cf   : > { %7739 = vmatmul.mubr.msk.bf16.gmra.mxu0 %vm2064_vm1, %v10630_v52  ;;  %v3993_v62 = vpop.f32.mrf.mxu1  ;;  %v6051_v26 = vmul.f32 %v4081_v58, %v4081_v58  ;;  %v7537_v3 = vpop.f32.mrf.mxu0  ;;  %v1897_v63 = vrot.slane %v1895_v8, 4 }
 0x1d0   : > { %7742 = vmatprep.mubr.msk.bf16.mxu0 %vm2064_vm1, %v10631_v35  ;;  %v6012_v50 = vadd.f32 %v6011_v40, %v4081_v58  ;;  %v6081_v1 = vadd.f32 %v6080_v18, %v6050_v2  ;;  %v4082_v0 = vadd.f32 %v3993_v62, %v3784_v23  ;;  %v3790_v48 = vadd.f32 %v7537_v3, %v9779_v19  ;;  %v10636_v18 = vld [vmem:[#allocation29_spill] sm:$0xff]  ;;  %v7994_v62 = vld [vmem:[%s8103_s24 + $0x20] sm:$0x1] }
 0x1d1   : > { %v7570_v15 = vpop.f32.mrf.mxu1  ;;  %v3711_v49 = vpop.f32.mrf.mxu0  ;;  %v6054_v23 = vmul.f32 %v4084_v46, %v4084_v46 }
 0x1d2   : > { %7773 = vmatmul.mubr.msk.bf16.gmra.mxu1 %vm2064_vm1, %v10632_v34  ;;  %v6082_v31 = vadd.f32 %v6081_v1, %v6051_v26  ;;  %v6013_v51 = vadd.f32 %v6012_v50, %v4082_v0  ;;  %v6052_v28 = vmul.f32 %v4082_v0, %v4082_v0  ;;  %v4087_v60 = vadd.f32 %v7570_v15, %v3789_v21  ;;  %v10637_v0 = vld [vmem:[#allocation32_spill] sm:$0xff] }
 0x1d3   : > { %7776 = vmatprep.mubr.msk.bf16.mxu1 %vm2064_vm1, %v10633_v61  ;;  %v4006_v53 = vpop.f32.mrf.mxu1  ;;  %v3788_v45 = vadd.f32 %v3711_v49, %v9782_v5  ;;  %v7540_v25 = vpop.f32.mrf.mxu0 }
 0x1d4   : > { %v6014_v16 = vadd.f32 %v6013_v51, %v4083_v29  ;;  %v6083_v39 = vadd.f32 %v6082_v31, %v6052_v28  ;;  %v4085_v33 = vadd.f32 %v4006_v53, %v3787_v54  ;;  %v3793_v22 = vadd.f32 %v7540_v25, %v9800_v11  ;;  %v10638_v53 = vld [vmem:[#allocation39_spill] sm:$0xff] }
 0x1d5   : > { %v7571_v19 = vpop.f32.mrf.mxu1  ;;  %v3724_v29 = vpop.f32.mrf.mxu0  ;;  %v1898_v54 = vrot.slane %v7994_v62, 5  ;;  %v6057_v51 = vmul.f32 %v4087_v60, %v4087_v60  ;;  %v6562_v62 = vld [vmem:[%s8103_s24 + $0x30] sm:$0xe] }
 0x1d6   : > { %v6084_v20 = vadd.f32 %v6083_v39, %v6053_v37  ;;  %v6015_v5 = vadd.f32 %v6014_v16, %v4084_v46  ;;  %v4088_v36 = vadd.f32 %v7571_v19, %v3790_v48  ;;  %v3791_v24 = vadd.f32 %v3724_v29, %v9804_v17  ;;  %v7995_v48 = vld [vmem:[%s8103_s24 + $0x28] sm:$0xf]  ;;  %v10639_v39 = vld [vmem:[#allocation40_spill] sm:$0xff] }
 0x1d7   : > { %7743 = vmatmul.mubr.msk.bf16.gmra.mxu0 %vm2064_vm1, %v10634_v42  ;;  %v4009_v58 = vpop.f32.mrf.mxu1  ;;  %v6055_v7 = vmul.f32 %v4085_v33, %v4085_v33  ;;  %v7541_v11 = vpop.f32.mrf.mxu0  ;;  %v6576_v46 = vrot.slane %v6560_v14, 9  ;;  %v1902_v31 = vrot.slane %v7995_v48, 5 }
 0x1d8   : > { %7746 = vmatprep.mubr.msk.bf16.mxu0 %vm2064_vm1, %v10635_v32  ;;  %v6016_v52 = vadd.f32 %v6015_v5, %v4085_v33  ;;  %v6085_v21 = vadd.f32 %v6084_v20, %v6054_v23  ;;  %v4086_v35 = vadd.f32 %v4009_v58, %v3788_v45  ;;  %v3794_v40 = vadd.f32 %v7541_v11, %v9812_v4  ;;  %v6561_v45 = vld [vmem:[%s8103_s24 + $0x24] sm:$0xe]  ;;  %v7996_v5 = vld [vmem:[%s8103_s24 + $0x2c] sm:$0x1] }
 0x1d9   : > { %v7574_v2 = vpop.f32.mrf.mxu1  ;;  %v3727_v3 = vpop.f32.mrf.mxu0  ;;  %v6058_v25 = vmul.f32 %v4088_v36, %v4088_v36  ;;  %v6577_v23 = vrot.slane %v6561_v45, 9  ;;  %v1904_v20 = vrot.slane %v1902_v31, 4  ;;  %v1905_v29 = vrot.slane %v7996_v5, 5 }
 0x1da   : > { %7777 = vmatmul.mubr.msk.bf16.gmra.mxu1 %vm2064_vm1, %v10636_v18  ;;  %v6086_v50 = vadd.f32 %v6085_v21, %v6055_v7  ;;  %v6017_v26 = vadd.f32 %v6016_v52, %v4086_v35  ;;  %v6056_v17 = vmul.f32 %v4086_v35, %v4086_v35  ;;  %v4091_v1 = vadd.f32 %v7574_v2, %v3793_v22  ;;  %v10641_v21 = vld [vmem:[#allocation33_spill] sm:$0xff]  ;;  %v7997_v35 = vld [vmem:[%s8103_s24 + $0x34] sm:$0xf] }
 0x1db   : > { %7780 = vmatprep.mubr.msk.bf16.mxu1 %vm2064_vm1, %v10637_v0  ;;  %v4022_v15 = vpop.f32.mrf.mxu1  ;;  %v3792_v34 = vadd.f32 %v3727_v3, %v9814_v44  ;;  %v7544_v49 = vpop.f32.mrf.mxu0  ;;  %v9937_v44 = vsel %vm8653_vm6, %v6576_v46, %v1895_v8  ;;  %v1909_v11 = vrot.slane %v7997_v35, 5  ;;  %v10642_v46 = vld [vmem:[#allocation36_spill] sm:$0xff] }
 0x1dc   : > { %v6018_v4 = vadd.f32 %v6017_v26, %v4087_v60  ;;  %v6087_v28 = vadd.f32 %v6086_v50, %v6056_v17  ;;  %v4089_v61 = vadd.f32 %v4022_v15, %v3791_v24  ;;  %v3797_v16 = vadd.f32 %v7544_v49, %v9820_v59 }
 0x1dd   : > { %v7575_v37 = vpop.f32.mrf.mxu1  ;;  %v9941_v60 = vsel %vm8653_vm6, %v1897_v63, %v1898_v54  ;;  %v3740_v32 = vpop.f32.mrf.mxu0  ;;  %v9961_v17 = vsel %vm8653_vm6, %v1904_v20, %v1905_v29  ;;  %v6061_v0 = vmul.f32 %v4091_v1, %v4091_v1  ;;  %v1911_v49 = vrot.slane %v1909_v11, 4  ;;  %v10645_v29 = vld [vmem:[#allocation38_spill] sm:$0xff] }
 0x1de   : > { %v6088_v42 = vadd.f32 %v6087_v28, %v6057_v51  ;;  %v6019_v19 = vadd.f32 %v6018_v4, %v4088_v36  ;;  %v4092_v22 = vadd.f32 %v7575_v37, %v3794_v40  ;;  %v3795_v59 = vadd.f32 %v3740_v32, %v9828_v47  ;;  %v10643_v51 = vld [vmem:[#allocation41_spill] sm:$0xff] }
 0x1df   : > { %7747 = vmatmul.mubr.msk.bf16.gmra.mxu0 %vm2064_vm1, %v10638_v53  ;;  %v4025_v43 = vpop.f32.mrf.mxu1  ;;  %v6059_v8 = vmul.f32 %v4089_v61, %v4089_v61  ;;  %v7545_v52 = vpop.f32.mrf.mxu0  ;;  %v7005_v26 = vcombine.low %v9937_v44, %v9941_v60  ;;  %v7998_v53 = vld [vmem:[%s8103_s24 + $0x38] sm:$0x1] }
 0x1e0   : > { %7750 = vmatprep.mubr.msk.bf16.mxu0 %vm2064_vm1, %v10639_v39  ;;  %v6020_v14 = vadd.f32 %v6019_v19, %v4089_v61  ;;  %v6089_v58 = vadd.f32 %v6088_v42, %v6058_v25  ;;  %v4090_v24 = vadd.f32 %v4025_v43, %v3792_v34  ;;  %v3798_v36 = vadd.f32 %v7545_v52, %v9835_v27  ;;  %v7999_v19 = vld [vmem:[%s8103_s24 + $0x40] sm:$0xf] }
 0x1e1   : > { %v7578_v7 = vpop.f32.mrf.mxu1  ;;  %v3743_v63 = vpop.f32.mrf.mxu0  ;;  %v9957_v27 = vsel %vm8653_vm6, %v6577_v23, %v1902_v31  ;;  %v10644_v31 = vld [vmem:[#allocation3_spill] sm:$0xff]  ;;  %v6578_v61 = vrot.slane %v6562_v62, 9  ;;  %v1912_v45 = vrot.slane %v7998_v53, 5  ;;  %v1916_v32 = vrot.slane %v7999_v19, 5  ;;  %v10649_v53 = vld [vmem:[#allocation14_spill] sm:$0xff] }
 0x1e2   : > { %7781 = vmatmul.mubr.msk.bf16.gmra.mxu1 %vm2064_vm1, %v10641_v21  ;;  %v6090_v2 = vadd.f32 %v6089_v58, %v6059_v8  ;;  %v6021_v47 = vadd.f32 %v6020_v14, %v4090_v24  ;;  %v6060_v18 = vmul.f32 %v4090_v24, %v4090_v24  ;;  %v4095_v40 = vadd.f32 %v7578_v7, %v3797_v16  ;;  %v8000_v58 = vld [vmem:[%s8103_s24 + $0x4c] sm:$0xf] }
 0x1e3   : > { %7784 = vmatprep.mubr.msk.bf16.mxu1 %vm2064_vm1, %v10642_v46  ;;  %v4038_v54 = vpop.f32.mrf.mxu1  ;;  %v3796_v50 = vadd.f32 %v3743_v63, %v9837_v38  ;;  %v7548_v48 = vpop.f32.mrf.mxu0  ;;  %v9966_v38 = vld [vmem:[%s8103_s24 + $0x3c] sm:$0xe]  ;;  %v7006_v42 = vcombine.low %v9957_v27, %v9961_v17  ;;  %v1913_v8 = vsel %vm8653_vm6, %v1911_v49, %v1912_v45  ;;  %v1923_v24 = vrot.slane %v8000_v58, 5  ;;  %v8001_v63 = vld [vmem:[%s8103_s24 + $0x44] sm:$0x1] }
 0x1e4   : > { %v6022_v3 = vadd.f32 %v6021_v47, %v4091_v1  ;;  %v6091_v15 = vadd.f32 %v6090_v2, %v6060_v18  ;;  %v4093_v34 = vadd.f32 %v4038_v54, %v3795_v59  ;;  %v3801_v28 = vadd.f32 %v7548_v48, %v9841_v12  ;;  %v6564_v2 = vld [vmem:[%s8103_s24 + $0x48] sm:$0xe]  ;;  %v10646_v47 = vld [vmem:[#allocation17_spill] sm:$0xff] }
 0x1e5   : > { %v7579_v4 = vpop.f32.mrf.mxu1  ;;  %v6062_v1 = vmul.f32 %v4092_v22, %v4092_v22  ;;  %v3756_v44 = vpop.f32.mrf.mxu0  ;;  %v6579_v12 = vrot.slane %v9966_v38, 9  ;;  %v5924_v18 = vrot.slane %v10646_v47, 4  ;;  %v1919_v62 = vrot.slane %v8001_v63, 5  ;;  %v8002_v38 = vld [vmem:[%s8103_s24 + $0x50] sm:$0x1] }
 0x1e6   : > { %v6092_v37 = vadd.f32 %v6091_v15, %v6061_v0  ;;  %v6023_v16 = vadd.f32 %v6022_v3, %v4092_v22  ;;  %v4096_v39 = vadd.f32 %v7579_v4, %v3798_v36  ;;  %v3799_v25 = vadd.f32 %v3756_v44, %v9845_v9  ;;  %v10647_v3 = vld [vmem:[#allocation6_spill] sm:$0xff] }
 0x1e7   : > { %7751 = vmatmul.mubr.msk.bf16.gmra.mxu0 %vm2064_vm1, %v10643_v51  ;;  %v4041_v60 = vpop.f32.mrf.mxu1  ;;  %v6063_v59 = vmul.f32 %v4093_v34, %v4093_v34  ;;  %v7549_v5 = vpop.f32.mrf.mxu0  ;;  %v1910_v9 = vsel %vm8653_vm6, %v6578_v61, %v1909_v11  ;;  %v1918_v11 = vrot.slane %v1916_v32, 4  ;;  %v6065_v54 = vmul.f32 %v4095_v40, %v4095_v40 }
 0x1e8   : > { %7790 = vmatprep.mubr.msk.bf16.mxu0 %vm2064_vm1, %v10644_v31  ;;  %v6024_v43 = vadd.f32 %v6023_v16, %v4093_v34  ;;  %v6093_v23 = vadd.f32 %v6092_v37, %v6062_v1  ;;  %v4094_v20 = vadd.f32 %v4041_v60, %v3796_v50  ;;  %v3802_v14 = vadd.f32 %v7549_v5, %v9853_v56  ;;  %v10648_v34 = vld [vmem:[#allocation7_spill] sm:$0xff] }
 0x1e9   : > { %v7582_v22 = vpop.f32.mrf.mxu1  ;;  %v3759_v35 = vpop.f32.mrf.mxu0  ;;  %v7007_v15 = vcombine.low %v1910_v9, %v1913_v8  ;;  %v6580_v48 = vrot.slane %v6564_v2, 9  ;;  %v1925_v51 = vrot.slane %v1923_v24, 4  ;;  %v6066_v4 = vmul.f32 %v4096_v39, %v4096_v39  ;;  %v6565_v9 = vld [vmem:[%s8103_s24 + $0x54] sm:$0xe] }
 0x1ea   : > { %7785 = vmatmul.mubr.msk.bf16.gmra.mxu1 %vm2064_vm1, %v10645_v29  ;;  %v6094_v52 = vadd.f32 %v6093_v23, %v6063_v59  ;;  %v6025_v7 = vadd.f32 %v6024_v43, %v4094_v20  ;;  %v6064_v21 = vmul.f32 %v4094_v20, %v4094_v20  ;;  %v4099_v36 = vadd.f32 %v7582_v22, %v3801_v28 }
 0x1eb   : > { %7824 = vmatprep.mubr.msk.bf16.mxu1 %vm2064_vm1, %v7005_v26  ;;  %v4054_v56 = vpop.f32.mrf.mxu1  ;;  %v3800_v46 = vadd.f32 %v3759_v35, %v9856_v13  ;;  %v7588_v0 = vpop.f32.mrf.mxu0  ;;  %v1926_v13 = vrot.slane %v8002_v38, 5  ;;  %v5925_v49 = vadd.f32 %v5924_v18, %v10646_v47  ;;  %v5994_v45 = vrot.slane %v10649_v53, 4 }
 0x1ec   : > { %v6026_v50 = vadd.f32 %v6025_v7, %v4095_v40  ;;  %v6095_v27 = vadd.f32 %v6094_v52, %v6064_v21  ;;  %v4097_v17 = vadd.f32 %v4054_v56, %v3799_v25  ;;  %v1917_v37 = vsel %vm8653_vm6, %v6579_v12, %v1916_v32  ;;  %v8003_v12 = vld [vmem:[%s8103_s24 + $0x58] sm:$0xf]  ;;  %v8004_v52 = vld [vmem:[%s8103_s24 + $0x64] sm:$0xf] }
 0x1ed   : > { %v7583_v26 = vpop.f32.mrf.mxu1  ;;  %v4147_v40 = vpop.f32.mrf.mxu0  ;;  %v1920_v16 = vsel %vm8653_vm6, %v1918_v11, %v1919_v62  ;;  %v1924_v59 = vsel %vm8653_vm6, %v6580_v48, %v1923_v24  ;;  %v1927_v23 = vsel %vm8653_vm6, %v1925_v51, %v1926_v13  ;;  %v1930_v32 = vrot.slane %v8003_v12, 5  ;;  %v10650_v56 = vld [vmem:[#allocation10_spill] sm:$0xff]  ;;  %v8006_v13 = vld [vmem:[%s8103_s24 + $0x68] sm:$0x1] }
 0x1ee   : > { %v6096_v28 = vadd.f32 %v6095_v27, %v6065_v54  ;;  %v6027_v31 = vadd.f32 %v6026_v50, %v4096_v39  ;;  %v4100_v61 = vadd.f32 %v7583_v26, %v3802_v14  ;;  %v6067_v60 = vmul.f32 %v4097_v17, %v4097_v17  ;;  %v8005_v50 = vld [vmem:[%s8103_s24 + $0x5c] sm:$0x1] }
 0x1ef   : > { %7791 = vmatmul.mubr.msk.bf16.vlgmr.msra.gmra.mxu0 %vm2064_vm1, %v10647_v3  ;;  %v4057_v1 = vpop.f32.mrf.mxu1  ;;  %v7589_v39 = vpop.f32.mrf.mxu0  ;;  %v5995_v8 = vadd.f32 %v5994_v45, %v10649_v53  ;;  %v7008_v24 = vcombine.low %v1917_v37, %v1920_v16  ;;  %v1937_v7 = vrot.slane %v8004_v52, 5  ;;  %v6069_v21 = vmul.f32 %v4099_v36, %v4099_v36 }
 0x1f0   : > { %7794 = vmatprep.mubr.msk.bf16.mxu0 %vm2064_vm1, %v10648_v34  ;;  %v6028_v44 = vadd.f32 %v6027_v31, %v4097_v17  ;;  %v6097_v25 = vadd.f32 %v6096_v28, %v6066_v4  ;;  %v4098_v19 = vadd.f32 %v4057_v1, %v3800_v46  ;;  %v6566_v46 = vld [vmem:[%s8103_s24 + $0x60] sm:$0xe]  ;;  %v7009_v63 = vcombine.low %v1924_v59, %v1927_v23  ;;  %v10651_v17 = vld [vmem:[#allocation11_spill] sm:$0xff] }
 0x1f1   : > { %v7622_v43 = vpop.f32.mrf.mxu1  ;;  %v4150_v14 = vpop.f32.mrf.mxu0  ;;  %v6581_v62 = vrot.slane %v6565_v9, 9  ;;  %v1932_v54 = vrot.slane %v1930_v32, 4  ;;  %v1933_v27 = vrot.slane %v8005_v50, 5  ;;  %v6582_v51 = vrot.slane %v6566_v46, 9 }
 0x1f2   : > { %7825 = vmatmul.mubr.msk.bf16.vlgmr.msra.gmra.mxu1 %vm2064_vm1, %v7006_v42  ;;  %v6098_v20 = vadd.f32 %v6097_v25, %v6067_v60  ;;  %v6029_v5 = vadd.f32 %v6028_v44, %v4098_v19  ;;  %v6068_v22 = vmul.f32 %v4098_v19, %v4098_v19  ;;  %v10007_v29 = vadd.f32 %v7622_v43, %v7588_v0 }
 0x1f3   : > { %7828 = vmatprep.mubr.msk.bf16.mxu1 %vm2064_vm1, %v7007_v15  ;;  %v5926_v42 = vrot.slane %v5925_v49, 2  ;;  %v4314_v58 = vpop.f32.mrf.mxu1  ;;  %v7592_v18 = vpop.f32.mrf.mxu0  ;;  %v6070_v0 = vmul.f32 %v4100_v61, %v4100_v61  ;;  %v1939_v38 = vrot.slane %v1937_v7, 4  ;;  %v1940_v4 = vrot.slane %v8006_v13, 5 }
 0x1f4   : > { %v6030_v35 = vadd.f32 %v6029_v5, %v4099_v36  ;;  %v6099_v2 = vadd.f32 %v6098_v20, %v6068_v22  ;;  %v10013_v47 = vadd.f32 %v4314_v58, %v4147_v40  ;;  %v5996_v28 = vrot.slane %v5995_v8, 2  ;;  %v10652_v58 = vld [vmem:[#allocation13_spill] sm:$0xff] }
 0x1f5   : > { %v7623_v11 = vpop.f32.mrf.mxu1  ;;  %v4163_v15 = vpop.f32.mrf.mxu0  ;;  %v5927_v34 = vadd.f32 %v5926_v42, %v5925_v49  ;;  %v8007_v49 = vld [vmem:[%s8103_s24 + $0x70] sm:$0xf]  ;;  %v1934_v25 = vsel %vm8653_vm6, %v1932_v54, %v1933_v27  ;;  %v1938_v23 = vsel %vm8653_vm6, %v6582_v51, %v1937_v7  ;;  %v1941_v12 = vsel %vm8653_vm6, %v1939_v38, %v1940_v4 }
 0x1f6   : > { %v6031_v36 = vadd.f32 %v6030_v35, %v4100_v61  ;;  %v6100_v3 = vadd.f32 %v6099_v2, %v6069_v21  ;;  %v10021_v26 = vadd.f32 %v7623_v11, %v7589_v39  ;;  %v1931_v61 = vsel %vm8653_vm6, %v6581_v62, %v1930_v32  ;;  %v6567_v39 = vld [vmem:[%s8103_s24 + $0x6c] sm:$0xe]  ;;  %v8008_v32 = vld [vmem:[%s8103_s24 + $0x7c] sm:$0xf]  ;;  %v8009_v2 = vld [vmem:[%s8103_s24 + $0x74] sm:$0x1] }
 0x1f7   : > { %7795 = vmatmul.mubr.msk.bf16.gmra.mxu0 %vm2064_vm1, %v10650_v56  ;;  %v4317_v48 = vpop.f32.mrf.mxu1  ;;  %v7593_v45 = vpop.f32.mrf.mxu0  ;;  %v1944_v37 = vrot.slane %v8007_v49, 5  ;;  %v5928_v43 = vrot.slane %v5927_v34, 1  ;;  %v1951_v20 = vrot.slane %v8008_v32, 5  ;;  %v5997_v5 = vadd.f32 %v5996_v28, %v5995_v8  ;;  %v10653_v56 = vld [vmem:[#allocation16_spill] sm:$0xff]  ;;  %v8011_v28 = vld [vmem:[%s8103_s24 + $0x88] sm:$0xf] }
 0x1f8   : > { %7798 = vmatprep.mubr.msk.bf16.mxu0 %vm2064_vm1, %v10651_v17  ;;  %v6032_v31 = vrot.slane %v6031_v36, 4  ;;  %v6101_v40 = vadd.f32 %v6100_v3, %v6070_v0  ;;  %v10024_v53 = vadd.f32 %v4317_v48, %v4150_v14  ;;  %v7010_v21 = vcombine.low %v1931_v61, %v1934_v25  ;;  %v8010_v17 = vld [vmem:[%s8103_s24 + $0x80] sm:$0x1]  ;;  %v6569_v49 = vld [vmem:[%s8103_s24 + $0x84] sm:$0xe] }
 0x1f9   : > { %v7626_v1 = vpop.f32.mrf.mxu1  ;;  %v4166_v19 = vpop.f32.mrf.mxu0  ;;  %v6583_v35 = vrot.slane %v6567_v39, 9  ;;  %v1946_v7 = vrot.slane %v1944_v37, 4  ;;  %v7011_v62 = vcombine.low %v1938_v23, %v1941_v12  ;;  %v1953_v27 = vrot.slane %v1951_v20, 4  ;;  %v8012_v25 = vld [vmem:[%s8103_s24 + $0x94] sm:$0xf]  ;;  %v10654_v32 = vld [vmem:[#allocation18_spill] sm:$0xff] }
 0x1fa   : > { %7829 = vmatmul.mubr.msk.bf16.gmra.mxu1 %vm2064_vm1, %v7008_v24  ;;  %v6033_v16 = vadd.f32 %v6032_v31, %v6031_v36  ;;  %v6102_v44 = vrot.slane %v6101_v40, 4  ;;  %v10030_v60 = vadd.f32 %v7626_v1, %v7592_v18  ;;  %v6568_v24 = vld [vmem:[%s8103_s24 + $0x78] sm:$0xe]  ;;  %v1947_v18 = vrot.slane %v8009_v2, 5 }
 0x1fb   : > { %7832 = vmatprep.mubr.msk.bf16.mxu1 %vm2064_vm1, %v7009_v63  ;;  %v4330_v59 = vpop.f32.mrf.mxu1  ;;  %v7596_v42 = vpop.f32.mrf.mxu0  ;;  %v6584_v50 = vrot.slane %v6568_v24, 9  ;;  %v1954_v0 = vrot.slane %v8010_v17, 5  ;;  %v5998_v36 = vrot.slane %v5997_v5, 1  ;;  %v5929_v38 = vadd.f32 %v5928_v43, %v5927_v34  ;;  %v10655_v24 = vld [vmem:[#allocation51_spill] sm:$0xff] }
 0x1fc   : > { %v6034_v22 = vrot.slane %v6033_v16, 2  ;;  %v6103_v14 = vadd.f32 %v6102_v44, %v6101_v40  ;;  %v10041_v9 = vadd.f32 %v4330_v59, %v4163_v15  ;;  %v1945_v4 = vsel %vm8653_vm6, %v6583_v35, %v1944_v37 }
 0x1fd   : > { %v7627_v52 = vpop.f32.mrf.mxu1  ;;  %v4179_v63 = vpop.f32.mrf.mxu0  ;;  %v1958_v31 = vrot.slane %v8011_v28, 5  ;;  %v1948_v61 = vsel %vm8653_vm6, %v1946_v7, %v1947_v18  ;;  %v1952_v44 = vsel %vm8653_vm6, %v6584_v50, %v1951_v20  ;;  %v1955_v37 = vsel %vm8653_vm6, %v1953_v27, %v1954_v0  ;;  %v8013_v7 = vld [vmem:[%s8103_s24 + $0x8c] sm:$0x1] }
 0x1fe   : > { %v6035_v8 = vadd.f32 %v6034_v22, %v6033_v16  ;;  %v6104_v46 = vrot.slane %v6103_v14, 2  ;;  %v10049_v11 = vadd.f32 %v7627_v52, %v7593_v45  ;;  %v5999_v39 = vadd.f32 %v5998_v36, %v5997_v5  ;;  %v6570_v22 = vld [vmem:[%s8103_s24 + $0x90] sm:$0xe]  ;;  %v8016_v28 = vld [vmem:[%s8103_s24 + $0xac] sm:$0xf] }
 0x1ff   : > { %7799 = vmatmul.mubr.msk.bf16.gmra.mxu0 %vm2064_vm1, %v10652_v58  ;;  %v4333_v54 = vpop.f32.mrf.mxu1  ;;  %v7597_v51 = vpop.f32.mrf.mxu0  ;;  %v7012_v20 = vcombine.low %v1945_v4, %v1948_v61  ;;  %v1960_v58 = vrot.slane %v1958_v31, 4  ;;  %v7013_v35 = vcombine.low %v1952_v44, %v1955_v37  ;;  %v1961_v2 = vrot.slane %v8013_v7, 5  ;;  %v6572_v61 = vld [vmem:[%s8103_s24 + $0xa8] sm:$0xe] }
 0x200   : > { %7802 = vmatprep.mubr.msk.bf16.mxu0 %vm2064_vm1, %v10653_v56  ;;  %v6036_v3 = vrot.slane %v6035_v8, 1  ;;  %v6105_v15 = vadd.f32 %v6104_v46, %v6103_v14  ;;  %v10052_v48 = vadd.f32 %v4333_v54, %v4166_v19  ;;  %v1965_v19 = vrot.slane %v8012_v25, 5  ;;  %v8014_v46 = vld [vmem:[%s8103_s24 + $0x98] sm:$0x1]  ;;  %v10656_v44 = vld [vmem:[#allocation19_spill] sm:$0xff] }
 0x201   : > { %v7630_v13 = vpop.f32.mrf.mxu1  ;;  %v4182_v34 = vpop.f32.mrf.mxu0  ;;  %v6586_v56 = vrot.slane %v6570_v22, 9  ;;  %v1962_v0 = vsel %vm8653_vm6, %v1960_v58, %v1961_v2  ;;  %v6588_v22 = vrot.slane %v6572_v61, 9 }
 0x202   : > { %7833 = vmatmul.mubr.msk.bf16.gmra.mxu1 %vm2064_vm1, %v7010_v21  ;;  %v6037_v40 = vadd.f32 %v6036_v3, %v6035_v8  ;;  %v6106_v45 = vrot.slane %v6105_v15, 1  ;;  %v10058_v1 = vadd.f32 %v7630_v13, %v7596_v42  ;;  %v6585_v42 = vrot.slane %v6569_v49, 9  ;;  %v6571_v3 = vld [vmem:[%s8103_s24 + $0x9c] sm:$0xe] }
 0x203   : > { %7836 = vmatprep.mubr.msk.bf16.mxu1 %vm2064_vm1, %v7011_v62  ;;  %v4346_v16 = vpop.f32.mrf.mxu1  ;;  %v7600_v12 = vpop.f32.mrf.mxu0  ;;  %v1967_v8 = vrot.slane %v1965_v19, 4  ;;  %v1966_v13 = vsel %vm8653_vm6, %v6586_v56, %v1965_v19  ;;  %v8019_v56 = vld [vmem:[%s8103_s24 + $0xb8] sm:$0xf] }
 0x204   : > { %v10069_v43 = vadd.f32 %v6037_v40, %v5929_v38  ;;  %v6107_v59 = vadd.f32 %v6106_v45, %v6105_v15  ;;  %v10071_v23 = vadd.f32 %v4346_v16, %v4179_v63  ;;  %v1968_v63 = vrot.slane %v8014_v46, 5  ;;  %v8015_v15 = vld [vmem:[%s8103_s24 + $0xa0] sm:$0xf] }
 0x205   : > { %v7631_v14 = vpop.f32.mrf.mxu1  ;;  %v4195_v21 = vpop.f32.mrf.mxu0  ;;  %v1959_v17 = vsel %vm8653_vm6, %v6585_v42, %v1958_v31  ;;  %v1979_v40 = vrot.slane %v8016_v28, 5  ;;  %v6587_v16 = vrot.slane %v6571_v3, 9  ;;  %v6574_v3 = vld [vmem:[%s8103_s24 + $0xc0] sm:$0xe] }
 0x206   : > { %v10078_v5 = vadd.f32 %v6107_v59, %v5999_v39  ;;  %v10080_v52 = vadd.f32 %v7631_v14, %v7597_v51  ;;  %v1972_v51 = vrot.slane %v8015_v15, 5  ;;  %v1969_v4 = vsel %vm8653_vm6, %v1967_v8, %v1968_v63  ;;  %v8017_v59 = vld [vmem:[%s8103_s24 + $0xa4] sm:$0x1] }
 0x207   : > { %7803 = vmatmul.mubr.msk.bf16.gmra.mxu0 %vm2064_vm1, %v10654_v32  ;;  %v4349_v18 = vpop.f32.mrf.mxu1  ;;  %v7601_v54 = vpop.f32.mrf.mxu0  ;;  %v7014_v49 = vcombine.low %v1959_v17, %v1962_v0  ;;  %v7015_v19 = vcombine.low %v1966_v13, %v1969_v4  ;;  %v1981_v14 = vrot.slane %v1979_v40, 4  ;;  %v1986_v8 = vrot.slane %v8019_v56, 5 }
 0x208   : > { %7806 = vmatprep.mubr.msk.bf16.mxu0 %vm2064_vm1, %v10655_v24  ;;  %v10084_v62 = vadd.f32 %v4349_v18, %v4182_v34  ;;  %v1974_v39 = vrot.slane %v1972_v51, 4  ;;  %v6573_v18 = vld [vmem:[%s8103_s24 + $0xb4] sm:$0xe]  ;;  %v1980_v63 = vsel %vm8653_vm6, %v6588_v22, %v1979_v40  ;;  %v6575_v22 = vld [vmem:[%s8103_s24 + $0xcc] sm:$0xe] }
 0x209   : > { %v7634_v50 = vpop.f32.mrf.mxu1  ;;  %v4198_v36 = vpop.f32.mrf.mxu0  ;;  %v1988_v40 = vrot.slane %v1986_v8, 4  ;;  %v6591_v56 = vrot.slane %v6575_v22, 9 }
 0x20a   : > { %7837 = vmatmul.mubr.msk.bf16.gmra.mxu1 %vm2064_vm1, %v7012_v20  ;;  %v10087_v27 = vadd.f32 %v7634_v50, %v7600_v12  ;;  %v1975_v12 = vrot.slane %v8017_v59, 5  ;;  %v8020_v50 = vld [vmem:[%s8103_s24 + $0xc4] sm:$0xf] }
 0x20b   : > { %7840 = vmatprep.mubr.msk.bf16.mxu1 %vm2064_vm1, %v7013_v35  ;;  %v4362_v38 = vpop.f32.mrf.mxu1  ;;  %v7604_v31 = vpop.f32.mrf.mxu0  ;;  %v1973_v35 = vsel %vm8653_vm6, %v6587_v16, %v1972_v51  ;;  %v1993_v17 = vrot.slane %v8020_v50, 5  ;;  %v8024_v50 = vld [vmem:[%s8103_s24 + $0xd4] sm:$0x1] }
 0x20c   : > { %v10101_v45 = vadd.f32 %v4362_v38, %v4195_v21  ;;  %v1976_v7 = vsel %vm8653_vm6, %v1974_v39, %v1975_v12  ;;  %v6589_v38 = vrot.slane %v6573_v18, 9 }
 0x20d   : > { %v7635_v34 = vpop.f32.mrf.mxu1  ;;  %v4211_v25 = vpop.f32.mrf.mxu0  ;;  %v7016_v51 = vcombine.low %v1973_v35, %v1976_v7  ;;  %v1995_v16 = vrot.slane %v1993_v17, 4 }
 0x20e   : > { %v10108_v37 = vadd.f32 %v7635_v34, %v7601_v54  ;;  %v1987_v59 = vsel %vm8653_vm6, %v6589_v38, %v1986_v8 }
 0x20f   : > { %7807 = vmatmul.mubr.msk.bf16.gmra.mxu0 %vm2064_vm1, %v9680_v57  ;;  %v4365_v32 = vpop.f32.mrf.mxu1  ;;  %v8018_v57 = vld [vmem:[%s8103_s24 + $0xb0] sm:$0x1]  ;;  %v7605_v58 = vpop.f32.mrf.mxu0 }
 0x210   : > { %7810 = vmatprep.mubr.msk.bf16.mxu0 %vm2064_vm1, %v10656_v44  ;;  %v1982_v20 = vrot.slane %v8018_v57, 5  ;;  %v10112_v42 = vadd.f32 %v4365_v32, %v4198_v36 }
 0x211   : > { %v7638_v24 = vpop.f32.mrf.mxu1  ;;  %v4214_v2 = vpop.f32.mrf.mxu0 }
 0x212   : > { %7841 = vmatmul.mubr.msk.bf16.gmra.mxu1 %vm2064_vm1, %v7014_v49  ;;  %v10115_v21 = vadd.f32 %v7638_v24, %v7604_v31  ;;  %v1983_v54 = vsel %vm8653_vm6, %v1981_v14, %v1982_v20  ;;  %v8021_v31 = vld [vmem:[%s8103_s24 + $0xbc] sm:$0x1]  ;;  %v6590_v49 = vrot.slane %v6574_v3, 9  ;;  %v8023_v14 = vld [vmem:[%s8103_s24 + $0xd0] sm:$0xf] }
 0x213   : > { %7844 = vmatprep.mubr.msk.bf16.mxu1 %vm2064_vm1, %v7015_v19  ;;  %v4378_v46 = vpop.f32.mrf.mxu1  ;;  %v7608_v36 = vpop.f32.mrf.mxu0  ;;  %v7017_v28 = vcombine.low %v1980_v63, %v1983_v54  ;;  %v1989_v61 = vrot.slane %v8021_v31, 5  ;;  %v2000_v57 = vrot.slane %v8023_v14, 5 }
 0x214   : > { %v10129_v0 = vadd.f32 %v4378_v46, %v4211_v25 }
 0x215   : > { %v7639_v15 = vpop.f32.mrf.mxu1  ;;  %v4227_v4 = vpop.f32.mrf.mxu0  ;;  %v1990_v12 = vsel %vm8653_vm6, %v1988_v40, %v1989_v61  ;;  %v2002_v54 = vrot.slane %v2000_v57, 4 }
 0x216   : > { %v10136_v13 = vadd.f32 %v7639_v15, %v7605_v58  ;;  %v1994_v58 = vsel %vm8653_vm6, %v6590_v49, %v1993_v17  ;;  %v7018_v18 = vcombine.low %v1987_v59, %v1990_v12  ;;  %v2003_v17 = vrot.slane %v8024_v50, 5 }
 0x217   : > { %7811 = vmatmul.mubr.msk.bf16.gmra.mxu0 %vm2064_vm1, %v9771_v10  ;;  %v4381_v34 = vpop.f32.mrf.mxu1  ;;  %v8022_v10 = vld [vmem:[%s8103_s24 + $0xc8] sm:$0x1]  ;;  %v7609_v19 = vpop.f32.mrf.mxu0  ;;  %s6415_s24 = sshll.u32 %s10674_s9, 1 }
 0x218   : > { %7814 = vmatprep.mubr.msk.bf16.mxu0 %vm2064_vm1, %v9776_v6  ;;  %v1996_v44 = vrot.slane %v8022_v10, 5  ;;  %v10140_v25 = vadd.f32 %v4381_v34, %v4214_v2  ;;  %v2004_v38 = vsel %vm8653_vm6, %v2002_v54, %v2003_v17  ;;  %s161_s28 = scalar_lea.vmem %s10388_s2, %s6415_s24 }
 0x219   : > { %v7642_v39 = vpop.f32.mrf.mxu1  ;;  %v4230_v32 = vpop.f32.mrf.mxu0 }
 0x21a   : > { %7845 = vmatmul.mubr.msk.bf16.gmra.mxu1 %vm2064_vm1, %v7016_v51  ;;  %v10143_v6 = vadd.f32 %v7642_v39, %v7608_v36  ;;  %v1997_v24 = vsel %vm8653_vm6, %v1995_v16, %v1996_v44 }
 0x21b   : > { %7848 = vmatprep.mubr.msk.bf16.mxu1 %vm2064_vm1, %v7017_v28  ;;  %v4394_v20 = vpop.f32.mrf.mxu1  ;;  %v7612_v7 = vpop.f32.mrf.mxu0  ;;  %v7019_v63 = vcombine.low %v1994_v58, %v1997_v24 }
 0x21c   : > { %v10156_v35 = vadd.f32 %v4394_v20, %v4227_v4 }
 0x21d   : > { %v7643_v2 = vpop.f32.mrf.mxu1  ;;  %v4243_v46 = vpop.f32.mrf.mxu0 }
 0x21e   : > { %v10162_v8 = vadd.f32 %v7643_v2, %v7609_v19 }
 0x21f   : > { %7815 = vmatmul.mubr.msk.bf16.gmra.mxu0 %vm2064_vm1, %v9807_v55  ;;  %v4397_v36 = vpop.f32.mrf.mxu1  ;;  %v7613_v15 = vpop.f32.mrf.mxu0 }
 0x220   : > { %7818 = vmatprep.mubr.msk.bf16.mxu0 %vm2064_vm1, %v9809_v41  ;;  %v10165_v3 = vadd.f32 %v4397_v36, %v4230_v32  ;;  %v2001_v41 = vsel %vm8653_vm6, %v6591_v56, %v2000_v57 }
 0x221   : > { %v7646_v51 = vpop.f32.mrf.mxu1  ;;  %v4246_v4 = vpop.f32.mrf.mxu0  ;;  %v7020_v34 = vcombine.low %v2001_v41, %v2004_v38 }
 0x222   : > { %7849 = vmatmul.mubr.msk.bf16.gmra.mxu1 %vm2064_vm1, %v7018_v18  ;;  %v10168_v55 = vadd.f32 %v7646_v51, %v7612_v7 }
 0x223   : > { %7852 = vmatprep.mubr.msk.bf16.mxu1 %vm2064_vm1, %v7019_v63  ;;  %v4410_v28 = vpop.f32.mrf.mxu1  ;;  %v7616_v31 = vpop.f32.mrf.mxu0 }
 0x224   : > { %v10175_v40 = vadd.f32 %v4410_v28, %v4243_v46 }
 0x225   : > { %v7647_v61 = vpop.f32.mrf.mxu1  ;;  %v4259_v16 = vpop.f32.mrf.mxu0 }
 0x226   : > { %v10179_v49 = vadd.f32 %v7647_v61, %v7613_v15 }
 0x227   : > { %7819 = vmatmul.mubr.msk.bf16.gmra.mxu0 %vm2064_vm1, %v9831_v30  ;;  %v4413_v10 = vpop.f32.mrf.mxu1  ;;  %v7617_v19 = vpop.f32.mrf.mxu0 }
 0x228   : > { %v10181_v44 = vadd.f32 %v4413_v10, %v4246_v4 }
 0x229   : > { %v7650_v39 = vpop.f32.mrf.mxu1  ;;  %v4262_v59 = vpop.f32.mrf.mxu0 }
 0x22a   : > { %7853 = vmatmul.mubr.msk.bf16.gmra.mxu1 %vm2064_vm1, %v7020_v34  ;;  %v10184_v33 = vadd.f32 %v7650_v39, %v7616_v31 }
 0x22b   : > { %v4426_v12 = vpop.f32.mrf.mxu1 }
 0x22c   : > { %v10186_v32 = vadd.f32 %v4426_v12, %v4259_v16 }
 0x22d   : > { %v7656_v22 = vpop.f32.mrf.mxu0  ;;  %v7651_v30 = vpop.f32.mrf.mxu1 }
 0x22e   : > { %v4725_v14 = vadd.f32 %v7656_v22, %v10007_v29  ;;  %v10189_v57 = vadd.f32 %v7651_v30, %v7617_v19 }
 0x22f   : > { %v4596_v20 = vpop.f32.mrf.mxu0  ;;  %v4429_v58 = vpop.f32.mrf.mxu1 }
 0x230   : > { %v4723_v24 = vadd.f32 %v4596_v20, %v10013_v47  ;;  %v10192_v7 = vadd.f32 %v4429_v58, %v4262_v59 }
 0x231   : > { %v7657_v2 = vpop.f32.mrf.mxu0  ;;  %v7690_v18 = vpop.f32.mrf.mxu1 }
 0x232   : > { %v4726_v56 = vadd.f32 %v7657_v2, %v10021_v26  ;;  %v5023_v46 = vadd.f32 %v7690_v18, %v4725_v14 }
 0x233   : > { %v4599_v63 = vpop.f32.mrf.mxu0  ;;  %v4894_v54 = vpop.f32.mrf.mxu1 }
 0x234   : > { %v4724_v50 = vadd.f32 %v4599_v63, %v10024_v53  ;;  %v5021_v17 = vadd.f32 %v4894_v54, %v4723_v24  ;;  %v6149_v59 = vmul.f32 %v5023_v46, %v5023_v46 }
 0x235   : > { %v7660_v36 = vpop.f32.mrf.mxu0  ;;  %v7691_v29 = vpop.f32.mrf.mxu1 }
 0x236   : > { %v4729_v15 = vadd.f32 %v7660_v36, %v10030_v60  ;;  %v5024_v51 = vadd.f32 %v7691_v29, %v4726_v56  ;;  %v6147_v61 = vmul.f32 %v5021_v17, %v5021_v17 }
 0x237   : > { %v4612_v41 = vpop.f32.mrf.mxu0  ;;  %v4897_v38 = vpop.f32.mrf.mxu1 }
 0x238   : > { %v4727_v47 = vadd.f32 %v4612_v41, %v10041_v9  ;;  %v5022_v4 = vadd.f32 %v4897_v38, %v4724_v50  ;;  %v6150_v20 = vmul.f32 %v5024_v51, %v5024_v51 }
 0x239   : > { %v7661_v28 = vpop.f32.mrf.mxu0  ;;  %v7694_v31 = vpop.f32.mrf.mxu1 }
 0x23a   : > { %v4730_v26 = vadd.f32 %v7661_v28, %v10049_v11  ;;  %v6109_v34 = vadd.f32 %v5022_v4, %v5021_v17  ;;  %v6148_v16 = vmul.f32 %v5022_v4, %v5022_v4  ;;  %v5027_v10 = vadd.f32 %v7694_v31, %v4729_v15 }
 0x23b   : > { %v4615_v53 = vpop.f32.mrf.mxu0  ;;  %v4910_v19 = vpop.f32.mrf.mxu1 }
 0x23c   : > { %v4728_v39 = vadd.f32 %v4615_v53, %v10052_v48  ;;  %v6110_v60 = vadd.f32 %v6109_v34, %v5023_v46  ;;  %v6179_v12 = vadd.f32 %v6148_v16, %v6147_v61  ;;  %v5025_v22 = vadd.f32 %v4910_v19, %v4727_v47 }
 0x23d   : > { %v7695_v14 = vpop.f32.mrf.mxu1  ;;  %v6153_v4 = vmul.f32 %v5027_v10, %v5027_v10 }
 0x23e   : > { %v7664_v30 = vpop.f32.mrf.mxu0  ;;  %v6180_v58 = vadd.f32 %v6179_v12, %v6149_v59  ;;  %v6111_v24 = vadd.f32 %v6110_v60, %v5024_v51  ;;  %v5028_v11 = vadd.f32 %v7695_v14, %v4730_v26  ;;  %v6151_v54 = vmul.f32 %v5025_v22, %v5025_v22 }
 0x23f   : > { %v4733_v9 = vadd.f32 %v7664_v30, %v10058_v1  ;;  %v4913_v18 = vpop.f32.mrf.mxu1 }
 0x240   : > { %v4628_v2 = vpop.f32.mrf.mxu0  ;;  %v6112_v63 = vadd.f32 %v6111_v24, %v5025_v22  ;;  %v6181_v50 = vadd.f32 %v6180_v58, %v6150_v20  ;;  %v5026_v48 = vadd.f32 %v4913_v18, %v4728_v39  ;;  %v6154_v16 = vmul.f32 %v5028_v11, %v5028_v11 }
 0x241   : > { %v4731_v56 = vadd.f32 %v4628_v2, %v10071_v23  ;;  %v7698_v46 = vpop.f32.mrf.mxu1 }
 0x242   : > { %v7665_v17 = vpop.f32.mrf.mxu0  ;;  %v6182_v29 = vadd.f32 %v6181_v50, %v6151_v54  ;;  %v6113_v15 = vadd.f32 %v6112_v63, %v5026_v48  ;;  %v6152_v41 = vmul.f32 %v5026_v48, %v5026_v48  ;;  %v5031_v1 = vadd.f32 %v7698_v46, %v4733_v9 }
 0x243   : > { %v4734_v36 = vadd.f32 %v7665_v17, %v10080_v52  ;;  %v4926_v47 = vpop.f32.mrf.mxu1 }
 0x244   : > { %v4631_v38 = vpop.f32.mrf.mxu0  ;;  %v6114_v28 = vadd.f32 %v6113_v15, %v5027_v10  ;;  %v6183_v31 = vadd.f32 %v6182_v29, %v6152_v41  ;;  %v5029_v23 = vadd.f32 %v4926_v47, %v4731_v56  ;;  %v6157_v56 = vmul.f32 %v5031_v1, %v5031_v1 }
 0x245   : > { %v4732_v51 = vadd.f32 %v4631_v38, %v10084_v62  ;;  %v7699_v61 = vpop.f32.mrf.mxu1 }
 0x246   : > { %v6184_v53 = vadd.f32 %v6183_v31, %v6153_v4  ;;  %v6115_v19 = vadd.f32 %v6114_v28, %v5028_v11  ;;  %v5032_v52 = vadd.f32 %v7699_v61, %v4734_v36  ;;  %v6155_v22 = vmul.f32 %v5029_v23, %v5029_v23 }
 0x247   : > { %v7668_v26 = vpop.f32.mrf.mxu0  ;;  %v4929_v59 = vpop.f32.mrf.mxu1 }
 0x248   : > { %v4737_v34 = vadd.f32 %v7668_v26, %v10087_v27  ;;  %v6116_v12 = vadd.f32 %v6115_v19, %v5029_v23  ;;  %v6185_v30 = vadd.f32 %v6184_v53, %v6154_v16  ;;  %v5030_v62 = vadd.f32 %v4929_v59, %v4732_v51 }
 0x249   : > { %v4644_v39 = vpop.f32.mrf.mxu0  ;;  %v7702_v10 = vpop.f32.mrf.mxu1  ;;  %v6158_v46 = vmul.f32 %v5032_v52, %v5032_v52 }
 0x24a   : > { %v4735_v60 = vadd.f32 %v4644_v39, %v10101_v45  ;;  %v6186_v20 = vadd.f32 %v6185_v30, %v6155_v22  ;;  %v6117_v58 = vadd.f32 %v6116_v12, %v5030_v62  ;;  %v6156_v24 = vmul.f32 %v5030_v62, %v5030_v62 }
 0x24b   : > { %v7669_v14 = vpop.f32.mrf.mxu0  ;;  %v5035_v27 = vadd.f32 %v7702_v10, %v4737_v34  ;;  %v4942_v18 = vpop.f32.mrf.mxu1 }
 0x24c   : > { %v4738_v9 = vadd.f32 %v7669_v14, %v10108_v37  ;;  %v6118_v63 = vadd.f32 %v6117_v58, %v5031_v1  ;;  %v6187_v54 = vadd.f32 %v6186_v20, %v6156_v24  ;;  %v5033_v45 = vadd.f32 %v4942_v18, %v4735_v60 }
 0x24d   : > { %v4647_v2 = vpop.f32.mrf.mxu0  ;;  %v7703_v48 = vpop.f32.mrf.mxu1  ;;  %v6161_v19 = vmul.f32 %v5035_v27, %v5035_v27 }
 0x24e   : > { %v4736_v11 = vadd.f32 %v4647_v2, %v10112_v42  ;;  %v6188_v36 = vadd.f32 %v6187_v54, %v6157_v56  ;;  %v6119_v29 = vadd.f32 %v6118_v63, %v5032_v52  ;;  %v5036_v37 = vadd.f32 %v7703_v48, %v4738_v9 }
 0x24f   : > { %v7672_v50 = vpop.f32.mrf.mxu0  ;;  %v4945_v41 = vpop.f32.mrf.mxu1  ;;  %v6159_v51 = vmul.f32 %v5033_v45, %v5033_v45 }
 0x250   : > { %v4741_v17 = vadd.f32 %v7672_v50, %v10115_v21  ;;  %v6120_v47 = vadd.f32 %v6119_v29, %v5033_v45  ;;  %v6189_v4 = vadd.f32 %v6188_v36, %v6158_v46  ;;  %v5034_v42 = vadd.f32 %v4945_v41, %v4736_v11 }
 0x251   : > { %v4660_v15 = vpop.f32.mrf.mxu0  ;;  %v6162_v22 = vmul.f32 %v5036_v37, %v5036_v37 }
 0x252   : > { %v4739_v38 = vadd.f32 %v4660_v15, %v10129_v0  ;;  %v7706_v1 = vpop.f32.mrf.mxu1  ;;  %v6190_v23 = vadd.f32 %v6189_v4, %v6159_v51  ;;  %v6121_v26 = vadd.f32 %v6120_v47, %v5034_v42  ;;  %v6160_v61 = vmul.f32 %v5034_v42, %v5034_v42 }
 0x253   : > { %v7673_v28 = vpop.f32.mrf.mxu0  ;;  %v5039_v21 = vadd.f32 %v7706_v1, %v4741_v17 }
 0x254   : > { %v4742_v31 = vadd.f32 %v7673_v28, %v10136_v13  ;;  %v4958_v16 = vpop.f32.mrf.mxu1  ;;  %v6122_v52 = vadd.f32 %v6121_v26, %v5035_v27  ;;  %v6191_v39 = vadd.f32 %v6190_v23, %v6160_v61 }
 0x255   : > { %v4663_v34 = vpop.f32.mrf.mxu0  ;;  %v5037_v0 = vadd.f32 %v4958_v16, %v4739_v38  ;;  %v6165_v48 = vmul.f32 %v5039_v21, %v5039_v21 }
 0x256   : > { %v4740_v53 = vadd.f32 %v4663_v34, %v10140_v25  ;;  %v7707_v60 = vpop.f32.mrf.mxu1  ;;  %v6192_v30 = vadd.f32 %v6191_v39, %v6161_v19  ;;  %v6123_v62 = vadd.f32 %v6122_v52, %v5036_v37 }
 0x257   : > { %v7676_v59 = vpop.f32.mrf.mxu0  ;;  %v5040_v13 = vadd.f32 %v7707_v60, %v4742_v31  ;;  %v6163_v58 = vmul.f32 %v5037_v0, %v5037_v0 }
 0x258   : > { %v4745_v12 = vadd.f32 %v7676_v59, %v10143_v6  ;;  %v4961_v10 = vpop.f32.mrf.mxu1  ;;  %v6124_v20 = vadd.f32 %v6123_v62, %v5037_v0  ;;  %v6193_v24 = vadd.f32 %v6192_v30, %v6162_v22 }
 0x259   : > { %v4676_v14 = vpop.f32.mrf.mxu0  ;;  %v5038_v25 = vadd.f32 %v4961_v10, %v4740_v53  ;;  %v6166_v15 = vmul.f32 %v5040_v13, %v5040_v13 }
 0x25a   : > { %v4743_v9 = vadd.f32 %v4676_v14, %v10156_v35  ;;  %v7710_v27 = vpop.f32.mrf.mxu1  ;;  %v6194_v11 = vadd.f32 %v6193_v24, %v6163_v58 }
 0x25b   : > { %v7677_v2 = vpop.f32.mrf.mxu0  ;;  %v6125_v56 = vadd.f32 %v6124_v20, %v5038_v25  ;;  %v6164_v63 = vmul.f32 %v5038_v25, %v5038_v25  ;;  %v5043_v6 = vadd.f32 %v7710_v27, %v4745_v12 }
 0x25c   : > { %v4746_v18 = vadd.f32 %v7677_v2, %v10162_v8  ;;  %v4974_v45 = vpop.f32.mrf.mxu1 }
 0x25d   : > { %v4679_v54 = vpop.f32.mrf.mxu0  ;;  %v6126_v17 = vadd.f32 %v6125_v56, %v5039_v21  ;;  %v6195_v46 = vadd.f32 %v6194_v11, %v6164_v63  ;;  %v5041_v35 = vadd.f32 %v4974_v45, %v4743_v9  ;;  %v6169_v52 = vmul.f32 %v5043_v6, %v5043_v6 }
 0x25e   : > { %v4744_v50 = vadd.f32 %v4679_v54, %v10165_v3  ;;  %v7711_v29 = vpop.f32.mrf.mxu1 }
 0x25f   : > { %v7680_v36 = vpop.f32.mrf.mxu0  ;;  %v6196_v41 = vadd.f32 %v6195_v46, %v6165_v48  ;;  %v6127_v38 = vadd.f32 %v6126_v17, %v5040_v13  ;;  %v5044_v8 = vadd.f32 %v7711_v29, %v4746_v18  ;;  %v6167_v28 = vmul.f32 %v5041_v35, %v5041_v35 }
 0x260   : > { %v4749_v37 = vadd.f32 %v7680_v36, %v10168_v55  ;;  %v4977_v51 = vpop.f32.mrf.mxu1 }
 0x261   : > { %v4692_v47 = vpop.f32.mrf.mxu0  ;;  %v6128_v42 = vadd.f32 %v6127_v38, %v5041_v35  ;;  %v6197_v1 = vadd.f32 %v6196_v41, %v6166_v15  ;;  %v5042_v3 = vadd.f32 %v4977_v51, %v4744_v50  ;;  %v6170_v22 = vmul.f32 %v5044_v8, %v5044_v8 }
 0x262   : > { %v4747_v4 = vadd.f32 %v4692_v47, %v10175_v40  ;;  %v7714_v23 = vpop.f32.mrf.mxu1 }
 0x263   : > { %v7681_v31 = vpop.f32.mrf.mxu0  ;;  %v6198_v61 = vadd.f32 %v6197_v1, %v6167_v28  ;;  %v6129_v21 = vadd.f32 %v6128_v42, %v5042_v3  ;;  %v6168_v34 = vmul.f32 %v5042_v3, %v5042_v3  ;;  %v5047_v55 = vadd.f32 %v7714_v23, %v4749_v37 }
 0x264   : > { %v4750_v26 = vadd.f32 %v7681_v31, %v10179_v49  ;;  %v4990_v53 = vpop.f32.mrf.mxu1 }
 0x265   : > { %v4695_v16 = vpop.f32.mrf.mxu0  ;;  %v6130_v39 = vadd.f32 %v6129_v21, %v5043_v6  ;;  %v6199_v0 = vadd.f32 %v6198_v61, %v6168_v34  ;;  %v5045_v40 = vadd.f32 %v4990_v53, %v4747_v4  ;;  %v6173_v54 = vmul.f32 %v5047_v55, %v5047_v55 }
 0x266   : > { %v4748_v19 = vadd.f32 %v4695_v16, %v10181_v44  ;;  %v7715_v60 = vpop.f32.mrf.mxu1 }
 0x267   : > { %v7684_v59 = vpop.f32.mrf.mxu0  ;;  %v6200_v30 = vadd.f32 %v6199_v0, %v6169_v52  ;;  %v6131_v62 = vadd.f32 %v6130_v39, %v5044_v8  ;;  %v5048_v49 = vadd.f32 %v7715_v60, %v4750_v26  ;;  %v6171_v20 = vmul.f32 %v5045_v40, %v5045_v40 }
 0x268   : > { %v4753_v12 = vadd.f32 %v7684_v59, %v10184_v33  ;;  %v4993_v14 = vpop.f32.mrf.mxu1 }
 0x269   : > { %v4708_v13 = vpop.f32.mrf.mxu0  ;;  %v6132_v9 = vadd.f32 %v6131_v62, %v5045_v40  ;;  %v6201_v58 = vadd.f32 %v6200_v30, %v6170_v22  ;;  %v5046_v44 = vadd.f32 %v4993_v14, %v4748_v19  ;;  %v6174_v46 = vmul.f32 %v5048_v49, %v5048_v49 }
 0x26a   : > { %v4751_v10 = vadd.f32 %v4708_v13, %v10186_v32  ;;  %v7718_v25 = vpop.f32.mrf.mxu1 }
 0x26b   : > { %v7685_v24 = vpop.f32.mrf.mxu0  ;;  %v6202_v27 = vadd.f32 %v6201_v58, %v6171_v20  ;;  %v6133_v18 = vadd.f32 %v6132_v9, %v5046_v44  ;;  %v6172_v11 = vmul.f32 %v5046_v44, %v5046_v44  ;;  %v5051_v33 = vadd.f32 %v7718_v25, %v4753_v12 }
 0x26c   : > { %v4754_v2 = vadd.f32 %v7685_v24, %v10189_v57  ;;  %v5006_v63 = vpop.f32.mrf.mxu1 }
 0x26d   : > { %v4711_v56 = vpop.f32.mrf.mxu0  ;;  %v6134_v45 = vadd.f32 %v6133_v18, %v5047_v55  ;;  %v6203_v50 = vadd.f32 %v6202_v27, %v6172_v11  ;;  %v5049_v32 = vadd.f32 %v5006_v63, %v4751_v10  ;;  %v6177_v31 = vmul.f32 %v5051_v33, %v5051_v33 }
 0x26e   : > { %v4752_v6 = vadd.f32 %v4711_v56, %v10192_v7  ;;  %v7719_v17 = vpop.f32.mrf.mxu1 }
 0x26f   : > { %v7724_v48 = vpop.f32.mrf.mxu0  ;;  %v6204_v35 = vadd.f32 %v6203_v50, %v6173_v54  ;;  %v6135_v36 = vadd.f32 %v6134_v45, %v5048_v49  ;;  %v5052_v29 = vadd.f32 %v7719_v17, %v4754_v2  ;;  %v6175_v41 = vmul.f32 %v5049_v32, %v5049_v32 }
 0x270   : > { %v5009_v57 = vpop.f32.mrf.mxu1 }
 0x271   : > { %v5099_v37 = vpop.f32.mrf.mxu0  ;;  %v6136_v15 = vadd.f32 %v6135_v36, %v5049_v32  ;;  %v6205_v38 = vadd.f32 %v6204_v35, %v6174_v46  ;;  %v5050_v8 = vadd.f32 %v5009_v57, %v4752_v6  ;;  %v6178_v55 = vmul.f32 %v5052_v29, %v5052_v29 }
 0x272   : > { %v7758_v51 = vpop.f32.mrf.mxu1 }
 0x273   : > { %v7725_v47 = vpop.f32.mrf.mxu0  ;;  %v6206_v4 = vadd.f32 %v6205_v38, %v6175_v41  ;;  %v6137_v7 = vadd.f32 %v6136_v15, %v5050_v8  ;;  %v6176_v42 = vmul.f32 %v5050_v8, %v5050_v8  ;;  %v10224_v28 = vadd.f32 %v7758_v51, %v7724_v48 }
 0x274   : > { %v5266_v3 = vpop.f32.mrf.mxu1 }
 0x275   : > { %v10226_v1 = vpop.f32.mrf.mxu0  ;;  %v6138_v23 = vadd.f32 %v6137_v7, %v5051_v33  ;;  %v6207_v26 = vadd.f32 %v6206_v4, %v6176_v42  ;;  %v10228_v61 = vadd.f32 %v5266_v3, %v5099_v37 }
 0x276   : > { %v7759_v34 = vpop.f32.mrf.mxu1 }
 0x277   : > { %v7728_v21 = vpop.f32.mrf.mxu0  ;;  %v6139_v16 = vadd.f32 %v6138_v23, %v5052_v29  ;;  %v6208_v53 = vadd.f32 %v6207_v26, %v6177_v31  ;;  %v10230_v19 = vadd.f32 %v7759_v34, %v7725_v47 }
 0x278   : > { %v10234_v39 = vpop.f32.mrf.mxu1 }
 0x279   : > { %v10232_v52 = vpop.f32.mrf.mxu0  ;;  %v6140_v0 = vrot.slane %v6139_v16, 4  ;;  %v6209_v40 = vadd.f32 %v6208_v53, %v6178_v55 }
 0x27a   : > { %v7762_v60 = vpop.f32.mrf.mxu1 }
 0x27b   : > { %v7729_v59 = vpop.f32.mrf.mxu0  ;;  %v6141_v12 = vadd.f32 %v6140_v0, %v6139_v16  ;;  %v6210_v22 = vrot.slane %v6209_v40, 4  ;;  %v10236_v30 = vadd.f32 %v7762_v60, %v7728_v21 }
 0x27c   : > { %v10240_v49 = vpop.f32.mrf.mxu1 }
 0x27d   : > { %v10238_v62 = vpop.f32.mrf.mxu0  ;;  %v6142_v13 = vrot.slane %v6141_v12, 2  ;;  %v6211_v14 = vadd.f32 %v6210_v22, %v6209_v40 }
 0x27e   : > { %v7763_v9 = vpop.f32.mrf.mxu1 }
 0x27f   : > { %v7732_v10 = vpop.f32.mrf.mxu0  ;;  %v6143_v20 = vadd.f32 %v6142_v13, %v6141_v12  ;;  %v6212_v58 = vrot.slane %v6211_v14, 2  ;;  %v10242_v44 = vadd.f32 %v7763_v9, %v7729_v59 }
 0x280   : > { %v10246_v25 = vpop.f32.mrf.mxu1 }
 0x281   : > { %v10244_v24 = vpop.f32.mrf.mxu0  ;;  %v6144_v2 = vrot.slane %v6143_v20, 1  ;;  %v6213_v27 = vadd.f32 %v6212_v58, %v6211_v14 }
 0x282   : > { %v7766_v11 = vpop.f32.mrf.mxu1 }
 0x283   : > { %v7733_v18 = vpop.f32.mrf.mxu0  ;;  %v6145_v33 = vadd.f32 %v6144_v2, %v6143_v20  ;;  %v6214_v56 = vrot.slane %v6213_v27, 1  ;;  %v10248_v63 = vadd.f32 %v7766_v11, %v7732_v10 }
 0x284   : > { %v10252_v54 = vpop.f32.mrf.mxu1 }
 0x285   : > { %v10250_v6 = vpop.f32.mrf.mxu0  ;;  %v10255_v45 = vadd.f32 %v6145_v33, %v10069_v43  ;;  %v6215_v50 = vadd.f32 %v6214_v56, %v6213_v27 }
 0x286   : > { %v7767_v48 = vpop.f32.mrf.mxu1 }
 0x287   : > { %10657 = vst [vmem:[#allocation24_spill] sm:$0xff] %v10255_v45  ;;  %v7736_v32 = vpop.f32.mrf.mxu0  ;;  %v10258_v17 = vadd.f32 %v6215_v50, %v10078_v5  ;;  %v10260_v46 = vadd.f32 %v7767_v48, %v7733_v18 }
 0x288   : > { %v10264_v36 = vpop.f32.mrf.mxu1 }
 0x289   : > { %10658 = vst [vmem:[#allocation26_spill] sm:$0xff] %v10258_v17  ;;  %v10262_v35 = vpop.f32.mrf.mxu0 }
 0x28a   : > { %v7770_v37 = vpop.f32.mrf.mxu1 }
 0x28b   : > { %v7737_v29 = vpop.f32.mrf.mxu0  ;;  %v10266_v57 = vadd.f32 %v7770_v37, %v7736_v32 }
 0x28c   : > { %v10270_v43 = vpop.f32.mrf.mxu1 }
 0x28d   : > { %v10268_v15 = vpop.f32.mrf.mxu0 }
 0x28e   : > { %v7771_v38 = vpop.f32.mrf.mxu1 }
 0x28f   : > { %v7740_v41 = vpop.f32.mrf.mxu0  ;;  %v10272_v8 = vadd.f32 %v7771_v38, %v7737_v29 }
 0x290   : > { %v10276_v47 = vpop.f32.mrf.mxu1 }
 0x291   : > { %v10274_v5 = vpop.f32.mrf.mxu0 }
 0x292   : > { %v7774_v4 = vpop.f32.mrf.mxu1 }
 0x293   : > { %v7741_v51 = vpop.f32.mrf.mxu0  ;;  %v10278_v7 = vadd.f32 %v7774_v4, %v7740_v41 }
 0x294   : > { %v10282_v3 = vpop.f32.mrf.mxu1 }
 0x295   : > { %v10280_v42 = vpop.f32.mrf.mxu0 }
 0x296   : > { %v7775_v23 = vpop.f32.mrf.mxu1 }
 0x297   : > { %v7744_v31 = vpop.f32.mrf.mxu0  ;;  %v10284_v26 = vadd.f32 %v7775_v23, %v7741_v51 }
 0x298   : > { %v10288_v34 = vpop.f32.mrf.mxu1 }
 0x299   : > { %v10286_v21 = vpop.f32.mrf.mxu0 }
 0x29a   : > { %v7778_v16 = vpop.f32.mrf.mxu1 }
 0x29b   : > { %v7745_v55 = vpop.f32.mrf.mxu0  ;;  %v10290_v53 = vadd.f32 %v7778_v16, %v7744_v31 }
 0x29c   : > { %v10294_v40 = vpop.f32.mrf.mxu1 }
 0x29d   : > { %v10292_v0 = vpop.f32.mrf.mxu0 }
 0x29e   : > { %v7779_v60 = vpop.f32.mrf.mxu1 }
 0x29f   : > { %v7748_v59 = vpop.f32.mrf.mxu0  ;;  %v10296_v12 = vadd.f32 %v7779_v60, %v7745_v55  ;;  %v5270_v55 = vadd.f32 %v10234_v39, %v10226_v1 }
 0x2a0   : > { %v10300_v13 = vpop.f32.mrf.mxu1 }
 0x2a1   : > { %v10298_v22 = vpop.f32.mrf.mxu0 }
 0x2a2   : > { %v7782_v10 = vpop.f32.mrf.mxu1 }
 0x2a3   : > { %v7749_v14 = vpop.f32.mrf.mxu0  ;;  %v10302_v9 = vadd.f32 %v7782_v10, %v7748_v59 }
 0x2a4   : > { %v10306_v58 = vpop.f32.mrf.mxu1 }
 0x2a5   : > { %v10304_v20 = vpop.f32.mrf.mxu0 }
 0x2a6   : > { %v7783_v27 = vpop.f32.mrf.mxu1 }
 0x2a7   : > { %v7752_v2 = vpop.f32.mrf.mxu0  ;;  %v10308_v18 = vadd.f32 %v7783_v27, %v7749_v14 }
 0x2a8   : > { %v10312_v33 = vpop.f32.mrf.mxu1 }
 0x2a9   : > { %v10310_v11 = vpop.f32.mrf.mxu0 }
 0x2aa   : > { %v7786_v50 = vpop.f32.mrf.mxu1 }
 0x2ab   : > { %v7753_v56 = vpop.f32.mrf.mxu0  ;;  %v10314_v32 = vadd.f32 %v7786_v50, %v7752_v2 }
 0x2ac   : > { %v10318_v29 = vpop.f32.mrf.mxu1 }
 0x2ad   : > { %10659 = vst [vmem:[#allocation30_spill] sm:$0xff] %v10314_v32  ;;  %v10316_v48 = vpop.f32.mrf.mxu0 }
 0x2ae   : > { %10660 = vst [vmem:[#allocation53_spill] sm:$0xff] %v10316_v48  ;;  %v7787_v41 = vpop.f32.mrf.mxu1 }
 0x2af   : > { %v7792_v37 = vpop.f32.mrf.mxu0  ;;  %v10320_v38 = vadd.f32 %v7787_v41, %v7753_v56  ;;  %v5283_v56 = vadd.f32 %v10240_v49, %v10232_v52 }
 0x2b0   : > { %v10322_v4 = vpop.f32.mrf.mxu1  ;;  %v5565_v14 = vadd.f32 %v7792_v37, %v10224_v28 }
 0x2b1   : > { %10661 = vst [vmem:[#allocation54_spill] sm:$0xff] %v10320_v38  ;;  %v5436_v51 = vpop.f32.mrf.mxu0  ;;  %10662 = vst [vmem:[#allocation55_spill] sm:$0xff] %v10322_v4 }
 0x2b2   : > { %v7826_v23 = vpop.f32.mrf.mxu1  ;;  %v5563_v16 = vadd.f32 %v5436_v51, %v10228_v61  ;;  %v5286_v61 = vadd.f32 %v10246_v25, %v10238_v62 }
 0x2b3   : > { %v7793_v31 = vpop.f32.mrf.mxu0  ;;  %v5863_v45 = vadd.f32 %v7826_v23, %v5565_v14 }
 0x2b4   : > { %v5734_v60 = vpop.f32.mrf.mxu1  ;;  %v5566_v41 = vadd.f32 %v7793_v31, %v10230_v19 }
 0x2b5   : > { %v5439_v59 = vpop.f32.mrf.mxu0  ;;  %v5861_v50 = vadd.f32 %v5734_v60, %v5563_v16  ;;  %v6257_v48 = vmul.f32 %v5863_v45, %v5863_v45 }
 0x2b6   : > { %v5564_v10 = vadd.f32 %v5439_v59, %v5270_v55  ;;  %v7827_v27 = vpop.f32.mrf.mxu1 }
 0x2b7   : > { %v7796_v2 = vpop.f32.mrf.mxu0  ;;  %v6255_v28 = vmul.f32 %v5861_v50, %v5861_v50  ;;  %v5864_v37 = vadd.f32 %v7827_v27, %v5566_v41 }
 0x2b8   : > { %v5737_v38 = vpop.f32.mrf.mxu1  ;;  %v5569_v49 = vadd.f32 %v7796_v2, %v10236_v30 }
 0x2b9   : > { %v5452_v17 = vpop.f32.mrf.mxu0  ;;  %v5862_v32 = vadd.f32 %v5737_v38, %v5564_v10  ;;  %v6258_v62 = vmul.f32 %v5864_v37, %v5864_v37 }
 0x2ba   : > { %v5567_v1 = vadd.f32 %v5452_v17, %v5283_v56  ;;  %v7830_v51 = vpop.f32.mrf.mxu1  ;;  %v5299_v17 = vadd.f32 %v10252_v54, %v10244_v24 }
 0x2bb   : > { %v7797_v39 = vpop.f32.mrf.mxu0  ;;  %v6217_v55 = vadd.f32 %v5862_v32, %v5861_v50  ;;  %v6256_v59 = vmul.f32 %v5862_v32, %v5862_v32  ;;  %v5867_v27 = vadd.f32 %v7830_v51, %v5569_v49 }
 0x2bc   : > { %v5750_v52 = vpop.f32.mrf.mxu1  ;;  %v5570_v10 = vadd.f32 %v7797_v39, %v10242_v44 }
 0x2bd   : > { %v5455_v4 = vpop.f32.mrf.mxu0  ;;  %v6218_v19 = vadd.f32 %v6217_v55, %v5863_v45  ;;  %v6287_v31 = vadd.f32 %v6256_v59, %v6255_v28  ;;  %v5865_v23 = vadd.f32 %v5750_v52, %v5567_v1  ;;  %v6261_v55 = vmul.f32 %v5867_v27, %v5867_v27 }
 0x2be   : > { %v5568_v16 = vadd.f32 %v5455_v4, %v5286_v61  ;;  %v7831_v60 = vpop.f32.mrf.mxu1  ;;  %v5302_v4 = vadd.f32 %v10264_v36, %v10250_v6 }
 0x2bf   : > { %v7800_v38 = vpop.f32.mrf.mxu0  ;;  %v6288_v25 = vadd.f32 %v6287_v31, %v6257_v48  ;;  %v6219_v14 = vadd.f32 %v6218_v19, %v5864_v37  ;;  %v6259_v56 = vmul.f32 %v5865_v23, %v5865_v23  ;;  %v5868_v54 = vadd.f32 %v7831_v60, %v5570_v10 }
 0x2c0   : > { %v5753_v50 = vpop.f32.mrf.mxu1  ;;  %v5573_v39 = vadd.f32 %v7800_v38, %v10248_v63  ;;  %v5315_v31 = vadd.f32 %v10270_v43, %v10262_v35 }
 0x2c1   : > { %v5468_v32 = vpop.f32.mrf.mxu0  ;;  %v6220_v41 = vadd.f32 %v6219_v14, %v5865_v23  ;;  %v6289_v30 = vadd.f32 %v6288_v25, %v6258_v62  ;;  %v5866_v45 = vadd.f32 %v5753_v50, %v5568_v16  ;;  %v6262_v6 = vmul.f32 %v5868_v54, %v5868_v54 }
 0x2c2   : > { %v5571_v2 = vadd.f32 %v5468_v32, %v5299_v17  ;;  %v7834_v61 = vpop.f32.mrf.mxu1 }
 0x2c3   : > { %v7801_v1 = vpop.f32.mrf.mxu0  ;;  %v6290_v24 = vadd.f32 %v6289_v30, %v6259_v56  ;;  %v6221_v28 = vadd.f32 %v6220_v41, %v5866_v45  ;;  %v6260_v48 = vmul.f32 %v5866_v45, %v5866_v45  ;;  %v5871_v62 = vadd.f32 %v7834_v61, %v5573_v39 }
 0x2c4   : > { %v5766_v44 = vpop.f32.mrf.mxu1  ;;  %v5574_v17 = vadd.f32 %v7801_v1, %v10260_v46  ;;  %v5318_v56 = vadd.f32 %v10276_v47, %v10268_v15 }
 0x2c5   : > { %v5471_v37 = vpop.f32.mrf.mxu0  ;;  %v6222_v51 = vadd.f32 %v6221_v28, %v5867_v27  ;;  %v6291_v59 = vadd.f32 %v6290_v24, %v6260_v48  ;;  %v5869_v52 = vadd.f32 %v5766_v44, %v5571_v2  ;;  %v6265_v2 = vmul.f32 %v5871_v62, %v5871_v62 }
 0x2c6   : > { %v5572_v49 = vadd.f32 %v5471_v37, %v5302_v4  ;;  %v7835_v23 = vpop.f32.mrf.mxu1  ;;  %v5331_v48 = vadd.f32 %v10282_v3, %v10274_v5 }
 0x2c7   : > { %v7804_v19 = vpop.f32.mrf.mxu0  ;;  %v6292_v36 = vadd.f32 %v6291_v59, %v6261_v55  ;;  %v6223_v16 = vadd.f32 %v6222_v51, %v5868_v54  ;;  %v6263_v25 = vmul.f32 %v5869_v52, %v5869_v52  ;;  %v5872_v43 = vadd.f32 %v7835_v23, %v5574_v17 }
 0x2c8   : > { %v5769_v14 = vpop.f32.mrf.mxu1  ;;  %v5577_v1 = vadd.f32 %v7804_v19, %v10266_v57 }
 0x2c9   : > { %v5484_v60 = vpop.f32.mrf.mxu0  ;;  %v6224_v10 = vadd.f32 %v6223_v16, %v5869_v52  ;;  %v6293_v63 = vadd.f32 %v6292_v36, %v6262_v6  ;;  %v5870_v38 = vadd.f32 %v5769_v14, %v5572_v49  ;;  %v6266_v15 = vmul.f32 %v5872_v43, %v5872_v43 }
 0x2ca   : > { %v5575_v32 = vadd.f32 %v5484_v60, %v5315_v31  ;;  %v7838_v50 = vpop.f32.mrf.mxu1  ;;  %v5334_v6 = vadd.f32 %v10288_v34, %v10280_v42 }
 0x2cb   : > { %v7805_v27 = vpop.f32.mrf.mxu0  ;;  %v6294_v35 = vadd.f32 %v6293_v63, %v6263_v25  ;;  %v6225_v41 = vadd.f32 %v6224_v10, %v5870_v38  ;;  %v6264_v30 = vmul.f32 %v5870_v38, %v5870_v38  ;;  %v5875_v51 = vadd.f32 %v7838_v50, %v5577_v1 }
 0x2cc   : > { %v5782_v46 = vpop.f32.mrf.mxu1  ;;  %v5578_v44 = vadd.f32 %v7805_v27, %v10272_v8  ;;  %v5347_v27 = vadd.f32 %v10294_v40, %v10286_v21 }
 0x2cd   : > { %v5487_v45 = vpop.f32.mrf.mxu0  ;;  %v6226_v4 = vadd.f32 %v6225_v41, %v5871_v62  ;;  %v6295_v61 = vadd.f32 %v6294_v35, %v6264_v30  ;;  %v5873_v24 = vadd.f32 %v5782_v46, %v5575_v32  ;;  %v6269_v62 = vmul.f32 %v5875_v51, %v5875_v51 }
 0x2ce   : > { %v5576_v54 = vadd.f32 %v5487_v45, %v5318_v56  ;;  %v7839_v37 = vpop.f32.mrf.mxu1 }
 0x2cf   : > { %v7808_v28 = vpop.f32.mrf.mxu0  ;;  %v6296_v47 = vadd.f32 %v6295_v61, %v6265_v2  ;;  %v6227_v55 = vadd.f32 %v6226_v4, %v5872_v43  ;;  %v6267_v59 = vmul.f32 %v5873_v24, %v5873_v24  ;;  %v5876_v3 = vadd.f32 %v7839_v37, %v5578_v44 }
 0x2d0   : > { %v5785_v52 = vpop.f32.mrf.mxu1  ;;  %v5581_v25 = vadd.f32 %v7808_v28, %v10278_v7  ;;  %v5350_v61 = vadd.f32 %v10300_v13, %v10292_v0 }
 0x2d1   : > { %v5500_v39 = vpop.f32.mrf.mxu0  ;;  %v6228_v49 = vadd.f32 %v6227_v55, %v5873_v24  ;;  %v6297_v57 = vadd.f32 %v6296_v47, %v6266_v15  ;;  %v5874_v19 = vadd.f32 %v5785_v52, %v5576_v54  ;;  %v6270_v42 = vmul.f32 %v5876_v3, %v5876_v3 }
 0x2d2   : > { %v5579_v31 = vadd.f32 %v5500_v39, %v5331_v48  ;;  %v7842_v36 = vpop.f32.mrf.mxu1 }
 0x2d3   : > { %v7809_v23 = vpop.f32.mrf.mxu0  ;;  %v6298_v5 = vadd.f32 %v6297_v57, %v6267_v59  ;;  %v6229_v16 = vadd.f32 %v6228_v49, %v5874_v19  ;;  %v6268_v17 = vmul.f32 %v5874_v19, %v5874_v19  ;;  %v5879_v41 = vadd.f32 %v7842_v36, %v5581_v25 }
 0x2d4   : > { %v5798_v8 = vpop.f32.mrf.mxu1  ;;  %v5582_v35 = vadd.f32 %v7809_v23, %v10284_v26  ;;  %v5363_v59 = vadd.f32 %v10306_v58, %v10298_v22 }
 0x2d5   : > { %v5503_v60 = vpop.f32.mrf.mxu0  ;;  %v6230_v14 = vadd.f32 %v6229_v16, %v5875_v51  ;;  %v6299_v10 = vadd.f32 %v6298_v5, %v6268_v17  ;;  %v5877_v63 = vadd.f32 %v5798_v8, %v5579_v31  ;;  %v6273_v37 = vmul.f32 %v5879_v41, %v5879_v41 }
 0x2d6   : > { %v5580_v38 = vadd.f32 %v5503_v60, %v5334_v6  ;;  %v7843_v56 = vpop.f32.mrf.mxu1  ;;  %v5366_v17 = vadd.f32 %v10312_v33, %v10304_v20 }
 0x2d7   : > { %v7812_v32 = vpop.f32.mrf.mxu0  ;;  %v6300_v34 = vadd.f32 %v6299_v10, %v6269_v62  ;;  %v6231_v50 = vadd.f32 %v6230_v14, %v5876_v3  ;;  %v6271_v30 = vmul.f32 %v5877_v63, %v5877_v63  ;;  %v5880_v40 = vadd.f32 %v7843_v56, %v5582_v35 }
 0x2d8   : > { %v5801_v45 = vpop.f32.mrf.mxu1  ;;  %v5585_v15 = vadd.f32 %v7812_v32, %v10290_v53 }
 0x2d9   : > { %v5516_v43 = vpop.f32.mrf.mxu0  ;;  %v6232_v2 = vadd.f32 %v6231_v50, %v5877_v63  ;;  %v6301_v7 = vadd.f32 %v6300_v34, %v6270_v42  ;;  %v5878_v46 = vadd.f32 %v5801_v45, %v5580_v38  ;;  %v6274_v0 = vmul.f32 %v5880_v40, %v5880_v40 }
 0x2da   : > { %v5583_v1 = vadd.f32 %v5516_v43, %v5347_v27  ;;  %v7846_v24 = vpop.f32.mrf.mxu1  ;;  %v5379_v42 = vadd.f32 %v10318_v29, %v10310_v11 }
 0x2db   : > { %v7813_v4 = vpop.f32.mrf.mxu0  ;;  %v6302_v21 = vadd.f32 %v6301_v7, %v6271_v30  ;;  %v6233_v54 = vadd.f32 %v6232_v2, %v5878_v46  ;;  %v6272_v28 = vmul.f32 %v5878_v46, %v5878_v46  ;;  %v5883_v31 = vadd.f32 %v7846_v24, %v5585_v15 }
 0x2dc   : > { %v5814_v26 = vpop.f32.mrf.mxu1  ;;  %v5586_v57 = vadd.f32 %v7813_v4, %v10296_v12  ;;  %v10663_v4 = vld [vmem:[#allocation53_spill] sm:$0xff] }
 0x2dd   : > { %v5519_v48 = vpop.f32.mrf.mxu0  ;;  %v6234_v47 = vadd.f32 %v6233_v54, %v5879_v41  ;;  %v6303_v55 = vadd.f32 %v6302_v21, %v6272_v28  ;;  %v5881_v44 = vadd.f32 %v5814_v26, %v5583_v1  ;;  %v6277_v14 = vmul.f32 %v5883_v31, %v5883_v31 }
 0x2de   : > { %v5584_v39 = vadd.f32 %v5519_v48, %v5350_v61  ;;  %v7847_v52 = vpop.f32.mrf.mxu1  ;;  %v10664_v61 = vld [vmem:[#allocation55_spill] sm:$0xff] }
 0x2df   : > { %v7816_v51 = vpop.f32.mrf.mxu0  ;;  %v6304_v13 = vadd.f32 %v6303_v55, %v6273_v37  ;;  %v6235_v49 = vadd.f32 %v6234_v47, %v5880_v40  ;;  %v6275_v23 = vmul.f32 %v5881_v44, %v5881_v44  ;;  %v5884_v58 = vadd.f32 %v7847_v52, %v5586_v57  ;;  %v10665_v37 = vld [vmem:[#allocation30_spill] sm:$0xff] }
 0x2e0   : > { %v5817_v6 = vpop.f32.mrf.mxu1  ;;  %v5589_v10 = vadd.f32 %v7816_v51, %v10302_v9  ;;  %v5382_v24 = vadd.f32 %v10664_v61, %v10663_v4 }
 0x2e1   : > { %v5532_v19 = vpop.f32.mrf.mxu0  ;;  %v6236_v36 = vadd.f32 %v6235_v49, %v5881_v44  ;;  %v6305_v53 = vadd.f32 %v6304_v13, %v6274_v0  ;;  %v5882_v5 = vadd.f32 %v5817_v6, %v5584_v39  ;;  %v6278_v20 = vmul.f32 %v5884_v58, %v5884_v58  ;;  %v10666_v0 = vld [vmem:[#allocation54_spill] sm:$0xff] }
 0x2e2   : > { %v5587_v3 = vadd.f32 %v5532_v19, %v5363_v59  ;;  %v7850_v60 = vpop.f32.mrf.mxu1 }
 0x2e3   : > { %v7817_v16 = vpop.f32.mrf.mxu0  ;;  %v6306_v22 = vadd.f32 %v6305_v53, %v6275_v23  ;;  %v6237_v62 = vadd.f32 %v6236_v36, %v5882_v5  ;;  %v6276_v8 = vmul.f32 %v5882_v5, %v5882_v5  ;;  %v5887_v41 = vadd.f32 %v7850_v60, %v5589_v10 }
 0x2e4   : > { %v5830_v12 = vpop.f32.mrf.mxu1  ;;  %v5590_v35 = vadd.f32 %v7817_v16, %v10308_v18 }
 0x2e5   : > { %v5535_v25 = vpop.f32.mrf.mxu0  ;;  %v6238_v63 = vadd.f32 %v6237_v62, %v5883_v31  ;;  %v6307_v38 = vadd.f32 %v6306_v22, %v6276_v8  ;;  %v5885_v32 = vadd.f32 %v5830_v12, %v5587_v3  ;;  %v6281_v48 = vmul.f32 %v5887_v41, %v5887_v41 }
 0x2e6   : > { %v5588_v27 = vadd.f32 %v5535_v25, %v5366_v17  ;;  %v7851_v34 = vpop.f32.mrf.mxu1 }
 0x2e7   : > { %v7820_v56 = vpop.f32.mrf.mxu0  ;;  %v6308_v33 = vadd.f32 %v6307_v38, %v6277_v14  ;;  %v6239_v50 = vadd.f32 %v6238_v63, %v5884_v58  ;;  %v6279_v30 = vmul.f32 %v5885_v32, %v5885_v32  ;;  %v5888_v29 = vadd.f32 %v7851_v34, %v5590_v35  ;;  %v10668_v35 = vld [vmem:[#allocation26_spill] sm:$0xff] }
 0x2e8   : > { %v5833_v45 = vpop.f32.mrf.mxu1  ;;  %v5593_v26 = vadd.f32 %v7820_v56, %v10665_v37 }
 0x2e9   : > { %v5548_v43 = vpop.f32.mrf.mxu0  ;;  %v6240_v2 = vadd.f32 %v6239_v50, %v5885_v32  ;;  %v6309_v9 = vadd.f32 %v6308_v33, %v6278_v20  ;;  %v5886_v7 = vadd.f32 %v5833_v45, %v5588_v27  ;;  %v6282_v51 = vmul.f32 %v5888_v29, %v5888_v29  ;;  %v10667_v20 = vld [vmem:[#allocation24_spill] sm:$0xff] }
 0x2ea   : > { %v5591_v46 = vadd.f32 %v5548_v43, %v5379_v42  ;;  %v7854_v21 = vpop.f32.mrf.mxu1 }
 0x2eb   : > { %v7821_v1 = vpop.f32.mrf.mxu0  ;;  %v6310_v11 = vadd.f32 %v6309_v9, %v6279_v30  ;;  %v6241_v40 = vadd.f32 %v6240_v2, %v5886_v7  ;;  %v6280_v54 = vmul.f32 %v5886_v7, %v5886_v7  ;;  %v5891_v49 = vadd.f32 %v7854_v21, %v5593_v26 }
 0x2ec   : > { %v5846_v18 = vpop.f32.mrf.mxu1  ;;  %v5594_v13 = vadd.f32 %v7821_v1, %v10666_v0 }
 0x2ed   : > { %v5551_v28 = vpop.f32.mrf.mxu0  ;;  %v6242_v15 = vadd.f32 %v6241_v40, %v5887_v41  ;;  %v6311_v47 = vadd.f32 %v6310_v11, %v6280_v54  ;;  %v5889_v55 = vadd.f32 %v5846_v18, %v5591_v46  ;;  %v6285_v16 = vmul.f32 %v5891_v49, %v5891_v49 }
 0x2ee   : > { %v5592_v44 = vadd.f32 %v5551_v28, %v5382_v24  ;;  %v7855_v39 = vpop.f32.mrf.mxu1 }
 0x2ef   : > { %v6312_v59 = vadd.f32 %v6311_v47, %v6281_v48  ;;  %v6243_v52 = vadd.f32 %v6242_v15, %v5888_v29  ;;  %v6283_v31 = vmul.f32 %v5889_v55, %v5889_v55  ;;  %v5892_v53 = vadd.f32 %v7855_v39, %v5594_v13 }
 0x2f0   : > { %v5849_v57 = vpop.f32.mrf.mxu1 }
 0x2f1   : > { %v6244_v19 = vadd.f32 %v6243_v52, %v5889_v55  ;;  %v6313_v23 = vadd.f32 %v6312_v59, %v6282_v51  ;;  %v5890_v6 = vadd.f32 %v5849_v57, %v5592_v44  ;;  %v6286_v22 = vmul.f32 %v5892_v53, %v5892_v53 }
 0x2f3   : > { %v6314_v36 = vadd.f32 %v6313_v23, %v6283_v31  ;;  %v6245_v5 = vadd.f32 %v6244_v19, %v5890_v6  ;;  %v6284_v3 = vmul.f32 %v5890_v6, %v5890_v6 }
 0x2f5   : > { %v6246_v17 = vadd.f32 %v6245_v5, %v5891_v49  ;;  %v6315_v60 = vadd.f32 %v6314_v36, %v6284_v3 }
 0x2f7   : > { %v6247_v58 = vadd.f32 %v6246_v17, %v5892_v53  ;;  %v6316_v62 = vadd.f32 %v6315_v60, %v6285_v16 }
 0x2f9   : > { %v6248_v8 = vrot.slane %v6247_v58, 4  ;;  %v6317_v25 = vadd.f32 %v6316_v62, %v6286_v22 }
 0x2fb   : > { %v6249_v14 = vadd.f32 %v6248_v8, %v6247_v58  ;;  %v6318_v12 = vrot.slane %v6317_v25, 4 }
 0x2fd   : > { %v6250_v10 = vrot.slane %v6249_v14, 2  ;;  %v6319_v63 = vadd.f32 %v6318_v12, %v6317_v25 }
 0x2ff   : > { %v6251_v38 = vadd.f32 %v6250_v10, %v6249_v14  ;;  %v6320_v32 = vrot.slane %v6319_v63, 2 }
 0x301   : > { %v6252_v27 = vrot.slane %v6251_v38, 1  ;;  %v6321_v56 = vadd.f32 %v6320_v32, %v6319_v63 }
 0x303   : > { %v6253_v42 = vadd.f32 %v6252_v27, %v6251_v38  ;;  %v6322_v34 = vrot.slane %v6321_v56, 1 }
 0x305   : > { %v6254_v33 = vadd.f32 %v6253_v42, %v10667_v20  ;;  %v6323_v50 = vadd.f32 %v6322_v34, %v6321_v56 }
 0x307   : > { %v6324_v43 = vadd.f32 %v6323_v50, %v10668_v35 }
 0x309   : > { %v6326_v41 = vsel %vm6325_vm7, %v6254_v33, %v6324_v43 }
 0x30a   : > { %6327 = vst [vmem:[%s161_s28] sm:$0x3] %v6326_v41 }
 0x30b PF: > { %s12_s11 = sadd.s32 1, %s8047_s11   ;;  %s10669_s9 = smov %s8043_s10 }
 0x30c   : > { %p9_p5 = scmp.ge.s32.totalorder %s12_s11, 4   ;;  %s10670_s10 = smov %s10672_s12 }
 0x30e   :  { %11 = sbr.rel (!%p9_p5) target bundleno = 2 (0x2), region = 76 }

// kernel: gblock_forward.3
= control target key start
LH: loop header
LB: loop body
LE: loop exit
PB: predicated region body
PF: predicated region fallthrough
CT: control target
= control target key end

     0   :  { %s9107_s15 = smov 0   ;;  %s9109_s16 = smov 0   ;;  %s12351_s0 = inlined_call_operand.vmem [shape: bf16[2,18,18,16], index: 0, kind: input, shape index: {}]   ;;  %s12352_s1 = inlined_call_operand.vmem [shape: bf16[4,4,16,128], index: 1, kind: input, shape index: {}]   ;;  %s12353_s2 = inlined_call_operand.vmem [shape: f32[1,128], index: 2, kind: input, shape index: {}]   ;;  %s12354_s3 = inlined_call_operand.vmem [shape: f32[1,128], index: 3, kind: input, shape index: {}]   ;;  %s12355_s4 = inlined_call_operand.vmem [shape: bf16[2,2,2,256,8], index: 4, kind: output, shape index: {}]  }
   0x1   :  { %s9111_s17 = smov 0  }
   0x2 LB: > { %s26_s18 = sadd.s32 1, %s9076_s16  ;;  %p7089_p0 = scmp.ge.s32.totalorder %s9080_s17, 1  ;;  %s9080_s17 = sphi %s9111_s17, %s14_s17   ;;  %s9076_s16 = sphi %s9109_s16, %s12751_s16   ;;  %s9072_s15 = sphi %s9107_s15, %s12750_s15  }
   0x3   : > { %p28_p1 = scmp.ge.s32.totalorder %s26_s18, 2  ;;  %p176_p2 = scmp.lt.s32.totalorder %s9080_s17, 3 }
   0x5   : > { %s12753_s18 = smov (%p28_p1, %s26_s18), 0  ;;  %p177_p3 = pnand %p7089_p0, %p176_p2 }
   0x7   : > { %180 = sbr.rel (%p177_p3) target bundleno = 764 (0x2fc), region = 36 }
   0xc   : > { %v8913_v0 = vld [vmem:[%s12352_s1] sm:$0xff]   ;;  %p206_p4 = scmp.lt.s32.totalorder %s9072_s15, 1  ;;  %v8914_v1 = vld [vmem:[%s12352_s1 + $0x8] sm:$0xff]   ;;  %v9136_v2 = vld [vmem:[%s12352_s1 + $0x10] sm:$0xff]   ;;  %vm274_vm0 = vsmask.f32 3328 }
   0xd   : > { %8378 = vmatprep.subr.bf16.mxu1 %v8913_v0  ;;  %8344 = vmatprep.subr.bf16.mxu0 %v8914_v1  ;;  %v8918_v3 = vld [vmem:[%s12352_s1 + $0x18] sm:$0xff]   ;;  %vm2123_vm1 = vcmask 130048   ;;  %vm275_vm2 = vsmask.f32 7440  ;;  %v9168_v24 = vld [vmem:[%s12352_s1 + $0x20] sm:$0xff]   ;;  %vm725_vm4 = vcmask 1042432  }
   0xe   : > { %s12755_s15 = smov (!%p206_p4, %s9072_s15), 1  ;;  %8379 = vmatpush3.bf16.msra.mxu1 %v8913_v0  ;;  %8345 = vmatpush3.bf16.msra.mxu0 %v8914_v1  ;;  %vm9176_vm3 = vmor %vm274_vm0, %vm275_vm2  ;;  %vm726_vm5 = vcmask 1046532   ;;  %vm6190_vm7 = vcmask 60416  }
   0xf   : > { %s8888_s25 = smul.u32 216, %s12755_s15  ;;  %8412 = vmatprep.subr.bf16.mxu0 %v9136_v2  ;;  %8446 = vmatprep.subr.bf16.mxu1 %v8918_v3  ;;  %vm9707_vm6 = vmor %vm725_vm4, %vm726_vm5  ;;  %s7943_s8 = sshll.u32 %s12755_s15, 9 }
  0x10   : > { %s10399_s10 = scalar_lea.vmem %s12355_s4, %s7943_s8 }
  0x11   : > { %s9146_s30 = scalar_lea.vmem %s12351_s0, %s8888_s25 }
  0x12   : > { %v226_v4 = vld [vmem:[%s9146_s30] sm:$0xf]  ;;  %v9150_v5 = vld [vmem:[%s9146_s30 + $0x4] sm:$0xf]  ;;  %v228_v6 = vld [vmem:[%s9146_s30 + $0xc] sm:$0xf] }
  0x13   : > { %v278_v7 = vshrl.u32 %v226_v4, 16  ;;  %v281_v8 = vshll.u32 %v226_v4, 16  ;;  %v291_v9 = vshrl.u32 %v9150_v5, 16  ;;  %v9155_v10 = vld [vmem:[%s9146_s30 + $0x10] sm:$0xf]  ;;  %v12356_v11 = vrot.slane %v9150_v5, 5 }
  0x14   : > { %v7304_v12 = vcombine.low %v226_v4, %v9150_v5  ;;  %v302_v13 = vshrl.u32 %v228_v6, 16  ;;  %v305_v14 = vshll.u32 %v228_v6, 16  ;;  %v258_v15 = vld [vmem:[%s9146_s30 + $0x8] sm:$0x1]  ;;  %v315_v18 = vshrl.u32 %v9155_v10, 16 }
  0x15   : > { %v280_v16 = vrot.slane %v278_v7, 4  ;;  %v283_v17 = vrot.slane %v281_v8, 5  ;;  %v7305_v21 = vcombine.low %v228_v6, %v9155_v10  ;;  %v287_v22 = vshll.u32 %v9150_v5, 16  ;;  %v259_v23 = vld [vmem:[%s9146_s30 + $0x14] sm:$0x1] }
  0x16   : > { %8380 = vmatprep.mubr.msk.bf16.mxu1 %vm2123_vm1, %v7304_v12  ;;  %v304_v19 = vrot.slane %v302_v13, 4  ;;  %v307_v20 = vrot.slane %v305_v14, 5  ;;  %v293_v26 = vrot.slane %v291_v9, 4  ;;  %v297_v27 = vshll.u32 %v258_v15, 16  ;;  %v230_v33 = vld [vmem:[%s9146_s30 + $0x18] sm:$0xf] }
  0x17   : > { %v284_v25 = vor.u32 %v283_v17, %v280_v16  ;;  %v9172_v28 = vrot.slane %v12356_v11, 4  ;;  %8381 = vmatmul.mubr.msk.bf16.vlgmr.msra.gmra.mxu1 %vm2123_vm1, %v7305_v21  ;;  %v289_v30 = vrot.slane %v287_v22, 5  ;;  %v311_v32 = vshll.u32 %v9155_v10, 16  ;;  %v231_v38 = vld [vmem:[%s9146_s30 + $0x1c] sm:$0xf]  ;;  %v9209_v16 = vld [vmem:[%s12352_s1 + $0x28] sm:$0xff]  }
  0x18   : > { %v308_v31 = vor.u32 %v307_v20, %v304_v19  ;;  %v12357_v34 = vrot.slane %v9155_v10, 5  ;;  %v317_v36 = vrot.slane %v315_v18, 4  ;;  %v321_v37 = vshll.u32 %v259_v23, 16  ;;  %8447 = vmatpush3.bf16.msra.mxu1 %v8918_v3  ;;  %v232_v43 = vld [vmem:[%s9146_s30 + $0x24] sm:$0xf] }
  0x19   : > { %v285_v35 = vrot.slane %v284_v25, 4  ;;  %v294_v39 = vor.u32 %v293_v26, %v289_v30  ;;  %v299_v40 = vrot.slane %v297_v27, 5  ;;  %v313_v42 = vrot.slane %v311_v32, 5  ;;  %8514 = vmatprep.subr.bf16.mxu1 %v9168_v24  ;;  %v233_v48 = vld [vmem:[%s9146_s30 + $0x28] sm:$0xf] }
  0x1a   : > { %v309_v41 = vrot.slane %v308_v31, 4  ;;  %v323_v45 = vrot.slane %v321_v37, 5  ;;  %v326_v46 = vshrl.u32 %v230_v33, 16  ;;  %v329_v47 = vshll.u32 %v230_v33, 16  ;;  %v260_v61 = vld [vmem:[%s9146_s30 + $0x20] sm:$0x1] }
  0x1b   : > { %v290_v44 = vsel %vm9176_vm3, %v285_v35, %v289_v30  ;;  %v295_v49 = vrot.slane %v294_v39, 4  ;;  %v318_v51 = vor.u32 %v317_v36, %v313_v42  ;;  %v339_v52 = vshrl.u32 %v231_v38, 16  ;;  %v261_v3 = vld [vmem:[%s9146_s30 + $0x2c] sm:$0x1]  ;;  %v234_v9 = vld [vmem:[%s9146_s30 + $0x30] sm:$0xf] }
  0x1c   : > { %v314_v50 = vsel %vm9176_vm3, %v309_v41, %v313_v42  ;;  %v328_v53 = vrot.slane %v326_v46, 4  ;;  %v331_v54 = vrot.slane %v329_v47, 5  ;;  %v7306_v55 = vcombine.low %v230_v33, %v231_v38  ;;  %v235_v21 = vld [vmem:[%s9146_s30 + $0x34] sm:$0xf]  ;;  %v236_v27 = vld [vmem:[%s9146_s30 + $0x3c] sm:$0xf] }
  0x1d   : > { %v350_v56 = vshrl.u32 %v232_v43, 16  ;;  %v300_v57 = vsel %vm9176_vm3, %v295_v49, %v299_v40  ;;  %v319_v58 = vrot.slane %v318_v51, 4  ;;  %v353_v59 = vshll.u32 %v232_v43, 16  ;;  %v237_v35 = vld [vmem:[%s9146_s30 + $0x40] sm:$0xf] }
  0x1e   : > { %v363_v60 = vshrl.u32 %v233_v48, 16  ;;  %v9194_v62 = vcombine.low %v290_v44, %v300_v57  ;;  %8384 = vmatprep.mubr.msk.bf16.mxu1 %vm2123_vm1, %v7306_v55  ;;  %v7307_v0 = vcombine.low %v232_v43, %v233_v48  ;;  %v332_v1 = vor.u32 %v331_v54, %v328_v53  ;;  %v262_v47 = vld [vmem:[%s9146_s30 + $0x38] sm:$0x1]  ;;  %v238_v57 = vld [vmem:[%s9146_s30 + $0x48] sm:$0xf] }
  0x1f   : > { %v352_v63 = vrot.slane %v350_v56, 4  ;;  %v324_v4 = vsel %vm9176_vm3, %v319_v58, %v323_v45  ;;  %v355_v6 = vrot.slane %v353_v59, 5  ;;  %v335_v7 = vshll.u32 %v231_v38, 16  ;;  %v9547_v11 = vld [vmem:[%s9146_s30 + $0x88] sm:$0xf] }
  0x20   : > { %v341_v8 = vrot.slane %v339_v52, 4  ;;  %8346 = vmatprep.mubr.msk.bf16.mxu0 %vm2123_vm1, %v9194_v62  ;;  %v9203_v12 = vcombine.low %v314_v50, %v324_v4  ;;  %8385 = vmatmul.mubr.msk.bf16.gmra.mxu1 %vm2123_vm1, %v7307_v0  ;;  %v333_v13 = vrot.slane %v332_v1, 4  ;;  %v345_v14 = vshll.u32 %v260_v61, 16  ;;  %v263_v52 = vld [vmem:[%s9146_s30 + $0x44] sm:$0x1]  ;;  %12454 = vst [vmem:[#allocation19_spill] sm:$0xff] %v9547_v11 }
  0x21   : > { %v359_v15 = vshll.u32 %v233_v48, 16  ;;  %v337_v17 = vrot.slane %v335_v7, 5  ;;  %v356_v18 = vor.u32 %v355_v6, %v352_v63  ;;  %v365_v19 = vrot.slane %v363_v60, 4  ;;  %v239_v4 = vld [vmem:[%s9146_s30 + $0x4c] sm:$0xf] }
  0x22   : > { %v369_v20 = vshll.u32 %v261_v3, 16  ;;  %8347 = vmatmul.mubr.msk.bf16.vlgmr.msra.gmra.mxu0 %vm2123_vm1, %v9203_v12  ;;  %v347_v22 = vrot.slane %v345_v14, 5  ;;  %v374_v25 = vshrl.u32 %v234_v9, 16  ;;  %v377_v26 = vshll.u32 %v234_v9, 16 }
  0x23   : > { %v361_v23 = vrot.slane %v359_v15, 5  ;;  %8413 = vmatpush3.bf16.msra.mxu0 %v9136_v2  ;;  %v338_v30 = vsel %vm9176_vm3, %v333_v13, %v337_v17  ;;  %v342_v31 = vor.u32 %v341_v8, %v337_v17  ;;  %v357_v32 = vrot.slane %v356_v18, 4  ;;  %v240_v13 = vld [vmem:[%s9146_s30 + $0x54] sm:$0xf] }
  0x24   : > { %v371_v33 = vrot.slane %v369_v20, 5  ;;  %v376_v37 = vrot.slane %v374_v25, 4  ;;  %v379_v38 = vrot.slane %v377_v26, 5  ;;  %v387_v39 = vshrl.u32 %v235_v21, 16  ;;  %8480 = vmatprep.subr.bf16.mxu0 %v9209_v16 }
  0x25   : > { %v366_v36 = vor.u32 %v365_v19, %v361_v23  ;;  %v343_v40 = vrot.slane %v342_v31, 4  ;;  %v362_v41 = vsel %vm9176_vm3, %v357_v32, %v361_v23  ;;  %v7308_v2 = vcombine.low %v234_v9, %v235_v21  ;;  %v241_v19 = vld [vmem:[%s9146_s30 + $0x58] sm:$0xf]  ;;  %v264_v31 = vld [vmem:[%s9146_s30 + $0x50] sm:$0x1] }
  0x26   : > { %v398_v42 = vshrl.u32 %v236_v27, 16  ;;  %v401_v44 = vshll.u32 %v236_v27, 16  ;;  %v411_v45 = vshrl.u32 %v237_v35, 16  ;;  %v7309_v46 = vcombine.low %v236_v27, %v237_v35 }
  0x27   : > { %v367_v43 = vrot.slane %v366_v36, 4  ;;  %v348_v48 = vsel %vm9176_vm3, %v343_v40, %v347_v22  ;;  %8388 = vmatprep.mubr.msk.bf16.mxu1 %vm2123_vm1, %v7308_v2  ;;  %v380_v50 = vor.u32 %v379_v38, %v376_v37  ;;  %v383_v51 = vshll.u32 %v235_v21, 16 }
  0x28   : > { %v400_v49 = vrot.slane %v398_v42, 4  ;;  %v9227_v53 = vcombine.low %v338_v30, %v348_v48  ;;  %v403_v55 = vrot.slane %v401_v44, 5  ;;  %8389 = vmatmul.mubr.msk.bf16.gmra.mxu1 %vm2123_vm1, %v7309_v46  ;;  %v389_v56 = vrot.slane %v387_v39, 4 }
  0x29   : > { %v372_v54 = vsel %vm9176_vm3, %v367_v43, %v371_v33  ;;  %v381_v59 = vrot.slane %v380_v50, 4  ;;  %v385_v60 = vrot.slane %v383_v51, 5  ;;  %v393_v61 = vshll.u32 %v262_v47, 16  ;;  %v243_v50 = vld [vmem:[%s9146_s30 + $0x64] sm:$0xf] }
  0x2a   : > { %v9233_v58 = vcombine.low %v362_v41, %v372_v54  ;;  %8350 = vmatprep.mubr.msk.bf16.mxu0 %vm2123_vm1, %v9227_v53  ;;  %v404_v63 = vor.u32 %v403_v55, %v400_v49  ;;  %v407_v0 = vshll.u32 %v237_v35, 16  ;;  %v413_v1 = vrot.slane %v411_v45, 4  ;;  %v265_v41 = vld [vmem:[%s9146_s30 + $0x5c] sm:$0x1]  ;;  %v242_v45 = vld [vmem:[%s9146_s30 + $0x60] sm:$0xf] }
  0x2b   : > { %v417_v3 = vshll.u32 %v263_v52, 16  ;;  %v386_v6 = vsel %vm9176_vm3, %v381_v59, %v385_v60  ;;  %v390_v7 = vor.u32 %v389_v56, %v385_v60  ;;  %v395_v8 = vrot.slane %v393_v61, 5  ;;  %v244_v61 = vld [vmem:[%s9146_s30 + $0x6c] sm:$0xf] }
  0x2c   : > { %8351 = vmatmul.mubr.msk.bf16.gmra.mxu0 %vm2123_vm1, %v9233_v58  ;;  %v422_v9 = vshrl.u32 %v238_v57, 16  ;;  %v405_v14 = vrot.slane %v404_v63, 4  ;;  %v409_v15 = vrot.slane %v407_v0, 5  ;;  %v425_v18 = vshll.u32 %v238_v57, 16 }
  0x2d   : > { %v419_v17 = vrot.slane %v417_v3, 5  ;;  %v391_v20 = vrot.slane %v390_v7, 4  ;;  %v435_v22 = vshrl.u32 %v239_v4, 16  ;;  %v7310_v23 = vcombine.low %v238_v57, %v239_v4 }
  0x2e   : > { %v424_v21 = vrot.slane %v422_v9, 4  ;;  %v410_v25 = vsel %vm9176_vm3, %v405_v14, %v409_v15  ;;  %v414_v26 = vor.u32 %v413_v1, %v409_v15  ;;  %v427_v27 = vrot.slane %v425_v18, 5 }
  0x2f   : > { %v446_v30 = vshrl.u32 %v240_v13, 16  ;;  %v396_v32 = vsel %vm9176_vm3, %v391_v20, %v395_v8  ;;  %8392 = vmatprep.mubr.msk.bf16.mxu1 %vm2123_vm1, %v7310_v23  ;;  %v449_v33 = vshll.u32 %v240_v13, 16  ;;  %v459_v35 = vshrl.u32 %v241_v19, 16 }
  0x30   : > { %v7311_v36 = vcombine.low %v240_v13, %v241_v19  ;;  %v9250_v37 = vcombine.low %v386_v6, %v396_v32  ;;  %v415_v38 = vrot.slane %v414_v26, 4  ;;  %v428_v40 = vor.u32 %v427_v27, %v424_v21 }
  0x31   : > { %v448_v39 = vrot.slane %v446_v30, 4  ;;  %v451_v2 = vrot.slane %v449_v33, 5  ;;  %v431_v42 = vshll.u32 %v239_v4, 16  ;;  %v437_v43 = vrot.slane %v435_v22, 4  ;;  %v245_v4 = vld [vmem:[%s9146_s30 + $0x70] sm:$0xf] }
  0x32   : > { %8393 = vmatmul.mubr.msk.bf16.gmra.mxu1 %vm2123_vm1, %v7311_v36  ;;  %v441_v44 = vshll.u32 %v264_v31, 16  ;;  %8354 = vmatprep.mubr.msk.bf16.mxu0 %vm2123_vm1, %v9250_v37  ;;  %v420_v46 = vsel %vm9176_vm3, %v415_v38, %v419_v17  ;;  %v429_v47 = vrot.slane %v428_v40, 4  ;;  %v455_v48 = vshll.u32 %v241_v19, 16  ;;  %v266_v22 = vld [vmem:[%s9146_s30 + $0x68] sm:$0x1] }
  0x33   : > { %v461_v49 = vrot.slane %v459_v35, 4  ;;  %v9260_v51 = vcombine.low %v410_v25, %v420_v46  ;;  %v433_v52 = vrot.slane %v431_v42, 5  ;;  %v452_v55 = vor.u32 %v451_v2, %v448_v39  ;;  %v267_v30 = vld [vmem:[%s9146_s30 + $0x74] sm:$0x1]  ;;  %v246_v36 = vld [vmem:[%s9146_s30 + $0x78] sm:$0xf] }
  0x34   : > { %v443_v54 = vrot.slane %v441_v44, 5  ;;  %v457_v56 = vrot.slane %v455_v48, 5  ;;  %v465_v57 = vshll.u32 %v265_v41, 16  ;;  %v470_v59 = vshrl.u32 %v242_v45, 16 }
  0x35   : > { %v473_v60 = vshll.u32 %v242_v45, 16  ;;  %8355 = vmatmul.mubr.msk.bf16.gmra.mxu0 %vm2123_vm1, %v9260_v51  ;;  %v434_v63 = vsel %vm9176_vm3, %v429_v47, %v433_v52  ;;  %v438_v0 = vor.u32 %v437_v43, %v433_v52  ;;  %v453_v1 = vrot.slane %v452_v55, 4 }
  0x36   : > { %v483_v3 = vshrl.u32 %v243_v50, 16  ;;  %v462_v6 = vor.u32 %v461_v49, %v457_v56  ;;  %v467_v7 = vrot.slane %v465_v57, 5  ;;  %v472_v8 = vrot.slane %v470_v59, 4  ;;  %v249_v57 = vld [vmem:[%s9146_s30 + $0x88] sm:$0xf] }
  0x37   : > { %v475_v9 = vrot.slane %v473_v60, 5  ;;  %v439_v13 = vrot.slane %v438_v0, 4  ;;  %v458_v14 = vsel %vm9176_vm3, %v453_v1, %v457_v56  ;;  %v7312_v15 = vcombine.low %v242_v45, %v243_v50  ;;  %v247_v45 = vld [vmem:[%s9146_s30 + $0x7c] sm:$0xf] }
  0x38   : > { %v494_v17 = vshrl.u32 %v244_v61, 16  ;;  %v463_v18 = vrot.slane %v462_v6, 4  ;;  %v497_v19 = vshll.u32 %v244_v61, 16  ;;  %v507_v20 = vshrl.u32 %v245_v4, 16  ;;  %v268_v6 = vld [vmem:[%s9146_s30 + $0x80] sm:$0x1] }
  0x39   : > { %v7313_v21 = vcombine.low %v244_v61, %v245_v4  ;;  %v444_v23 = vsel %vm9176_vm3, %v439_v13, %v443_v54  ;;  %8396 = vmatprep.mubr.msk.bf16.mxu1 %vm2123_vm1, %v7312_v15  ;;  %v476_v26 = vor.u32 %v475_v9, %v472_v8  ;;  %v479_v27 = vshll.u32 %v243_v50, 16  ;;  %v248_v50 = vld [vmem:[%s9146_s30 + $0x84] sm:$0xf] }
  0x3a   : > { %v496_v25 = vrot.slane %v494_v17, 4  ;;  %v9275_v31 = vcombine.low %v434_v63, %v444_v23  ;;  %v468_v32 = vsel %vm9176_vm3, %v463_v18, %v467_v7  ;;  %v499_v33 = vrot.slane %v497_v19, 5  ;;  %v269_v19 = vld [vmem:[%s9146_s30 + $0x8c] sm:$0x1] }
  0x3b   : > { %8397 = vmatmul.mubr.msk.bf16.gmra.mxu1 %vm2123_vm1, %v7313_v21  ;;  %v485_v35 = vrot.slane %v483_v3, 4  ;;  %v9281_v38 = vcombine.low %v458_v14, %v468_v32  ;;  %v477_v39 = vrot.slane %v476_v26, 4  ;;  %v481_v40 = vrot.slane %v479_v27, 5 }
  0x3c   : > { %v489_v41 = vshll.u32 %v266_v22, 16  ;;  %8358 = vmatprep.mubr.msk.bf16.mxu0 %vm2123_vm1, %v9275_v31  ;;  %v500_v2 = vor.u32 %v499_v33, %v496_v25  ;;  %v503_v42 = vshll.u32 %v245_v4, 16  ;;  %v509_v43 = vrot.slane %v507_v20, 4  ;;  %v250_v25 = vld [vmem:[%s9146_s30 + $0x90] sm:$0xf] }
  0x3d   : > { %v513_v44 = vshll.u32 %v267_v30, 16  ;;  %8359 = vmatmul.mubr.msk.bf16.gmra.mxu0 %vm2123_vm1, %v9281_v38  ;;  %v482_v46 = vsel %vm9176_vm3, %v477_v39, %v481_v40  ;;  %v486_v47 = vor.u32 %v485_v35, %v481_v40  ;;  %v518_v49 = vshrl.u32 %v246_v36, 16  ;;  %v251_v33 = vld [vmem:[%s9146_s30 + $0x94] sm:$0xf] }
  0x3e   : > { %v491_v48 = vrot.slane %v489_v41, 5  ;;  %v501_v52 = vrot.slane %v500_v2, 4  ;;  %v505_v54 = vrot.slane %v503_v42, 5  ;;  %v521_v56 = vshll.u32 %v246_v36, 16 }
  0x3f   : > { %v515_v55 = vrot.slane %v513_v44, 5  ;;  %v487_v59 = vrot.slane %v486_v47, 4  ;;  %v520_v60 = vrot.slane %v518_v49, 4  ;;  %v531_v61 = vshrl.u32 %v247_v45, 16  ;;  %v252_v44 = vld [vmem:[%s9146_s30 + $0x9c] sm:$0xf] }
  0x40   : > { %v7314_v63 = vcombine.low %v246_v36, %v247_v45  ;;  %v506_v0 = vsel %vm9176_vm3, %v501_v52, %v505_v54  ;;  %v510_v1 = vor.u32 %v509_v43, %v505_v54  ;;  %v523_v3 = vrot.slane %v521_v56, 5  ;;  %v253_v49 = vld [vmem:[%s9146_s30 + $0xa0] sm:$0xf] }
  0x41   : > { %v542_v4 = vshrl.u32 %v248_v50, 16  ;;  %v492_v7 = vsel %vm9176_vm3, %v487_v59, %v491_v48  ;;  %v545_v8 = vshll.u32 %v248_v50, 16  ;;  %v555_v9 = vshrl.u32 %v249_v57, 16 }
  0x42   : > { %8400 = vmatprep.mubr.msk.bf16.mxu1 %vm2123_vm1, %v7314_v63  ;;  %v7315_v13 = vcombine.low %v248_v50, %v249_v57  ;;  %v9298_v14 = vcombine.low %v482_v46, %v492_v7  ;;  %v511_v15 = vrot.slane %v510_v1, 4  ;;  %v524_v18 = vor.u32 %v523_v3, %v520_v60  ;;  %v270_v3 = vld [vmem:[%s9146_s30 + $0x98] sm:$0x1] }
  0x43   : > { %v544_v17 = vrot.slane %v542_v4, 4  ;;  %v547_v20 = vrot.slane %v545_v8, 5  ;;  %v527_v21 = vshll.u32 %v247_v45, 16  ;;  %v533_v22 = vrot.slane %v531_v61, 4 }
  0x44   : > { %8401 = vmatmul.mubr.msk.bf16.gmra.mxu1 %vm2123_vm1, %v7315_v13  ;;  %v537_v23 = vshll.u32 %v268_v6, 16  ;;  %8362 = vmatprep.mubr.msk.bf16.mxu0 %vm2123_vm1, %v9298_v14  ;;  %v516_v26 = vsel %vm9176_vm3, %v511_v15, %v515_v55  ;;  %v525_v27 = vrot.slane %v524_v18, 4  ;;  %v551_v30 = vshll.u32 %v249_v57, 16 }
  0x45   : > { %v557_v32 = vrot.slane %v555_v9, 4  ;;  %v9308_v35 = vcombine.low %v506_v0, %v516_v26  ;;  %v529_v36 = vrot.slane %v527_v21, 5  ;;  %v548_v40 = vor.u32 %v547_v20, %v544_v17  ;;  %v271_v9 = vld [vmem:[%s9146_s30 + $0xa4] sm:$0x1] }
  0x46   : > { %v539_v39 = vrot.slane %v537_v23, 5  ;;  %v553_v41 = vrot.slane %v551_v30, 5  ;;  %v561_v2 = vshll.u32 %v269_v19, 16  ;;  %v566_v42 = vshrl.u32 %v250_v25, 16  ;;  %v254_v19 = vld [vmem:[%s9146_s30 + $0xa8] sm:$0xf] }
  0x47   : > { %v569_v43 = vshll.u32 %v250_v25, 16  ;;  %8363 = vmatmul.mubr.msk.bf16.gmra.mxu0 %vm2123_vm1, %v9308_v35  ;;  %v530_v45 = vsel %vm9176_vm3, %v525_v27, %v529_v36  ;;  %v534_v46 = vor.u32 %v533_v22, %v529_v36  ;;  %v549_v47 = vrot.slane %v548_v40, 4 }
  0x48   : > { %v579_v48 = vshrl.u32 %v251_v33, 16  ;;  %v558_v50 = vor.u32 %v557_v32, %v553_v41  ;;  %v563_v52 = vrot.slane %v561_v2, 5  ;;  %v568_v54 = vrot.slane %v566_v42, 4  ;;  %v255_v32 = vld [vmem:[%s9146_s30 + $0xac] sm:$0xf] }
  0x49   : > { %v571_v55 = vrot.slane %v569_v43, 5  ;;  %v535_v56 = vrot.slane %v534_v46, 4  ;;  %v554_v57 = vsel %vm9176_vm3, %v549_v47, %v553_v41  ;;  %v7316_v59 = vcombine.low %v250_v25, %v251_v33  ;;  %v256_v41 = vld [vmem:[%s9146_s30 + $0xb4] sm:$0xf] }
  0x4a   : > { %v590_v60 = vshrl.u32 %v252_v44, 16  ;;  %v559_v61 = vrot.slane %v558_v50, 4  ;;  %v593_v63 = vshll.u32 %v252_v44, 16  ;;  %v603_v0 = vshrl.u32 %v253_v49, 16 }
  0x4b   : > { %v7317_v1 = vcombine.low %v252_v44, %v253_v49  ;;  %v540_v4 = vsel %vm9176_vm3, %v535_v56, %v539_v39  ;;  %8404 = vmatprep.mubr.msk.bf16.mxu1 %vm2123_vm1, %v7316_v59  ;;  %v572_v7 = vor.u32 %v571_v55, %v568_v54  ;;  %v575_v8 = vshll.u32 %v251_v33, 16  ;;  %v272_v56 = vld [vmem:[%s9146_s30 + $0xb0] sm:$0x1] }
  0x4c   : > { %v592_v6 = vrot.slane %v590_v60, 4  ;;  %v9323_v13 = vcombine.low %v530_v45, %v540_v4  ;;  %v564_v15 = vsel %vm9176_vm3, %v559_v61, %v563_v52  ;;  %v595_v17 = vrot.slane %v593_v63, 5  ;;  %v257_v45 = vld [vmem:[%s9146_s30 + $0xb8] sm:$0xf]  ;;  %v273_v63 = vld [vmem:[%s9146_s30 + $0xbc] sm:$0x1] }
  0x4d   : > { %8405 = vmatmul.mubr.msk.bf16.gmra.mxu1 %vm2123_vm1, %v7317_v1  ;;  %v581_v18 = vrot.slane %v579_v48, 4  ;;  %v9329_v20 = vcombine.low %v554_v57, %v564_v15  ;;  %v573_v21 = vrot.slane %v572_v7, 4  ;;  %v577_v22 = vrot.slane %v575_v8, 5 }
  0x4e   : > { %v585_v23 = vshll.u32 %v270_v3, 16  ;;  %8366 = vmatprep.mubr.msk.bf16.mxu0 %vm2123_vm1, %v9323_v13  ;;  %v596_v25 = vor.u32 %v595_v17, %v592_v6  ;;  %v599_v26 = vshll.u32 %v253_v49, 16  ;;  %v605_v27 = vrot.slane %v603_v0, 4  ;;  %v9350_v6 = vld [vmem:[%s9146_s30 + $0xc] sm:$0xf] }
  0x4f   : > { %v609_v30 = vshll.u32 %v271_v9, 16  ;;  %8367 = vmatmul.mubr.msk.bf16.gmra.mxu0 %vm2123_vm1, %v9329_v20  ;;  %v578_v33 = vsel %vm9176_vm3, %v573_v21, %v577_v22  ;;  %v582_v36 = vor.u32 %v581_v18, %v577_v22  ;;  %v614_v40 = vshrl.u32 %v254_v19, 16  ;;  %v7110_v22 = vld [vmem:[%s9146_s30 + $0x10] sm:$0xf] }
  0x50   : > { %v587_v39 = vrot.slane %v585_v23, 5  ;;  %v597_v2 = vrot.slane %v596_v25, 4  ;;  %v601_v42 = vrot.slane %v599_v26, 5  ;;  %v617_v44 = vshll.u32 %v254_v19, 16 }
  0x51   : > { %v611_v43 = vrot.slane %v609_v30, 5  ;;  %v583_v46 = vrot.slane %v582_v36, 4  ;;  %v616_v47 = vrot.slane %v614_v40, 4  ;;  %v627_v48 = vshrl.u32 %v255_v32, 16 }
  0x52   : > { %v7318_v49 = vcombine.low %v254_v19, %v255_v32  ;;  %v602_v50 = vsel %vm9176_vm3, %v597_v2, %v601_v42  ;;  %v606_v52 = vor.u32 %v605_v27, %v601_v42  ;;  %v619_v54 = vrot.slane %v617_v44, 5  ;;  %v7141_v2 = vld [vmem:[%s9146_s30 + $0x14] sm:$0x1] }
  0x53   : > { %v638_v55 = vshrl.u32 %v256_v41, 16  ;;  %v588_v57 = vsel %vm9176_vm3, %v583_v46, %v587_v39  ;;  %v641_v59 = vshll.u32 %v256_v41, 16  ;;  %v651_v60 = vshrl.u32 %v257_v45, 16 }
  0x54   : > { %8408 = vmatprep.mubr.msk.bf16.mxu1 %vm2123_vm1, %v7318_v49  ;;  %v7319_v61 = vcombine.low %v256_v41, %v257_v45  ;;  %v9347_v0 = vcombine.low %v578_v33, %v588_v57  ;;  %v607_v1 = vrot.slane %v606_v52, 4  ;;  %v620_v4 = vor.u32 %v619_v54, %v616_v47 }
  0x55   : > { %v640_v3 = vrot.slane %v638_v55, 4  ;;  %v643_v7 = vrot.slane %v641_v59, 5  ;;  %v623_v8 = vshll.u32 %v255_v32, 16  ;;  %v629_v9 = vrot.slane %v627_v48, 4  ;;  %v7112_v48 = vld [vmem:[%s9146_s30 + $0x1c] sm:$0xf] }
  0x56   : > { %8409 = vmatmul.mubr.msk.bf16.gmra.mxu1 %vm2123_vm1, %v7319_v61  ;;  %v633_v15 = vshll.u32 %v272_v56, 16  ;;  %8370 = vmatprep.mubr.msk.bf16.mxu0 %vm2123_vm1, %v9347_v0  ;;  %v612_v17 = vsel %vm9176_vm3, %v607_v1, %v611_v43  ;;  %v621_v18 = vrot.slane %v620_v4, 4  ;;  %v647_v19 = vshll.u32 %v257_v45, 16  ;;  %v7111_v43 = vld [vmem:[%s9146_s30 + $0x18] sm:$0xf] }
  0x57   : > { %v653_v21 = vrot.slane %v651_v60, 4  ;;  %v9358_v23 = vcombine.low %v602_v50, %v612_v17  ;;  %v625_v25 = vrot.slane %v623_v8, 5  ;;  %v644_v27 = vor.u32 %v643_v7, %v640_v3 }
  0x58   : > { %v635_v26 = vrot.slane %v633_v15, 5  ;;  %v649_v30 = vrot.slane %v647_v19, 5  ;;  %v657_v32 = vshll.u32 %v273_v63, 16  ;;  %v893_v33 = vshrl.u32 %v9350_v6, 16  ;;  %v7142_v63 = vld [vmem:[%s9146_s30 + $0x20] sm:$0x1] }
  0x59   : > { %v896_v36 = vshll.u32 %v9350_v6, 16  ;;  %8371 = vmatmul.mubr.msk.bf16.gmra.mxu0 %vm2123_vm1, %v9358_v23  ;;  %v626_v39 = vsel %vm9176_vm3, %v621_v18, %v625_v25  ;;  %v630_v40 = vor.u32 %v629_v9, %v625_v25  ;;  %v645_v41 = vrot.slane %v644_v27, 4  ;;  %v7114_v25 = vld [vmem:[%s9146_s30 + $0x28] sm:$0xf] }
  0x5a   : > { %v902_v42 = vshll.u32 %v7110_v22, 16  ;;  %v654_v44 = vor.u32 %v653_v21, %v649_v30  ;;  %v659_v45 = vrot.slane %v657_v32, 5  ;;  %v895_v46 = vrot.slane %v893_v33, 4  ;;  %v7113_v21 = vld [vmem:[%s9146_s30 + $0x24] sm:$0xf] }
  0x5b   : > { %v898_v47 = vrot.slane %v896_v36, 5  ;;  %v631_v49 = vrot.slane %v630_v40, 4  ;;  %v650_v50 = vsel %vm9176_vm3, %v645_v41, %v649_v30  ;;  %v906_v54 = vshrl.u32 %v7110_v22, 16  ;;  %v7143_v33 = vld [vmem:[%s9146_s30 + $0x2c] sm:$0x1] }
  0x5c   : > { %v904_v52 = vrot.slane %v902_v42, 5  ;;  %v655_v55 = vrot.slane %v654_v44, 4  ;;  %v912_v57 = vshll.u32 %v7141_v2, 16  ;;  %v917_v59 = vshrl.u32 %v7111_v43, 16  ;;  %v7115_v2 = vld [vmem:[%s9146_s30 + $0x30] sm:$0xf] }
  0x5d   : > { %v899_v56 = vor.u32 %v898_v47, %v895_v46  ;;  %v636_v60 = vsel %vm9176_vm3, %v631_v49, %v635_v26  ;;  %v908_v61 = vrot.slane %v906_v54, 4  ;;  %v920_v1 = vshll.u32 %v7111_v43, 16  ;;  %v7116_v47 = vld [vmem:[%s9146_s30 + $0x34] sm:$0xf] }
  0x5e   : > { %v926_v3 = vshll.u32 %v7112_v48, 16  ;;  %v9374_v4 = vcombine.low %v626_v39, %v636_v60  ;;  %v660_v7 = vsel %vm9176_vm3, %v655_v55, %v659_v45  ;;  %v914_v9 = vrot.slane %v912_v57, 5 }
  0x5f   : > { %v900_v8 = vrot.slane %v899_v56, 4  ;;  %v9378_v15 = vcombine.low %v650_v50, %v660_v7  ;;  %v909_v17 = vor.u32 %v908_v61, %v904_v52  ;;  %v919_v18 = vrot.slane %v917_v59, 4 }
  0x60   : > { %v922_v19 = vrot.slane %v920_v1, 5  ;;  %8374 = vmatprep.mubr.msk.bf16.mxu0 %vm2123_vm1, %v9374_v4  ;;  %v928_v27 = vrot.slane %v926_v3, 5  ;;  %v930_v30 = vshrl.u32 %v7112_v48, 16  ;;  %v936_v32 = vshll.u32 %v7142_v63, 16  ;;  %v7144_v63 = vld [vmem:[%s9146_s30 + $0x38] sm:$0x1] }
  0x61   : > { %v905_v26 = vsel %vm9176_vm3, %v900_v8, %v904_v52  ;;  %8375 = vmatmul.mubr.msk.bf16.gmra.mxu0 %vm2123_vm1, %v9378_v15  ;;  %v910_v36 = vrot.slane %v909_v17, 4  ;;  %v9390_v40 = vcombine.low %v9350_v6, %v7110_v22  ;;  %v9392_v41 = vcombine.low %v7111_v43, %v7112_v48 }
  0x62   : > { %v923_v39 = vor.u32 %v922_v19, %v919_v18  ;;  %v932_v42 = vrot.slane %v930_v30, 4  ;;  %v938_v44 = vrot.slane %v936_v32, 5  ;;  %v941_v45 = vshrl.u32 %v7113_v21, 16  ;;  %v7117_v18 = vld [vmem:[%s9146_s30 + $0x3c] sm:$0xf]  ;;  %v9411_v19 = vld [vmem:[%s12352_s1 + $0x30] sm:$0xff]  }
  0x63   : > { %12437 = vst [vmem:[#allocation2_spill] sm:$0xff] %v9390_v40  ;;  %12438 = vst [vmem:[#allocation3_spill] sm:$0xff] %v9392_v41  ;;  %v944_v46 = vshll.u32 %v7113_v21, 16  ;;  %v915_v49 = vsel %vm9176_vm3, %v910_v36, %v914_v9  ;;  %8414 = vmatprep.mubr.msk.bf16.mxu0 %vm2123_vm1, %v9390_v40  ;;  %v950_v52 = vshll.u32 %v7114_v25, 16  ;;  %v954_v54 = vshrl.u32 %v7114_v25, 16 }
  0x64   : > { %v924_v50 = vrot.slane %v923_v39, 4  ;;  %v9400_v6 = vcombine.low %v905_v26, %v915_v49  ;;  %v933_v22 = vor.u32 %v932_v42, %v928_v27  ;;  %v943_v43 = vrot.slane %v941_v45, 4  ;;  %v9424_v49 = vld [vmem:[%s12352_s1 + $0x38] sm:$0xff]  }
  0x65   : > { %v946_v48 = vrot.slane %v944_v46, 5  ;;  %v952_v56 = vrot.slane %v950_v52, 5  ;;  %v956_v57 = vrot.slane %v954_v54, 4  ;;  %v960_v59 = vshll.u32 %v7143_v33, 16  ;;  %v7118_v33 = vld [vmem:[%s9146_s30 + $0x40] sm:$0xf] }
  0x66   : > { %v929_v55 = vsel %vm9176_vm3, %v924_v50, %v928_v27  ;;  %8448 = vmatprep.mubr.msk.bf16.mxu1 %vm2123_vm1, %v9400_v6  ;;  %v934_v60 = vrot.slane %v933_v22, 4  ;;  %v965_v1 = vshrl.u32 %v7115_v2, 16  ;;  %v968_v3 = vshll.u32 %v7115_v2, 16  ;;  %v7145_v46 = vld [vmem:[%s9146_s30 + $0x44] sm:$0x1] }
  0x67   : > { %v947_v61 = vor.u32 %v946_v48, %v943_v43  ;;  %v957_v7 = vor.u32 %v956_v57, %v952_v56  ;;  %v962_v8 = vrot.slane %v960_v59, 5  ;;  %v974_v9 = vshll.u32 %v7116_v47, 16  ;;  %v7119_v22 = vld [vmem:[%s9146_s30 + $0x48] sm:$0xf]  ;;  %v7120_v59 = vld [vmem:[%s9146_s30 + $0x4c] sm:$0xf] }
  0x68   : > { %v978_v17 = vshrl.u32 %v7116_v47, 16  ;;  %v939_v26 = vsel %vm9176_vm3, %v934_v60, %v938_v44  ;;  %v967_v30 = vrot.slane %v965_v1, 4  ;;  %v970_v32 = vrot.slane %v968_v3, 5 }
  0x69   : > { %v948_v27 = vrot.slane %v947_v61, 4  ;;  %v9416_v36 = vcombine.low %v929_v55, %v939_v26  ;;  %8415 = vmatmul.mubr.msk.bf16.vlgmr.msra.gmra.mxu0 %vm2123_vm1, %v9392_v41  ;;  %v958_v39 = vrot.slane %v957_v7, 4  ;;  %v976_v42 = vrot.slane %v974_v9, 5 }
  0x6a   : > { %v980_v45 = vrot.slane %v978_v17, 4  ;;  %8481 = vmatpush3.bf16.msra.mxu0 %v9209_v16  ;;  %v971_v50 = vor.u32 %v970_v32, %v967_v30  ;;  %v984_v52 = vshll.u32 %v7144_v63, 16  ;;  %v9429_v54 = vcombine.low %v7113_v21, %v7114_v25 }
  0x6b   : > { %v953_v44 = vsel %vm9176_vm3, %v948_v27, %v952_v56  ;;  %8449 = vmatmul.mubr.msk.bf16.vlgmr.msra.gmra.mxu1 %vm2123_vm1, %v9416_v36  ;;  %v963_v43 = vsel %vm9176_vm3, %v958_v39, %v962_v8  ;;  %v9436_v55 = vcombine.low %v7115_v2, %v7116_v47  ;;  %v989_v16 = vshrl.u32 %v7117_v18, 16  ;;  %8548 = vmatprep.subr.bf16.mxu0 %v9411_v19  ;;  %v7146_v2 = vld [vmem:[%s9146_s30 + $0x50] sm:$0x1] }
  0x6c   : > { %12439 = vst [vmem:[#allocation4_spill] sm:$0xff] %v9429_v54  ;;  %v981_v48 = vor.u32 %v980_v45, %v976_v42  ;;  %8515 = vmatpush3.bf16.msra.mxu1 %v9168_v24  ;;  %v9440_v56 = vcombine.low %v953_v44, %v963_v43  ;;  %v972_v21 = vrot.slane %v971_v50, 4  ;;  %v986_v25 = vrot.slane %v984_v52, 5  ;;  %8418 = vmatprep.mubr.msk.bf16.mxu0 %vm2123_vm1, %v9429_v54  ;;  %v7121_v50 = vld [vmem:[%s9146_s30 + $0x54] sm:$0xf] }
  0x6d   : > { %12440 = vst [vmem:[#allocation5_spill] sm:$0xff] %v9436_v55  ;;  %v992_v57 = vshll.u32 %v7117_v18, 16  ;;  %v991_v61 = vrot.slane %v989_v16, 4  ;;  %v998_v63 = vshll.u32 %v7118_v33, 16  ;;  %v1002_v1 = vshrl.u32 %v7118_v33, 16  ;;  %8582 = vmatprep.subr.bf16.mxu1 %v9424_v49 }
  0x6e   : > { %v982_v60 = vrot.slane %v981_v48, 4  ;;  %8452 = vmatprep.mubr.msk.bf16.mxu1 %vm2123_vm1, %v9440_v56  ;;  %v977_v24 = vsel %vm9176_vm3, %v972_v21, %v976_v42  ;;  %v1008_v3 = vshll.u32 %v7145_v46, 16  ;;  %v1013_v7 = vshrl.u32 %v7119_v22, 16  ;;  %v9463_v21 = vld [vmem:[%s9146_s30 + $0x58] sm:$0xf] }
  0x6f   : > { %v994_v47 = vrot.slane %v992_v57, 5  ;;  %v1000_v9 = vrot.slane %v998_v63, 5  ;;  %v1004_v17 = vrot.slane %v1002_v1, 4  ;;  %v1016_v26 = vshll.u32 %v7119_v22, 16 }
  0x70   : > { %v987_v8 = vsel %vm9176_vm3, %v982_v60, %v986_v25  ;;  %v1010_v32 = vrot.slane %v1008_v3, 5  ;;  %v1015_v39 = vrot.slane %v1013_v7, 4  ;;  %v1022_v44 = vshll.u32 %v7120_v59, 16  ;;  %v7123_v3 = vld [vmem:[%s9146_s30 + $0x60] sm:$0xf] }
  0x71   : > { %v9453_v27 = vcombine.low %v977_v24, %v987_v8  ;;  %v995_v30 = vor.u32 %v994_v47, %v991_v61  ;;  %8419 = vmatmul.mubr.msk.bf16.gmra.mxu0 %vm2123_vm1, %v9436_v55  ;;  %v1005_v42 = vor.u32 %v1004_v17, %v1000_v9  ;;  %v1018_v45 = vrot.slane %v1016_v26, 5  ;;  %v7124_v26 = vld [vmem:[%s9146_s30 + $0x64] sm:$0xf]  ;;  %v9577_v55 = vld [vmem:[%s9146_s30 + $0x98] sm:$0x1] }
  0x72   : > { %v1026_v46 = vshrl.u32 %v7120_v59, 16  ;;  %v1032_v43 = vshll.u32 %v7146_v2, 16  ;;  %v9458_v48 = vcombine.low %v7117_v18, %v7118_v33  ;;  %v9460_v16 = vcombine.low %v7119_v22, %v7120_v59  ;;  %v7147_v18 = vld [vmem:[%s9146_s30 + $0x5c] sm:$0x1]  ;;  %12459 = vst [vmem:[#allocation24_spill] sm:$0xff] %v9577_v55 }
  0x73   : > { %12441 = vst [vmem:[#allocation6_spill] sm:$0xff] %v9453_v27  ;;  %v996_v52 = vrot.slane %v995_v30, 4  ;;  %8453 = vmatmul.mubr.msk.bf16.gmra.mxu1 %vm2123_vm1, %v9453_v27  ;;  %v1006_v25 = vrot.slane %v1005_v42, 4  ;;  %v1019_v57 = vor.u32 %v1018_v45, %v1015_v39  ;;  %v1024_v60 = vrot.slane %v1022_v44, 5 }
  0x74   : > { %12442 = vst [vmem:[#allocation7_spill] sm:$0xff] %v9458_v48  ;;  %12443 = vst [vmem:[#allocation8_spill] sm:$0xff] %v9460_v16  ;;  %v1028_v61 = vrot.slane %v1026_v46, 4  ;;  %v1034_v1 = vrot.slane %v1032_v43, 5  ;;  %8422 = vmatprep.mubr.msk.bf16.mxu0 %vm2123_vm1, %v9458_v48  ;;  %v1037_v33 = vshrl.u32 %v7121_v50, 16  ;;  %v1040_v22 = vshll.u32 %v7121_v50, 16 }
  0x75   : > { %v1001_v63 = vsel %vm9176_vm3, %v996_v52, %v1000_v9  ;;  %v1011_v59 = vsel %vm9176_vm3, %v1006_v25, %v1010_v32  ;;  %v1020_v2 = vrot.slane %v1019_v57, 4  ;;  %v1046_v47 = vshll.u32 %v9463_v21, 16  ;;  %v7148_v46 = vld [vmem:[%s9146_s30 + $0x68] sm:$0x1] }
  0x76   : > { %v1029_v24 = vor.u32 %v1028_v61, %v1024_v60  ;;  %v9476_v7 = vcombine.low %v1001_v63, %v1011_v59  ;;  %v1039_v8 = vrot.slane %v1037_v33, 4  ;;  %v1042_v9 = vrot.slane %v1040_v22, 5  ;;  %v7125_v59 = vld [vmem:[%s9146_s30 + $0x6c] sm:$0xf] }
  0x77   : > { %v1050_v17 = vshrl.u32 %v9463_v21, 16  ;;  %v1025_v30 = vsel %vm9176_vm3, %v1020_v2, %v1024_v60  ;;  %v1048_v42 = vrot.slane %v1046_v47, 5  ;;  %v1056_v45 = vshll.u32 %v7147_v18, 16 }
  0x78   : > { %12444 = vst [vmem:[#allocation9_spill] sm:$0xff] %v9476_v7  ;;  %v1030_v39 = vrot.slane %v1029_v24, 4  ;;  %8456 = vmatprep.mubr.msk.bf16.mxu1 %vm2123_vm1, %v9476_v7  ;;  %v1043_v32 = vor.u32 %v1042_v9, %v1039_v8  ;;  %v1061_v52 = vshrl.u32 %v7123_v3, 16  ;;  %v1064_v43 = vshll.u32 %v7123_v3, 16  ;;  %v9493_v9 = vld [vmem:[%s9146_s30 + $0x70] sm:$0xf] }
  0x79   : > { %v1052_v44 = vrot.slane %v1050_v17, 4  ;;  %8423 = vmatmul.mubr.msk.bf16.gmra.mxu0 %vm2123_vm1, %v9460_v16  ;;  %v1058_v57 = vrot.slane %v1056_v45, 5  ;;  %v1070_v60 = vshll.u32 %v7124_v26, 16  ;;  %v1074_v61 = vshrl.u32 %v7124_v26, 16 }
  0x7a   : > { %v1035_v25 = vsel %vm9176_vm3, %v1030_v39, %v1034_v1  ;;  %v1044_v18 = vrot.slane %v1043_v32, 4  ;;  %v1063_v22 = vrot.slane %v1061_v52, 4  ;;  %v1066_v2 = vrot.slane %v1064_v43, 5  ;;  %v9505_v52 = vld [vmem:[%s9146_s30 + $0x74] sm:$0x1] }
  0x7b   : > { %v9489_v63 = vcombine.low %v1025_v30, %v1035_v25  ;;  %v1053_v33 = vor.u32 %v1052_v44, %v1048_v42  ;;  %v1072_v24 = vrot.slane %v1070_v60, 5  ;;  %v1076_v47 = vrot.slane %v1074_v61, 4  ;;  %12448 = vst [vmem:[#allocation13_spill] sm:$0xff] %v9505_v52 }
  0x7c   : > { %v1080_v8 = vshll.u32 %v7148_v46, 16  ;;  %v1049_v1 = vsel %vm9176_vm3, %v1044_v18, %v1048_v42  ;;  %v9500_v30 = vcombine.low %v7121_v50, %v9463_v21  ;;  %v9502_v39 = vcombine.low %v7123_v3, %v7124_v26  ;;  %v7127_v3 = vld [vmem:[%s9146_s30 + $0x78] sm:$0xf] }
  0x7d   : > { %12445 = vst [vmem:[#allocation10_spill] sm:$0xff] %v9489_v63  ;;  %8457 = vmatmul.mubr.msk.bf16.gmra.mxu1 %vm2123_vm1, %v9489_v63  ;;  %v1054_v17 = vrot.slane %v1053_v33, 4  ;;  %v1067_v45 = vor.u32 %v1066_v2, %v1063_v22  ;;  %v1077_v32 = vor.u32 %v1076_v47, %v1072_v24  ;;  %v1085_v46 = vshrl.u32 %v7125_v59, 16  ;;  %v9518_v47 = vld [vmem:[%s9146_s30 + $0x7c] sm:$0xf] }
  0x7e   : > { %12446 = vst [vmem:[#allocation11_spill] sm:$0xff] %v9500_v30  ;;  %12447 = vst [vmem:[#allocation12_spill] sm:$0xff] %v9502_v39  ;;  %v1082_v44 = vrot.slane %v1080_v8, 5  ;;  %8426 = vmatprep.mubr.msk.bf16.mxu0 %vm2123_vm1, %v9500_v30  ;;  %v1088_v42 = vshll.u32 %v7125_v59, 16  ;;  %v1094_v25 = vshll.u32 %v9493_v9, 16  ;;  %v1098_v50 = vshrl.u32 %v9493_v9, 16 }
  0x7f   : > { %v1059_v43 = vsel %vm9176_vm3, %v1054_v17, %v1058_v57  ;;  %v1068_v60 = vrot.slane %v1067_v45, 4  ;;  %v1078_v61 = vrot.slane %v1077_v32, 4  ;;  %v1087_v18 = vrot.slane %v1085_v46, 4  ;;  %12450 = vst [vmem:[#allocation15_spill] sm:$0xff] %v9518_v47  ;;  %v9529_v17 = vld [vmem:[%s9146_s30 + $0x80] sm:$0x1] }
  0x80   : > { %v9514_v26 = vcombine.low %v1049_v1, %v1059_v43  ;;  %v1090_v33 = vrot.slane %v1088_v42, 5  ;;  %v1096_v22 = vrot.slane %v1094_v25, 5  ;;  %v1100_v2 = vrot.slane %v1098_v50, 4  ;;  %12451 = vst [vmem:[#allocation16_spill] sm:$0xff] %v9529_v17 }
  0x81   : > { %v1104_v57 = vshll.u32 %v9505_v52, 16  ;;  %v1073_v8 = vsel %vm9176_vm3, %v1068_v60, %v1072_v24  ;;  %v1083_v1 = vsel %vm9176_vm3, %v1078_v61, %v1082_v44  ;;  %8427 = vmatmul.mubr.msk.bf16.gmra.mxu0 %vm2123_vm1, %v9502_v39  ;;  %v1109_v45 = vshrl.u32 %v7127_v3, 16 }
  0x82   : > { %12449 = vst [vmem:[#allocation14_spill] sm:$0xff] %v9514_v26  ;;  %8460 = vmatprep.mubr.msk.bf16.mxu1 %vm2123_vm1, %v9514_v26  ;;  %v1112_v32 = vshll.u32 %v7127_v3, 16  ;;  %v9531_v46 = vcombine.low %v1073_v8, %v1083_v1  ;;  %v1091_v43 = vor.u32 %v1090_v33, %v1087_v18  ;;  %v1101_v42 = vor.u32 %v1100_v2, %v1096_v22  ;;  %v7129_v2 = vld [vmem:[%s9146_s30 + $0x84] sm:$0xf] }
  0x83   : > { %v1106_v25 = vrot.slane %v1104_v57, 5  ;;  %v1111_v50 = vrot.slane %v1109_v45, 4  ;;  %v1118_v60 = vshll.u32 %v9518_v47, 16  ;;  %v1122_v44 = vshrl.u32 %v9518_v47, 16 }
  0x84   : > { %12452 = vst [vmem:[#allocation17_spill] sm:$0xff] %v9531_v46  ;;  %v1114_v24 = vrot.slane %v1112_v32, 5  ;;  %v9537_v61 = vrot.slane %v12357_v34, 4  ;;  %v1092_v8 = vrot.slane %v1091_v43, 4  ;;  %v1102_v18 = vrot.slane %v1101_v42, 4 }
  0x85   : > { %8461 = vmatmul.mubr.msk.bf16.gmra.mxu1 %vm2123_vm1, %v9531_v46  ;;  %v1128_v33 = vshll.u32 %v9529_v17, 16  ;;  %v1120_v1 = vrot.slane %v1118_v60, 5  ;;  %v1124_v45 = vrot.slane %v1122_v44, 4  ;;  %v9544_v32 = vcombine.low %v7125_v59, %v9493_v9  ;;  %v9550_v34 = vld [vmem:[%s9146_s30 + $0x8c] sm:$0x1] }
  0x86   : > { %v1115_v57 = vor.u32 %v1114_v24, %v1111_v50  ;;  %12455 = vst [vmem:[#allocation20_spill] sm:$0xff] %v9550_v34  ;;  %v1097_v39 = vsel %vm9176_vm3, %v1092_v8, %v1096_v22  ;;  %v1107_v43 = vsel %vm9176_vm3, %v1102_v18, %v1106_v25  ;;  %v9557_v30 = vcombine.low %v7127_v3, %v9518_v47  ;;  %v7131_v50 = vld [vmem:[%s9146_s30 + $0x90] sm:$0xf]  ;;  %v9568_v18 = vld [vmem:[%s9146_s30 + $0x94] sm:$0xf] }
  0x87   : > { %12453 = vst [vmem:[#allocation18_spill] sm:$0xff] %v9544_v32  ;;  %v1130_v42 = vrot.slane %v1128_v33, 5  ;;  %v9560_v24 = vcombine.low %v1097_v39, %v1107_v43  ;;  %v1125_v60 = vor.u32 %v1124_v45, %v1120_v1  ;;  %8430 = vmatprep.mubr.msk.bf16.mxu0 %vm2123_vm1, %v9544_v32  ;;  %v1133_v44 = vshrl.u32 %v7129_v2, 16  ;;  %12458 = vst [vmem:[#allocation23_spill] sm:$0xff] %v9568_v18  ;;  %v7137_v46 = vld [vmem:[%s9146_s30 + $0xb4] sm:$0xf] }
  0x88   : > { %12456 = vst [vmem:[#allocation21_spill] sm:$0xff] %v9557_v30  ;;  %v1116_v59 = vrot.slane %v1115_v57, 4  ;;  %v1136_v16 = vshll.u32 %v7129_v2, 16  ;;  %v1142_v22 = vshll.u32 %v9547_v11, 16  ;;  %v1146_v8 = vshrl.u32 %v9547_v11, 16 }
  0x89   : > { %12457 = vst [vmem:[#allocation22_spill] sm:$0xff] %v9560_v24  ;;  %v1152_v25 = vshll.u32 %v9550_v34, 16  ;;  %8464 = vmatprep.mubr.msk.bf16.mxu1 %vm2123_vm1, %v9560_v24  ;;  %v1126_v3 = vrot.slane %v1125_v60, 4  ;;  %8431 = vmatmul.mubr.msk.bf16.gmra.mxu0 %vm2123_vm1, %v9557_v30  ;;  %v1135_v33 = vrot.slane %v1133_v44, 4  ;;  %v1157_v57 = vshrl.u32 %v7131_v50, 16 }
  0x8a   : > { %v1121_v39 = vsel %vm9176_vm3, %v1116_v59, %v1120_v1  ;;  %v1138_v45 = vrot.slane %v1136_v16, 5  ;;  %v1144_v43 = vrot.slane %v1142_v22, 5  ;;  %v1148_v32 = vrot.slane %v1146_v8, 4  ;;  %v7133_v16 = vld [vmem:[%s9146_s30 + $0x9c] sm:$0xf] }
  0x8b   : > { %v1154_v48 = vrot.slane %v1152_v25, 5  ;;  %v1131_v54 = vsel %vm9176_vm3, %v1126_v3, %v1130_v42  ;;  %v1159_v41 = vrot.slane %v1157_v57, 4  ;;  %v1160_v40 = vshll.u32 %v7131_v50, 16  ;;  %v9587_v22 = vld [vmem:[%s9146_s30 + $0x8] sm:$0x1] }
  0x8c   : > { %v1166_v1 = vshll.u32 %v9568_v18, 16  ;;  %v9582_v59 = vcombine.low %v1121_v39, %v1131_v54  ;;  %v1139_v60 = vor.u32 %v1138_v45, %v1135_v33  ;;  %v1149_v44 = vor.u32 %v1148_v32, %v1144_v43  ;;  %v9597_v33 = vld [vmem:[%s9146_s30 + $0xa0] sm:$0xf] }
  0x8d   : > { %v1170_v30 = vshrl.u32 %v9568_v18, 16  ;;  %v1162_v25 = vrot.slane %v1160_v40, 5  ;;  %v1176_v42 = vshll.u32 %v9577_v55, 16  ;;  %v9594_v32 = vcombine.low %v7129_v2, %v9547_v11  ;;  %12462 = vst [vmem:[#allocation27_spill] sm:$0xff] %v9597_v33  ;;  %v9603_v40 = vld [vmem:[%s9146_s30 + $0xa4] sm:$0x1] }
  0x8e   : > { %12460 = vst [vmem:[#allocation25_spill] sm:$0xff] %v9582_v59  ;;  %v1168_v34 = vrot.slane %v1166_v1, 5  ;;  %8465 = vmatmul.mubr.msk.bf16.gmra.mxu1 %vm2123_vm1, %v9582_v59  ;;  %v1140_v54 = vrot.slane %v1139_v60, 4  ;;  %v1150_v39 = vrot.slane %v1149_v44, 4  ;;  %v9600_v8 = vcombine.low %v7131_v50, %v9568_v18  ;;  %12464 = vst [vmem:[#allocation29_spill] sm:$0xff] %v9603_v40 }
  0x8f   : > { %v1172_v3 = vrot.slane %v1170_v30, 4  ;;  %12461 = vst [vmem:[#allocation26_spill] sm:$0xff] %v9594_v32  ;;  %v1163_v57 = vor.u32 %v1162_v25, %v1159_v41  ;;  %v1178_v45 = vrot.slane %v1176_v42, 5  ;;  %v1181_v1 = vshrl.u32 %v7133_v16, 16  ;;  %8434 = vmatprep.mubr.msk.bf16.mxu0 %vm2123_vm1, %v9594_v32  ;;  %v7135_v2 = vld [vmem:[%s9146_s30 + $0xa8] sm:$0xf] }
  0x90   : > { %12463 = vst [vmem:[#allocation28_spill] sm:$0xff] %v9600_v8  ;;  %v1145_v55 = vsel %vm9176_vm3, %v1140_v54, %v1144_v43  ;;  %v1155_v30 = vsel %vm9176_vm3, %v1150_v39, %v1154_v48  ;;  %v1184_v41 = vshll.u32 %v7133_v16, 16  ;;  %v1190_v42 = vshll.u32 %v9597_v33, 16  ;;  %v9638_v11 = vld [vmem:[%s9146_s30 + $0x14] sm:$0x1] }
  0x91   : > { %v1173_v60 = vor.u32 %v1172_v3, %v1168_v34  ;;  %v9612_v44 = vcombine.low %v1145_v55, %v1155_v30  ;;  %v1164_v50 = vrot.slane %v1163_v57, 4  ;;  %8435 = vmatmul.mubr.msk.bf16.gmra.mxu0 %vm2123_vm1, %v9600_v8  ;;  %v1183_v25 = vrot.slane %v1181_v1, 4  ;;  %v9620_v3 = vld [vmem:[%s9146_s30 + $0xac] sm:$0xf]  ;;  %v9627_v30 = vld [vmem:[%s9146_s30 + $0xb0] sm:$0x1] }
  0x92   : > { %v1186_v54 = vrot.slane %v1184_v41, 5  ;;  %v1194_v48 = vshrl.u32 %v9597_v33, 16  ;;  %v1200_v39 = vshll.u32 %v9603_v40, 16  ;;  %v1192_v57 = vrot.slane %v1190_v42, 5 }
  0x93   : > { %12465 = vst [vmem:[#allocation30_spill] sm:$0xff] %v9612_v44  ;;  %v1174_v43 = vrot.slane %v1173_v60, 4  ;;  %8468 = vmatprep.mubr.msk.bf16.mxu1 %vm2123_vm1, %v9612_v44  ;;  %v1169_v55 = vsel %vm9176_vm3, %v1164_v50, %v1168_v34  ;;  %v1205_v1 = vshrl.u32 %v7135_v2, 16  ;;  %v1208_v60 = vshll.u32 %v7135_v2, 16 }
  0x94   : > { %v1187_v8 = vor.u32 %v1186_v54, %v1183_v25  ;;  %v1196_v32 = vrot.slane %v1194_v48, 4  ;;  %v1202_v40 = vrot.slane %v1200_v39, 5  ;;  %v1214_v34 = vshll.u32 %v9620_v3, 16 }
  0x95   : > { %v1179_v41 = vsel %vm9176_vm3, %v1174_v43, %v1178_v45  ;;  %v1207_v44 = vrot.slane %v1205_v1, 4  ;;  %v1210_v18 = vrot.slane %v1208_v60, 5  ;;  %v1218_v17 = vshrl.u32 %v9620_v3, 16 }
  0x96   : > { %v9631_v59 = vcombine.low %v1169_v55, %v1179_v41  ;;  %v1188_v50 = vrot.slane %v1187_v8, 4  ;;  %v1197_v42 = vor.u32 %v1196_v32, %v1192_v57  ;;  %v1224_v24 = vshll.u32 %v9627_v30, 16  ;;  %v9647_v8 = vld [vmem:[%s9146_s30 + $0xb8] sm:$0xf] }
  0x97   : > { %v1211_v25 = vor.u32 %v1210_v18, %v1207_v44  ;;  %v1216_v43 = vrot.slane %v1214_v34, 5  ;;  %v9644_v54 = vcombine.low %v7133_v16, %v9597_v33  ;;  %v1220_v39 = vrot.slane %v1218_v17, 4  ;;  %v9657_v44 = vld [vmem:[%s9146_s30 + $0xbc] sm:$0x1]  ;;  %v9677_v33 = vld [vmem:[%s9146_s30 + $0xc8] sm:$0x1] }
  0x98   : > { %12466 = vst [vmem:[#allocation31_spill] sm:$0xff] %v9631_v59  ;;  %8469 = vmatmul.mubr.msk.bf16.gmra.mxu1 %vm2123_vm1, %v9631_v59  ;;  %v1193_v32 = vsel %vm9176_vm3, %v1188_v50, %v1192_v57  ;;  %v1198_v48 = vrot.slane %v1197_v42, 4  ;;  %v1226_v55 = vrot.slane %v1224_v24, 5  ;;  %v9654_v18 = vcombine.low %v7135_v2, %v9620_v3  ;;  %v7139_v24 = vld [vmem:[%s9146_s30 + $0xc0] sm:$0xf] }
  0x99   : > { %12467 = vst [vmem:[#allocation32_spill] sm:$0xff] %v9644_v54  ;;  %v1212_v1 = vrot.slane %v1211_v25, 4  ;;  %8438 = vmatprep.mubr.msk.bf16.mxu0 %vm2123_vm1, %v9644_v54  ;;  %v1229_v16 = vshrl.u32 %v7137_v46, 16  ;;  %v1232_v60 = vshll.u32 %v7137_v46, 16  ;;  %v1221_v34 = vor.u32 %v1220_v39, %v1216_v43  ;;  %v9665_v50 = vld [vmem:[%s9146_s30 + $0xc4] sm:$0xf] }
  0x9a   : > { %12468 = vst [vmem:[#allocation33_spill] sm:$0xff] %v9654_v18  ;;  %v1203_v41 = vsel %vm9176_vm3, %v1198_v48, %v1202_v40  ;;  %v1238_v57 = vshll.u32 %v9647_v8, 16  ;;  %v1242_v17 = vshrl.u32 %v9647_v8, 16  ;;  %8439 = vmatmul.mubr.msk.bf16.gmra.mxu0 %vm2123_vm1, %v9654_v18  ;;  %v1248_v54 = vshll.u32 %v9657_v44, 16 }
  0x9b   : > { %v9667_v42 = vcombine.low %v1193_v32, %v1203_v41  ;;  %v1217_v2 = vsel %vm9176_vm3, %v1212_v1, %v1216_v43  ;;  %v1231_v25 = vrot.slane %v1229_v16, 4  ;;  %v1234_v45 = vrot.slane %v1232_v60, 5 }
  0x9c   : > { %v1222_v40 = vrot.slane %v1221_v34, 4  ;;  %v1240_v48 = vrot.slane %v1238_v57, 5  ;;  %v1244_v39 = vrot.slane %v1242_v17, 4  ;;  %v1253_v32 = vshrl.u32 %v7139_v24, 16 }
  0x9d   : > { %12469 = vst [vmem:[#allocation34_spill] sm:$0xff] %v9667_v42  ;;  %8472 = vmatprep.mubr.msk.bf16.mxu1 %vm2123_vm1, %v9667_v42  ;;  %v1235_v59 = vor.u32 %v1234_v45, %v1231_v25  ;;  %v1256_v41 = vshll.u32 %v7139_v24, 16  ;;  %v1262_v43 = vshll.u32 %v9665_v50, 16  ;;  %v1250_v60 = vrot.slane %v1248_v54, 5 }
  0x9e   : > { %v1227_v1 = vsel %vm9176_vm3, %v1222_v40, %v1226_v55  ;;  %v1245_v16 = vor.u32 %v1244_v39, %v1240_v48  ;;  %v1266_v34 = vshrl.u32 %v9665_v50, 16  ;;  %v1255_v45 = vrot.slane %v1253_v32, 4  ;;  %v662_v39 = vld [vmem:[%s9146_s30 + $0xc] sm:$0xe] }
  0x9f   : > { %v9683_v57 = vcombine.low %v1217_v2, %v1227_v1  ;;  %v1236_v17 = vrot.slane %v1235_v59, 4  ;;  %v1258_v25 = vrot.slane %v1256_v41, 5  ;;  %v1264_v42 = vrot.slane %v1262_v43, 5  ;;  %v661_v2 = vld [vmem:[%s9146_s30] sm:$0xe] }
  0xa0   : > { %v1246_v18 = vrot.slane %v1245_v16, 4  ;;  %v1268_v47 = vrot.slane %v1266_v34, 4  ;;  %v1272_v52 = vshll.u32 %v9677_v33, 16  ;;  %v9691_v40 = vcombine.low %v7137_v46, %v9647_v8  ;;  %v663_v59 = vld [vmem:[%s9146_s30 + $0x18] sm:$0xe] }
  0xa1   : > { %12470 = vst [vmem:[#allocation35_spill] sm:$0xff] %v9683_v57  ;;  %8473 = vmatmul.mubr.msk.bf16.gmra.mxu1 %vm2123_vm1, %v9683_v57  ;;  %v1241_v55 = vsel %vm9176_vm3, %v1236_v17, %v1240_v48  ;;  %v1259_v54 = vor.u32 %v1258_v25, %v1255_v45  ;;  %v9699_v1 = vcombine.low %v7139_v24, %v9665_v50  ;;  %v7095_v24 = vrot.slane %v663_v59, 9 }
  0xa2   : > { %12471 = vst [vmem:[#allocation36_spill] sm:$0xff] %v9691_v40  ;;  %v1251_v32 = vsel %vm9176_vm3, %v1246_v18, %v1250_v60  ;;  %v1269_v41 = vor.u32 %v1268_v47, %v1264_v42  ;;  %v1274_v43 = vrot.slane %v1272_v52, 5  ;;  %8442 = vmatprep.mubr.msk.bf16.mxu0 %vm2123_vm1, %v9691_v40  ;;  %v12474_v52 = vmov 0 }
  0xa3   : > { %12472 = vst [vmem:[#allocation37_spill] sm:$0xff] %v9699_v1  ;;  %v9701_v16 = vcombine.low %v1241_v55, %v1251_v32  ;;  %v1260_v34 = vrot.slane %v1259_v54, 4  ;;  %8443 = vmatmul.mubr.msk.bf16.gmra.mxu0 %vm2123_vm1, %v9699_v1  ;;  %v12475_v52 = vsel %vm9707_vm6, 4294967295, %v12474_v52  ;;  %v7093_v47 = vrot.slane %v661_v2, 9  ;;  %v8977_v55 = vld [vmem:[%s9146_s30 + $0x1c] sm:$0xf] }
  0xa4   : > { %v1270_v46 = vrot.slane %v1269_v41, 4  ;;  %12476 = vst [vmem:[#allocation39_spill] sm:$0xff] %v12475_v52  ;;  %v7094_v18 = vrot.slane %v662_v39, 9  ;;  %v12477_v60 = vrot.slane %v9587_v22, 5  ;;  %v12478_v45 = vrot.slane %v9638_v11, 5 }
  0xa5   : > { %12473 = vst [vmem:[#allocation38_spill] sm:$0xff] %v9701_v16  ;;  %8476 = vmatprep.mubr.msk.bf16.mxu1 %vm2123_vm1, %v9701_v16  ;;  %v1265_v48 = vsel %vm9176_vm3, %v1260_v34, %v1264_v42  ;;  %v744_v54 = vrot.slane %v8977_v55, 5  ;;  %v12479_v42 = vrot.slane %v9150_v5, 5  ;;  %v12480_v39 = vrot.slane %v9155_v10, 5 }
  0xa6   : > { %v734_v17 = vsel %vm9707_vm6, %v9172_v28, %v12477_v60  ;;  %v741_v25 = vsel %vm9707_vm6, %v9537_v61, %v12478_v45  ;;  %v1275_v2 = vsel %vm9176_vm3, %v1270_v46, %v1274_v43  ;;  %v8978_v28 = vld [vmem:[%s9146_s30 + $0x20] sm:$0x1]  ;;  %v664_v61 = vld [vmem:[%s9146_s30 + $0x24] sm:$0xe]  ;;  %v665_v43 = vld [vmem:[%s9146_s30 + $0x30] sm:$0xe] }
  0xa7   : > { %v731_v22 = vsel %vm9707_vm6, %v7093_v47, %v12479_v42  ;;  %v738_v11 = vsel %vm9707_vm6, %v7094_v18, %v12480_v39  ;;  %v747_v59 = vrot.slane %v8978_v28, 5  ;;  %v9738_v32 = vcombine.low %v1265_v48, %v1275_v2  ;;  %v8979_v47 = vld [vmem:[%s9146_s30 + $0x28] sm:$0xf]  ;;  %v8980_v60 = vld [vmem:[%s9146_s30 + $0x2c] sm:$0x1] }
  0xa8   : > { %v7411_v41 = vcombine.low %v731_v22, %v734_v17  ;;  %v7412_v34 = vcombine.low %v738_v11, %v741_v25  ;;  %v745_v5 = vsel %vm9707_vm6, %v7095_v24, %v744_v54  ;;  %v746_v46 = vrot.slane %v744_v54, 4  ;;  %v8981_v48 = vld [vmem:[%s9146_s30 + $0x34] sm:$0xf]  ;;  %v8982_v54 = vld [vmem:[%s9146_s30 + $0x38] sm:$0x1]  ;;  %v9757_v42 = vld [vmem:[%s12352_s1 + $0x48] sm:$0xff]  }
  0xa9   : > { %12481 = vst [vmem:[#allocation40_spill] sm:$0xff] %v9738_v32  ;;  %v751_v10 = vrot.slane %v8979_v47, 5  ;;  %8477 = vmatmul.mubr.msk.bf16.gmra.mxu1 %vm2123_vm1, %v9738_v32  ;;  %v7096_v18 = vrot.slane %v664_v61, 9  ;;  %v754_v45 = vrot.slane %v8980_v60, 5  ;;  %v758_v17 = vrot.slane %v8981_v48, 5 }
  0xaa   : > { %8482 = vmatprep.mubr.msk.bf16.mxu0 %vm2123_vm1, %v7411_v41  ;;  %8516 = vmatprep.mubr.msk.bf16.mxu1 %vm2123_vm1, %v9194_v62  ;;  %v748_v24 = vsel %vm9707_vm6, %v746_v46, %v747_v59  ;;  %v7097_v55 = vrot.slane %v665_v43, 9  ;;  %v761_v2 = vrot.slane %v8982_v54, 5  ;;  %v8983_v28 = vld [vmem:[%s9146_s30 + $0x40] sm:$0xf]  ;;  %v8984_v43 = vld [vmem:[%s9146_s30 + $0x4c] sm:$0xf] }
  0xab   : > { %v753_v25 = vrot.slane %v751_v10, 4  ;;  %v7413_v22 = vcombine.low %v745_v5, %v748_v24  ;;  %v760_v39 = vrot.slane %v758_v17, 4  ;;  %8483 = vmatmul.mubr.msk.bf16.vlgmr.msra.gmra.mxu0 %vm2123_vm1, %v7412_v34  ;;  %v752_v62 = vsel %vm9707_vm6, %v7096_v18, %v751_v10  ;;  %v666_v34 = vld [vmem:[%s9146_s30 + $0x3c] sm:$0xe]  ;;  %v667_v5 = vld [vmem:[%s9146_s30 + $0x48] sm:$0xe] }
  0xac   : > { %8549 = vmatpush3.bf16.msra.mxu0 %v9411_v19  ;;  %v765_v59 = vrot.slane %v8983_v28, 5  ;;  %v759_v61 = vsel %vm9707_vm6, %v7097_v55, %v758_v17  ;;  %v772_v19 = vrot.slane %v8984_v43, 5  ;;  %v9778_v46 = vld [vmem:[%s12352_s1 + $0x40] sm:$0xff]   ;;  %v7098_v18 = vrot.slane %v666_v34, 9  ;;  %v8987_v54 = vld [vmem:[%s9146_s30 + $0x58] sm:$0xf] }
  0xad   : > { %8486 = vmatprep.mubr.msk.bf16.mxu0 %vm2123_vm1, %v7413_v22  ;;  %v755_v11 = vsel %vm9707_vm6, %v753_v25, %v754_v45  ;;  %v762_v41 = vsel %vm9707_vm6, %v760_v39, %v761_v2  ;;  %8616 = vmatprep.subr.bf16.mxu0 %v9757_v42  ;;  %v8985_v45 = vld [vmem:[%s9146_s30 + $0x44] sm:$0x1]  ;;  %v7099_v17 = vrot.slane %v667_v5, 9  ;;  %v8986_v25 = vld [vmem:[%s9146_s30 + $0x50] sm:$0x1] }
  0xae   : > { %v7414_v47 = vcombine.low %v752_v62, %v755_v11  ;;  %v7415_v10 = vcombine.low %v759_v61, %v762_v41  ;;  %v767_v60 = vrot.slane %v765_v59, 4  ;;  %v768_v48 = vrot.slane %v8985_v45, 5  ;;  %v668_v39 = vld [vmem:[%s9146_s30 + $0x54] sm:$0xe]  ;;  %v8988_v62 = vld [vmem:[%s9146_s30 + $0x64] sm:$0xf] }
  0xaf   : > { %v774_v24 = vrot.slane %v772_v19, 4  ;;  %v775_v55 = vrot.slane %v8986_v25, 5  ;;  %v773_v2 = vsel %vm9707_vm6, %v7099_v17, %v772_v19  ;;  %v786_v11 = vrot.slane %v8988_v62, 5  ;;  %v669_v28 = vld [vmem:[%s9146_s30 + $0x60] sm:$0xe] }
  0xb0   : > { %v7100_v41 = vrot.slane %v668_v39, 9  ;;  %v8989_v43 = vld [vmem:[%s9146_s30 + $0x5c] sm:$0x1]  ;;  %v7101_v5 = vrot.slane %v669_v28, 9  ;;  %v8991_v45 = vld [vmem:[%s9146_s30 + $0x70] sm:$0xf] }
  0xb1   : > { %8517 = vmatmul.mubr.msk.bf16.vlgmr.msra.gmra.mxu1 %vm2123_vm1, %v9203_v12  ;;  %v766_v12 = vsel %vm9707_vm6, %v7098_v18, %v765_v59  ;;  %v776_v22 = vsel %vm9707_vm6, %v774_v24, %v775_v55  ;;  %v782_v19 = vrot.slane %v8989_v43, 5  ;;  %v670_v24 = vld [vmem:[%s9146_s30 + $0x6c] sm:$0xe]  ;;  %v8992_v25 = vld [vmem:[%s9146_s30 + $0x7c] sm:$0xf] }
  0xb2   : > { %8583 = vmatpush3.bf16.msra.mxu1 %v9424_v49  ;;  %8520 = vmatprep.mubr.msk.bf16.mxu1 %vm2123_vm1, %v9227_v53  ;;  %v769_v49 = vsel %vm9707_vm6, %v767_v60, %v768_v48  ;;  %v779_v53 = vrot.slane %v8987_v54, 5  ;;  %v7417_v59 = vcombine.low %v773_v2, %v776_v22  ;;  %v793_v48 = vrot.slane %v8991_v45, 5  ;;  %v8993_v22 = vld [vmem:[%s9146_s30 + $0x74] sm:$0x1]  ;;  %v8994_v28 = vld [vmem:[%s9146_s30 + $0x80] sm:$0x1] }
  0xb3   : > { %8650 = vmatprep.subr.bf16.mxu1 %v9778_v46  ;;  %8487 = vmatmul.mubr.msk.bf16.gmra.mxu0 %vm2123_vm1, %v7414_v47  ;;  %v7416_v61 = vcombine.low %v766_v12, %v769_v49  ;;  %v788_v47 = vrot.slane %v786_v11, 4  ;;  %v800_v55 = vrot.slane %v8992_v25, 5  ;;  %v671_v12 = vld [vmem:[%s9146_s30 + $0x78] sm:$0xe]  ;;  %v796_v39 = vrot.slane %v8993_v22, 5 }
  0xb4   : > { %8490 = vmatprep.mubr.msk.bf16.mxu0 %vm2123_vm1, %v7415_v10  ;;  %v781_v34 = vrot.slane %v779_v53, 4  ;;  %v8990_v10 = vld [vmem:[%s9146_s30 + $0x68] sm:$0x1]  ;;  %v795_v2 = vrot.slane %v793_v48, 4  ;;  %v7103_v62 = vrot.slane %v671_v12, 9 }
  0xb5   : > { %v789_v18 = vrot.slane %v8990_v10, 5  ;;  %v673_v10 = vld [vmem:[%s9146_s30 + $0x90] sm:$0xe]  ;;  %v8998_v25 = vld [vmem:[%s9146_s30 + $0x98] sm:$0x1] }
  0xb6   : > { %v783_v60 = vsel %vm9707_vm6, %v781_v34, %v782_v19  ;;  %v672_v19 = vld [vmem:[%s9146_s30 + $0x84] sm:$0xe]  ;;  %v8999_v12 = vld [vmem:[%s9146_s30 + $0xa0] sm:$0xf]  ;;  %v9000_v22 = vld [vmem:[%s9146_s30 + $0xac] sm:$0xf] }
  0xb7   : > { %v790_v17 = vsel %vm9707_vm6, %v788_v47, %v789_v18 }
  0xb9   : > { %8521 = vmatmul.mubr.msk.bf16.gmra.mxu1 %vm2123_vm1, %v9233_v58  ;;  %v780_v58 = vsel %vm9707_vm6, %v7100_v41, %v779_v53  ;;  %v7102_v53 = vrot.slane %v670_v24, 9  ;;  %v8995_v41 = vld [vmem:[%s9146_s30 + $0x88] sm:$0xf] }
  0xba   : > { %8524 = vmatprep.mubr.msk.bf16.mxu1 %vm2123_vm1, %v9250_v37  ;;  %v787_v37 = vsel %vm9707_vm6, %v7101_v5, %v786_v11  ;;  %v7418_v49 = vcombine.low %v780_v58, %v783_v60  ;;  %v802_v11 = vrot.slane %v800_v55, 4  ;;  %v807_v34 = vrot.slane %v8995_v41, 5  ;;  %v8996_v5 = vld [vmem:[%s9146_s30 + $0x94] sm:$0xf]  ;;  %v7170_v41 = vld [vmem:[%s9146_s30 + $0xa8] sm:$0xe] }
  0xbb   : > { %8491 = vmatmul.mubr.msk.bf16.gmra.mxu0 %vm2123_vm1, %v7416_v61  ;;  %v7419_v54 = vcombine.low %v787_v37, %v790_v17  ;;  %v803_v61 = vrot.slane %v8994_v28, 5  ;;  %v814_v47 = vrot.slane %v8996_v5, 5  ;;  %v7104_v60 = vrot.slane %v672_v19, 9  ;;  %v9002_v5 = vld [vmem:[%s9146_s30 + $0xb0] sm:$0x1] }
  0xbc   : > { %8494 = vmatprep.mubr.msk.bf16.mxu0 %vm2123_vm1, %v7417_v59  ;;  %v797_v59 = vsel %vm9707_vm6, %v795_v2, %v796_v39  ;;  %v809_v45 = vrot.slane %v807_v34, 4  ;;  %v7105_v17 = vrot.slane %v673_v10, 9  ;;  %v828_v39 = vrot.slane %v9000_v22, 5  ;;  %v7171_v10 = vld [vmem:[%s9146_s30 + $0xb4] sm:$0xe] }
  0xbd   : > { %v804_v43 = vsel %vm9707_vm6, %v802_v11, %v803_v61  ;;  %v816_v24 = vrot.slane %v814_v47, 4 }
  0xbe   : > { %v830_v19 = vrot.slane %v828_v39, 4 }
  0xc1   : > { %8525 = vmatmul.mubr.msk.bf16.gmra.mxu1 %vm2123_vm1, %v9260_v51  ;;  %v794_v51 = vsel %vm9707_vm6, %v7102_v53, %v793_v48  ;;  %v8997_v48 = vld [vmem:[%s9146_s30 + $0x8c] sm:$0x1]  ;;  %v815_v53 = vsel %vm9707_vm6, %v7105_v17, %v814_v47  ;;  %v831_v47 = vrot.slane %v9002_v5, 5 }
  0xc2   : > { %8528 = vmatprep.mubr.msk.bf16.mxu1 %vm2123_vm1, %v9275_v31  ;;  %v801_v31 = vsel %vm9707_vm6, %v7103_v62, %v800_v55  ;;  %v7420_v18 = vcombine.low %v794_v51, %v797_v59  ;;  %v810_v37 = vrot.slane %v8997_v48, 5  ;;  %v817_v55 = vrot.slane %v8998_v25, 5  ;;  %v675_v62 = vld [vmem:[%s9146_s30 + $0xa8] sm:$0xe]  ;;  %v9001_v51 = vld [vmem:[%s9146_s30 + $0xa4] sm:$0x1] }
  0xc3   : > { %8495 = vmatmul.mubr.msk.bf16.gmra.mxu0 %vm2123_vm1, %v7418_v49  ;;  %v7421_v58 = vcombine.low %v801_v31, %v804_v43  ;;  %v808_v49 = vsel %vm9707_vm6, %v7104_v60, %v807_v34  ;;  %v824_v59 = vrot.slane %v9001_v51, 5  ;;  %v676_v31 = vld [vmem:[%s9146_s30 + $0xb4] sm:$0xe]  ;;  %v7107_v43 = vrot.slane %v675_v62, 9 }
  0xc4   : > { %8498 = vmatprep.mubr.msk.bf16.mxu0 %vm2123_vm1, %v7419_v54  ;;  %v674_v54 = vld [vmem:[%s9146_s30 + $0x9c] sm:$0xe]  ;;  %v818_v2 = vsel %vm9707_vm6, %v816_v24, %v817_v55  ;;  %v1450_v60 = vrot.slane %v9677_v33, 5  ;;  %v7108_v48 = vrot.slane %v676_v31, 9  ;;  %v1440_v24 = vrot.slane %v9647_v8, 5 }
  0xc5   : > { %v7106_v28 = vrot.slane %v674_v54, 9  ;;  %v7423_v34 = vcombine.low %v815_v53, %v818_v2  ;;  %v7172_v33 = vld [vmem:[%s9146_s30 + $0xc0] sm:$0xe]  ;;  %v829_v25 = vsel %vm9707_vm6, %v7107_v43, %v828_v39  ;;  %v832_v55 = vsel %vm9707_vm6, %v830_v19, %v831_v47  ;;  %v9004_v53 = vld [vmem:[%s9146_s30 + $0xbc] sm:$0x1] }
  0xc6   : > { %v1442_v54 = vrot.slane %v1440_v24, 4  ;;  %v1443_v8 = vrot.slane %v9657_v44, 5  ;;  %v838_v2 = vrot.slane %v9004_v53, 5  ;;  %v7188_v39 = vrot.slane %v7172_v33, 9  ;;  %v7157_v43 = vld [vmem:[%s9146_s30 + $0xc] sm:$0xe] }
  0xc7   : > { %v1447_v62 = vrot.slane %v9665_v50, 5 }
  0xc8   : > { %v1444_v44 = vsel %vm9707_vm6, %v1442_v54, %v1443_v8  ;;  %v9009_v8 = vld [vmem:[%s9146_s30 + $0x20] sm:$0x1] }
  0xc9   : > { %8529 = vmatmul.mubr.msk.bf16.gmra.mxu1 %vm2123_vm1, %v9281_v38  ;;  %v821_v38 = vrot.slane %v8999_v12, 5  ;;  %v1448_v50 = vsel %vm9707_vm6, %v7188_v39, %v1447_v62  ;;  %v1352_v53 = vrot.slane %v9009_v8, 5 }
  0xca   : > { %8532 = vmatprep.mubr.msk.bf16.mxu1 %vm2123_vm1, %v9298_v14  ;;  %v811_v14 = vsel %vm9707_vm6, %v809_v45, %v810_v37  ;;  %v9003_v37 = vld [vmem:[%s9146_s30 + $0xb8] sm:$0xf] }
  0xcb   : > { %8499 = vmatmul.mubr.msk.bf16.gmra.mxu0 %vm2123_vm1, %v7420_v18  ;;  %v7422_v11 = vcombine.low %v808_v49, %v811_v14  ;;  %v823_v61 = vrot.slane %v821_v38, 4  ;;  %v1436_v18 = vrot.slane %v9627_v30, 5  ;;  %v835_v17 = vrot.slane %v9003_v37, 5 }
  0xcc   : > { %8502 = vmatprep.mubr.msk.bf16.mxu0 %vm2123_vm1, %v7421_v58  ;;  %v7186_v58 = vrot.slane %v7170_v41, 9  ;;  %v7187_v30 = vrot.slane %v7171_v10, 9  ;;  %v1449_v41 = vrot.slane %v1447_v62, 4 }
  0xcd   : > { %v825_v45 = vsel %vm9707_vm6, %v823_v61, %v824_v59 }
  0xce   : > { %v1441_v14 = vsel %vm9707_vm6, %v7187_v30, %v1440_v24  ;;  %v1451_v19 = vsel %vm9707_vm6, %v1449_v41, %v1450_v60 }
  0xcf   : > { %v9908_v59 = vcombine.low %v1441_v14, %v1444_v44  ;;  %v9926_v10 = vcombine.low %v1448_v50, %v1451_v19 }
  0xd1   : > { %8533 = vmatmul.mubr.msk.bf16.gmra.mxu1 %vm2123_vm1, %v9308_v35  ;;  %v822_v35 = vsel %vm9707_vm6, %v7106_v28, %v821_v38  ;;  %v837_v28 = vrot.slane %v835_v17, 4  ;;  %12483 = vst [vmem:[#allocation42_spill] sm:$0xff] %v9908_v59  ;;  %12484 = vst [vmem:[#allocation43_spill] sm:$0xff] %v9926_v10 }
  0xd2   : > { %8536 = vmatprep.mubr.msk.bf16.mxu1 %vm2123_vm1, %v9323_v13  ;;  %v1433_v13 = vrot.slane %v9620_v3, 5  ;;  %v7424_v38 = vcombine.low %v822_v35, %v825_v45  ;;  %v9006_v35 = vld [vmem:[%s9146_s30 + $0x14] sm:$0x1] }
  0xd3   : > { %8503 = vmatmul.mubr.msk.bf16.gmra.mxu0 %vm2123_vm1, %v7422_v11  ;;  %v7425_v11 = vcombine.low %v829_v25, %v832_v55  ;;  %v839_v5 = vsel %vm9707_vm6, %v837_v28, %v838_v2  ;;  %v1345_v45 = vrot.slane %v9006_v35, 5  ;;  %v7158_v25 = vld [vmem:[%s9146_s30 + $0x18] sm:$0xe]  ;;  %v9008_v55 = vld [vmem:[%s9146_s30 + $0x28] sm:$0xf] }
  0xd4   : > { %8506 = vmatprep.mubr.msk.bf16.mxu0 %vm2123_vm1, %v7423_v34  ;;  %v1434_v12 = vsel %vm9707_vm6, %v7186_v58, %v1433_v13  ;;  %v1435_v3 = vrot.slane %v1433_v13, 4  ;;  %v7174_v14 = vrot.slane %v7158_v25, 9  ;;  %v9012_v35 = vld [vmem:[%s9146_s30 + $0x40] sm:$0xf] }
  0xd6   : > { %v1437_v22 = vsel %vm9707_vm6, %v1435_v3, %v1436_v18  ;;  %v7173_v18 = vrot.slane %v7157_v43, 9 }
  0xd7   : > { %v9889_v49 = vpop.f32.mrf.mxu1  ;;  %v9902_v51 = vcombine.low %v1434_v12, %v1437_v22  ;;  %v7159_v12 = vld [vmem:[%s9146_s30 + $0x24] sm:$0xe] }
  0xd8   : > { %v7175_v39 = vrot.slane %v7159_v12, 9 }
  0xd9   : > { %8537 = vmatmul.mubr.msk.bf16.gmra.mxu1 %vm2123_vm1, %v9329_v20  ;;  %v9900_v61 = vpop.f32.mrf.mxu1  ;;  %12482 = vst [vmem:[#allocation41_spill] sm:$0xff] %v9902_v51  ;;  %v9005_v20 = vld [vmem:[%s9146_s30 + $0x10] sm:$0xf] }
  0xda   : > { %8540 = vmatprep.mubr.msk.bf16.mxu1 %vm2123_vm1, %v9347_v0  ;;  %v1342_v34 = vrot.slane %v9005_v20, 5  ;;  %v836_v0 = vsel %vm9707_vm6, %v7108_v48, %v835_v17  ;;  %v9007_v48 = vld [vmem:[%s9146_s30 + $0x1c] sm:$0xf] }
  0xdb   : > { %v9913_v31 = vpop.f32.mrf.mxu1  ;;  %8507 = vmatmul.mubr.msk.bf16.gmra.mxu0 %vm2123_vm1, %v7424_v38  ;;  %v7426_v60 = vcombine.low %v836_v0, %v839_v5  ;;  %v1349_v37 = vrot.slane %v9007_v48, 5  ;;  %v9980_v0 = vld [vmem:[%s12352_s1 + $0x50] sm:$0xff]  }
  0xdc   : > { %8510 = vmatprep.mubr.msk.bf16.mxu0 %vm2123_vm1, %v7425_v11  ;;  %v1344_v58 = vrot.slane %v1342_v34, 4  ;;  %v1343_v24 = vsel %vm9707_vm6, %v7173_v18, %v1342_v34  ;;  %v9010_v11 = vld [vmem:[%s9146_s30 + $0x2c] sm:$0x1]  ;;  %v9011_v34 = vld [vmem:[%s9146_s30 + $0x34] sm:$0xf] }
  0xdd   : > { %v9924_v47 = vpop.f32.mrf.mxu1  ;;  %v1351_v54 = vrot.slane %v1349_v37, 4  ;;  %v1359_v28 = vrot.slane %v9010_v11, 5  ;;  %v1350_v41 = vsel %vm9707_vm6, %v7174_v14, %v1349_v37  ;;  %v1363_v43 = vrot.slane %v9011_v34, 5  ;;  %v7160_v18 = vld [vmem:[%s9146_s30 + $0x30] sm:$0xe] }
  0xde   : > { %v1346_v33 = vsel %vm9707_vm6, %v1344_v58, %v1345_v45  ;;  %v1370_v45 = vrot.slane %v9012_v35, 5  ;;  %v7176_v25 = vrot.slane %v7160_v18, 9  ;;  %v9015_v34 = vld [vmem:[%s9146_s30 + $0x4c] sm:$0xf]  ;;  %v7162_v35 = vld [vmem:[%s9146_s30 + $0x48] sm:$0xe] }
  0xdf   : > { %v9954_v38 = vcombine.low %v1343_v24, %v1346_v33  ;;  %v1353_v20 = vsel %vm9707_vm6, %v1351_v54, %v1352_v53 }
  0xe0   : > { %v9929_v13 = vpop.f32.mrf.mxu1  ;;  %v9995_v37 = vcombine.low %v1350_v41, %v1353_v20  ;;  %v1372_v8 = vrot.slane %v1370_v45, 4  ;;  %v1364_v41 = vsel %vm9707_vm6, %v7176_v25, %v1363_v43 }
  0xe1   : > { %8541 = vmatmul.mubr.msk.bf16.gmra.mxu1 %vm2123_vm1, %v9358_v23  ;;  %v1356_v23 = vrot.slane %v9008_v55, 5  ;;  %12485 = vst [vmem:[#allocation44_spill] sm:$0xff] %v9954_v38  ;;  %v1365_v55 = vrot.slane %v1363_v43, 4  ;;  %v7163_v43 = vld [vmem:[%s9146_s30 + $0x54] sm:$0xe] }
  0xe2   : > { %8544 = vmatprep.mubr.msk.bf16.mxu1 %vm2123_vm1, %v9374_v4  ;;  %v9936_v17 = vpop.f32.mrf.mxu0  ;;  %v9938_v30 = vpop.f32.mrf.mxu1  ;;  %12487 = vst [vmem:[#allocation46_spill] sm:$0xff] %v9995_v37 }
  0xe3   : > { %8511 = vmatmul.mubr.msk.bf16.gmra.mxu0 %vm2123_vm1, %v7426_v60  ;;  %v1358_v62 = vrot.slane %v1356_v23, 4  ;;  %v7161_v60 = vld [vmem:[%s9146_s30 + $0x3c] sm:$0xe] }
  0xe4   : > { %v9947_v4 = vpop.f32.mrf.mxu0  ;;  %v9950_v3 = vpop.f32.mrf.mxu1  ;;  %8550 = vmatprep.mubr.msk.bf16.mxu0 %vm2123_vm1, %v9400_v6  ;;  %v7177_v54 = vrot.slane %v7161_v60, 9 }
  0xe5   : > { %v1360_v5 = vsel %vm9707_vm6, %v1358_v62, %v1359_v28  ;;  %v10014_v62 = vld [vmem:[%s12352_s1 + $0x58] sm:$0xff]  }
  0xe6   : > { %v9957_v2 = vpop.f32.mrf.mxu0  ;;  %v9959_v22 = vpop.f32.mrf.mxu1 }
  0xe8   : > { %v9962_v44 = vpop.f32.mrf.mxu0  ;;  %v9964_v50 = vpop.f32.mrf.mxu1 }
  0xe9   : > { %8545 = vmatmul.mubr.msk.bf16.gmra.mxu1 %vm2123_vm1, %v9378_v15  ;;  %v1357_v15 = vsel %vm9707_vm6, %v7175_v39, %v1356_v23  ;;  %v9013_v23 = vld [vmem:[%s9146_s30 + $0x38] sm:$0x1] }
  0xea   : > { %8584 = vmatprep.mubr.msk.bf16.mxu1 %vm2123_vm1, %v9954_v38  ;;  %v9975_v19 = vpop.f32.mrf.mxu1  ;;  %v10002_v33 = vcombine.low %v1357_v15, %v1360_v5  ;;  %v1366_v12 = vrot.slane %v9013_v23, 5  ;;  %v1377_v15 = vrot.slane %v9015_v34, 5  ;;  %v1371_v5 = vsel %vm9707_vm6, %v7177_v54, %v1370_v45  ;;  %v9016_v54 = vld [vmem:[%s9146_s30 + $0x50] sm:$0x1]  ;;  %v7164_v38 = vld [vmem:[%s9146_s30 + $0x60] sm:$0xe] }
  0xeb   : > { %8551 = vmatmul.mubr.msk.bf16.vlgmr.msra.gmra.mxu0 %vm2123_vm1, %v9416_v36 }
  0xec   : > { %v9987_v58 = vpop.f32.mrf.mxu0  ;;  %v9993_v48 = vpop.f32.mrf.mxu1  ;;  %8617 = vmatpush3.bf16.msra.mxu0 %v9757_v42  ;;  %8554 = vmatprep.mubr.msk.bf16.mxu0 %vm2123_vm1, %v9440_v56  ;;  %12488 = vst [vmem:[#allocation47_spill] sm:$0xff] %v10002_v33  ;;  %v9014_v42 = vld [vmem:[%s9146_s30 + $0x44] sm:$0x1]  ;;  %v1367_v20 = vsel %vm9707_vm6, %v1365_v55, %v1366_v12  ;;  %v1379_v12 = vrot.slane %v1377_v15, 4 }
  0xed   : > { %12486 = vst [vmem:[#allocation45_spill] sm:$0xff] %v9993_v48  ;;  %8684 = vmatprep.subr.bf16.mxu0 %v9980_v0  ;;  %v1373_v53 = vrot.slane %v9014_v42, 5  ;;  %v10042_v25 = vcombine.low %v1364_v41, %v1367_v20  ;;  %v9017_v20 = vld [vmem:[%s9146_s30 + $0x5c] sm:$0x1] }
  0xee   : > { %v10000_v24 = vpop.f32.mrf.mxu0  ;;  %v10005_v14 = vpop.f32.mrf.mxu1  ;;  %v1387_v34 = vrot.slane %v9017_v20, 5 }
  0xef   : > { %12489 = vst [vmem:[#allocation48_spill] sm:$0xff] %v10005_v14  ;;  %v1374_v18 = vsel %vm9707_vm6, %v1372_v8, %v1373_v53  ;;  %12492 = vst [vmem:[#allocation51_spill] sm:$0xff] %v10042_v25  ;;  %v1380_v8 = vrot.slane %v9016_v54, 5  ;;  %v7179_v53 = vrot.slane %v7163_v43, 9  ;;  %v9018_v43 = vld [vmem:[%s9146_s30 + $0x64] sm:$0xf] }
  0xf0   : > { %v10009_v39 = vpop.f32.mrf.mxu0  ;;  %v10050_v23 = vcombine.low %v1371_v5, %v1374_v18  ;;  %v1391_v54 = vrot.slane %v9018_v43, 5 }
  0xf1   : > { %8585 = vmatmul.mubr.msk.bf16.vlgmr.msra.gmra.mxu1 %vm2123_vm1, %v9995_v37 }
  0xf2   : > { %v10018_v11 = vpop.f32.mrf.mxu0  ;;  %v10020_v28 = vpop.f32.mrf.mxu1  ;;  %8651 = vmatpush3.bf16.msra.mxu1 %v9778_v46  ;;  %8588 = vmatprep.mubr.msk.bf16.mxu1 %vm2123_vm1, %v10002_v33  ;;  %v1384_v46 = vrot.slane %v9463_v21, 5  ;;  %12494 = vst [vmem:[#allocation53_spill] sm:$0xff] %v10050_v23  ;;  %v7178_v21 = vrot.slane %v7162_v35, 9  ;;  %v1381_v35 = vsel %vm9707_vm6, %v1379_v12, %v1380_v8 }
  0xf3   : > { %12490 = vst [vmem:[#allocation49_spill] sm:$0xff] %v10020_v28  ;;  %8718 = vmatprep.subr.bf16.mxu1 %v10014_v62  ;;  %8555 = vmatmul.mubr.msk.bf16.gmra.mxu0 %vm2123_vm1, %v9453_v27  ;;  %v12517_v28 = vld [vmem:[#allocation20_spill] sm:$0xff] }
  0xf4   : > { %v10036_v60 = vpop.f32.mrf.mxu1  ;;  %8558 = vmatprep.mubr.msk.bf16.mxu0 %vm2123_vm1, %v9476_v7  ;;  %v1386_v41 = vrot.slane %v1384_v46, 4  ;;  %v1378_v18 = vsel %vm9707_vm6, %v7178_v21, %v1377_v15  ;;  %v1385_v37 = vsel %vm9707_vm6, %v7179_v53, %v1384_v46  ;;  %v7165_v15 = vld [vmem:[%s9146_s30 + $0x6c] sm:$0xe]  ;;  %v7180_v53 = vrot.slane %v7164_v38, 9 }
  0xf5   : > { %12491 = vst [vmem:[#allocation50_spill] sm:$0xff] %v10036_v60  ;;  %v10046_v45 = vpop.f32.mrf.mxu0  ;;  %v10084_v12 = vcombine.low %v1378_v18, %v1381_v35  ;;  %v12505_v18 = vld [vmem:[#allocation13_spill] sm:$0xff] }
  0xf6   : > { %v10048_v55 = vpop.f32.mrf.mxu1  ;;  %v1401_v35 = vrot.slane %v12505_v18, 5  ;;  %v1392_v38 = vsel %vm9707_vm6, %v7180_v53, %v1391_v54  ;;  %v12511_v60 = vld [vmem:[#allocation17_spill] sm:$0xff] }
  0xf7   : > { %12493 = vst [vmem:[#allocation52_spill] sm:$0xff] %v10048_v55  ;;  %v10053_v42 = vpop.f32.mrf.mxu0  ;;  %12500 = vst [vmem:[#allocation59_spill] sm:$0xff] %v10084_v12  ;;  %v12510_v55 = vld [vmem:[#allocation19_spill] sm:$0xff] }
  0xf8   : > { %v10056_v33 = vpop.f32.mrf.mxu1 }
  0xf9   : > { %12495 = vst [vmem:[#allocation54_spill] sm:$0xff] %v10056_v33  ;;  %8589 = vmatmul.mubr.msk.bf16.gmra.mxu1 %vm2123_vm1, %v10042_v25  ;;  %v10060_v5 = vpop.f32.mrf.mxu0  ;;  %v1388_v25 = vsel %vm9707_vm6, %v1386_v41, %v1387_v34  ;;  %v1393_v41 = vrot.slane %v1391_v54, 4  ;;  %v9019_v34 = vld [vmem:[%s9146_s30 + $0x68] sm:$0x1]  ;;  %v7167_v54 = vld [vmem:[%s9146_s30 + $0x84] sm:$0xe] }
  0xfa   : > { %12496 = vst [vmem:[#allocation55_spill] sm:$0xff] %v10060_v5  ;;  %8592 = vmatprep.mubr.msk.bf16.mxu1 %vm2123_vm1, %v10050_v23  ;;  %v1398_v23 = vrot.slane %v9493_v9, 5  ;;  %v10090_v8 = vcombine.low %v1385_v37, %v1388_v25  ;;  %v1394_v9 = vrot.slane %v9019_v34, 5  ;;  %v10224_v5 = vld [vmem:[%s9146_s30 + $0x30] sm:$0xf] }
  0xfb   : > { %v10069_v20 = vpop.f32.mrf.mxu1  ;;  %v10076_v1 = vpop.f32.mrf.mxu0  ;;  %8559 = vmatmul.mubr.msk.bf16.gmra.mxu0 %vm2123_vm1, %v9489_v63 }
  0xfc   : > { %12497 = vst [vmem:[#allocation56_spill] sm:$0xff] %v10069_v20  ;;  %12498 = vst [vmem:[#allocation57_spill] sm:$0xff] %v10076_v1  ;;  %8562 = vmatprep.mubr.msk.bf16.mxu0 %vm2123_vm1, %v9514_v26  ;;  %v7181_v20 = vrot.slane %v7165_v15, 9  ;;  %v1395_v25 = vsel %vm9707_vm6, %v1393_v41, %v1394_v9  ;;  %v12508_v15 = vld [vmem:[#allocation15_spill] sm:$0xff]  ;;  %v12513_v41 = vld [vmem:[#allocation22_spill] sm:$0xff] }
  0xfd   : > { %v10082_v21 = vpop.f32.mrf.mxu1  ;;  %v10088_v46 = vpop.f32.mrf.mxu0  ;;  %12502 = vst [vmem:[#allocation61_spill] sm:$0xff] %v10090_v8  ;;  %v1405_v34 = vrot.slane %v12508_v15, 5  ;;  %v10122_v53 = vcombine.low %v1392_v38, %v1395_v25 }
  0xfe   : > { %12499 = vst [vmem:[#allocation58_spill] sm:$0xff] %v10082_v21  ;;  %12501 = vst [vmem:[#allocation60_spill] sm:$0xff] %v10088_v46  ;;  %v1400_v21 = vrot.slane %v1398_v23, 4  ;;  %v1399_v18 = vsel %vm9707_vm6, %v7181_v20, %v1398_v23  ;;  %v12514_v23 = vld [vmem:[#allocation16_spill] sm:$0xff] }
  0xff   : > { %v10093_v43 = vpop.f32.mrf.mxu1  ;;  %v10095_v40 = vpop.f32.mrf.mxu0  ;;  %12512 = vst [vmem:[#allocation19_spill] sm:$0xff] %v10122_v53  ;;  %v1408_v20 = vrot.slane %v12514_v23, 5  ;;  %v1407_v15 = vrot.slane %v1405_v34, 4 }
 0x100   : > { %12503 = vst [vmem:[#allocation62_spill] sm:$0xff] %v10093_v43  ;;  %12504 = vst [vmem:[#allocation63_spill] sm:$0xff] %v10095_v40 }
 0x101   : > { %v10098_v33 = vpop.f32.mrf.mxu1  ;;  %8593 = vmatmul.mubr.msk.bf16.gmra.mxu1 %vm2123_vm1, %v10084_v12  ;;  %v10102_v37 = vpop.f32.mrf.mxu0  ;;  %v7166_v12 = vld [vmem:[%s9146_s30 + $0x78] sm:$0xe] }
 0x102   : > { %12506 = vst [vmem:[#allocation13_spill] sm:$0xff] %v10098_v33  ;;  %12507 = vst [vmem:[#allocation64_spill] sm:$0xff] %v10102_v37  ;;  %8596 = vmatprep.mubr.msk.bf16.mxu1 %vm2123_vm1, %v10090_v8  ;;  %v1402_v33 = vsel %vm9707_vm6, %v1400_v21, %v1401_v35  ;;  %v1412_v37 = vrot.slane %v12510_v55, 5  ;;  %v7182_v35 = vrot.slane %v7166_v12, 9  ;;  %v7183_v55 = vrot.slane %v7167_v54, 9 }
 0x103   : > { %v10116_v43 = vpop.f32.mrf.mxu0  ;;  %8563 = vmatmul.mubr.msk.bf16.gmra.mxu0 %vm2123_vm1, %v12511_v60  ;;  %v10127_v21 = vcombine.low %v1399_v18, %v1402_v33  ;;  %v1415_v60 = vrot.slane %v12517_v28, 5  ;;  %v1409_v12 = vsel %vm9707_vm6, %v1407_v15, %v1408_v20  ;;  %v7168_v18 = vld [vmem:[%s9146_s30 + $0x90] sm:$0xe] }
 0x104   : > { %12509 = vst [vmem:[#allocation15_spill] sm:$0xff] %v10116_v43  ;;  %v8402_v8 = vpop.f32.mrf.mxu1  ;;  %8566 = vmatprep.mubr.msk.bf16.mxu0 %vm2123_vm1, %v12513_v41  ;;  %v1414_v40 = vrot.slane %v1412_v37, 4  ;;  %v12519_v41 = vld [vmem:[#allocation23_spill] sm:$0xff]  ;;  %v1406_v33 = vsel %vm9707_vm6, %v7182_v35, %v1405_v34  ;;  %v1413_v28 = vsel %vm9707_vm6, %v7183_v55, %v1412_v37  ;;  %v12523_v34 = vld [vmem:[#allocation24_spill] sm:$0xff]  ;;  %v7184_v20 = vrot.slane %v7168_v18, 9  ;;  %v12526_v55 = vld [vmem:[#allocation30_spill] sm:$0xff] }
 0x105   : > { %12515 = vst [vmem:[#allocation16_spill] sm:$0xff] %v10127_v21  ;;  %v1419_v23 = vrot.slane %v12519_v41, 5  ;;  %v12521_v41 = vld [vmem:[#allocation27_spill] sm:$0xff]  ;;  %v1422_v35 = vrot.slane %v12523_v34, 5  ;;  %v10155_v1 = vcombine.low %v1406_v33, %v1409_v12 }
 0x106   : > { %v2565_v9 = vpop.f32.mrf.mxu1  ;;  %v1416_v54 = vsel %vm9707_vm6, %v1414_v40, %v1415_v60 }
 0x107   : > { %v10129_v43 = vpop.f32.mrf.mxu0  ;;  %12524 = vst [vmem:[#allocation27_spill] sm:$0xff] %v10155_v1  ;;  %v1421_v15 = vrot.slane %v1419_v23, 4  ;;  %v10161_v40 = vcombine.low %v1413_v28, %v1416_v54  ;;  %v1420_v12 = vsel %vm9707_vm6, %v7184_v20, %v1419_v23  ;;  %v10173_v54 = vld [vmem:[%s9146_s30 + $0x18] sm:$0xf] }
 0x108   : > { %12516 = vst [vmem:[#allocation65_spill] sm:$0xff] %v10129_v43  ;;  %v8403_v38 = vpop.f32.mrf.mxu1  ;;  %v12522_v43 = vld [vmem:[#allocation25_spill] sm:$0xff] }
 0x109   : > { %8597 = vmatmul.mubr.msk.bf16.gmra.mxu1 %vm2123_vm1, %v10122_v53  ;;  %v10134_v25 = vpop.f32.mrf.mxu0  ;;  %12527 = vst [vmem:[#allocation66_spill] sm:$0xff] %v10161_v40  ;;  %v1423_v18 = vsel %vm9707_vm6, %v1421_v15, %v1422_v35 }
 0x10a   : > { %12518 = vst [vmem:[#allocation20_spill] sm:$0xff] %v10134_v25  ;;  %v2568_v46 = vpop.f32.mrf.mxu1  ;;  %8600 = vmatprep.mubr.msk.bf16.mxu1 %vm2123_vm1, %v10127_v21  ;;  %v1426_v25 = vrot.slane %v12521_v41, 5  ;;  %v7169_v21 = vld [vmem:[%s9146_s30 + $0x9c] sm:$0xe]  ;;  %v10189_v15 = vcombine.low %v1420_v12, %v1423_v18 }
 0x10b   : > { %v10148_v53 = vpop.f32.mrf.mxu0  ;;  %8567 = vmatmul.mubr.msk.bf16.gmra.mxu0 %vm2123_vm1, %v12522_v43  ;;  %v7185_v41 = vrot.slane %v7169_v21, 9  ;;  %v10183_v21 = vld [vmem:[%s9146_s30 + $0x24] sm:$0xf] }
 0x10c   : > { %12520 = vst [vmem:[#allocation23_spill] sm:$0xff] %v10148_v53  ;;  %8570 = vmatprep.mubr.msk.bf16.mxu0 %vm2123_vm1, %v12526_v55  ;;  %v1428_v43 = vrot.slane %v1426_v25, 4  ;;  %v12528_v53 = vld [vmem:[#allocation29_spill] sm:$0xff]  ;;  %12531 = vst [vmem:[#allocation68_spill] sm:$0xff] %v10189_v15  ;;  %v1532_v12 = vshll.u32 %v10183_v21, 16 }
 0x10d   : > { %v8406_v14 = vpop.f32.mrf.mxu1  ;;  %v10157_v37 = vpop.f32.mrf.mxu0  ;;  %v1429_v26 = vrot.slane %v12528_v53, 5 }
 0x10e   : > { %12525 = vst [vmem:[#allocation24_spill] sm:$0xff] %v10157_v37 }
 0x10f   : > { %v8368_v60 = vpop.f32.mrf.mxu0  ;;  %v2581_v34 = vpop.f32.mrf.mxu1  ;;  %v1430_v23 = vsel %vm9707_vm6, %v1428_v43, %v1429_v26 }
 0x110   : > { %v10164_v33 = vadd.f32 %v8402_v8, %v8368_v60  ;;  %v10180_v8 = vld [vmem:[%s9146_s30 + $0x1c] sm:$0xf]  ;;  %v1427_v60 = vsel %vm9707_vm6, %v7185_v41, %v1426_v25  ;;  %v12534_v25 = vld [vmem:[#allocation34_spill] sm:$0xff]  ;;  %v1529_v41 = vshrl.u32 %v10183_v21, 16 }
 0x111   : > { %8601 = vmatmul.mubr.msk.bf16.gmra.mxu1 %vm2123_vm1, %v10155_v1  ;;  %v2286_v28 = vpop.f32.mrf.mxu0  ;;  %v8407_v20 = vpop.f32.mrf.mxu1  ;;  %v12532_v1 = vld [vmem:[#allocation31_spill] sm:$0xff]  ;;  %v1514_v26 = vshll.u32 %v10180_v8, 16  ;;  %v1518_v43 = vshrl.u32 %v10180_v8, 16 }
 0x112   : > { %12529 = vst [vmem:[#allocation29_spill] sm:$0xff] %v10164_v33  ;;  %8604 = vmatprep.mubr.msk.bf16.mxu1 %vm2123_vm1, %v10161_v40  ;;  %v10177_v53 = vadd.f32 %v2565_v9, %v2286_v28  ;;  %v1505_v9 = vshrl.u32 %v10173_v54, 16  ;;  %v1508_v28 = vshll.u32 %v10173_v54, 16 }
 0x113   : > { %v8369_v35 = vpop.f32.mrf.mxu0  ;;  %8571 = vmatmul.mubr.msk.bf16.gmra.mxu0 %vm2123_vm1, %v12532_v1  ;;  %v10214_v55 = vrot.slane %v1514_v26, 5  ;;  %v1520_v63 = vrot.slane %v1518_v43, 4  ;;  %v7222_v43 = vld [vmem:[%s9146_s30 + $0x2c] sm:$0x1] }
 0x114   : > { %12530 = vst [vmem:[#allocation67_spill] sm:$0xff] %v10177_v53  ;;  %v10193_v40 = vadd.f32 %v8403_v38, %v8369_v35  ;;  %v10198_v53 = vld [vmem:[%s9146_s30 + $0x28] sm:$0xf]  ;;  %8574 = vmatprep.mubr.msk.bf16.mxu0 %vm2123_vm1, %v12534_v25  ;;  %v10206_v38 = vcombine.low %v1427_v60, %v1430_v23  ;;  %v2584_v35 = vpop.f32.mrf.mxu1  ;;  %v1507_v25 = vrot.slane %v1505_v9, 4  ;;  %v1510_v1 = vrot.slane %v1508_v28, 5 }
 0x115   : > { %v2289_v33 = vpop.f32.mrf.mxu0  ;;  %v1538_v52 = vshll.u32 %v10198_v53, 16  ;;  %v1531_v60 = vrot.slane %v1529_v41, 4  ;;  %v1534_v23 = vrot.slane %v1532_v12, 5 }
 0x116   : > { %12533 = vst [vmem:[#allocation69_spill] sm:$0xff] %v10193_v40  ;;  %12535 = vst [vmem:[#allocation70_spill] sm:$0xff] %v10206_v38  ;;  %v10208_v18 = vadd.f32 %v2568_v46, %v2289_v33  ;;  %v1542_v40 = vshrl.u32 %v10198_v53, 16  ;;  %v7221_v33 = vld [vmem:[%s9146_s30 + $0x20] sm:$0x1]  ;;  %v8410_v48 = vpop.f32.mrf.mxu1 }
 0x117   : > { %v10221_v9 = vrot.slane %v1538_v52, 5  ;;  %v1524_v12 = vshll.u32 %v7221_v33, 16  ;;  %v1535_v52 = vor.u32 %v1534_v23, %v1531_v60 }
 0x118   : > { %12536 = vst [vmem:[#allocation71_spill] sm:$0xff] %v10208_v18  ;;  %v1544_v28 = vrot.slane %v1542_v40, 4  ;;  %v1553_v40 = vshrl.u32 %v10224_v5, 16 }
 0x119   : > { %8605 = vmatmul.mubr.msk.bf16.gmra.mxu1 %vm2123_vm1, %v10189_v15  ;;  %v8372_v37 = vpop.f32.mrf.mxu0  ;;  %v1556_v15 = vshll.u32 %v10224_v5, 16  ;;  %v1536_v60 = vrot.slane %v1535_v52, 4 }
 0x11a   : > { %8608 = vmatprep.mubr.msk.bf16.mxu1 %vm2123_vm1, %v10206_v38  ;;  %v10218_v46 = vadd.f32 %v8406_v14, %v8372_v37  ;;  %v1511_v14 = vor.u32 %v1510_v1, %v1507_v25  ;;  %v1521_v37 = vor.u32 %v1520_v63, %v10214_v55  ;;  %v1526_v25 = vrot.slane %v1524_v12, 5  ;;  %v10257_v12 = vld [vmem:[%s9146_s30 + $0x3c] sm:$0xf] }
 0x11b   : > { %v2302_v18 = vpop.f32.mrf.mxu0  ;;  %8575 = vmatmul.mubr.msk.bf16.gmra.mxu0 %vm2123_vm1, %v9683_v57  ;;  %v2597_v57 = vpop.f32.mrf.mxu1  ;;  %v1555_v33 = vrot.slane %v1553_v40, 4 }
 0x11c   : > { %12537 = vst [vmem:[#allocation72_spill] sm:$0xff] %v10218_v46  ;;  %v10228_v26 = vadd.f32 %v2581_v34, %v2302_v18  ;;  %8578 = vmatprep.mubr.msk.bf16.mxu0 %vm2123_vm1, %v9701_v16  ;;  %v1545_v34 = vor.u32 %v1544_v28, %v10221_v9  ;;  %v1548_v18 = vshll.u32 %v7222_v43, 16  ;;  %v1512_v1 = vrot.slane %v1511_v14, 4 }
 0x11d   : > { %v8373_v41 = vpop.f32.mrf.mxu0  ;;  %v1558_v28 = vrot.slane %v1556_v15, 5  ;;  %v2486_v15 = vadd.f32 %v9900_v61, %v9947_v4 }
 0x11e   : > { %12538 = vst [vmem:[#allocation73_spill] sm:$0xff] %v10228_v26  ;;  %v10234_v38 = vadd.f32 %v8407_v20, %v8373_v41  ;;  %v10240_v26 = vld [vmem:[%s9146_s30 + $0x34] sm:$0xf]  ;;  %v1522_v20 = vrot.slane %v1521_v37, 4  ;;  %v1546_v41 = vrot.slane %v1545_v34, 4  ;;  %v1517_v40 = vsel %vm9176_vm3, %v1512_v1, %v10214_v55 }
 0x11f   : > { %v2305_v46 = vpop.f32.mrf.mxu0  ;;  %v1566_v14 = vshrl.u32 %v10240_v26, 16  ;;  %v7223_v34 = vld [vmem:[%s9146_s30 + $0x38] sm:$0x1]  ;;  %v1577_v1 = vshrl.u32 %v10257_v12, 16 }
 0x120   : > { %v10242_v7 = vadd.f32 %v2584_v35, %v2305_v46  ;;  %v1562_v35 = vshll.u32 %v10240_v26, 16  ;;  %v8411_v46 = vpop.f32.mrf.mxu1 }
 0x121   : > { %8609 = vmatmul.mubr.msk.bf16.gmra.mxu1 %vm2123_vm1, %v9902_v51  ;;  %v8376_v63 = vpop.f32.mrf.mxu0  ;;  %v1550_v51 = vrot.slane %v1548_v18, 5  ;;  %v1568_v55 = vrot.slane %v1566_v14, 4 }
 0x122   : > { %8612 = vmatprep.mubr.msk.bf16.mxu1 %vm2123_vm1, %v9908_v59  ;;  %v10248_v23 = vadd.f32 %v8410_v48, %v8376_v63  ;;  %v2494_v48 = vadd.f32 %v9889_v49, %v9936_v17  ;;  %v1541_v49 = vsel %vm9176_vm3, %v1536_v60, %v10221_v9  ;;  %v1559_v17 = vor.u32 %v1558_v28, %v1555_v33  ;;  %v2600_v4 = vpop.f32.mrf.mxu1 }
 0x123   : > { %v2318_v43 = vpop.f32.mrf.mxu0  ;;  %8579 = vmatmul.mubr.msk.bf16.gmra.mxu0 %vm2123_vm1, %v9738_v32  ;;  %v10276_v61 = vrot.slane %v1562_v35, 5  ;;  %v2489_v9 = vadd.f32 %v9924_v47, %v9962_v44  ;;  %v1572_v33 = vshll.u32 %v7223_v34, 16  ;;  %v10290_v28 = vadd.f32 %v9929_v13, %v9987_v58  ;;  %v12540_v44 = vld [vmem:[#allocation2_spill] sm:$0xff] }
 0x124   : > { %v10254_v37 = vadd.f32 %v2597_v57, %v2318_v43  ;;  %8618 = vmatprep.mubr.msk.bf16.mxu0 %vm2123_vm1, %v9400_v6  ;;  %v1527_v57 = vsel %vm9176_vm3, %v1522_v20, %v1526_v25  ;;  %v1551_v43 = vsel %vm9176_vm3, %v1546_v41, %v1550_v51  ;;  %v1580_v20 = vshll.u32 %v10257_v12, 16 }
 0x125   : > { %v8377_v52 = vpop.f32.mrf.mxu0  ;;  %v2497_v25 = vadd.f32 %v9913_v31, %v9957_v2  ;;  %v10294_v51 = vadd.f32 %v9938_v30, %v10000_v24  ;;  %v10298_v35 = vadd.f32 %v9950_v3, %v10009_v39  ;;  %v10302_v47 = vcombine.low %v1517_v40, %v1527_v57  ;;  %v10305_v2 = vld [vmem:[%s9146_s30 + $0x40] sm:$0xf]  ;;  %v10318_v3 = vld [vmem:[%s12352_s1 + $0x68] sm:$0xff]   ;;  %v7224_v39 = vld [vmem:[%s9146_s30 + $0x44] sm:$0x1] }
 0x126   : > { %v10271_v18 = vadd.f32 %v8411_v46, %v8377_v52  ;;  %v10309_v13 = vadd.f32 %v9959_v22, %v10018_v11  ;;  %v10313_v58 = vcombine.low %v1541_v49, %v1551_v43  ;;  %v10320_v24 = vrot.slane %v1559_v17, 4  ;;  %v10324_v46 = vld [vmem:[%s9146_s30 + $0x48] sm:$0xf]  ;;  %v10329_v22 = vld [vmem:[%s12353_s2] ss:$0 sm:$0xff] }
 0x127   : > { %v2321_v63 = vpop.f32.mrf.mxu0  ;;  %12539 = vst [vmem:[#allocation74_spill] sm:$0xff] %v10302_v47  ;;  %v10334_v52 = vrot.slane %v1577_v1, 4  ;;  %v10336_v40 = vrot.slane %v1580_v20, 5  ;;  %v10342_v17 = vrot.slane %v1572_v33, 5  ;;  %v1596_v1 = vshll.u32 %v7224_v39, 16  ;;  %v10368_v39 = vld [vmem:[%s12352_s1 + $0x60] sm:$0xff]  }
 0x128   : > { %v10286_v60 = vadd.f32 %v2600_v4, %v2321_v63  ;;  %12541 = vst [vmem:[#allocation2_spill] sm:$0xff] %v10313_v58  ;;  %v10347_v63 = vld [vmem:[%s12354_s3] ss:$0 sm:$0xff]  ;;  %v1601_v20 = vshrl.u32 %v10324_v46, 16 }
 0x129   : > { %8613 = vmatmul.mubr.msk.bf16.gmra.mxu1 %vm2123_vm1, %v9926_v10  ;;  %v8416_v31 = vpop.f32.mrf.mxu0 }
 0x12a   : > { %8652 = vmatprep.mubr.msk.bf16.mxu1 %vm2123_vm1, %v12540_v44  ;;  %v2896_v30 = vadd.f32 %v8416_v31, %v2494_v48  ;;  %v1569_v48 = vor.u32 %v1568_v55, %v10276_v61  ;;  %v1586_v55 = vshll.u32 %v10305_v2, 16 }
 0x12b   : > { %v8450_v41 = vpop.f32.mrf.mxu1  ;;  %v2767_v11 = vpop.f32.mrf.mxu0  ;;  %8619 = vmatmul.mubr.msk.bf16.vlgmr.msra.gmra.mxu0 %vm2123_vm1, %v9416_v36 }
 0x12c   : > { %v3194_v57 = vadd.f32 %v8450_v41, %v2896_v30  ;;  %v2894_v34 = vadd.f32 %v2767_v11, %v2486_v15  ;;  %8685 = vmatpush3.bf16.msra.mxu0 %v9980_v0  ;;  %8622 = vmatprep.mubr.msk.bf16.mxu0 %vm2123_vm1, %v9440_v56  ;;  %v1590_v15 = vshrl.u32 %v10305_v2, 16  ;;  %v1565_v0 = vsel %vm9176_vm3, %v10320_v24, %v10276_v61 }
 0x12d   : > { %v3065_v4 = vpop.f32.mrf.mxu1  ;;  %v8417_v43 = vpop.f32.mrf.mxu0  ;;  %8752 = vmatprep.subr.bf16.mxu0 %v10318_v3  ;;  %v10363_v30 = vadd.f32 %v9964_v50, %v10046_v45  ;;  %v10378_v14 = vrot.slane %v1586_v55, 5  ;;  %v2518_v55 = vadd.f32 %v9975_v19, %v10053_v42 }
 0x12e   : > { %v5962_v33 = vmul.f32 %v10329_v22, %v3194_v57  ;;  %v3192_v31 = vadd.f32 %v3065_v4, %v2894_v34  ;;  %v2897_v44 = vadd.f32 %v8417_v43, %v2497_v25  ;;  %v1570_v57 = vrot.slane %v1569_v48, 4  ;;  %v12542_v4 = vld [vmem:[#allocation3_spill] sm:$0xff] }
 0x12f   : > { %v8451_v41 = vpop.f32.mrf.mxu1  ;;  %v2770_v11 = vpop.f32.mrf.mxu0  ;;  %v1583_v25 = vor.u32 %v10336_v40, %v10334_v52  ;;  %v1604_v34 = vshll.u32 %v10324_v46, 16  ;;  %v10380_v48 = vrot.slane %v1590_v15, 4  ;;  %v10382_v52 = vrot.slane %v1596_v1, 5 }
 0x130   : > { %v6000_v61 = vadd.f32 %v10347_v63, %v5962_v33  ;;  %v5960_v24 = vmul.f32 %v10329_v22, %v3192_v31  ;;  %v3195_v50 = vadd.f32 %v8451_v41, %v2897_v44  ;;  %v2895_v45 = vadd.f32 %v2770_v11, %v2489_v9  ;;  %v12543_v31 = vld [vmem:[#allocation4_spill] sm:$0xff]  ;;  %v10392_v41 = vld [vmem:[%s9146_s30 + $0x4c] sm:$0xf] }
 0x131   : > { %8653 = vmatmul.mubr.msk.bf16.vlgmr.msra.gmra.mxu1 %vm2123_vm1, %v12542_v4  ;;  %v3068_v43 = vpop.f32.mrf.mxu1  ;;  %v8420_v49 = vpop.f32.mrf.mxu0  ;;  %v10384_v40 = vrot.slane %v1601_v20, 4  ;;  %v1575_v20 = vsel %vm9176_vm3, %v1570_v57, %v10342_v17  ;;  %v10406_v11 = vrot.slane %v1604_v34, 5  ;;  %v12544_v4 = vld [vmem:[#allocation9_spill] sm:$0xff]  ;;  %v10415_v17 = vrot.slane %v1583_v25, 4 }
 0x132   : > { %v6032_v10 = vmax.f32 %v6000_v61, 0.0  ;;  %v5998_v33 = vadd.f32 %v10347_v63, %v5960_v24  ;;  %8719 = vmatpush3.bf16.msra.mxu1 %v10014_v62  ;;  %8656 = vmatprep.mubr.msk.bf16.mxu1 %vm2123_vm1, %v12543_v31  ;;  %v5963_v9 = vmul.f32 %v10329_v22, %v3195_v50  ;;  %v3193_v44 = vadd.f32 %v3068_v43, %v2895_v45 }
 0x133   : > { %v8454_v15 = vpop.f32.mrf.mxu1  ;;  %v2900_v1 = vadd.f32 %v8420_v49, %v10290_v28  ;;  %v2783_v62 = vpop.f32.mrf.mxu0  ;;  %8786 = vmatprep.subr.bf16.mxu1 %v10368_v39  ;;  %8623 = vmatmul.mubr.msk.bf16.gmra.mxu0 %vm2123_vm1, %v9453_v27  ;;  %v1593_v25 = vor.u32 %v10380_v48, %v10378_v14  ;;  %v1607_v48 = vor.u32 %v10406_v11, %v10384_v40 }
 0x134   : > { %v7946_v61 = vpack.c.bf16 %v6032_v10, %v6032_v10  ;;  %v6030_v19 = vmax.f32 %v5998_v33, 0.0  ;;  %v6001_v42 = vadd.f32 %v10347_v63, %v5963_v9  ;;  %v5961_v24 = vmul.f32 %v10329_v22, %v3193_v44  ;;  %8626 = vmatprep.mubr.msk.bf16.mxu0 %vm2123_vm1, %v12544_v4 }
 0x135   : > { %v3081_v28 = vpop.f32.mrf.mxu1  ;;  %v3198_v49 = vadd.f32 %v8454_v15, %v2900_v1  ;;  %v2898_v50 = vadd.f32 %v2783_v62, %v10294_v51  ;;  %v8421_v45 = vpop.f32.mrf.mxu0  ;;  %v1610_v10 = vshll.u32 %v10392_v41, 16  ;;  %v10423_v15 = vcombine.low %v1565_v0, %v1575_v20 }
 0x136   : > { %6193 = vst.msk [vmem:[%s10399_s10 + $0x8] sm:$0xf] %vm6190_vm7, %v7946_v61  ;;  %v7944_v57 = vpack.c.bf16 %v6030_v19, %v6030_v19  ;;  %v6033_v34 = vmax.f32 %v6001_v42, 0.0  ;;  %v5999_v43 = vadd.f32 %v10347_v63, %v5961_v24  ;;  %v2901_v33 = vadd.f32 %v8421_v45, %v10298_v35  ;;  %v12546_v42 = vld [vmem:[#allocation5_spill] sm:$0xff] }
 0x137   : > { %v5966_v31 = vmul.f32 %v10329_v22, %v3198_v49  ;;  %v8455_v51 = vpop.f32.mrf.mxu1  ;;  %v3196_v9 = vadd.f32 %v3081_v28, %v2898_v50  ;;  %v2786_v44 = vpop.f32.mrf.mxu0  ;;  %12545 = vst [vmem:[#allocation3_spill] sm:$0xff] %v10423_v15  ;;  %v12547_v50 = vld [vmem:[#allocation7_spill] sm:$0xff]  ;;  %v12562_v28 = vld [vmem:[#allocation17_spill] sm:$0xff] }
 0x138   : > { %6191 = vst.msk [vmem:[%s10399_s10] sm:$0xf] %vm6190_vm7, %v7944_v57  ;;  %v7947_v1 = vpack.c.bf16 %v6033_v34, %v6033_v34  ;;  %v6031_v62 = vmax.f32 %v5999_v43, 0.0  ;;  %v3199_v61 = vadd.f32 %v8455_v51, %v2901_v33  ;;  %v2899_v19 = vadd.f32 %v2786_v44, %v10309_v13  ;;  %v12548_v34 = vld [vmem:[#allocation55_spill] sm:$0xff]  ;;  %v12549_v43 = vld [vmem:[#allocation45_spill] sm:$0xff] }
 0x139   : > { %8657 = vmatmul.mubr.msk.bf16.gmra.mxu1 %vm2123_vm1, %v12546_v42  ;;  %v6004_v35 = vadd.f32 %v10347_v63, %v5966_v31  ;;  %v5964_v24 = vmul.f32 %v10329_v22, %v3196_v9  ;;  %v3084_v0 = vpop.f32.mrf.mxu1  ;;  %v8424_v20 = vpop.f32.mrf.mxu0  ;;  %v2529_v33 = vadd.f32 %v12549_v43, %v12548_v34 }
 0x13a   : > { %6194 = vst.msk [vmem:[%s10399_s10 + $0xc] sm:$0xf] %vm6190_vm7, %v7947_v1  ;;  %v7945_v49 = vpack.c.bf16 %v6031_v62, %v6031_v62  ;;  %8660 = vmatprep.mubr.msk.bf16.mxu1 %vm2123_vm1, %v12547_v50  ;;  %v5967_v13 = vmul.f32 %v10329_v22, %v3199_v61  ;;  %v3197_v45 = vadd.f32 %v3084_v0, %v2899_v19  ;;  %v12550_v1 = vld [vmem:[#allocation10_spill] sm:$0xff]  ;;  %v12553_v50 = vld [vmem:[#allocation48_spill] sm:$0xff]  ;;  %v12555_v61 = vld [vmem:[#allocation49_spill] sm:$0xff] }
 0x13b   : > { %v2904_v57 = vadd.f32 %v8424_v20, %v10363_v30  ;;  %v6036_v31 = vmax.f32 %v6004_v35, 0.0  ;;  %v6002_v51 = vadd.f32 %v10347_v63, %v5964_v24  ;;  %v2799_v40 = vpop.f32.mrf.mxu0  ;;  %8627 = vmatmul.mubr.msk.bf16.gmra.mxu0 %vm2123_vm1, %v12550_v1  ;;  %v12551_v0 = vld [vmem:[#allocation14_spill] sm:$0xff]  ;;  %v10460_v20 = vrot.slane %v1610_v10, 5  ;;  %v12568_v1 = vld [vmem:[#allocation56_spill] sm:$0xff] }
 0x13c   : > { %6192 = vst.msk [vmem:[%s10399_s10 + $0x4] sm:$0xf] %vm6190_vm7, %v7945_v49  ;;  %v6005_v9 = vadd.f32 %v10347_v63, %v5967_v13  ;;  %v5965_v30 = vmul.f32 %v10329_v22, %v3197_v45  ;;  %v2902_v62 = vadd.f32 %v2799_v40, %v2518_v55  ;;  %8630 = vmatprep.mubr.msk.bf16.mxu0 %vm2123_vm1, %v12551_v0  ;;  %v12552_v49 = vld [vmem:[#allocation57_spill] sm:$0xff]  ;;  %v10468_v10 = vrot.slane %v1593_v25, 4 }
 0x13d   : > { %v8458_v44 = vpop.f32.mrf.mxu1  ;;  %v7950_v19 = vpack.c.bf16 %v6036_v31, %v6036_v31  ;;  %v6034_v42 = vmax.f32 %v6002_v51, 0.0  ;;  %v8425_v24 = vpop.f32.mrf.mxu0  ;;  %v2521_v13 = vadd.f32 %v12553_v50, %v12552_v49  ;;  %v12567_v0 = vld [vmem:[#allocation65_spill] sm:$0xff] }
 0x13e   : > { %v3202_v35 = vadd.f32 %v8458_v44, %v2904_v57  ;;  %v6037_v45 = vmax.f32 %v6005_v9, 0.0  ;;  %v6003_v34 = vadd.f32 %v10347_v63, %v5965_v30  ;;  %v2905_v43 = vadd.f32 %v8425_v24, %v2529_v33  ;;  %v12554_v44 = vld [vmem:[#allocation60_spill] sm:$0xff]  ;;  %v12557_v24 = vld [vmem:[#allocation63_spill] sm:$0xff] }
 0x13f   : > { %v3097_v55 = vpop.f32.mrf.mxu1  ;;  %6197 = vst.msk [vmem:[%s10399_s10 + $0x18] sm:$0xf] %vm6190_vm7, %v7950_v19  ;;  %v7948_v31 = vpack.c.bf16 %v6034_v42, %v6034_v42  ;;  %v2802_v40 = vpop.f32.mrf.mxu0  ;;  %v2542_v49 = vadd.f32 %v12555_v61, %v12554_v44  ;;  %v12556_v33 = vld [vmem:[#allocation8_spill] sm:$0xff] }
 0x140   : > { %v5970_v57 = vmul.f32 %v10329_v22, %v3202_v35  ;;  %v3200_v51 = vadd.f32 %v3097_v55, %v2902_v62  ;;  %v7951_v50 = vpack.c.bf16 %v6037_v45, %v6037_v45  ;;  %v6035_v9 = vmax.f32 %v6003_v34, 0.0  ;;  %v10481_v61 = vld [vmem:[%s9146_s30 + $0x50] sm:$0x1]  ;;  %v10494_v35 = vld [vmem:[%s9146_s30 + $0x54] sm:$0xf] }
 0x141   : > { %v8459_v11 = vpop.f32.mrf.mxu1  ;;  %v2903_v30 = vadd.f32 %v2802_v40, %v2521_v13  ;;  %6195 = vst.msk [vmem:[%s10399_s10 + $0x10] sm:$0xf] %vm6190_vm7, %v7948_v31  ;;  %8661 = vmatmul.mubr.msk.bf16.gmra.mxu1 %vm2123_vm1, %v12556_v33  ;;  %v8428_v25 = vpop.f32.mrf.mxu0  ;;  %v12558_v13 = vld [vmem:[#allocation50_spill] sm:$0xff]  ;;  %v12559_v31 = vld [vmem:[#allocation11_spill] sm:$0xff] }
 0x142   : > { %v6008_v19 = vadd.f32 %v10347_v63, %v5970_v57  ;;  %v5968_v62 = vmul.f32 %v10329_v22, %v3200_v51  ;;  %v3203_v42 = vadd.f32 %v8459_v11, %v2905_v43  ;;  %v2534_v45 = vadd.f32 %v12558_v13, %v12557_v24  ;;  %6198 = vst.msk [vmem:[%s10399_s10 + $0x1c] sm:$0xf] %vm6190_vm7, %v7951_v50  ;;  %v12560_v24 = vld [vmem:[#allocation64_spill] sm:$0xff] }
 0x143   : > { %v7949_v34 = vpack.c.bf16 %v6035_v9, %v6035_v9  ;;  %v3100_v55 = vpop.f32.mrf.mxu1  ;;  %8664 = vmatprep.mubr.msk.bf16.mxu1 %vm2123_vm1, %v12559_v31  ;;  %v2908_v57 = vadd.f32 %v8428_v25, %v2542_v49  ;;  %v10489_v11 = vrot.slane %v1607_v48, 4  ;;  %v2815_v33 = vpop.f32.mrf.mxu0  ;;  %v12561_v13 = vld [vmem:[#allocation52_spill] sm:$0xff]  ;;  %8631 = vmatmul.mubr.msk.bf16.gmra.mxu0 %vm2123_vm1, %v12562_v28  ;;  %v12563_v49 = vshrl.u32 %v10392_v41, 16 }
 0x144   : > { %v6040_v43 = vmax.f32 %v6008_v19, 0.0  ;;  %v6006_v51 = vadd.f32 %v10347_v63, %v5968_v62  ;;  %v5971_v40 = vmul.f32 %v10329_v22, %v3203_v42  ;;  %v3201_v44 = vadd.f32 %v3100_v55, %v2903_v30 }
 0x145   : > { %v2545_v50 = vadd.f32 %v12561_v13, %v12560_v24  ;;  %6196 = vst.msk [vmem:[%s10399_s10 + $0x14] sm:$0xf] %vm6190_vm7, %v7949_v34  ;;  %v8462_v9 = vpop.f32.mrf.mxu1  ;;  %v2906_v48 = vadd.f32 %v2815_v33, %v2534_v45  ;;  %v10504_v19 = vrot.slane %v12563_v49, 4  ;;  %v8429_v31 = vpop.f32.mrf.mxu0  ;;  %v12564_v34 = vld [vmem:[#allocation22_spill] sm:$0xff]  ;;  %v12565_v24 = vld [vmem:[#allocation15_spill] sm:$0xff] }
 0x146   : > { %v7954_v62 = vpack.c.bf16 %v6040_v43, %v6040_v43  ;;  %v6038_v42 = vmax.f32 %v6006_v51, 0.0  ;;  %v6009_v25 = vadd.f32 %v10347_v63, %v5971_v40  ;;  %v5969_v55 = vmul.f32 %v10329_v22, %v3201_v44  ;;  %8634 = vmatprep.mubr.msk.bf16.mxu0 %vm2123_vm1, %v12564_v34  ;;  %v12566_v13 = vld [vmem:[#allocation54_spill] sm:$0xff] }
 0x147   : > { %v2537_v59 = vadd.f32 %v12566_v13, %v12565_v24  ;;  %v3113_v45 = vpop.f32.mrf.mxu1  ;;  %v3206_v33 = vadd.f32 %v8462_v9, %v2908_v57  ;;  %v2909_v49 = vadd.f32 %v8429_v31, %v2545_v50  ;;  %v2818_v30 = vpop.f32.mrf.mxu0  ;;  %v2558_v34 = vadd.f32 %v12568_v1, %v12567_v0  ;;  %v12569_v9 = vld [vmem:[#allocation12_spill] sm:$0xff]  ;;  %v12571_v0 = vld [vmem:[#allocation58_spill] sm:$0xff] }
 0x148   : > { %6201 = vst.msk [vmem:[%s10399_s10 + $0x28] sm:$0xf] %vm6190_vm7, %v7954_v62  ;;  %v7952_v43 = vpack.c.bf16 %v6038_v42, %v6038_v42  ;;  %v6041_v51 = vmax.f32 %v6009_v25, 0.0  ;;  %v6007_v40 = vadd.f32 %v10347_v63, %v5969_v55  ;;  %v3204_v44 = vadd.f32 %v3113_v45, %v2906_v48  ;;  %v12570_v1 = vld [vmem:[#allocation20_spill] sm:$0xff] }
 0x149   : > { %v5974_v4 = vmul.f32 %v10329_v22, %v3206_v33  ;;  %v8463_v24 = vpop.f32.mrf.mxu1  ;;  %v2907_v13 = vadd.f32 %v2818_v30, %v2537_v59  ;;  %v1628_v57 = vshll.u32 %v10494_v35, 16  ;;  %8665 = vmatmul.mubr.msk.bf16.gmra.mxu1 %vm2123_vm1, %v12569_v9  ;;  %v8432_v25 = vpop.f32.mrf.mxu0  ;;  %v2550_v55 = vadd.f32 %v12571_v0, %v12570_v1  ;;  %v12572_v30 = vld [vmem:[#allocation18_spill] sm:$0xff] }
 0x14a   : > { %6199 = vst.msk [vmem:[%s10399_s10 + $0x20] sm:$0xf] %vm6190_vm7, %v7952_v43  ;;  %v7955_v50 = vpack.c.bf16 %v6041_v51, %v6041_v51  ;;  %v6039_v62 = vmax.f32 %v6007_v40, 0.0  ;;  %v5972_v48 = vmul.f32 %v10329_v22, %v3204_v44  ;;  %v3207_v42 = vadd.f32 %v8463_v24, %v2909_v49  ;;  %8668 = vmatprep.mubr.msk.bf16.mxu1 %vm2123_vm1, %v12572_v30  ;;  %v10540_v44 = vld [vmem:[%s9146_s30 + $0x58] sm:$0xf]  ;;  %v12573_v24 = vld [vmem:[#allocation23_spill] sm:$0xff] }
 0x14b   : > { %v6012_v31 = vadd.f32 %v10347_v63, %v5974_v4  ;;  %v3116_v59 = vpop.f32.mrf.mxu1  ;;  %v2912_v45 = vadd.f32 %v8432_v25, %v2558_v34  ;;  %v1599_v33 = vsel %vm9176_vm3, %v10468_v10, %v10382_v52  ;;  %v2831_v4 = vpop.f32.mrf.mxu0  ;;  %v12574_v9 = vld [vmem:[#allocation62_spill] sm:$0xff]  ;;  %v12575_v25 = vld [vmem:[#allocation25_spill] sm:$0xff]  ;;  %v1617_v10 = vor.u32 %v10504_v19, %v10460_v20 }
 0x14c   : > { %6202 = vst.msk [vmem:[%s10399_s10 + $0x2c] sm:$0xf] %vm6190_vm7, %v7955_v50  ;;  %v7953_v49 = vpack.c.bf16 %v6039_v62, %v6039_v62  ;;  %v6010_v43 = vadd.f32 %v10347_v63, %v5972_v48  ;;  %v5975_v51 = vmul.f32 %v10329_v22, %v3207_v42  ;;  %v3205_v40 = vadd.f32 %v3116_v59, %v2907_v13  ;;  %v12576_v0 = vld [vmem:[#allocation30_spill] sm:$0xff]  ;;  %v12578_v59 = vld [vmem:[#allocation13_spill] sm:$0xff] }
 0x14d   : > { %v2561_v1 = vadd.f32 %v12574_v9, %v12573_v24  ;;  %v6044_v34 = vmax.f32 %v6012_v31, 0.0  ;;  %8635 = vmatmul.mubr.msk.bf16.gmra.mxu0 %vm2123_vm1, %v12575_v25  ;;  %v2910_v48 = vadd.f32 %v2831_v4, %v2550_v55  ;;  %v8433_v42 = vpop.f32.mrf.mxu0  ;;  %v12577_v31 = vld [vmem:[#allocation24_spill] sm:$0xff] }
 0x14e   : > { %6200 = vst.msk [vmem:[%s10399_s10 + $0x24] sm:$0xf] %vm6190_vm7, %v7953_v49  ;;  %v6042_v13 = vmax.f32 %v6010_v43, 0.0  ;;  %v6013_v50 = vadd.f32 %v10347_v63, %v5975_v51  ;;  %v5973_v62 = vmul.f32 %v10329_v22, %v3205_v40  ;;  %8638 = vmatprep.mubr.msk.bf16.mxu0 %vm2123_vm1, %v12576_v0  ;;  %v2553_v30 = vadd.f32 %v12578_v59, %v12577_v31  ;;  %v8466_v9 = vpop.f32.mrf.mxu1  ;;  %v12587_v0 = vld [vmem:[#allocation34_spill] sm:$0xff] }
 0x14f   : > { %v7958_v24 = vpack.c.bf16 %v6044_v34, %v6044_v34  ;;  %v2913_v19 = vadd.f32 %v8433_v42, %v2561_v1  ;;  %v1634_v49 = vshll.u32 %v10540_v44, 16  ;;  %v3210_v40 = vadd.f32 %v8466_v9, %v2912_v45  ;;  %v2834_v55 = vpop.f32.mrf.mxu0  ;;  %v7226_v9 = vld [vmem:[%s9146_s30 + $0x5c] sm:$0x1] }
 0x150   : > { %v7956_v43 = vpack.c.bf16 %v6042_v13, %v6042_v13  ;;  %v6045_v52 = vmax.f32 %v6013_v50, 0.0  ;;  %v6011_v51 = vadd.f32 %v10347_v63, %v5973_v62  ;;  %v3129_v4 = vpop.f32.mrf.mxu1  ;;  %v2911_v28 = vadd.f32 %v2834_v55, %v2553_v30  ;;  %v12582_v62 = vld [vmem:[#allocation21_spill] sm:$0xff] }
 0x151   : > { %6205 = vst.msk [vmem:[%s10399_s10 + $0x38] sm:$0xf] %vm6190_vm7, %v7958_v24  ;;  %v12579_v34 = vsel %vm9176_vm3, %v10415_v17, %v10378_v14  ;;  %v1618_v42 = vrot.slane %v1617_v10, 4  ;;  %v12581_v13 = vshll.u32 %v10481_v61, 16  ;;  %8669 = vmatmul.mubr.msk.bf16.gmra.mxu1 %vm2123_vm1, %v12582_v62  ;;  %v5978_v59 = vmul.f32 %v10329_v22, %v3210_v40  ;;  %v8436_v24 = vpop.f32.mrf.mxu0  ;;  %v10580_v14 = vld [vmem:[%s9146_s30 + $0x60] sm:$0xf] }
 0x152   : > { %v10569_v1 = vcombine.low %v12579_v34, %v1599_v33  ;;  %6203 = vst.msk [vmem:[%s10399_s10 + $0x30] sm:$0xf] %vm6190_vm7, %v7956_v43  ;;  %v7959_v45 = vpack.c.bf16 %v6045_v52, %v6045_v52  ;;  %v6043_v31 = vmax.f32 %v6011_v51, 0.0  ;;  %v3208_v30 = vadd.f32 %v3129_v4, %v2910_v48  ;;  %v8467_v17 = vpop.f32.mrf.mxu1  ;;  %v12583_v33 = vld [vmem:[#allocation26_spill] sm:$0xff]  ;;  %v12585_v62 = vld [vmem:[#allocation29_spill] sm:$0xff] }
 0x153   : > { %v1622_v50 = vrot.slane %v12581_v13, 5  ;;  %8672 = vmatprep.mubr.msk.bf16.mxu1 %vm2123_vm1, %v12583_v33  ;;  %v12584_v61 = vshrl.u32 %v10494_v35, 16  ;;  %v1630_v52 = vrot.slane %v1628_v57, 5  ;;  %v10586_v43 = vrot.slane %v1634_v49, 5  ;;  %v2847_v34 = vpop.f32.mrf.mxu0 }
 0x154   : > { %12580 = vst [vmem:[#allocation4_spill] sm:$0xff] %v10569_v1  ;;  %v1638_v51 = vshrl.u32 %v10540_v44, 16  ;;  %6206 = vst.msk [vmem:[%s10399_s10 + $0x3c] sm:$0xf] %vm6190_vm7, %v7959_v45  ;;  %v7957_v48 = vpack.c.bf16 %v6043_v31, %v6043_v31  ;;  %v6016_v40 = vadd.f32 %v10347_v63, %v5978_v59  ;;  %v5976_v55 = vmul.f32 %v10329_v22, %v3208_v30  ;;  %v3132_v13 = vpop.f32.mrf.mxu1 }
 0x155   : > { %v1627_v10 = vrot.slane %v12584_v61, 4  ;;  %v3211_v4 = vadd.f32 %v8467_v17, %v2913_v19  ;;  %v2916_v33 = vadd.f32 %v8436_v24, %v12585_v62  ;;  %v12586_v61 = vld [vmem:[#allocation31_spill] sm:$0xff]  ;;  %v1623_v57 = vsel %vm9176_vm3, %v1618_v42, %v1622_v50  ;;  %v8437_v17 = vpop.f32.mrf.mxu0  ;;  %v10606_v24 = vld [vmem:[%s9146_s30 + $0x64] sm:$0xf] }
 0x156   : > { %8639 = vmatmul.mubr.msk.bf16.gmra.mxu0 %vm2123_vm1, %v12586_v61  ;;  %v1644_v49 = vshll.u32 %v7226_v9, 16  ;;  %v1649_v45 = vshrl.u32 %v10580_v14, 16  ;;  %6204 = vst.msk [vmem:[%s10399_s10 + $0x34] sm:$0xf] %vm6190_vm7, %v7957_v48  ;;  %v6048_v31 = vmax.f32 %v6016_v40, 0.0  ;;  %v6014_v59 = vadd.f32 %v10347_v63, %v5976_v55  ;;  %v12588_v62 = vld [vmem:[#allocation67_spill] sm:$0xff] }
 0x157   : > { %v5979_v19 = vmul.f32 %v10329_v22, %v3211_v4  ;;  %v3209_v30 = vadd.f32 %v3132_v13, %v2911_v28  ;;  %8642 = vmatprep.mubr.msk.bf16.mxu0 %vm2123_vm1, %v12587_v0  ;;  %v2914_v42 = vadd.f32 %v2847_v34, %v12588_v62  ;;  %v1631_v50 = vor.u32 %v1630_v52, %v1627_v10  ;;  %v2850_v13 = vpop.f32.mrf.mxu0  ;;  %v12589_v0 = vld [vmem:[#allocation69_spill] sm:$0xff] }
 0x158   : > { %v10609_v9 = vrot.slane %v1638_v51, 4  ;;  %v1652_v48 = vshll.u32 %v10580_v14, 16  ;;  %v7962_v40 = vpack.c.bf16 %v6048_v31, %v6048_v31  ;;  %v6046_v61 = vmax.f32 %v6014_v59, 0.0  ;;  %v8470_v4 = vpop.f32.mrf.mxu1  ;;  %v12592_v59 = vld [vmem:[#allocation28_spill] sm:$0xff] }
 0x159   : > { %v6017_v55 = vadd.f32 %v10347_v63, %v5979_v19  ;;  %v5977_v28 = vmul.f32 %v10329_v22, %v3209_v30  ;;  %v3214_v25 = vadd.f32 %v8470_v4, %v2916_v33  ;;  %v2917_v27 = vadd.f32 %v8437_v17, %v12589_v0  ;;  %8673 = vmatmul.mubr.msk.bf16.gmra.mxu1 %vm2123_vm1, %v12592_v59  ;;  %v12596_v59 = vld [vmem:[#allocation72_spill] sm:$0xff] }
 0x15a   : > { %v12590_v10 = vsel %vm9176_vm3, %v10489_v11, %v10460_v20  ;;  %v1658_v51 = vshll.u32 %v10606_v24, 16  ;;  %6209 = vst.msk [vmem:[%s10399_s10 + $0x48] sm:$0xf] %vm6190_vm7, %v7962_v40  ;;  %v7960_v34 = vpack.c.bf16 %v6046_v61, %v6046_v61  ;;  %v3145_v19 = vpop.f32.mrf.mxu1  ;;  %v10628_v0 = vrot.slane %v1644_v49, 5  ;;  %v12593_v20 = vld [vmem:[#allocation32_spill] sm:$0xff]  ;;  %v12594_v11 = vld [vmem:[#allocation71_spill] sm:$0xff]  ;;  %v8440_v4 = vpop.f32.mrf.mxu0 }
 0x15b   : > { %v10620_v52 = vcombine.low %v12590_v10, %v1623_v57  ;;  %v6049_v31 = vmax.f32 %v6017_v55, 0.0  ;;  %v6015_v33 = vadd.f32 %v10347_v63, %v5977_v28  ;;  %v5982_v30 = vmul.f32 %v10329_v22, %v3214_v25  ;;  %8676 = vmatprep.mubr.msk.bf16.mxu1 %vm2123_vm1, %v12593_v20  ;;  %v12595_v10 = vld [vmem:[#allocation35_spill] sm:$0xff] }
 0x15c   : > { %v3212_v17 = vadd.f32 %v3145_v19, %v2914_v42  ;;  %v2915_v57 = vadd.f32 %v2850_v13, %v12594_v11  ;;  %6207 = vst.msk [vmem:[%s10399_s10 + $0x40] sm:$0xf] %vm6190_vm7, %v7960_v34  ;;  %v8471_v55 = vpop.f32.mrf.mxu1  ;;  %v10638_v49 = vrot.slane %v1631_v50, 4  ;;  %v1641_v25 = vor.u32 %v10609_v9, %v10586_v43  ;;  %v10657_v34 = vld [vmem:[%s9146_s30 + $0x6c] sm:$0xf] }
 0x15d   : > { %12591 = vst [vmem:[#allocation5_spill] sm:$0xff] %v10620_v52  ;;  %v7963_v62 = vpack.c.bf16 %v6049_v31, %v6049_v31  ;;  %v6047_v40 = vmax.f32 %v6015_v33, 0.0  ;;  %v6020_v42 = vadd.f32 %v10347_v63, %v5982_v30  ;;  %v3215_v13 = vadd.f32 %v8471_v55, %v2917_v27  ;;  %v2863_v33 = vpop.f32.mrf.mxu0  ;;  %v7227_v55 = vld [vmem:[%s9146_s30 + $0x68] sm:$0x1] }
 0x15e   : > { %v5980_v28 = vmul.f32 %v10329_v22, %v3212_v17  ;;  %8643 = vmatmul.mubr.msk.bf16.gmra.mxu0 %vm2123_vm1, %v12595_v10  ;;  %v3148_v31 = vpop.f32.mrf.mxu1  ;;  %v2920_v9 = vadd.f32 %v8440_v4, %v12596_v59  ;;  %v1651_v19 = vrot.slane %v1649_v45, 4  ;;  %v1654_v27 = vrot.slane %v1652_v48, 5  ;;  %v12598_v59 = vld [vmem:[#allocation33_spill] sm:$0xff] }
 0x15f   : > { %6210 = vst.msk [vmem:[%s10399_s10 + $0x4c] sm:$0xf] %vm6190_vm7, %v7963_v62  ;;  %v7961_v50 = vpack.c.bf16 %v6047_v40, %v6047_v40  ;;  %8646 = vmatprep.mubr.msk.bf16.mxu0 %vm2123_vm1, %v9701_v16  ;;  %v6052_v30 = vmax.f32 %v6020_v42, 0.0  ;;  %v5983_v20 = vmul.f32 %v10329_v22, %v3215_v13  ;;  %v3213_v11 = vadd.f32 %v3148_v31, %v2915_v57  ;;  %v12597_v62 = vld [vmem:[#allocation73_spill] sm:$0xff]  ;;  %v8441_v4 = vpop.f32.mrf.mxu0  ;;  %v12599_v16 = vld [vmem:[#allocation36_spill] sm:$0xff] }
 0x160   : > { %v6018_v17 = vadd.f32 %v10347_v63, %v5980_v28  ;;  %v2918_v40 = vadd.f32 %v2863_v33, %v12597_v62  ;;  %v10666_v48 = vrot.slane %v1658_v51, 5  ;;  %v1662_v42 = vshrl.u32 %v10606_v24, 16 }
 0x161   : > { %6208 = vst.msk [vmem:[%s10399_s10 + $0x44] sm:$0xf] %vm6190_vm7, %v7961_v50  ;;  %v7966_v28 = vpack.c.bf16 %v6052_v30, %v6052_v30  ;;  %v6021_v13 = vadd.f32 %v10347_v63, %v5983_v20  ;;  %v5981_v50 = vmul.f32 %v10329_v22, %v3213_v11  ;;  %v8474_v31 = vpop.f32.mrf.mxu1  ;;  %8677 = vmatmul.mubr.msk.bf16.gmra.mxu1 %vm2123_vm1, %v12598_v59  ;;  %v2866_v62 = vpop.f32.mrf.mxu0  ;;  %v10674_v45 = vrot.slane %v1641_v25, 4  ;;  %v10683_v59 = vld [vmem:[%s9146_s30 + $0x70] sm:$0xf] }
 0x162   : > { %v6050_v57 = vmax.f32 %v6018_v17, 0.0  ;;  %v2921_v33 = vadd.f32 %v8441_v4, %v10234_v38  ;;  %v1668_v51 = vshll.u32 %v7227_v55, 16  ;;  %v1673_v61 = vshrl.u32 %v10657_v34, 16  ;;  %8680 = vmatprep.mubr.msk.bf16.mxu1 %vm2123_vm1, %v12599_v16 }
 0x163   : > { %6213 = vst.msk [vmem:[%s10399_s10 + $0x58] sm:$0xf] %vm6190_vm7, %v7966_v28  ;;  %v6053_v17 = vmax.f32 %v6021_v13, 0.0  ;;  %v6019_v20 = vadd.f32 %v10347_v63, %v5981_v50  ;;  %v3218_v11 = vadd.f32 %v8474_v31, %v2920_v9  ;;  %v3161_v38 = vpop.f32.mrf.mxu1  ;;  %v2919_v4 = vadd.f32 %v2866_v62, %v10242_v7  ;;  %v8444_v50 = vpop.f32.mrf.mxu0 }
 0x164   : > { %v7964_v30 = vpack.c.bf16 %v6050_v57, %v6050_v57  ;;  %v1655_v25 = vor.u32 %v1654_v27, %v1651_v19  ;;  %v10686_v55 = vrot.slane %v1662_v42, 4  ;;  %v1676_v10 = vshll.u32 %v10657_v34, 16 }
 0x165   : > { %v7967_v28 = vpack.c.bf16 %v6053_v17, %v6053_v17  ;;  %v6051_v57 = vmax.f32 %v6019_v20, 0.0  ;;  %v5986_v9 = vmul.f32 %v10329_v22, %v3218_v11  ;;  %v3216_v13 = vadd.f32 %v3161_v38, %v2918_v40  ;;  %v8475_v16 = vpop.f32.mrf.mxu1 }
 0x166   : > { %6211 = vst.msk [vmem:[%s10399_s10 + $0x50] sm:$0xf] %vm6190_vm7, %v7964_v30  ;;  %8647 = vmatmul.mubr.msk.bf16.gmra.mxu0 %vm2123_vm1, %v9738_v32  ;;  %v12600_v7 = vcombine.low %v10173_v54, %v10180_v8  ;;  %v10702_v27 = vrot.slane %v1668_v51, 5  ;;  %v10704_v42 = vrot.slane %v1673_v61, 4  ;;  %v1682_v40 = vshll.u32 %v10683_v59, 16  ;;  %v2879_v30 = vpop.f32.mrf.mxu0 }
 0x167   : > { %6214 = vst.msk [vmem:[%s10399_s10 + $0x5c] sm:$0xf] %vm6190_vm7, %v7967_v28  ;;  %v7965_v31 = vpack.c.bf16 %v6051_v57, %v6051_v57  ;;  %v6024_v54 = vadd.f32 %v10347_v63, %v5986_v9  ;;  %v5984_v8 = vmul.f32 %v10329_v22, %v3216_v13  ;;  %v3219_v62 = vadd.f32 %v8475_v16, %v2921_v33  ;;  %v3164_v17 = vpop.f32.mrf.mxu1  ;;  %v10721_v13 = vld [vmem:[%s9146_s30 + $0x74] sm:$0x1] }
 0x168   : > { %8686 = vmatprep.mubr.msk.bf16.mxu0 %vm2123_vm1, %v12600_v7  ;;  %v2924_v20 = vadd.f32 %v8444_v50, %v10248_v23  ;;  %v2922_v51 = vadd.f32 %v2879_v30, %v10254_v37  ;;  %v10713_v11 = vrot.slane %v1655_v25, 4  ;;  %v1686_v61 = vshrl.u32 %v10683_v59, 16  ;;  %v8445_v33 = vpop.f32.mrf.mxu0  ;;  %v12601_v23 = vld [vmem:[#allocation37_spill] sm:$0xff] }
 0x169   : > { %6212 = vst.msk [vmem:[%s10399_s10 + $0x54] sm:$0xf] %vm6190_vm7, %v7965_v31  ;;  %v6056_v38 = vmax.f32 %v6024_v54, 0.0  ;;  %v6022_v28 = vadd.f32 %v10347_v63, %v5984_v8  ;;  %v5987_v57 = vmul.f32 %v10329_v22, %v3219_v62  ;;  %v3217_v9 = vadd.f32 %v3164_v17, %v2919_v4  ;;  %v8478_v16 = vpop.f32.mrf.mxu1  ;;  %8681 = vmatmul.mubr.msk.bf16.gmra.mxu1 %vm2123_vm1, %v12601_v23 }
 0x16a   : > { %v2925_v37 = vadd.f32 %v8445_v33, %v10271_v18  ;;  %v1665_v25 = vor.u32 %v10686_v55, %v10666_v48  ;;  %v10728_v50 = vrot.slane %v1676_v10, 5  ;;  %v10730_v7 = vrot.slane %v1682_v40, 5  ;;  %8720 = vmatprep.mubr.msk.bf16.mxu1 %vm2123_vm1, %v10302_v47  ;;  %v2882_v62 = vpop.f32.mrf.mxu0  ;;  %v10737_v18 = vld [vmem:[%s9146_s30 + $0x78] sm:$0xf]  ;;  %v10742_v10 = vld [vmem:[%s12352_s1 + $0x70] sm:$0xff]  }
 0x16b   : > { %v7970_v31 = vpack.c.bf16 %v6056_v38, %v6056_v38  ;;  %v6054_v54 = vmax.f32 %v6022_v28, 0.0  ;;  %v6025_v4 = vadd.f32 %v10347_v63, %v5987_v57  ;;  %v5985_v8 = vmul.f32 %v10329_v22, %v3217_v9  ;;  %v3177_v55 = vpop.f32.mrf.mxu1 }
 0x16c   : > { %v3222_v40 = vadd.f32 %v8478_v16, %v2924_v20  ;;  %v2923_v30 = vadd.f32 %v2882_v62, %v10286_v60  ;;  %v10745_v17 = vrot.slane %v1686_v61, 4  ;;  %v3220_v33 = vadd.f32 %v3177_v55, %v2922_v51  ;;  %v10751_v23 = vpop.f32.mrf.mxu0  ;;  %v10758_v60 = vld [vmem:[%s9146_s30 + $0x7c] sm:$0xf] }
 0x16d   : > { %6217 = vst.msk [vmem:[%s10399_s10 + $0x68] sm:$0xf] %vm6190_vm7, %v7970_v31  ;;  %v7968_v28 = vpack.c.bf16 %v6054_v54, %v6054_v54  ;;  %v6057_v57 = vmax.f32 %v6025_v4, 0.0  ;;  %v6023_v9 = vadd.f32 %v10347_v63, %v5985_v8  ;;  %v12602_v19 = vcombine.low %v10183_v21, %v10198_v53  ;;  %v8479_v61 = vpop.f32.mrf.mxu1 }
 0x16e   : > { %v5990_v20 = vmul.f32 %v10329_v22, %v3222_v40  ;;  %v12603_v16 = vcombine.low %v10224_v5, %v10240_v26  ;;  %v1697_v21 = vshrl.u32 %v10737_v18, 16  ;;  %v5988_v31 = vmul.f32 %v10329_v22, %v3220_v33  ;;  %v10775_v26 = vpop.f32.mrf.mxu0  ;;  %v10785_v40 = vld [vmem:[%s9146_s30 + $0x84] sm:$0xf] }
 0x16f   : > { %8687 = vmatmul.mubr.msk.bf16.vlgmr.msra.gmra.mxu0 %vm2123_vm1, %v12602_v19  ;;  %v1700_v19 = vshll.u32 %v10737_v18, 16  ;;  %6215 = vst.msk [vmem:[%s10399_s10 + $0x60] sm:$0xf] %vm6190_vm7, %v7968_v28  ;;  %v7971_v51 = vpack.c.bf16 %v6057_v57, %v6057_v57  ;;  %v3223_v5 = vadd.f32 %v8479_v61, %v2925_v37  ;;  %v3180_v4 = vpop.f32.mrf.mxu1  ;;  %v10779_v8 = vrot.slane %v1665_v25, 4  ;;  %v10790_v37 = vld [vmem:[%s12352_s1 + $0x78] sm:$0xff]  }
 0x170   : > { %8753 = vmatpush3.bf16.msra.mxu0 %v10318_v3  ;;  %8690 = vmatprep.mubr.msk.bf16.mxu0 %vm2123_vm1, %v12603_v16  ;;  %v6055_v3 = vmax.f32 %v6023_v9, 0.0  ;;  %v6028_v54 = vadd.f32 %v10347_v63, %v5990_v20  ;;  %v1679_v62 = vor.u32 %v10728_v50, %v10704_v42  ;;  %v1706_v55 = vshll.u32 %v10758_v60, 16  ;;  %v10796_v33 = vpop.f32.mrf.mxu0  ;;  %v10799_v42 = vld [vmem:[%s9146_s30 + $0x88] sm:$0xf] }
 0x171   : > { %8820 = vmatprep.subr.bf16.mxu0 %v10742_v10  ;;  %6218 = vst.msk [vmem:[%s10399_s10 + $0x6c] sm:$0xf] %vm6190_vm7, %v7971_v51  ;;  %v6026_v57 = vadd.f32 %v10347_v63, %v5988_v31  ;;  %v5991_v25 = vmul.f32 %v10329_v22, %v3223_v5  ;;  %v3221_v9 = vadd.f32 %v3180_v4, %v2923_v30  ;;  %v10801_v20 = vpop.f32.mrf.mxu1  ;;  %v1699_v61 = vrot.slane %v1697_v21, 4 }
 0x172   : > { %v7969_v28 = vpack.c.bf16 %v6055_v3, %v6055_v3  ;;  %v6060_v50 = vmax.f32 %v6028_v54, 0.0  ;;  %8721 = vmatmul.mubr.msk.bf16.vlgmr.msra.gmra.mxu1 %vm2123_vm1, %v10313_v58  ;;  %v1702_v16 = vrot.slane %v1700_v19, 5  ;;  %v1710_v51 = vshrl.u32 %v10758_v60, 16  ;;  %v10813_v5 = vpop.f32.mrf.mxu0 }
 0x173   : > { %v6058_v3 = vmax.f32 %v6026_v57, 0.0  ;;  %v6029_v31 = vadd.f32 %v10347_v63, %v5991_v25  ;;  %v5989_v30 = vmul.f32 %v10329_v22, %v3221_v9  ;;  %8787 = vmatpush3.bf16.msra.mxu1 %v10368_v39  ;;  %8724 = vmatprep.mubr.msk.bf16.mxu1 %vm2123_vm1, %v10423_v15  ;;  %v1721_v21 = vshrl.u32 %v10785_v40, 16  ;;  %v10816_v54 = vpop.f32.mrf.mxu1 }
 0x174   : > { %6216 = vst.msk [vmem:[%s10399_s10 + $0x64] sm:$0xf] %vm6190_vm7, %v7969_v28  ;;  %v7974_v19 = vpack.c.bf16 %v6060_v50, %v6060_v50  ;;  %v1724_v4 = vshll.u32 %v10785_v40, 16  ;;  %v1730_v28 = vshll.u32 %v10799_v42, 16  ;;  %v1734_v22 = vshrl.u32 %v10799_v42, 16  ;;  %8854 = vmatprep.subr.bf16.mxu1 %v10790_v37  ;;  %v10823_v9 = vpop.f32.mrf.mxu0 }
 0x175   : > { %v7972_v39 = vpack.c.bf16 %v6058_v3, %v6058_v3  ;;  %v6061_v57 = vmax.f32 %v6029_v31, 0.0  ;;  %v6027_v25 = vadd.f32 %v10347_v63, %v5989_v30  ;;  %v12604_v50 = vcombine.low %v10257_v12, %v10305_v2  ;;  %v10833_v38 = vpop.f32.mrf.mxu1  ;;  %v7229_v31 = vld [vmem:[%s9146_s30 + $0x80] sm:$0x1] }
 0x176   : > { %v1689_v53 = vor.u32 %v10745_v17, %v10730_v7  ;;  %6221 = vst.msk [vmem:[%s10399_s10 + $0x78] sm:$0xf] %vm6190_vm7, %v7974_v19  ;;  %v12605_v3 = vcombine.low %v10324_v46, %v10392_v41  ;;  %v7561_v63 = vcombine.low %v10580_v14, %v10606_v24  ;;  %v1703_v12 = vor.u32 %v1702_v16, %v1699_v61  ;;  %v10857_v24 = vld [vmem:[%s9146_s30 + $0x90] sm:$0xf] }
 0x177   : > { %8691 = vmatmul.mubr.msk.bf16.gmra.mxu0 %vm2123_vm1, %v12604_v50  ;;  %v10842_v2 = vrot.slane %v1706_v55, 5  ;;  %v1712_v30 = vrot.slane %v1710_v51, 4  ;;  %6219 = vst.msk [vmem:[%s10399_s10 + $0x70] sm:$0xf] %vm6190_vm7, %v7972_v39  ;;  %v7975_v17 = vpack.c.bf16 %v6061_v57, %v6061_v57  ;;  %v6059_v19 = vmax.f32 %v6027_v25, 0.0  ;;  %v10846_v50 = vpop.f32.mrf.mxu0  ;;  %v10859_v55 = vpop.f32.mrf.mxu1 }
 0x178   : > { %8694 = vmatprep.mubr.msk.bf16.mxu0 %vm2123_vm1, %v12605_v3  ;;  %v1671_v46 = vsel %vm9176_vm3, %v10779_v8, %v10702_v27  ;;  %v12606_v41 = vshll.u32 %v10721_v13, 16  ;;  %v1723_v61 = vrot.slane %v1721_v21, 4  ;;  %v1726_v16 = vrot.slane %v1724_v4, 5  ;;  %v10864_v57 = vld [vmem:[%s9146_s30 + $0x94] sm:$0xf] }
 0x179   : > { %v10861_v51 = vrot.slane %v1730_v28, 5  ;;  %v1736_v39 = vrot.slane %v1734_v22, 4  ;;  %6222 = vst.msk [vmem:[%s10399_s10 + $0x7c] sm:$0xf] %vm6190_vm7, %v7975_v17  ;;  %v7973_v25 = vpack.c.bf16 %v6059_v19, %v6059_v19  ;;  %v10868_v27 = vpop.f32.mrf.mxu0  ;;  %v10870_v13 = vrot.slane %v1679_v62, 4  ;;  %v10875_v15 = vpop.f32.mrf.mxu1 }
 0x17a   : > { %v10854_v14 = vrot.slane %v12606_v41, 5  ;;  %v10872_v8 = vrot.slane %v1689_v53, 4  ;;  %v1716_v3 = vshll.u32 %v7229_v31, 16  ;;  %v7230_v41 = vld [vmem:[%s9146_s30 + $0x8c] sm:$0x1]  ;;  %8725 = vmatmul.mubr.msk.bf16.gmra.mxu1 %vm2123_vm1, %v10569_v1  ;;  %v10879_v21 = vrot.slane %v1703_v12, 4 }
 0x17b   : > { %v1713_v4 = vor.u32 %v1712_v30, %v10842_v2  ;;  %v1745_v28 = vshrl.u32 %v10857_v24, 16  ;;  %v1748_v22 = vshll.u32 %v10857_v24, 16  ;;  %6220 = vst.msk [vmem:[%s10399_s10 + $0x74] sm:$0xf] %vm6190_vm7, %v7973_v25  ;;  %8728 = vmatprep.mubr.msk.bf16.mxu1 %vm2123_vm1, %v10620_v52  ;;  %v12607_v53 = vsel %vm9176_vm3, %v10674_v45, %v10628_v0  ;;  %v10900_v12 = vpop.f32.mrf.mxu0  ;;  %v10904_v19 = vpop.f32.mrf.mxu1 }
 0x17c   : > { %v12608_v62 = vsel %vm9176_vm3, %v10638_v49, %v10586_v43  ;;  %v1754_v30 = vshll.u32 %v10864_v57, 16  ;;  %v1758_v17 = vshrl.u32 %v10864_v57, 16  ;;  %v7562_v0 = vcombine.low %v10657_v34, %v10683_v59  ;;  %v10910_v43 = vld [vmem:[%s9146_s30 + $0x9c] sm:$0xf] }
 0x17d   : > { %v10898_v31 = vcombine.low %v12608_v62, %v12607_v53  ;;  %v1727_v45 = vor.u32 %v1726_v16, %v1723_v61  ;;  %v1737_v25 = vor.u32 %v1736_v39, %v10861_v51  ;;  %v1740_v52 = vshll.u32 %v7230_v41, 16  ;;  %v10912_v49 = vpop.f32.mrf.mxu0  ;;  %v10935_v16 = vld [vmem:[%s9146_s30 + $0xa0] sm:$0xf]  ;;  %v10937_v39 = vpop.f32.mrf.mxu1 }
 0x17e   : > { %v12610_v53 = vcombine.low %v10494_v35, %v10540_v44  ;;  %v12611_v62 = vsel %vm9176_vm3, %v10713_v11, %v10666_v48  ;;  %v1685_v59 = vsel %vm9176_vm3, %v10870_v13, %v10730_v7  ;;  %v1695_v61 = vsel %vm9176_vm3, %v10872_v8, %v10854_v14  ;;  %v7231_v44 = vld [vmem:[%s9146_s30 + $0x98] sm:$0x1]  ;;  %v10945_v13 = vld [vmem:[%s9146_s30 + $0xa8] sm:$0xf] }
 0x17f   : > { %12609 = vst [vmem:[#allocation7_spill] sm:$0xff] %v10898_v31  ;;  %v10923_v34 = vcombine.low %v12611_v62, %v1671_v46  ;;  %v1718_v35 = vrot.slane %v1716_v3, 5  ;;  %v1709_v48 = vsel %vm9176_vm3, %v10879_v21, %v10842_v2  ;;  %v1714_v11 = vrot.slane %v1713_v4, 4  ;;  %v10947_v14 = vpop.f32.mrf.mxu0  ;;  %v10956_v62 = vpop.f32.mrf.mxu1 }
 0x180   : > { %8695 = vmatmul.mubr.msk.bf16.gmra.mxu0 %vm2123_vm1, %v12610_v53  ;;  %v1747_v7 = vrot.slane %v1745_v28, 4  ;;  %v1750_v46 = vrot.slane %v1748_v22, 5  ;;  %12613 = vst [vmem:[#allocation45_spill] sm:$0xff] %v10947_v14  ;;  %v10949_v8 = vrot.slane %v1754_v30, 5  ;;  %v1760_v3 = vrot.slane %v1758_v17, 4 }
 0x181   : > { %12612 = vst [vmem:[#allocation55_spill] sm:$0xff] %v10923_v34  ;;  %8698 = vmatprep.mubr.msk.bf16.mxu0 %vm2123_vm1, %v7561_v63  ;;  %v1769_v41 = vshrl.u32 %v10910_v43, 16  ;;  %v1772_v53 = vshll.u32 %v10910_v43, 16  ;;  %v10954_v63 = vld [vmem:[%s9146_s30 + $0xac] sm:$0xf]  ;;  %v1728_v1 = vrot.slane %v1727_v45, 4  ;;  %v7563_v4 = vcombine.low %v10737_v18, %v10758_v60  ;;  %v10960_v28 = vpop.f32.mrf.mxu0  ;;  %v10966_v32 = vpop.f32.mrf.mxu1 }
 0x182   : > { %v1738_v2 = vrot.slane %v1737_v25, 4  ;;  %v1742_v21 = vrot.slane %v1740_v52, 5  ;;  %12614 = vst [vmem:[#allocation57_spill] sm:$0xff] %v10960_v28  ;;  %v1778_v22 = vshll.u32 %v10935_v16, 16  ;;  %v1782_v30 = vshrl.u32 %v10935_v16, 16  ;;  %12615 = vst [vmem:[#allocation48_spill] sm:$0xff] %v10966_v32  ;;  %8729 = vmatmul.mubr.msk.bf16.gmra.mxu1 %vm2123_vm1, %v10898_v31 }
 0x183   : > { %v1793_v17 = vshrl.u32 %v10945_v13, 16  ;;  %v1796_v58 = vshll.u32 %v10945_v13, 16  ;;  %v1719_v52 = vsel %vm9176_vm3, %v1714_v11, %v1718_v35  ;;  %v1764_v18 = vshll.u32 %v7231_v44, 16  ;;  %8732 = vmatprep.mubr.msk.bf16.mxu1 %vm2123_vm1, %v10923_v34  ;;  %v10976_v25 = vpop.f32.mrf.mxu0  ;;  %v10979_v31 = vpop.f32.mrf.mxu1  ;;  %v7232_v34 = vld [vmem:[%s9146_s30 + $0xa4] sm:$0x1] }
 0x184   : > { %v1802_v60 = vshll.u32 %v10954_v63, 16  ;;  %v1806_v45 = vshrl.u32 %v10954_v63, 16  ;;  %12616 = vst [vmem:[#allocation60_spill] sm:$0xff] %v10976_v25  ;;  %v1751_v47 = vor.u32 %v1750_v46, %v1747_v7  ;;  %v1761_v28 = vor.u32 %v1760_v3, %v10949_v8  ;;  %12617 = vst [vmem:[#allocation49_spill] sm:$0xff] %v10979_v31 }
 0x185   : > { %v1771_v14 = vrot.slane %v1769_v41, 4  ;;  %v1774_v32 = vrot.slane %v1772_v53, 5  ;;  %v10981_v35 = vcombine.low %v1685_v59, %v1695_v61  ;;  %v1733_v44 = vsel %vm9176_vm3, %v1728_v1, %v10861_v51  ;;  %v10989_v25 = vpop.f32.mrf.mxu0  ;;  %v10995_v59 = vld [vmem:[%s9146_s30 + $0xb4] sm:$0xf]  ;;  %v10997_v61 = vpop.f32.mrf.mxu1  ;;  %v7233_v51 = vld [vmem:[%s9146_s30 + $0xb0] sm:$0x1] }
 0x186   : > { %v1743_v11 = vsel %vm9176_vm3, %v1738_v2, %v1742_v21  ;;  %12619 = vst [vmem:[#allocation63_spill] sm:$0xff] %v10989_v25  ;;  %v10992_v7 = vrot.slane %v1778_v22, 5  ;;  %v1784_v46 = vrot.slane %v1782_v30, 4  ;;  %v1795_v3 = vrot.slane %v1793_v17, 4  ;;  %12620 = vst [vmem:[#allocation50_spill] sm:$0xff] %v10997_v61 }
 0x187   : > { %12618 = vst [vmem:[#allocation8_spill] sm:$0xff] %v10981_v35  ;;  %v1798_v41 = vrot.slane %v1796_v58, 5  ;;  %v10999_v53 = vcombine.low %v1709_v48, %v1719_v52  ;;  %v1766_v1 = vrot.slane %v1764_v18, 5  ;;  %v11003_v2 = vrot.slane %v1802_v60, 5  ;;  %v11008_v25 = vld [vmem:[%s9146_s30 + $0xb8] sm:$0xf]  ;;  %v11010_v61 = vpop.f32.mrf.mxu1 }
 0x188   : > { %8699 = vmatmul.mubr.msk.bf16.gmra.mxu0 %vm2123_vm1, %v7562_v0  ;;  %v1808_v21 = vrot.slane %v1806_v45, 4  ;;  %v11005_v0 = vpop.f32.mrf.mxu0  ;;  %v1752_v22 = vrot.slane %v1751_v47, 4  ;;  %v1762_v30 = vrot.slane %v1761_v28, 4  ;;  %v1775_v58 = vor.u32 %v1774_v32, %v1771_v14  ;;  %12623 = vst [vmem:[#allocation52_spill] sm:$0xff] %v11010_v61  ;;  %v11026_v14 = vld [vmem:[%s9146_s30 + $0xc4] sm:$0xf] }
 0x189   : > { %12621 = vst [vmem:[#allocation11_spill] sm:$0xff] %v10999_v53  ;;  %8702 = vmatprep.mubr.msk.bf16.mxu0 %vm2123_vm1, %v7563_v4  ;;  %12622 = vst [vmem:[#allocation64_spill] sm:$0xff] %v11005_v0  ;;  %v1788_v17 = vshll.u32 %v7232_v34, 16  ;;  %v11012_v48 = vcombine.low %v1733_v44, %v1743_v11  ;;  %v7564_v4 = vcombine.low %v10785_v40, %v10799_v42  ;;  %v1812_v28 = vshll.u32 %v7233_v51, 16  ;;  %v11023_v34 = vld [vmem:[%s9146_s30 + $0xc0] sm:$0xf]  ;;  %v11028_v45 = vpop.f32.mrf.mxu1 }
 0x18a   : > { %v7565_v52 = vcombine.low %v10857_v24, %v10864_v57  ;;  %v11018_v18 = vpop.f32.mrf.mxu0  ;;  %v1785_v60 = vor.u32 %v1784_v46, %v10992_v7  ;;  %v1799_v47 = vor.u32 %v1798_v41, %v1795_v3  ;;  %v1817_v32 = vshrl.u32 %v10995_v59, 16  ;;  %12626 = vst [vmem:[#allocation65_spill] sm:$0xff] %v11028_v45  ;;  %8733 = vmatmul.mubr.msk.bf16.gmra.mxu1 %vm2123_vm1, %v10981_v35 }
 0x18b   : > { %12624 = vst [vmem:[#allocation15_spill] sm:$0xff] %v11012_v48  ;;  %12625 = vst [vmem:[#allocation54_spill] sm:$0xff] %v11018_v18  ;;  %v1809_v40 = vor.u32 %v1808_v21, %v11003_v2  ;;  %v1820_v42 = vshll.u32 %v10995_v59, 16  ;;  %v1826_v24 = vshll.u32 %v11008_v25, 16  ;;  %v1830_v57 = vshrl.u32 %v11008_v25, 16  ;;  %8736 = vmatprep.mubr.msk.bf16.mxu1 %vm2123_vm1, %v10999_v53  ;;  %v11045_v51 = vpop.f32.mrf.mxu1 }
 0x18c   : > { %v11038_v44 = vpop.f32.mrf.mxu0  ;;  %v1757_v11 = vsel %vm9176_vm3, %v1752_v22, %v10949_v8  ;;  %v1767_v46 = vsel %vm9176_vm3, %v1762_v30, %v1766_v1  ;;  %v1776_v3 = vrot.slane %v1775_v58, 4  ;;  %v1790_v41 = vrot.slane %v1788_v17, 5  ;;  %12628 = vst [vmem:[#allocation12_spill] sm:$0xff] %v11045_v51  ;;  %v7234_v51 = vld [vmem:[%s9146_s30 + $0xbc] sm:$0x1] }
 0x18d   : > { %12627 = vst [vmem:[#allocation56_spill] sm:$0xff] %v11038_v44  ;;  %v1841_v21 = vshrl.u32 %v11023_v34, 16  ;;  %v1844_v35 = vshll.u32 %v11023_v34, 16  ;;  %v1850_v53 = vshll.u32 %v11026_v14, 16  ;;  %v1854_v44 = vshrl.u32 %v11026_v14, 16  ;;  %v11054_v58 = vpop.f32.mrf.mxu1 }
 0x18e   : > { %v11051_v18 = vpop.f32.mrf.mxu0  ;;  %v1786_v8 = vrot.slane %v1785_v60, 4  ;;  %v1800_v1 = vrot.slane %v1799_v47, 4  ;;  %v1814_v22 = vrot.slane %v1812_v28, 5  ;;  %v1819_v30 = vrot.slane %v1817_v32, 4  ;;  %v11067_v60 = vld [vmem:[%s9146_s30 + $0xcc] sm:$0xf] }
 0x18f   : > { %12629 = vst [vmem:[#allocation20_spill] sm:$0xff] %v11051_v18  ;;  %v1810_v17 = vrot.slane %v1809_v40, 4  ;;  %v1822_v0 = vrot.slane %v1820_v42, 5  ;;  %v11058_v45 = vrot.slane %v1826_v24, 5  ;;  %v1832_v61 = vrot.slane %v1830_v57, 4  ;;  %v11069_v47 = vpop.f32.mrf.mxu1 }
 0x190   : > { %8703 = vmatmul.mubr.msk.bf16.gmra.mxu0 %vm2123_vm1, %v7564_v4  ;;  %v11060_v18 = vpop.f32.mrf.mxu0  ;;  %v11062_v31 = vcombine.low %v1757_v11, %v1767_v46  ;;  %v7566_v4 = vcombine.low %v10910_v43, %v10935_v16  ;;  %v1843_v28 = vrot.slane %v1841_v21, 4  ;;  %v11071_v32 = vrot.slane %v1850_v53, 5  ;;  %v11074_v42 = vld [vmem:[%s9146_s30 + $0xd0] sm:$0xf]  ;;  %v7235_v46 = vld [vmem:[%s9146_s30 + $0xc8] sm:$0x1] }
 0x191   : > { %8706 = vmatprep.mubr.msk.bf16.mxu0 %vm2123_vm1, %v7565_v52  ;;  %v1846_v52 = vrot.slane %v1844_v35, 5  ;;  %v1856_v40 = vrot.slane %v1854_v44, 4  ;;  %v1781_v57 = vsel %vm9176_vm3, %v1776_v3, %v10992_v7  ;;  %v1791_v43 = vsel %vm9176_vm3, %v1786_v8, %v1790_v41  ;;  %v11086_v35 = vpop.f32.mrf.mxu1 }
 0x192   : > { %12630 = vst [vmem:[#allocation58_spill] sm:$0xff] %v11062_v31  ;;  %v11076_v24 = vpop.f32.mrf.mxu0  ;;  %v1836_v16 = vshll.u32 %v7234_v51, 16  ;;  %v7567_v11 = vcombine.low %v10945_v13, %v10954_v63  ;;  %8737 = vmatmul.mubr.msk.bf16.gmra.mxu1 %vm2123_vm1, %v11012_v48  ;;  %v1805_v53 = vsel %vm9176_vm3, %v1800_v1, %v11003_v2  ;;  %v1815_v7 = vsel %vm9176_vm3, %v1810_v17, %v1814_v22 }
 0x193   : > { %12631 = vst [vmem:[#allocation18_spill] sm:$0xff] %v11076_v24  ;;  %v1823_v44 = vor.u32 %v1822_v0, %v1819_v30  ;;  %v1833_v3 = vor.u32 %v1832_v61, %v11058_v45  ;;  %8740 = vmatprep.mubr.msk.bf16.mxu1 %vm2123_vm1, %v11062_v31  ;;  %v1865_v63 = vshrl.u32 %v11067_v60, 16  ;;  %v1868_v41 = vshll.u32 %v11067_v60, 16  ;;  %v11104_v2 = vpop.f32.mrf.mxu1 }
 0x194   : > { %v11098_v13 = vpop.f32.mrf.mxu0  ;;  %v1874_v51 = vshll.u32 %v11074_v42, 16  ;;  %v1878_v21 = vshrl.u32 %v11074_v42, 16  ;;  %12633 = vst [vmem:[#allocation62_spill] sm:$0xff] %v11104_v2  ;;  %v1847_v8 = vor.u32 %v1846_v52, %v1843_v28  ;;  %v1857_v0 = vor.u32 %v1856_v40, %v11071_v32  ;;  %v7236_v2 = vld [vmem:[%s9146_s30 + $0xd4] sm:$0x1] }
 0x195   : > { %12632 = vst [vmem:[#allocation23_spill] sm:$0xff] %v11098_v13  ;;  %v1860_v1 = vshll.u32 %v7235_v46, 16  ;;  %v11107_v61 = vcombine.low %v1781_v57, %v1791_v43  ;;  %v11112_v30 = vpop.f32.mrf.mxu1  ;;  %v11114_v17 = vcombine.low %v1805_v53, %v1815_v7  ;;  %v1824_v31 = vrot.slane %v1823_v44, 4 }
 0x196   : > { %v11109_v22 = vpop.f32.mrf.mxu0  ;;  %12635 = vst [vmem:[#allocation13_spill] sm:$0xff] %v11112_v30  ;;  %v1834_v48 = vrot.slane %v1833_v3, 4  ;;  %v1838_v13 = vrot.slane %v1836_v16, 5  ;;  %v1867_v52 = vrot.slane %v1865_v63, 4  ;;  %v1870_v40 = vrot.slane %v1868_v41, 5 }
 0x197   : > { %12634 = vst [vmem:[#allocation24_spill] sm:$0xff] %v11109_v22  ;;  %v1876_v57 = vrot.slane %v1874_v51, 5  ;;  %v1880_v43 = vrot.slane %v1878_v21, 4  ;;  %v11119_v46 = vpop.f32.mrf.mxu1  ;;  %v1848_v22 = vrot.slane %v1847_v8, 4  ;;  %v1862_v24 = vrot.slane %v1860_v1, 5 }
 0x198   : > { %8707 = vmatmul.mubr.msk.bf16.gmra.mxu0 %vm2123_vm1, %v7566_v4  ;;  %v11117_v28 = vpop.f32.mrf.mxu0  ;;  %v1858_v4 = vrot.slane %v1857_v0, 4  ;;  %v7568_v53 = vcombine.low %v10995_v59, %v11008_v25  ;;  %v7569_v7 = vcombine.low %v11023_v34, %v11026_v14  ;;  %v1839_v44 = vsel %vm9176_vm3, %v1834_v48, %v1838_v13 }
 0x199   : > { %8710 = vmatprep.mubr.msk.bf16.mxu0 %vm2123_vm1, %v7567_v11  ;;  %v11126_v16 = vpop.f32.mrf.mxu1  ;;  %v1829_v11 = vsel %vm9176_vm3, %v1824_v31, %v11058_v45  ;;  %v1871_v25 = vor.u32 %v1870_v40, %v1867_v52  ;;  %v1881_v59 = vor.u32 %v1880_v43, %v1876_v57  ;;  %v1884_v63 = vshll.u32 %v7236_v2, 16 }
 0x19a   : > { %v11122_v30 = vpop.f32.mrf.mxu0  ;;  %8741 = vmatmul.mubr.msk.bf16.gmra.mxu1 %vm2123_vm1, %v11107_v61  ;;  %v1853_v31 = vsel %vm9176_vm3, %v1848_v22, %v11071_v32  ;;  %v1863_v34 = vsel %vm9176_vm3, %v1858_v4, %v1862_v24  ;;  %v11153_v48 = vcombine.low %v1829_v11, %v1839_v44  ;;  %v7570_v0 = vcombine.low %v11067_v60, %v11074_v42 }
 0x19b   : > { %8744 = vmatprep.mubr.msk.bf16.mxu1 %vm2123_vm1, %v11114_v17  ;;  %v11141_v41 = vpop.f32.mrf.mxu1  ;;  %v11158_v51 = vcombine.low %v1853_v31, %v1863_v34  ;;  %v1872_v21 = vrot.slane %v1871_v25, 4  ;;  %v1882_v2 = vrot.slane %v1881_v59, 4  ;;  %v1886_v32 = vrot.slane %v1884_v63, 5  ;;  %v12637_v31 = vld [vmem:[#allocation46_spill] sm:$0xff] }
 0x19c   : > { %v11139_v3 = vpop.f32.mrf.mxu0  ;;  %v3542_v59 = vadd.f32 %v10801_v20, %v10751_v23  ;;  %v3545_v23 = vadd.f32 %v10833_v38, %v10796_v33  ;;  %v11230_v38 = vld [vmem:[%s12353_s2] ss:$0 sm:$0xff] }
 0x19d   : > { %v11151_v45 = vpop.f32.mrf.mxu1  ;;  %v1877_v22 = vsel %vm9176_vm3, %v1872_v21, %v1876_v57  ;;  %v1887_v52 = vsel %vm9176_vm3, %v1882_v2, %v1886_v32  ;;  %v12638_v21 = vld [vmem:[#allocation47_spill] sm:$0xff] }
 0x19e   : > { %v11148_v14 = vpop.f32.mrf.mxu0  ;;  %v11185_v42 = vcombine.low %v1877_v22, %v1887_v52 }
 0x19f   : > { %v11160_v8 = vpop.f32.mrf.mxu1 }
 0x1a0   : > { %8711 = vmatmul.mubr.msk.bf16.gmra.mxu0 %vm2123_vm1, %v7568_v53  ;;  %v11156_v13 = vpop.f32.mrf.mxu0  ;;  %v12636_v53 = vld [vmem:[#allocation44_spill] sm:$0xff] }
 0x1a1   : > { %8714 = vmatprep.mubr.msk.bf16.mxu0 %vm2123_vm1, %v7569_v7  ;;  %v11166_v1 = vpop.f32.mrf.mxu1 }
 0x1a2   : > { %v11162_v24 = vpop.f32.mrf.mxu0  ;;  %8745 = vmatmul.mubr.msk.bf16.gmra.mxu1 %vm2123_vm1, %v11153_v48 }
 0x1a3   : > { %8748 = vmatprep.mubr.msk.bf16.mxu1 %vm2123_vm1, %v11158_v51  ;;  %v11178_v43 = vpop.f32.mrf.mxu1 }
 0x1a4   : > { %v11176_v40 = vpop.f32.mrf.mxu0 }
 0x1a5   : > { %v11183_v60 = vpop.f32.mrf.mxu1 }
 0x1a6   : > { %v11180_v4 = vpop.f32.mrf.mxu0 }
 0x1a7   : > { %v11191_v57 = vpop.f32.mrf.mxu1 }
 0x1a8   : > { %8715 = vmatmul.mubr.msk.bf16.gmra.mxu0 %vm2123_vm1, %v7570_v0  ;;  %v11189_v11 = vpop.f32.mrf.mxu0 }
 0x1a9   : > { %8754 = vmatprep.mubr.msk.bf16.mxu0 %vm2123_vm1, %v12636_v53  ;;  %v11195_v7 = vpop.f32.mrf.mxu1 }
 0x1aa   : > { %v11193_v29 = vpop.f32.mrf.mxu0  ;;  %8749 = vmatmul.mubr.msk.bf16.gmra.mxu1 %vm2123_vm1, %v11185_v42 }
 0x1ab   : > { %8788 = vmatprep.mubr.msk.bf16.mxu1 %vm2123_vm1, %v9400_v6  ;;  %v11203_v25 = vpop.f32.mrf.mxu1  ;;  %v3534_v6 = vadd.f32 %v10816_v54, %v10775_v26 }
 0x1ac   : > { %v11201_v44 = vpop.f32.mrf.mxu0 }
 0x1ad   : > { %v11209_v34 = vpop.f32.mrf.mxu1 }
 0x1ae   : > { %v8552_v63 = vpop.f32.mrf.mxu0 }
 0x1af   : > { %v3832_v2 = vadd.f32 %v8552_v63, %v3542_v59  ;;  %v11216_v0 = vpop.f32.mrf.mxu1 }
 0x1b0   : > { %8755 = vmatmul.mubr.msk.bf16.vlgmr.msra.gmra.mxu0 %vm2123_vm1, %v12637_v31  ;;  %v3703_v32 = vpop.f32.mrf.mxu0 }
 0x1b1   : > { %8821 = vmatpush3.bf16.msra.mxu0 %v10742_v10  ;;  %8758 = vmatprep.mubr.msk.bf16.mxu0 %vm2123_vm1, %v12638_v21  ;;  %v3830_v20 = vadd.f32 %v3703_v32, %v3534_v6  ;;  %v8586_v52 = vpop.f32.mrf.mxu1  ;;  %v3537_v10 = vadd.f32 %v10859_v55, %v10813_v5  ;;  %v12639_v5 = vld [vmem:[#allocation51_spill] sm:$0xff]  ;;  %v12640_v21 = vld [vmem:[#allocation53_spill] sm:$0xff]  ;;  %v11244_v6 = vld [vmem:[%s12354_s3] ss:$0 sm:$0xff] }
 0x1b2   : > { %v8553_v22 = vpop.f32.mrf.mxu0  ;;  %8789 = vmatmul.mubr.msk.bf16.vlgmr.msra.gmra.mxu1 %vm2123_vm1, %v9416_v36  ;;  %v4130_v53 = vadd.f32 %v8586_v52, %v3832_v2 }
 0x1b3   : > { %8855 = vmatpush3.bf16.msra.mxu1 %v10790_v37  ;;  %8792 = vmatprep.mubr.msk.bf16.mxu1 %vm2123_vm1, %v9440_v56  ;;  %v3833_v26 = vadd.f32 %v8553_v22, %v3545_v23  ;;  %v4001_v59 = vpop.f32.mrf.mxu1  ;;  %v3558_v37 = vadd.f32 %v10875_v15, %v10823_v9  ;;  %v3550_v56 = vadd.f32 %v10904_v19, %v10846_v50 }
 0x1b4   : > { %v3706_v54 = vpop.f32.mrf.mxu0  ;;  %v6225_v33 = vmul.f32 %v11230_v38, %v4130_v53  ;;  %v4128_v36 = vadd.f32 %v4001_v59, %v3830_v20  ;;  %v3561_v15 = vadd.f32 %v10937_v39, %v10868_v27  ;;  %v3553_v59 = vadd.f32 %v10956_v62, %v10900_v12 }
 0x1b5   : > { %v3831_v63 = vadd.f32 %v3706_v54, %v3537_v10  ;;  %v8587_v55 = vpop.f32.mrf.mxu1 }
 0x1b6   : > { %v8556_v31 = vpop.f32.mrf.mxu0  ;;  %v6257_v2 = vadd.f32 %v11244_v6, %v6225_v33  ;;  %v6223_v32 = vmul.f32 %v11230_v38, %v4128_v36  ;;  %v4131_v23 = vadd.f32 %v8587_v55, %v3833_v26  ;;  %v12641_v26 = vld [vmem:[#allocation6_spill] sm:$0xff] }
 0x1b7   : > { %v4004_v9 = vpop.f32.mrf.mxu1  ;;  %v3836_v50 = vadd.f32 %v8556_v31, %v3558_v37  ;;  %v12642_v37 = vld [vmem:[#allocation9_spill] sm:$0xff] }
 0x1b8   : > { %8759 = vmatmul.mubr.msk.bf16.gmra.mxu0 %vm2123_vm1, %v12639_v5  ;;  %v3719_v20 = vpop.f32.mrf.mxu0  ;;  %v6289_v22 = vmax.f32 %v6257_v2, 0.0  ;;  %v6255_v52 = vadd.f32 %v11244_v6, %v6223_v32  ;;  %v6226_v10 = vmul.f32 %v11230_v38, %v4131_v23  ;;  %v4129_v53 = vadd.f32 %v4004_v9, %v3831_v63  ;;  %v12644_v9 = vld [vmem:[#allocation59_spill] sm:$0xff] }
 0x1b9   : > { %8762 = vmatprep.mubr.msk.bf16.mxu0 %vm2123_vm1, %v12640_v21  ;;  %v3834_v19 = vadd.f32 %v3719_v20, %v3550_v56  ;;  %v8590_v33 = vpop.f32.mrf.mxu1  ;;  %v12643_v56 = vld [vmem:[#allocation48_spill] sm:$0xff] }
 0x1ba   : > { %v8557_v54 = vpop.f32.mrf.mxu0  ;;  %8793 = vmatmul.mubr.msk.bf16.gmra.mxu1 %vm2123_vm1, %v12641_v26  ;;  %v7978_v27 = vpack.c.bf16 %v6289_v22, %v6289_v22  ;;  %v6287_v39 = vmax.f32 %v6255_v52, 0.0  ;;  %v6258_v31 = vadd.f32 %v11244_v6, %v6226_v10  ;;  %v6224_v5 = vmul.f32 %v11230_v38, %v4129_v53  ;;  %v12645_v10 = vld [vmem:[#allocation61_spill] sm:$0xff] }
 0x1bb   : > { %v3837_v36 = vadd.f32 %v8557_v54, %v3561_v15  ;;  %8796 = vmatprep.mubr.msk.bf16.mxu1 %vm2123_vm1, %v12642_v37  ;;  %v3574_v55 = vadd.f32 %v12643_v56, %v10912_v49  ;;  %v4017_v12 = vpop.f32.mrf.mxu1  ;;  %v4134_v62 = vadd.f32 %v8590_v33, %v3836_v50  ;;  %v12646_v33 = vld [vmem:[#allocation45_spill] sm:$0xff] }
 0x1bc   : > { %v3722_v63 = vpop.f32.mrf.mxu0  ;;  %7783 = vst.msk [vmem:[%s10399_s10 + $0x88] sm:$0xf] %vm6190_vm7, %v7978_v27  ;;  %v7976_v2 = vpack.c.bf16 %v6287_v39, %v6287_v39  ;;  %v6290_v32 = vmax.f32 %v6258_v31, 0.0  ;;  %v6256_v23 = vadd.f32 %v11244_v6, %v6224_v5  ;;  %v4132_v20 = vadd.f32 %v4017_v12, %v3834_v19  ;;  %v12647_v26 = vld [vmem:[#allocation49_spill] sm:$0xff]  ;;  %v12649_v31 = vld [vmem:[#allocation50_spill] sm:$0xff] }
 0x1bd   : > { %v3835_v21 = vadd.f32 %v3722_v63, %v3553_v59  ;;  %v6229_v22 = vmul.f32 %v11230_v38, %v4134_v62  ;;  %v8591_v52 = vpop.f32.mrf.mxu1  ;;  %v3566_v27 = vadd.f32 %v12647_v26, %v12646_v33  ;;  %v12648_v39 = vld [vmem:[#allocation57_spill] sm:$0xff] }
 0x1be   : > { %v8560_v15 = vpop.f32.mrf.mxu0  ;;  %7781 = vst.msk [vmem:[%s10399_s10 + $0x80] sm:$0xf] %vm6190_vm7, %v7976_v2  ;;  %v7979_v50 = vpack.c.bf16 %v6290_v32, %v6290_v32  ;;  %v6288_v53 = vmax.f32 %v6256_v23, 0.0  ;;  %v6227_v19 = vmul.f32 %v11230_v38, %v4132_v20  ;;  %v4135_v54 = vadd.f32 %v8591_v52, %v3837_v36  ;;  %v9022_v56 = vld [vmem:[%s9146_s30 + $0x1c] sm:$0xf]  ;;  %v12650_v20 = vld [vmem:[#allocation60_spill] sm:$0xff] }
 0x1bf   : > { %v3840_v49 = vadd.f32 %v8560_v15, %v3574_v55  ;;  %v3577_v5 = vadd.f32 %v12649_v31, %v12648_v39  ;;  %v6261_v37 = vadd.f32 %v11244_v6, %v6229_v22  ;;  %v4020_v63 = vpop.f32.mrf.mxu1  ;;  %v1954_v55 = vrot.slane %v9022_v56, 5  ;;  %v7237_v23 = vld [vmem:[%s9146_s30 + $0x18] sm:$0xe]  ;;  %v12651_v15 = vld [vmem:[#allocation52_spill] sm:$0xff]  ;;  %v12652_v22 = vld [vmem:[#allocation10_spill] sm:$0xff] }
 0x1c0   : > { %8763 = vmatmul.mubr.msk.bf16.gmra.mxu0 %vm2123_vm1, %v12644_v9  ;;  %v3735_v59 = vpop.f32.mrf.mxu0  ;;  %7784 = vst.msk [vmem:[%s10399_s10 + $0x8c] sm:$0xf] %vm6190_vm7, %v7979_v50  ;;  %v7977_v12 = vpack.c.bf16 %v6288_v53, %v6288_v53  ;;  %v6259_v62 = vadd.f32 %v11244_v6, %v6227_v19  ;;  %v6230_v36 = vmul.f32 %v11230_v38, %v4135_v54  ;;  %v12653_v54 = vld [vmem:[#allocation14_spill] sm:$0xff]  ;;  %v12654_v31 = vld [vmem:[#allocation63_spill] sm:$0xff] }
 0x1c1   : > { %8766 = vmatprep.mubr.msk.bf16.mxu0 %vm2123_vm1, %v12645_v10  ;;  %v4133_v2 = vadd.f32 %v4020_v63, %v3835_v21  ;;  %v3569_v9 = vadd.f32 %v12651_v15, %v12650_v20  ;;  %v6293_v52 = vmax.f32 %v6261_v37, 0.0  ;;  %v8594_v10 = vpop.f32.mrf.mxu1  ;;  %v3838_v33 = vadd.f32 %v3735_v59, %v3566_v27  ;;  %v12655_v37 = vld [vmem:[#allocation65_spill] sm:$0xff]  ;;  %v12658_v15 = vld [vmem:[#allocation12_spill] sm:$0xff] }
 0x1c2   : > { %v8561_v32 = vpop.f32.mrf.mxu0  ;;  %8797 = vmatmul.mubr.msk.bf16.gmra.mxu1 %vm2123_vm1, %v12652_v22  ;;  %7782 = vst.msk [vmem:[%s10399_s10 + $0x84] sm:$0xf] %vm6190_vm7, %v7977_v12  ;;  %v6291_v50 = vmax.f32 %v6259_v62, 0.0  ;;  %v6262_v53 = vadd.f32 %v11244_v6, %v6230_v36  ;;  %v4138_v21 = vadd.f32 %v8594_v10, %v3840_v49  ;;  %v3590_v63 = vadd.f32 %v12655_v37, %v12654_v31  ;;  %v12659_v22 = vld [vmem:[#allocation16_spill] sm:$0xff]  ;;  %v11310_v31 = vld [vmem:[%s9146_s30 + $0x24] sm:$0xe] }
 0x1c3   : > { %v3841_v26 = vadd.f32 %v8561_v32, %v3577_v5  ;;  %v6228_v19 = vmul.f32 %v11230_v38, %v4133_v2  ;;  %8800 = vmatprep.mubr.msk.bf16.mxu1 %vm2123_vm1, %v12653_v54  ;;  %v7982_v56 = vpack.c.bf16 %v6293_v52, %v6293_v52  ;;  %v4033_v20 = vpop.f32.mrf.mxu1  ;;  %v7253_v27 = vrot.slane %v7237_v23, 9  ;;  %v12656_v2 = vld [vmem:[#allocation19_spill] sm:$0xff]  ;;  %v12657_v32 = vld [vmem:[#allocation64_spill] sm:$0xff] }
 0x1c4   : > { %v3738_v39 = vpop.f32.mrf.mxu0  ;;  %v7980_v5 = vpack.c.bf16 %v6291_v50, %v6291_v50  ;;  %v6294_v12 = vmax.f32 %v6262_v53, 0.0  ;;  %v6233_v36 = vmul.f32 %v11230_v38, %v4138_v21  ;;  %v3582_v10 = vadd.f32 %v12658_v15, %v12657_v32  ;;  %v12661_v32 = vld [vmem:[#allocation54_spill] sm:$0xff] }
 0x1c5   : > { %v3839_v59 = vadd.f32 %v3738_v39, %v3569_v9  ;;  %v6260_v62 = vadd.f32 %v11244_v6, %v6228_v19  ;;  %7787 = vst.msk [vmem:[%s10399_s10 + $0x98] sm:$0xf] %vm6190_vm7, %v7982_v56  ;;  %v8595_v52 = vpop.f32.mrf.mxu1  ;;  %v4136_v9 = vadd.f32 %v4033_v20, %v3838_v33  ;;  %v1956_v50 = vrot.slane %v1954_v55, 4 }
 0x1c6   : > { %v8564_v49 = vpop.f32.mrf.mxu0  ;;  %7785 = vst.msk [vmem:[%s10399_s10 + $0x90] sm:$0xf] %vm6190_vm7, %v7980_v5  ;;  %v7983_v53 = vpack.c.bf16 %v6294_v12, %v6294_v12  ;;  %v6265_v21 = vadd.f32 %v11244_v6, %v6233_v36  ;;  %v4139_v54 = vadd.f32 %v8595_v52, %v3841_v26  ;;  %v11315_v20 = vsel %vm9707_vm6, %v7253_v27, %v1954_v55  ;;  %v12662_v52 = vld [vmem:[#allocation56_spill] sm:$0xff]  ;;  %v12663_v27 = vld [vmem:[#allocation17_spill] sm:$0xff] }
 0x1c7   : > { %v3844_v23 = vadd.f32 %v8564_v49, %v3590_v63  ;;  %v6292_v19 = vmax.f32 %v6260_v62, 0.0  ;;  %v6231_v37 = vmul.f32 %v11230_v38, %v4136_v9  ;;  %v4036_v56 = vpop.f32.mrf.mxu1  ;;  %v9023_v49 = vld [vmem:[%s9146_s30 + $0x20] sm:$0x1]  ;;  %v3593_v15 = vadd.f32 %v11054_v58, %v12661_v32 }
 0x1c8   : > { %8767 = vmatmul.mubr.msk.bf16.gmra.mxu0 %vm2123_vm1, %v12656_v2  ;;  %v3751_v39 = vpop.f32.mrf.mxu0  ;;  %v1957_v2 = vrot.slane %v9023_v49, 5  ;;  %7788 = vst.msk [vmem:[%s10399_s10 + $0x9c] sm:$0xf] %vm6190_vm7, %v7983_v53  ;;  %v6297_v12 = vmax.f32 %v6265_v21, 0.0  ;;  %v6234_v26 = vmul.f32 %v11230_v38, %v4139_v54  ;;  %v4137_v62 = vadd.f32 %v4036_v56, %v3839_v59  ;;  %v12664_v21 = vld [vmem:[#allocation22_spill] sm:$0xff]  ;;  %v12665_v54 = vld [vmem:[#allocation20_spill] sm:$0xff] }
 0x1c9   : > { %8770 = vmatprep.mubr.msk.bf16.mxu0 %vm2123_vm1, %v12659_v22  ;;  %v3842_v33 = vadd.f32 %v3751_v39, %v3582_v10  ;;  %v7981_v5 = vpack.c.bf16 %v6292_v19, %v6292_v19  ;;  %v3585_v10 = vadd.f32 %v11069_v47, %v12662_v52  ;;  %v6263_v9 = vadd.f32 %v11244_v6, %v6231_v37  ;;  %v8598_v55 = vpop.f32.mrf.mxu1  ;;  %v12666_v52 = vld [vmem:[#allocation27_spill] sm:$0xff] }
 0x1ca   : > { %v8565_v36 = vpop.f32.mrf.mxu0  ;;  %8801 = vmatmul.mubr.msk.bf16.gmra.mxu1 %vm2123_vm1, %v12663_v27  ;;  %v7254_v22 = vrot.slane %v11310_v31, 9  ;;  %v7986_v53 = vpack.c.bf16 %v6297_v12, %v6297_v12  ;;  %v6266_v59 = vadd.f32 %v11244_v6, %v6234_v26  ;;  %v6232_v19 = vmul.f32 %v11230_v38, %v4137_v62 }
 0x1cb   : > { %7786 = vst.msk [vmem:[%s10399_s10 + $0x94] sm:$0xf] %vm6190_vm7, %v7981_v5  ;;  %v4142_v58 = vadd.f32 %v8598_v55, %v3844_v23  ;;  %8804 = vmatprep.mubr.msk.bf16.mxu1 %vm2123_vm1, %v12664_v21  ;;  %v3606_v39 = vadd.f32 %v11086_v35, %v12665_v54  ;;  %v6295_v37 = vmax.f32 %v6263_v9, 0.0  ;;  %v4049_v56 = vpop.f32.mrf.mxu1  ;;  %v3845_v49 = vadd.f32 %v8565_v36, %v3593_v15  ;;  %v12667_v55 = vld [vmem:[#allocation62_spill] sm:$0xff]  ;;  %v12670_v21 = vld [vmem:[#allocation13_spill] sm:$0xff] }
 0x1cc   : > { %v3754_v47 = vpop.f32.mrf.mxu0  ;;  %7791 = vst.msk [vmem:[%s10399_s10 + $0xa8] sm:$0xf] %vm6190_vm7, %v7986_v53  ;;  %v6298_v5 = vmax.f32 %v6266_v59, 0.0  ;;  %v6264_v12 = vadd.f32 %v11244_v6, %v6232_v19  ;;  %v4140_v23 = vadd.f32 %v4049_v56, %v3842_v33  ;;  %v3598_v35 = vadd.f32 %v12667_v55, %v11060_v18  ;;  %v12669_v18 = vld [vmem:[#allocation18_spill] sm:$0xff]  ;;  %v9024_v56 = vld [vmem:[%s9146_s30 + $0x28] sm:$0xf] }
 0x1cd   : > { %v3843_v32 = vadd.f32 %v3754_v47, %v3585_v10  ;;  %v6237_v26 = vmul.f32 %v11230_v38, %v4142_v58  ;;  %v7984_v9 = vpack.c.bf16 %v6295_v37, %v6295_v37  ;;  %v8599_v36 = vpop.f32.mrf.mxu1  ;;  %v12668_v10 = vld [vmem:[#allocation66_spill] sm:$0xff]  ;;  %v11349_v27 = vsel %vm9707_vm6, %v1956_v50, %v1957_v2  ;;  %v12671_v55 = vld [vmem:[#allocation25_spill] sm:$0xff] }
 0x1ce   : > { %v8568_v62 = vpop.f32.mrf.mxu0  ;;  %v7987_v33 = vpack.c.bf16 %v6298_v5, %v6298_v5  ;;  %v6296_v53 = vmax.f32 %v6264_v12, 0.0  ;;  %v6235_v19 = vmul.f32 %v11230_v38, %v4140_v23  ;;  %v3609_v47 = vadd.f32 %v12670_v21, %v12669_v18  ;;  %v12674_v21 = vld [vmem:[#allocation24_spill] sm:$0xff] }
 0x1cf   : > { %v3848_v15 = vadd.f32 %v8568_v62, %v3606_v39  ;;  %v6269_v59 = vadd.f32 %v11244_v6, %v6237_v26  ;;  %7789 = vst.msk [vmem:[%s10399_s10 + $0xa0] sm:$0xf] %vm6190_vm7, %v7984_v9  ;;  %v4052_v54 = vpop.f32.mrf.mxu1  ;;  %v4143_v39 = vadd.f32 %v8599_v36, %v3845_v49  ;;  %v1961_v50 = vrot.slane %v9024_v56, 5 }
 0x1d0   : > { %8771 = vmatmul.mubr.msk.bf16.gmra.mxu0 %vm2123_vm1, %v12666_v52  ;;  %v3767_v58 = vpop.f32.mrf.mxu0  ;;  %7792 = vst.msk [vmem:[%s10399_s10 + $0xac] sm:$0xf] %vm6190_vm7, %v7987_v33  ;;  %v7985_v2 = vpack.c.bf16 %v6296_v53, %v6296_v53  ;;  %v6267_v12 = vadd.f32 %v11244_v6, %v6235_v19  ;;  %v4141_v26 = vadd.f32 %v4052_v54, %v3843_v32 }
 0x1d1   : > { %8774 = vmatprep.mubr.msk.bf16.mxu0 %vm2123_vm1, %v12668_v10  ;;  %v3846_v37 = vadd.f32 %v3767_v58, %v3598_v35  ;;  %v6301_v5 = vmax.f32 %v6269_v59, 0.0  ;;  %v6238_v62 = vmul.f32 %v11230_v38, %v4143_v39  ;;  %v8602_v52 = vpop.f32.mrf.mxu1  ;;  %v7682_v49 = vcombine.low %v11315_v20, %v11349_v27  ;;  %v11367_v35 = vld [vmem:[%s9146_s30 + $0x2c] sm:$0x1]  ;;  %v12672_v59 = vld [vmem:[#allocation30_spill] sm:$0xff]  ;;  %v7241_v27 = vld [vmem:[%s9146_s30 + $0x48] sm:$0xe] }
 0x1d2   : > { %v8569_v23 = vpop.f32.mrf.mxu0  ;;  %8805 = vmatmul.mubr.msk.bf16.gmra.mxu1 %vm2123_vm1, %v12671_v55  ;;  %v1964_v36 = vrot.slane %v11367_v35, 5  ;;  %7790 = vst.msk [vmem:[%s10399_s10 + $0xa4] sm:$0xf] %vm6190_vm7, %v7985_v2  ;;  %v6299_v32 = vmax.f32 %v6267_v12, 0.0  ;;  %v6236_v33 = vmul.f32 %v11230_v38, %v4141_v26  ;;  %v4146_v53 = vadd.f32 %v8602_v52, %v3848_v15  ;;  %v12673_v58 = vld [vmem:[#allocation23_spill] sm:$0xff]  ;;  %v12676_v52 = vld [vmem:[#allocation70_spill] sm:$0xff] }
 0x1d3   : > { %v3849_v9 = vadd.f32 %v8569_v23, %v3609_v47  ;;  %v7990_v10 = vpack.c.bf16 %v6301_v5, %v6301_v5  ;;  %8808 = vmatprep.mubr.msk.bf16.mxu1 %vm2123_vm1, %v12672_v59  ;;  %v3601_v18 = vadd.f32 %v11119_v46, %v12673_v58  ;;  %v3622_v47 = vadd.f32 %v11126_v16, %v12674_v21  ;;  %v4065_v39 = vpop.f32.mrf.mxu1  ;;  %v12675_v16 = vld [vmem:[#allocation68_spill] sm:$0xff]  ;;  %v12686_v20 = vld [vmem:[#allocation2_spill] sm:$0xff] }
 0x1d4   : > { %v3770_v19 = vpop.f32.mrf.mxu0  ;;  %v6270_v54 = vadd.f32 %v11244_v6, %v6238_v62  ;;  %v11384_v56 = vsel %vm9707_vm6, %v7254_v22, %v1961_v50  ;;  %v7988_v15 = vpack.c.bf16 %v6299_v32, %v6299_v32  ;;  %v6268_v2 = vadd.f32 %v11244_v6, %v6236_v33 }
 0x1d5   : > { %7795 = vst.msk [vmem:[%s10399_s10 + $0xb8] sm:$0xf] %vm6190_vm7, %v7990_v10  ;;  %v6241_v46 = vmul.f32 %v11230_v38, %v4146_v53  ;;  %v4144_v5 = vadd.f32 %v4065_v39, %v3846_v37  ;;  %v3614_v26 = vadd.f32 %v11141_v41, %v11117_v28  ;;  %v8603_v23 = vpop.f32.mrf.mxu1  ;;  %v3847_v62 = vadd.f32 %v3770_v19, %v3601_v18 }
 0x1d6   : > { %v8572_v12 = vpop.f32.mrf.mxu0  ;;  %v6302_v31 = vmax.f32 %v6270_v54, 0.0  ;;  %7793 = vst.msk [vmem:[%s10399_s10 + $0xb0] sm:$0xf] %vm6190_vm7, %v7988_v15  ;;  %v6300_v55 = vmax.f32 %v6268_v2, 0.0  ;;  %v4147_v10 = vadd.f32 %v8603_v23, %v3849_v9  ;;  %v3625_v28 = vadd.f32 %v11151_v45, %v11122_v30  ;;  %v11405_v54 = vld [vmem:[%s9146_s30 + $0x30] sm:$0xe] }
 0x1d7   : > { %v3852_v22 = vadd.f32 %v8572_v12, %v3622_v47  ;;  %v6273_v37 = vadd.f32 %v11244_v6, %v6241_v46  ;;  %v6239_v35 = vmul.f32 %v11230_v38, %v4144_v5  ;;  %v4068_v33 = vpop.f32.mrf.mxu1  ;;  %v1963_v59 = vrot.slane %v1961_v50, 4  ;;  %v12677_v45 = vld [vmem:[#allocation31_spill] sm:$0xff]  ;;  %v11414_v15 = vld [vmem:[%s9146_s30 + $0x34] sm:$0xf] }
 0x1d8   : > { %8775 = vmatmul.mubr.msk.bf16.gmra.mxu0 %vm2123_vm1, %v12675_v16  ;;  %v3783_v32 = vpop.f32.mrf.mxu0  ;;  %v7991_v41 = vpack.c.bf16 %v6302_v31, %v6302_v31  ;;  %v7989_v19 = vpack.c.bf16 %v6300_v55, %v6300_v55  ;;  %v6242_v21 = vmul.f32 %v11230_v38, %v4147_v10  ;;  %v3617_v9 = vadd.f32 %v11160_v8, %v11139_v3  ;;  %v12678_v8 = vld [vmem:[#allocation34_spill] sm:$0xff] }
 0x1d9   : > { %8778 = vmatprep.mubr.msk.bf16.mxu0 %vm2123_vm1, %v12676_v52  ;;  %v3850_v53 = vadd.f32 %v3783_v32, %v3614_v26  ;;  %v6305_v58 = vmax.f32 %v6273_v37, 0.0  ;;  %v6271_v18 = vadd.f32 %v11244_v6, %v6239_v35  ;;  %v8606_v30 = vpop.f32.mrf.mxu1  ;;  %v4145_v39 = vadd.f32 %v4068_v33, %v3847_v62  ;;  %v12679_v32 = vld [vmem:[#allocation41_spill] sm:$0xff] }
 0x1da   : > { %v8573_v47 = vpop.f32.mrf.mxu0  ;;  %7796 = vst.msk [vmem:[%s10399_s10 + $0xbc] sm:$0xf] %vm6190_vm7, %v7991_v41  ;;  %8809 = vmatmul.mubr.msk.bf16.gmra.mxu1 %vm2123_vm1, %v12677_v45  ;;  %v1968_v2 = vrot.slane %v11414_v15, 5  ;;  %7794 = vst.msk [vmem:[%s10399_s10 + $0xb4] sm:$0xf] %vm6190_vm7, %v7989_v19  ;;  %v6274_v12 = vadd.f32 %v11244_v6, %v6242_v21  ;;  %v4150_v3 = vadd.f32 %v8606_v30, %v3852_v22  ;;  %v7255_v52 = vrot.slane %v11405_v54, 9 }
 0x1db   : > { %v3853_v50 = vadd.f32 %v8573_v47, %v3625_v28  ;;  %v7994_v46 = vpack.c.bf16 %v6305_v58, %v6305_v58  ;;  %v6303_v5 = vmax.f32 %v6271_v18, 0.0  ;;  %8812 = vmatprep.mubr.msk.bf16.mxu1 %vm2123_vm1, %v12678_v8  ;;  %v6240_v26 = vmul.f32 %v11230_v38, %v4145_v39  ;;  %v4081_v31 = vpop.f32.mrf.mxu1 }
 0x1dc   : > { %v3786_v16 = vpop.f32.mrf.mxu0  ;;  %v11425_v62 = vsel %vm9707_vm6, %v1963_v59, %v1964_v36  ;;  %v6306_v37 = vmax.f32 %v6274_v12, 0.0  ;;  %v6245_v22 = vmul.f32 %v11230_v38, %v4150_v3  ;;  %v4148_v35 = vadd.f32 %v4081_v31, %v3850_v53  ;;  %v12680_v59 = vld [vmem:[#allocation42_spill] sm:$0xff]  ;;  %v9027_v3 = vld [vmem:[%s9146_s30 + $0x38] sm:$0x1] }
 0x1dd   : > { %v3851_v23 = vadd.f32 %v3786_v16, %v3617_v9  ;;  %7799 = vst.msk [vmem:[%s10399_s10 + $0xc8] sm:$0xf] %vm6190_vm7, %v7994_v46  ;;  %v7992_v55 = vpack.c.bf16 %v6303_v5, %v6303_v5  ;;  %v3638_v28 = vadd.f32 %v11166_v1, %v11148_v14  ;;  %v3630_v36 = vadd.f32 %v11178_v43, %v11156_v13  ;;  %v8607_v33 = vpop.f32.mrf.mxu1 }
 0x1de   : > { %v8576_v10 = vpop.f32.mrf.mxu0  ;;  %v6272_v41 = vadd.f32 %v11244_v6, %v6240_v26  ;;  %v1970_v53 = vrot.slane %v1968_v2, 4  ;;  %v7995_v19 = vpack.c.bf16 %v6306_v37, %v6306_v37  ;;  %v6277_v58 = vadd.f32 %v11244_v6, %v6245_v22 }
 0x1df   : > { %7797 = vst.msk [vmem:[%s10399_s10 + $0xc0] sm:$0xf] %vm6190_vm7, %v7992_v55  ;;  %v6243_v14 = vmul.f32 %v11230_v38, %v4148_v35  ;;  %v4151_v1 = vadd.f32 %v8607_v33, %v3853_v50  ;;  %v3641_v13 = vadd.f32 %v11183_v60, %v11162_v24  ;;  %v4084_v21 = vpop.f32.mrf.mxu1  ;;  %v3856_v47 = vadd.f32 %v8576_v10, %v3638_v28  ;;  %v12681_v60 = vld [vmem:[#allocation35_spill] sm:$0xff]  ;;  %v12682_v55 = vld [vmem:[#allocation38_spill] sm:$0xff] }
 0x1e0   : > { %8779 = vmatmul.mubr.msk.bf16.gmra.mxu0 %vm2123_vm1, %v12679_v32  ;;  %v3799_v18 = vpop.f32.mrf.mxu0  ;;  %v6304_v43 = vmax.f32 %v6272_v41, 0.0  ;;  %7800 = vst.msk [vmem:[%s10399_s10 + $0xcc] sm:$0xf] %vm6190_vm7, %v7995_v19  ;;  %v6309_v9 = vmax.f32 %v6277_v58, 0.0  ;;  %v4149_v39 = vadd.f32 %v4084_v21, %v3851_v23  ;;  %v3633_v50 = vadd.f32 %v11191_v57, %v11176_v40  ;;  %v12684_v58 = vld [vmem:[#allocation74_spill] sm:$0xff] }
 0x1e1   : > { %8782 = vmatprep.mubr.msk.bf16.mxu0 %vm2123_vm1, %v12680_v59  ;;  %v3854_v54 = vadd.f32 %v3799_v18, %v3630_v36  ;;  %v6275_v30 = vadd.f32 %v11244_v6, %v6243_v14  ;;  %v6246_v45 = vmul.f32 %v11230_v38, %v4151_v1  ;;  %v8610_v24 = vpop.f32.mrf.mxu1  ;;  %v1971_v8 = vrot.slane %v9027_v3, 5  ;;  %v12683_v59 = vld [vmem:[#allocation43_spill] sm:$0xff] }
 0x1e2   : > { %v8577_v46 = vpop.f32.mrf.mxu0  ;;  %v7993_v5 = vpack.c.bf16 %v6304_v43, %v6304_v43  ;;  %8813 = vmatmul.mubr.msk.bf16.gmra.mxu1 %vm2123_vm1, %v12681_v60  ;;  %v7998_v16 = vpack.c.bf16 %v6309_v9, %v6309_v9  ;;  %v6244_v23 = vmul.f32 %v11230_v38, %v4149_v39  ;;  %v3654_v40 = vadd.f32 %v11195_v7, %v11180_v4 }
 0x1e3   : > { %v3857_v12 = vadd.f32 %v8577_v46, %v3641_v13  ;;  %v6307_v26 = vmax.f32 %v6275_v30, 0.0  ;;  %v6278_v31 = vadd.f32 %v11244_v6, %v6246_v45  ;;  %8816 = vmatprep.mubr.msk.bf16.mxu1 %vm2123_vm1, %v12682_v55  ;;  %v4097_v57 = vpop.f32.mrf.mxu1  ;;  %v4154_v22 = vadd.f32 %v8610_v24, %v3856_v47  ;;  %v9029_v55 = vld [vmem:[%s9146_s30 + $0x4c] sm:$0xf] }
 0x1e4   : > { %v3802_v37 = vpop.f32.mrf.mxu0  ;;  %7798 = vst.msk [vmem:[%s10399_s10 + $0xc4] sm:$0xf] %vm6190_vm7, %v7993_v5  ;;  %v7683_v10 = vcombine.low %v11384_v56, %v11425_v62  ;;  %7803 = vst.msk [vmem:[%s10399_s10 + $0xd8] sm:$0xf] %vm6190_vm7, %v7998_v16  ;;  %v6276_v36 = vadd.f32 %v11244_v6, %v6244_v23  ;;  %v4152_v41 = vadd.f32 %v4097_v57, %v3854_v54  ;;  %v12685_v5 = vld [vmem:[#allocation40_spill] sm:$0xff] }
 0x1e5   : > { %v3855_v35 = vadd.f32 %v3802_v37, %v3633_v50  ;;  %v7996_v32 = vpack.c.bf16 %v6307_v26, %v6307_v26  ;;  %v6310_v28 = vmax.f32 %v6278_v31, 0.0  ;;  %v6249_v4 = vmul.f32 %v11230_v38, %v4154_v22  ;;  %v8611_v7 = vpop.f32.mrf.mxu1 }
 0x1e6   : > { %v8580_v33 = vpop.f32.mrf.mxu0  ;;  %v11479_v14 = vsel %vm9707_vm6, %v7255_v52, %v1968_v2  ;;  %v11483_v1 = vsel %vm9707_vm6, %v1970_v53, %v1971_v8  ;;  %v6308_v13 = vmax.f32 %v6276_v36, 0.0  ;;  %v6247_v43 = vmul.f32 %v11230_v38, %v4152_v41  ;;  %v11494_v53 = vld [vmem:[%s9146_s30 + $0x40] sm:$0xf] }
 0x1e7   : > { %v3860_v19 = vadd.f32 %v8580_v33, %v3654_v40  ;;  %7801 = vst.msk [vmem:[%s10399_s10 + $0xd0] sm:$0xf] %vm6190_vm7, %v7996_v32  ;;  %v7999_v18 = vpack.c.bf16 %v6310_v28, %v6310_v28  ;;  %v4155_v21 = vadd.f32 %v8611_v7, %v3857_v12  ;;  %v3646_v15 = vadd.f32 %v11203_v25, %v11189_v11  ;;  %v4100_v54 = vpop.f32.mrf.mxu1  ;;  %v7240_v25 = vld [vmem:[%s9146_s30 + $0x3c] sm:$0xe]  ;;  %v9030_v33 = vld [vmem:[%s9146_s30 + $0x44] sm:$0x1] }
 0x1e8   : > { %8783 = vmatmul.mubr.msk.bf16.gmra.mxu0 %vm2123_vm1, %v12683_v59  ;;  %v3815_v47 = vpop.f32.mrf.mxu0  ;;  %v3657_v2 = vadd.f32 %v11209_v34, %v11193_v29  ;;  %v6281_v52 = vadd.f32 %v11244_v6, %v6249_v4  ;;  %v1975_v9 = vrot.slane %v11494_v53, 5  ;;  %v7997_v30 = vpack.c.bf16 %v6308_v13, %v6308_v13  ;;  %v12687_v4 = vld [vmem:[#allocation3_spill] sm:$0xff] }
 0x1e9   : > { %8822 = vmatprep.mubr.msk.bf16.mxu0 %vm2123_vm1, %v12684_v58  ;;  %7804 = vst.msk [vmem:[%s10399_s10 + $0xdc] sm:$0xf] %vm6190_vm7, %v7999_v18  ;;  %v6279_v45 = vadd.f32 %v11244_v6, %v6247_v43  ;;  %v6250_v39 = vmul.f32 %v11230_v38, %v4155_v21  ;;  %v4153_v46 = vadd.f32 %v4100_v54, %v3855_v35  ;;  %v8614_v50 = vpop.f32.mrf.mxu1  ;;  %v7256_v23 = vrot.slane %v7240_v25, 9  ;;  %v9032_v25 = vld [vmem:[%s9146_s30 + $0x58] sm:$0xf] }
 0x1ea   : > { %v8581_v11 = vpop.f32.mrf.mxu0  ;;  %v3649_v29 = vadd.f32 %v11216_v0, %v11201_v44  ;;  %v6313_v34 = vmax.f32 %v6281_v52, 0.0  ;;  %8817 = vmatmul.mubr.msk.bf16.gmra.mxu1 %vm2123_vm1, %v12685_v5  ;;  %v3858_v24 = vadd.f32 %v3815_v47, %v3646_v15  ;;  %7802 = vst.msk [vmem:[%s10399_s10 + $0xd4] sm:$0xf] %vm6190_vm7, %v7997_v30  ;;  %v4158_v16 = vadd.f32 %v8614_v50, %v3860_v19  ;;  %v9031_v47 = vld [vmem:[%s9146_s30 + $0x50] sm:$0x1] }
 0x1eb   : > { %v3861_v60 = vadd.f32 %v8581_v11, %v3657_v2  ;;  %v6311_v12 = vmax.f32 %v6279_v45, 0.0  ;;  %v6282_v3 = vadd.f32 %v11244_v6, %v6250_v39  ;;  %v6248_v8 = vmul.f32 %v11230_v38, %v4153_v46  ;;  %8856 = vmatprep.mubr.msk.bf16.mxu1 %vm2123_vm1, %v7682_v49  ;;  %v4113_v26 = vpop.f32.mrf.mxu1 }
 0x1ec   : > { %v3818_v44 = vpop.f32.mrf.mxu0  ;;  %v8002_v0 = vpack.c.bf16 %v6313_v34, %v6313_v34  ;;  %v1982_v37 = vrot.slane %v9029_v55, 5  ;;  %v6253_v35 = vmul.f32 %v11230_v38, %v4158_v16  ;;  %v4156_v28 = vadd.f32 %v4113_v26, %v3858_v24 }
 0x1ed   : > { %v3859_v31 = vadd.f32 %v3818_v44, %v3649_v29  ;;  %v8000_v40 = vpack.c.bf16 %v6311_v12, %v6311_v12  ;;  %v6314_v57 = vmax.f32 %v6282_v3, 0.0  ;;  %v6280_v22 = vadd.f32 %v11244_v6, %v6248_v8  ;;  %v8615_v49 = vpop.f32.mrf.mxu1  ;;  %v9033_v12 = vld [vmem:[%s9146_s30 + $0x64] sm:$0xf]  ;;  %v12688_v44 = vld [vmem:[#allocation4_spill] sm:$0xff] }
 0x1ee   : > { %v11517_v32 = vpop.f32.mrf.mxu0  ;;  %7807 = vst.msk [vmem:[%s10399_s10 + $0xe8] sm:$0xf] %vm6190_vm7, %v8002_v0  ;;  %v7684_v36 = vcombine.low %v11479_v14, %v11483_v1  ;;  %v1977_v41 = vrot.slane %v1975_v9, 4  ;;  %v1978_v59 = vrot.slane %v9030_v33, 5  ;;  %v6285_v58 = vadd.f32 %v11244_v6, %v6253_v35  ;;  %v7243_v0 = vld [vmem:[%s9146_s30 + $0x60] sm:$0xe] }
 0x1ef   : > { %7805 = vst.msk [vmem:[%s10399_s10 + $0xe0] sm:$0xf] %vm6190_vm7, %v8000_v40  ;;  %v8003_v7 = vpack.c.bf16 %v6314_v57, %v6314_v57  ;;  %v6312_v19 = vmax.f32 %v6280_v22, 0.0  ;;  %v4159_v18 = vadd.f32 %v8615_v49, %v3861_v60  ;;  %v6251_v14 = vmul.f32 %v11230_v38, %v4156_v28  ;;  %v4116_v1 = vpop.f32.mrf.mxu1  ;;  %v12689_v40 = vld [vmem:[#allocation5_spill] sm:$0xff] }
 0x1f0   : > { %8823 = vmatmul.mubr.msk.bf16.vlgmr.msra.gmra.mxu0 %vm2123_vm1, %v12686_v20  ;;  %v11534_v13 = vpop.f32.mrf.mxu0  ;;  %v7257_v43 = vrot.slane %v7241_v27, 9  ;;  %v1984_v21 = vrot.slane %v1982_v37, 4  ;;  %v1985_v15 = vrot.slane %v9031_v47, 5  ;;  %v6317_v52 = vmax.f32 %v6285_v58, 0.0  ;;  %v9034_v20 = vld [vmem:[%s9146_s30 + $0x5c] sm:$0x1] }
 0x1f1   : > { %8826 = vmatprep.mubr.msk.bf16.mxu0 %vm2123_vm1, %v12687_v4  ;;  %7808 = vst.msk [vmem:[%s10399_s10 + $0xec] sm:$0xf] %vm6190_vm7, %v8003_v7  ;;  %v8001_v2 = vpack.c.bf16 %v6312_v19, %v6312_v19  ;;  %v6254_v54 = vmul.f32 %v11230_v38, %v4159_v18  ;;  %v4157_v30 = vadd.f32 %v4116_v1, %v3859_v31  ;;  %v11544_v46 = vpop.f32.mrf.mxu1  ;;  %v1989_v29 = vrot.slane %v9032_v25, 5 }
 0x1f2   : > { %v11541_v45 = vpop.f32.mrf.mxu0  ;;  %v6283_v39 = vadd.f32 %v11244_v6, %v6251_v14  ;;  %8857 = vmatmul.mubr.msk.bf16.vlgmr.msra.gmra.mxu1 %vm2123_vm1, %v7683_v10  ;;  %v1976_v11 = vsel %vm9707_vm6, %v7256_v23, %v1975_v9  ;;  %v8006_v34 = vpack.c.bf16 %v6317_v52, %v6317_v52  ;;  %v1979_v56 = vsel %vm9707_vm6, %v1977_v41, %v1978_v59  ;;  %v7242_v10 = vld [vmem:[%s9146_s30 + $0x54] sm:$0xe]  ;;  %v9035_v41 = vld [vmem:[%s9146_s30 + $0x68] sm:$0x1]  ;;  %v9036_v14 = vld [vmem:[%s9146_s30 + $0x70] sm:$0xf] }
 0x1f3   : > { %7806 = vst.msk [vmem:[%s10399_s10 + $0xe4] sm:$0xf] %vm6190_vm7, %v8001_v2  ;;  %v6286_v50 = vadd.f32 %v11244_v6, %v6254_v54  ;;  %v6252_v5 = vmul.f32 %v11230_v38, %v4157_v30  ;;  %8860 = vmatprep.mubr.msk.bf16.mxu1 %vm2123_vm1, %v7684_v36  ;;  %v11565_v9 = vpop.f32.mrf.mxu1  ;;  %v1983_v24 = vsel %vm9707_vm6, %v7257_v43, %v1982_v37  ;;  %v1996_v38 = vrot.slane %v9033_v12, 5  ;;  %v9037_v2 = vld [vmem:[%s9146_s30 + $0x7c] sm:$0xf]  ;;  %v12690_v30 = vld [vmem:[#allocation7_spill] sm:$0xff] }
 0x1f4   : > { %v11562_v62 = vpop.f32.mrf.mxu0  ;;  %v6315_v53 = vmax.f32 %v6283_v39, 0.0  ;;  %v1986_v60 = vsel %vm9707_vm6, %v1984_v21, %v1985_v15  ;;  %7811 = vst.msk [vmem:[%s10399_s10 + $0xf8] sm:$0xf] %vm6190_vm7, %v8006_v34  ;;  %v7685_v23 = vcombine.low %v1976_v11, %v1979_v56  ;;  %v7258_v55 = vrot.slane %v7242_v10, 9  ;;  %v7244_v15 = vld [vmem:[%s9146_s30 + $0x6c] sm:$0xe] }
 0x1f5   : > { %v6318_v3 = vmax.f32 %v6286_v50, 0.0  ;;  %v6284_v8 = vadd.f32 %v11244_v6, %v6252_v5  ;;  %v11580_v31 = vpop.f32.mrf.mxu1  ;;  %v1991_v37 = vrot.slane %v1989_v29, 4  ;;  %v7686_v35 = vcombine.low %v1983_v24, %v1986_v60  ;;  %v7245_v39 = vld [vmem:[%s9146_s30 + $0x78] sm:$0xe]  ;;  %v9038_v10 = vld [vmem:[%s9146_s30 + $0x74] sm:$0x1] }
 0x1f6   : > { %v11575_v16 = vpop.f32.mrf.mxu0  ;;  %v8004_v26 = vpack.c.bf16 %v6315_v53, %v6315_v53  ;;  %v1992_v27 = vrot.slane %v9034_v20, 5  ;;  %v7259_v28 = vrot.slane %v7243_v0, 9  ;;  %v1998_v36 = vrot.slane %v1996_v38, 4  ;;  %v9041_v20 = vld [vmem:[%s9146_s30 + $0x94] sm:$0xf] }
 0x1f7   : > { %v8007_v57 = vpack.c.bf16 %v6318_v3, %v6318_v3  ;;  %v6316_v6 = vmax.f32 %v6284_v8, 0.0  ;;  %v11589_v49 = vpop.f32.mrf.mxu1  ;;  %v1999_v33 = vrot.slane %v9035_v41, 5  ;;  %v1990_v19 = vsel %vm9707_vm6, %v7258_v55, %v1989_v29  ;;  %v12691_v29 = vld [vmem:[#allocation55_spill] sm:$0xff]  ;;  %v7247_v41 = vld [vmem:[%s9146_s30 + $0x90] sm:$0xe] }
 0x1f8   : > { %8827 = vmatmul.mubr.msk.bf16.gmra.mxu0 %vm2123_vm1, %v12688_v44  ;;  %v11584_v22 = vpop.f32.mrf.mxu0  ;;  %7809 = vst.msk [vmem:[%s10399_s10 + $0xf0] sm:$0xf] %vm6190_vm7, %v8004_v26  ;;  %v1993_v58 = vsel %vm9707_vm6, %v1991_v37, %v1992_v27  ;;  %v2003_v1 = vrot.slane %v9036_v14, 5  ;;  %v1997_v21 = vsel %vm9707_vm6, %v7259_v28, %v1996_v38  ;;  %v2010_v52 = vrot.slane %v9037_v2, 5  ;;  %v9039_v38 = vld [vmem:[%s9146_s30 + $0x80] sm:$0x1] }
 0x1f9   : > { %8830 = vmatprep.mubr.msk.bf16.mxu0 %vm2123_vm1, %v12689_v40  ;;  %7812 = vst.msk [vmem:[%s10399_s10 + $0xfc] sm:$0xf] %vm6190_vm7, %v8007_v57  ;;  %v8005_v59 = vpack.c.bf16 %v6316_v6, %v6316_v6  ;;  %v11596_v7 = vpop.f32.mrf.mxu1  ;;  %v2000_v47 = vsel %vm9707_vm6, %v1998_v36, %v1999_v33  ;;  %v7687_v25 = vcombine.low %v1990_v19, %v1993_v58  ;;  %v7260_v5 = vrot.slane %v7244_v15, 9  ;;  %v9040_v55 = vld [vmem:[%s9146_s30 + $0x88] sm:$0xf]  ;;  %v12692_v36 = vld [vmem:[#allocation8_spill] sm:$0xff] }
 0x1fa   : > { %v11594_v4 = vpop.f32.mrf.mxu0  ;;  %8861 = vmatmul.mubr.msk.bf16.gmra.mxu1 %vm2123_vm1, %v7685_v23  ;;  %v7688_v50 = vcombine.low %v1997_v21, %v2000_v47  ;;  %v2005_v56 = vrot.slane %v2003_v1, 4  ;;  %v2006_v53 = vrot.slane %v9038_v10, 5  ;;  %v7261_v60 = vrot.slane %v7245_v39, 9  ;;  %v12693_v19 = vld [vmem:[#allocation11_spill] sm:$0xff]  ;;  %v9043_v39 = vld [vmem:[%s9146_s30 + $0x98] sm:$0x1] }
 0x1fb   : > { %7810 = vst.msk [vmem:[%s10399_s10 + $0xf4] sm:$0xf] %vm6190_vm7, %v8005_v59  ;;  %8864 = vmatprep.mubr.msk.bf16.mxu1 %vm2123_vm1, %v7686_v35  ;;  %v11609_v43 = vpop.f32.mrf.mxu1  ;;  %v2012_v12 = vrot.slane %v2010_v52, 4  ;;  %v2013_v3 = vrot.slane %v9039_v38, 5  ;;  %v2004_v0 = vsel %vm9707_vm6, %v7260_v5, %v2003_v1  ;;  %v2017_v37 = vrot.slane %v9040_v55, 5 }
 0x1fc   : > { %v11606_v18 = vpop.f32.mrf.mxu0  ;;  %v2007_v26 = vsel %vm9707_vm6, %v2005_v56, %v2006_v53  ;;  %v2011_v57 = vsel %vm9707_vm6, %v7261_v60, %v2010_v52  ;;  %v7246_v35 = vld [vmem:[%s9146_s30 + $0x84] sm:$0xe]  ;;  %v2024_v27 = vrot.slane %v9041_v20, 5  ;;  %v9042_v47 = vld [vmem:[%s9146_s30 + $0x8c] sm:$0x1]  ;;  %v7263_v52 = vrot.slane %v7247_v41, 9 }
 0x1fd   : > { %v11622_v11 = vpop.f32.mrf.mxu1  ;;  %v2014_v6 = vsel %vm9707_vm6, %v2012_v12, %v2013_v3  ;;  %v7689_v59 = vcombine.low %v2004_v0, %v2007_v26  ;;  %v7262_v1 = vrot.slane %v7246_v35, 9  ;;  %v2019_v21 = vrot.slane %v2017_v37, 4  ;;  %v9044_v53 = vld [vmem:[%s9146_s30 + $0xa0] sm:$0xf]  ;;  %v7248_v0 = vld [vmem:[%s9146_s30 + $0x9c] sm:$0xe] }
 0x1fe   : > { %v11617_v54 = vpop.f32.mrf.mxu0  ;;  %v7690_v14 = vcombine.low %v2011_v57, %v2014_v6  ;;  %v2020_v15 = vrot.slane %v9042_v47, 5  ;;  %v2031_v60 = vrot.slane %v9044_v53, 5  ;;  %v2025_v38 = vsel %vm9707_vm6, %v7263_v52, %v2024_v27  ;;  %v9045_v26 = vld [vmem:[%s9146_s30 + $0xac] sm:$0xf]  ;;  %v7249_v6 = vld [vmem:[%s9146_s30 + $0xa8] sm:$0xe] }
 0x1ff   : > { %v11629_v24 = vpop.f32.mrf.mxu1  ;;  %v2018_v5 = vsel %vm9707_vm6, %v7262_v1, %v2017_v37  ;;  %v2038_v55 = vrot.slane %v9045_v26, 5  ;;  %v12694_v57 = vld [vmem:[#allocation15_spill] sm:$0xff]  ;;  %v7265_v47 = vrot.slane %v7249_v6, 9  ;;  %v9047_v52 = vld [vmem:[%s9146_s30 + $0xb0] sm:$0x1] }
 0x200   : > { %8831 = vmatmul.mubr.msk.bf16.gmra.mxu0 %vm2123_vm1, %v12690_v30  ;;  %v11626_v34 = vpop.f32.mrf.mxu0  ;;  %v2026_v30 = vrot.slane %v2024_v27, 4  ;;  %v2021_v56 = vsel %vm9707_vm6, %v2019_v21, %v2020_v15  ;;  %v7250_v6 = vld [vmem:[%s9146_s30 + $0xb4] sm:$0xe] }
 0x201   : > { %8834 = vmatprep.mubr.msk.bf16.mxu0 %vm2123_vm1, %v12691_v29  ;;  %v11634_v44 = vpop.f32.mrf.mxu1  ;;  %v7691_v20 = vcombine.low %v2018_v5, %v2021_v56  ;;  %v2040_v15 = vrot.slane %v2038_v55, 4  ;;  %v2039_v26 = vsel %vm9707_vm6, %v7265_v47, %v2038_v55 }
 0x202   : > { %v11632_v8 = vpop.f32.mrf.mxu0  ;;  %8865 = vmatmul.mubr.msk.bf16.gmra.mxu1 %vm2123_vm1, %v7687_v25  ;;  %v2027_v25 = vrot.slane %v9043_v39, 5 }
 0x203   : > { %8868 = vmatprep.mubr.msk.bf16.mxu1 %vm2123_vm1, %v7688_v50  ;;  %v11645_v40 = vpop.f32.mrf.mxu1 }
 0x204   : > { %v11642_v23 = vpop.f32.mrf.mxu0  ;;  %v2028_v3 = vsel %vm9707_vm6, %v2026_v30, %v2027_v25  ;;  %v2041_v30 = vrot.slane %v9047_v52, 5 }
 0x205   : > { %v11658_v33 = vpop.f32.mrf.mxu1  ;;  %v7692_v41 = vcombine.low %v2025_v38, %v2028_v3  ;;  %v9048_v38 = vld [vmem:[%s9146_s30 + $0xb8] sm:$0xf] }
 0x206   : > { %v11653_v28 = vpop.f32.mrf.mxu0  ;;  %v2045_v3 = vrot.slane %v9048_v38, 5 }
 0x207   : > { %v11665_v2 = vpop.f32.mrf.mxu1 }
 0x208   : > { %8835 = vmatmul.mubr.msk.bf16.gmra.mxu0 %vm2123_vm1, %v12692_v36  ;;  %v11662_v58 = vpop.f32.mrf.mxu0  ;;  %v12695_v36 = vld [vmem:[#allocation58_spill] sm:$0xff]  ;;  %v2047_v47 = vrot.slane %v2045_v3, 4 }
 0x209   : > { %8838 = vmatprep.mubr.msk.bf16.mxu0 %vm2123_vm1, %v12693_v19  ;;  %v11670_v50 = vpop.f32.mrf.mxu1  ;;  %v2033_v19 = vrot.slane %v2031_v60, 4 }
 0x20a   : > { %v11668_v29 = vpop.f32.mrf.mxu0  ;;  %8869 = vmatmul.mubr.msk.bf16.gmra.mxu1 %vm2123_vm1, %v7689_v59  ;;  %v7264_v59 = vrot.slane %v7248_v0, 9 }
 0x20b   : > { %8872 = vmatprep.mubr.msk.bf16.mxu1 %vm2123_vm1, %v7690_v14  ;;  %v11681_v12 = vpop.f32.mrf.mxu1  ;;  %v9046_v14 = vld [vmem:[%s9146_s30 + $0xa4] sm:$0x1] }
 0x20c   : > { %v11678_v10 = vpop.f32.mrf.mxu0  ;;  %v2034_v1 = vrot.slane %v9046_v14, 5  ;;  %v2032_v5 = vsel %vm9707_vm6, %v7264_v59, %v2031_v60 }
 0x20d   : > { %v11694_v35 = vpop.f32.mrf.mxu1 }
 0x20e   : > { %v11689_v37 = vpop.f32.mrf.mxu0  ;;  %v2035_v56 = vsel %vm9707_vm6, %v2033_v19, %v2034_v1  ;;  %v7266_v1 = vrot.slane %v7250_v6, 9 }
 0x20f   : > { %v11701_v21 = vpop.f32.mrf.mxu1  ;;  %v7693_v19 = vcombine.low %v2032_v5, %v2035_v56 }
 0x210   : > { %8839 = vmatmul.mubr.msk.bf16.gmra.mxu0 %vm2123_vm1, %v12694_v57  ;;  %v11698_v27 = vpop.f32.mrf.mxu0  ;;  %v2042_v57 = vsel %vm9707_vm6, %v2040_v15, %v2041_v30  ;;  %v9050_v15 = vld [vmem:[%s9146_s30 + $0xbc] sm:$0x1] }
 0x211   : > { %8842 = vmatprep.mubr.msk.bf16.mxu0 %vm2123_vm1, %v12695_v36  ;;  %v11706_v25 = vpop.f32.mrf.mxu1  ;;  %v7694_v14 = vcombine.low %v2039_v26, %v2042_v57  ;;  %v2048_v52 = vrot.slane %v9050_v15, 5  ;;  %v9052_v57 = vld [vmem:[%s9146_s30 + $0xd0] sm:$0xf] }
 0x212   : > { %v11704_v39 = vpop.f32.mrf.mxu0  ;;  %8873 = vmatmul.mubr.msk.bf16.gmra.mxu1 %vm2123_vm1, %v7691_v20  ;;  %v9049_v20 = vld [vmem:[%s9146_s30 + $0xc4] sm:$0xf]  ;;  %v2059_v6 = vrot.slane %v9052_v57, 5 }
 0x213   : > { %8876 = vmatprep.mubr.msk.bf16.mxu1 %vm2123_vm1, %v7692_v41  ;;  %v11717_v0 = vpop.f32.mrf.mxu1  ;;  %v2052_v36 = vrot.slane %v9049_v20, 5  ;;  %v7251_v41 = vld [vmem:[%s9146_s30 + $0xc0] sm:$0xe]  ;;  %v9051_v20 = vld [vmem:[%s9146_s30 + $0xc8] sm:$0x1]  ;;  %v2049_v56 = vsel %vm9707_vm6, %v2047_v47, %v2048_v52 }
 0x214   : > { %v11714_v53 = vpop.f32.mrf.mxu0  ;;  %v7267_v38 = vrot.slane %v7251_v41, 9 }
 0x215   : > { %12696 = vst [vmem:[#allocation21_spill] sm:$0xff] %v11714_v53  ;;  %v11730_v59 = vpop.f32.mrf.mxu1 }
 0x216   : > { %v11725_v60 = vpop.f32.mrf.mxu0  ;;  %v2053_v15 = vsel %vm9707_vm6, %v7267_v38, %v2052_v36  ;;  %v9053_v38 = vld [vmem:[%s9146_s30 + $0xd4] sm:$0x1] }
 0x217   : > { %12697 = vst [vmem:[#allocation26_spill] sm:$0xff] %v11725_v60  ;;  %v11737_v30 = vpop.f32.mrf.mxu1  ;;  %v2055_v60 = vrot.slane %v9051_v20, 5 }
 0x218   : > { %8843 = vmatmul.mubr.msk.bf16.gmra.mxu0 %vm2123_vm1, %v11107_v61  ;;  %v11734_v55 = vpop.f32.mrf.mxu0  ;;  %v2054_v61 = vrot.slane %v2052_v36, 4  ;;  %v2061_v36 = vrot.slane %v2059_v6, 4 }
 0x219   : > { %8846 = vmatprep.mubr.msk.bf16.mxu0 %vm2123_vm1, %v11114_v17  ;;  %v11742_v5 = vpop.f32.mrf.mxu1  ;;  %v2046_v17 = vsel %vm9707_vm6, %v7266_v1, %v2045_v3 }
 0x21a   : > { %v11740_v53 = vpop.f32.mrf.mxu0  ;;  %8877 = vmatmul.mubr.msk.bf16.gmra.mxu1 %vm2123_vm1, %v7693_v19  ;;  %v2056_v19 = vsel %vm9707_vm6, %v2054_v61, %v2055_v60  ;;  %v7695_v1 = vcombine.low %v2046_v17, %v2049_v56 }
 0x21b   : > { %8880 = vmatprep.mubr.msk.bf16.mxu1 %vm2123_vm1, %v7694_v14  ;;  %v11753_v41 = vpop.f32.mrf.mxu1  ;;  %v7252_v14 = vld [vmem:[%s9146_s30 + $0xcc] sm:$0xe]  ;;  %v7696_v52 = vcombine.low %v2053_v15, %v2056_v19 }
 0x21c   : > { %v11750_v26 = vpop.f32.mrf.mxu0  ;;  %v7268_v57 = vrot.slane %v7252_v14, 9 }
 0x21d   : > { %12698 = vst [vmem:[#allocation29_spill] sm:$0xff] %v11750_v26  ;;  %v11764_v3 = vpop.f32.mrf.mxu1  ;;  %v2062_v26 = vrot.slane %v9053_v38, 5 }
 0x21e   : > { %v11760_v20 = vpop.f32.mrf.mxu0 }
 0x21f   : > { %12699 = vst [vmem:[#allocation67_spill] sm:$0xff] %v11760_v20  ;;  %v11771_v60 = vpop.f32.mrf.mxu1 }
 0x220   : > { %8847 = vmatmul.mubr.msk.bf16.gmra.mxu0 %vm2123_vm1, %v11153_v48  ;;  %v11768_v47 = vpop.f32.mrf.mxu0  ;;  %v2060_v48 = vsel %vm9707_vm6, %v7268_v57, %v2059_v6 }
 0x221   : > { %8850 = vmatprep.mubr.msk.bf16.mxu0 %vm2123_vm1, %v11158_v51  ;;  %v11775_v20 = vpop.f32.mrf.mxu1  ;;  %v2063_v51 = vsel %vm9707_vm6, %v2061_v36, %v2062_v26 }
 0x222   : > { %v11773_v61 = vpop.f32.mrf.mxu0  ;;  %8881 = vmatmul.mubr.msk.bf16.gmra.mxu1 %vm2123_vm1, %v7695_v1  ;;  %v7697_v14 = vcombine.low %v2060_v48, %v2063_v51  ;;  %v4374_v48 = vadd.f32 %v11565_v9, %v11534_v13  ;;  %v11821_v13 = vld [vmem:[%s12353_s2] ss:$0 sm:$0xff] }
 0x223   : > { %8884 = vmatprep.mubr.msk.bf16.mxu1 %vm2123_vm1, %v7696_v52  ;;  %v11785_v56 = vpop.f32.mrf.mxu1 }
 0x224   : > { %v11783_v17 = vpop.f32.mrf.mxu0 }
 0x225   : > { %v11791_v19 = vpop.f32.mrf.mxu1 }
 0x226   : > { %v11787_v15 = vpop.f32.mrf.mxu0 }
 0x227   : > { %12700 = vst [vmem:[#allocation69_spill] sm:$0xff] %v11787_v15  ;;  %v11795_v52 = vpop.f32.mrf.mxu1 }
 0x228   : > { %8851 = vmatmul.mubr.msk.bf16.gmra.mxu0 %vm2123_vm1, %v11185_v42  ;;  %v11793_v1 = vpop.f32.mrf.mxu0  ;;  %12702 = vst [vmem:[#allocation32_spill] sm:$0xff] %v11795_v52  ;;  %v4382_v42 = vadd.f32 %v11544_v46, %v11517_v32 }
 0x229   : > { %12701 = vst [vmem:[#allocation28_spill] sm:$0xff] %v11793_v1  ;;  %v11799_v63 = vpop.f32.mrf.mxu1 }
 0x22a   : > { %v11797_v6 = vpop.f32.mrf.mxu0  ;;  %12704 = vst [vmem:[#allocation72_spill] sm:$0xff] %v11799_v63  ;;  %8885 = vmatmul.mubr.msk.bf16.gmra.mxu1 %vm2123_vm1, %v7697_v14  ;;  %v4385_v14 = vadd.f32 %v11580_v31, %v11541_v45  ;;  %v4398_v31 = vadd.f32 %v11596_v7, %v11575_v16 }
 0x22b   : > { %12703 = vst [vmem:[#allocation71_spill] sm:$0xff] %v11797_v6  ;;  %v11804_v57 = vpop.f32.mrf.mxu1 }
 0x22c   : > { %v11802_v26 = vpop.f32.mrf.mxu0  ;;  %12706 = vst [vmem:[#allocation33_spill] sm:$0xff] %v11804_v57  ;;  %v4377_v57 = vadd.f32 %v11589_v49, %v11562_v62  ;;  %v4390_v62 = vadd.f32 %v11609_v43, %v11584_v22 }
 0x22d   : > { %12705 = vst [vmem:[#allocation73_spill] sm:$0xff] %v11802_v26  ;;  %v11808_v38 = vpop.f32.mrf.mxu1 }
 0x22e   : > { %12707 = vst [vmem:[#allocation36_spill] sm:$0xff] %v11808_v38 }
 0x22f   : > { %v8688_v36 = vpop.f32.mrf.mxu0  ;;  %v11812_v6 = vpop.f32.mrf.mxu1 }
 0x230   : > { %v4784_v51 = vadd.f32 %v8688_v36, %v4382_v42 }
 0x231   : > { %v4655_v1 = vpop.f32.mrf.mxu0 }
 0x232   : > { %v4782_v63 = vadd.f32 %v4655_v1, %v4374_v48  ;;  %v8722_v15 = vpop.f32.mrf.mxu1 }
 0x233   : > { %v8689_v26 = vpop.f32.mrf.mxu0  ;;  %v5082_v32 = vadd.f32 %v8722_v15, %v4784_v51  ;;  %v11831_v15 = vld [vmem:[%s12354_s3] ss:$0 sm:$0xff] }
 0x234   : > { %v4785_v46 = vadd.f32 %v8689_v26, %v4385_v14  ;;  %v4953_v38 = vpop.f32.mrf.mxu1 }
 0x235   : > { %v4658_v52 = vpop.f32.mrf.mxu0  ;;  %v6482_v9 = vmul.f32 %v11821_v13, %v5082_v32  ;;  %v5080_v42 = vadd.f32 %v4953_v38, %v4782_v63  ;;  %v4393_v32 = vadd.f32 %v11629_v24, %v11606_v18 }
 0x236   : > { %v4783_v36 = vadd.f32 %v4658_v52, %v4377_v57  ;;  %v8723_v49 = vpop.f32.mrf.mxu1  ;;  %v4401_v52 = vadd.f32 %v11622_v11, %v11594_v4 }
 0x237   : > { %v8692_v45 = vpop.f32.mrf.mxu0  ;;  %v6514_v1 = vadd.f32 %v11831_v15, %v6482_v9  ;;  %v6480_v26 = vmul.f32 %v11821_v13, %v5080_v42  ;;  %v5083_v48 = vadd.f32 %v8723_v49, %v4785_v46 }
 0x238   : > { %v4956_v57 = vpop.f32.mrf.mxu1  ;;  %v4788_v16 = vadd.f32 %v8692_v45, %v4398_v31  ;;  %v4414_v31 = vadd.f32 %v11634_v44, %v11617_v54 }
 0x239   : > { %v4671_v63 = vpop.f32.mrf.mxu0  ;;  %v6546_v38 = vmax.f32 %v6514_v1, 0.0  ;;  %v6512_v22 = vadd.f32 %v11831_v15, %v6480_v26  ;;  %v6483_v43 = vmul.f32 %v11821_v13, %v5083_v48  ;;  %v5081_v51 = vadd.f32 %v4956_v57, %v4783_v36 }
 0x23a   : > { %v4786_v7 = vadd.f32 %v4671_v63, %v4390_v62  ;;  %v8726_v9 = vpop.f32.mrf.mxu1 }
 0x23b   : > { %v8693_v14 = vpop.f32.mrf.mxu0  ;;  %v8010_v42 = vpack.c.bf16 %v6546_v38, %v6546_v38  ;;  %v6544_v49 = vmax.f32 %v6512_v22, 0.0  ;;  %v6515_v4 = vadd.f32 %v11831_v15, %v6483_v43  ;;  %v6481_v11 = vmul.f32 %v11821_v13, %v5081_v51 }
 0x23c   : > { %v4789_v46 = vadd.f32 %v8693_v14, %v4401_v52  ;;  %v4969_v62 = vpop.f32.mrf.mxu1  ;;  %v5086_v1 = vadd.f32 %v8726_v9, %v4788_v16  ;;  %v4406_v51 = vadd.f32 %v11645_v40, %v11626_v34 }
 0x23d   : > { %v4674_v45 = vpop.f32.mrf.mxu0  ;;  %7847 = vst.msk [vmem:[%s10399_s10 + $0x108] sm:$0xf] %vm6190_vm7, %v8010_v42  ;;  %v8008_v26 = vpack.c.bf16 %v6544_v49, %v6544_v49  ;;  %v6547_v18 = vmax.f32 %v6515_v4, 0.0  ;;  %v6513_v24 = vadd.f32 %v11831_v15, %v6481_v11  ;;  %v5084_v48 = vadd.f32 %v4969_v62, %v4786_v7 }
 0x23e   : > { %v4787_v36 = vadd.f32 %v4674_v45, %v4393_v32  ;;  %v6486_v52 = vmul.f32 %v11821_v13, %v5086_v1  ;;  %v8727_v57 = vpop.f32.mrf.mxu1  ;;  %v4417_v7 = vadd.f32 %v11658_v33, %v11632_v8  ;;  %v4409_v11 = vadd.f32 %v11665_v2, %v11642_v23 }
 0x23f   : > { %7845 = vst.msk [vmem:[%s10399_s10 + $0x100] sm:$0xf] %vm6190_vm7, %v8008_v26  ;;  %v8011_v22 = vpack.c.bf16 %v6547_v18, %v6547_v18  ;;  %v6545_v54 = vmax.f32 %v6513_v24, 0.0  ;;  %v6484_v44 = vmul.f32 %v11821_v13, %v5084_v48  ;;  %v5087_v16 = vadd.f32 %v8727_v57, %v4789_v46 }
 0x240   : > { %v8696_v63 = vpop.f32.mrf.mxu0  ;;  %v6518_v14 = vadd.f32 %v11831_v15, %v6486_v52  ;;  %v4972_v32 = vpop.f32.mrf.mxu1 }
 0x241   : > { %v4792_v38 = vadd.f32 %v8696_v63, %v4414_v31  ;;  %7848 = vst.msk [vmem:[%s10399_s10 + $0x10c] sm:$0xf] %vm6190_vm7, %v8011_v22  ;;  %v8009_v9 = vpack.c.bf16 %v6545_v54, %v6545_v54  ;;  %v6516_v42 = vadd.f32 %v11831_v15, %v6484_v44  ;;  %v6487_v49 = vmul.f32 %v11821_v13, %v5087_v16 }
 0x242   : > { %v4687_v43 = vpop.f32.mrf.mxu0  ;;  %v5085_v4 = vadd.f32 %v4972_v32, %v4787_v36  ;;  %v6550_v45 = vmax.f32 %v6518_v14, 0.0  ;;  %v8730_v34 = vpop.f32.mrf.mxu1  ;;  %v4430_v36 = vadd.f32 %v11670_v50, %v11653_v28  ;;  %v4422_v22 = vadd.f32 %v11681_v12, %v11662_v58 }
 0x243   : > { %v4790_v40 = vadd.f32 %v4687_v43, %v4406_v51  ;;  %7846 = vst.msk [vmem:[%s10399_s10 + $0x104] sm:$0xf] %vm6190_vm7, %v8009_v9  ;;  %v6548_v8 = vmax.f32 %v6516_v42, 0.0  ;;  %v6519_v33 = vadd.f32 %v11831_v15, %v6487_v49  ;;  %v5090_v1 = vadd.f32 %v8730_v34, %v4792_v38 }
 0x244   : > { %v8697_v46 = vpop.f32.mrf.mxu0  ;;  %v6485_v62 = vmul.f32 %v11821_v13, %v5085_v4  ;;  %v8014_v18 = vpack.c.bf16 %v6550_v45, %v6550_v45  ;;  %v4985_v23 = vpop.f32.mrf.mxu1  ;;  %v4433_v4 = vadd.f32 %v11694_v35, %v11668_v29 }
 0x245   : > { %v4793_v31 = vadd.f32 %v8697_v46, %v4417_v7  ;;  %v8012_v24 = vpack.c.bf16 %v6548_v8, %v6548_v8  ;;  %v6551_v48 = vmax.f32 %v6519_v33, 0.0  ;;  %v6490_v52 = vmul.f32 %v11821_v13, %v5090_v1 }
 0x246   : > { %v4690_v26 = vpop.f32.mrf.mxu0  ;;  %v6517_v63 = vadd.f32 %v11831_v15, %v6485_v62  ;;  %7851 = vst.msk [vmem:[%s10399_s10 + $0x118] sm:$0xf] %vm6190_vm7, %v8014_v18  ;;  %v8731_v38 = vpop.f32.mrf.mxu1  ;;  %v5088_v54 = vadd.f32 %v4985_v23, %v4790_v40  ;;  %v4425_v46 = vadd.f32 %v11701_v21, %v11678_v10  ;;  %v4446_v62 = vadd.f32 %v11706_v25, %v11689_v37 }
 0x247   : > { %v4791_v2 = vadd.f32 %v4690_v26, %v4409_v11  ;;  %7849 = vst.msk [vmem:[%s10399_s10 + $0x110] sm:$0xf] %vm6190_vm7, %v8012_v24  ;;  %v8015_v28 = vpack.c.bf16 %v6551_v48, %v6551_v48  ;;  %v6522_v16 = vadd.f32 %v11831_v15, %v6490_v52  ;;  %v5091_v43 = vadd.f32 %v8731_v38, %v4793_v31 }
 0x248   : > { %v8700_v57 = vpop.f32.mrf.mxu0  ;;  %v6549_v50 = vmax.f32 %v6517_v63, 0.0  ;;  %v6488_v7 = vmul.f32 %v11821_v13, %v5088_v54  ;;  %v4988_v14 = vpop.f32.mrf.mxu1  ;;  %v4449_v38 = vadd.f32 %v11730_v59, %v11704_v39 }
 0x249   : > { %v4796_v44 = vadd.f32 %v8700_v57, %v4430_v36  ;;  %7852 = vst.msk [vmem:[%s10399_s10 + $0x11c] sm:$0xf] %vm6190_vm7, %v8015_v28  ;;  %v6554_v12 = vmax.f32 %v6522_v16, 0.0  ;;  %v6491_v9 = vmul.f32 %v11821_v13, %v5091_v43  ;;  %v5089_v42 = vadd.f32 %v4988_v14, %v4791_v2 }
 0x24a   : > { %v4703_v51 = vpop.f32.mrf.mxu0  ;;  %v8013_v58 = vpack.c.bf16 %v6549_v50, %v6549_v50  ;;  %v6520_v11 = vadd.f32 %v11831_v15, %v6488_v7  ;;  %v8734_v45 = vpop.f32.mrf.mxu1  ;;  %v4438_v2 = vadd.f32 %v11717_v0, %v11698_v27 }
 0x24b   : > { %v4794_v32 = vadd.f32 %v4703_v51, %v4422_v22  ;;  %v8018_v34 = vpack.c.bf16 %v6554_v12, %v6554_v12  ;;  %v6523_v40 = vadd.f32 %v11831_v15, %v6491_v9  ;;  %v6489_v31 = vmul.f32 %v11821_v13, %v5089_v42  ;;  %v12708_v9 = vld [vmem:[#allocation21_spill] sm:$0xff] }
 0x24c   : > { %v8701_v49 = vpop.f32.mrf.mxu0  ;;  %7850 = vst.msk [vmem:[%s10399_s10 + $0x114] sm:$0xf] %vm6190_vm7, %v8013_v58  ;;  %v5094_v8 = vadd.f32 %v8734_v45, %v4796_v44  ;;  %v6552_v1 = vmax.f32 %v6520_v11, 0.0  ;;  %v5001_v29 = vpop.f32.mrf.mxu1  ;;  %v4441_v42 = vadd.f32 %v11737_v30, %v12708_v9 }
 0x24d   : > { %v4797_v35 = vadd.f32 %v8701_v49, %v4433_v4  ;;  %7855 = vst.msk [vmem:[%s10399_s10 + $0x128] sm:$0xf] %vm6190_vm7, %v8018_v34  ;;  %v6555_v10 = vmax.f32 %v6523_v40, 0.0  ;;  %v6521_v21 = vadd.f32 %v11831_v15, %v6489_v31  ;;  %v5092_v18 = vadd.f32 %v5001_v29, %v4794_v32  ;;  %v12709_v49 = vld [vmem:[#allocation26_spill] sm:$0xff] }
 0x24e   : > { %v4706_v33 = vpop.f32.mrf.mxu0  ;;  %v6494_v36 = vmul.f32 %v11821_v13, %v5094_v8  ;;  %v8016_v24 = vpack.c.bf16 %v6552_v1, %v6552_v1  ;;  %v8735_v37 = vpop.f32.mrf.mxu1  ;;  %v4462_v4 = vadd.f32 %v11742_v5, %v12709_v49 }
 0x24f   : > { %v4795_v26 = vadd.f32 %v4706_v33, %v4425_v46  ;;  %v8019_v48 = vpack.c.bf16 %v6555_v10, %v6555_v10  ;;  %v6553_v63 = vmax.f32 %v6521_v21, 0.0  ;;  %v6492_v57 = vmul.f32 %v11821_v13, %v5092_v18 }
 0x250   : > { %v8704_v23 = vpop.f32.mrf.mxu0  ;;  %v6526_v52 = vadd.f32 %v11831_v15, %v6494_v36  ;;  %7853 = vst.msk [vmem:[%s10399_s10 + $0x120] sm:$0xf] %vm6190_vm7, %v8016_v24  ;;  %v5004_v54 = vpop.f32.mrf.mxu1  ;;  %v5095_v44 = vadd.f32 %v8735_v37, %v4797_v35  ;;  %v4454_v33 = vadd.f32 %v11753_v41, %v11734_v55  ;;  %v4465_v36 = vadd.f32 %v11764_v3, %v11740_v53 }
 0x251   : > { %v4800_v25 = vadd.f32 %v8704_v23, %v4446_v62  ;;  %7856 = vst.msk [vmem:[%s10399_s10 + $0x12c] sm:$0xf] %vm6190_vm7, %v8019_v48  ;;  %v8017_v27 = vpack.c.bf16 %v6553_v63, %v6553_v63  ;;  %v6524_v50 = vadd.f32 %v11831_v15, %v6492_v57  ;;  %v5093_v16 = vadd.f32 %v5004_v54, %v4795_v26  ;;  %v12710_v48 = vld [vmem:[#allocation29_spill] sm:$0xff] }
 0x252   : > { %v4719_v22 = vpop.f32.mrf.mxu0  ;;  %v6558_v0 = vmax.f32 %v6526_v52, 0.0  ;;  %v6495_v51 = vmul.f32 %v11821_v13, %v5095_v44  ;;  %v8738_v7 = vpop.f32.mrf.mxu1  ;;  %v4457_v63 = vadd.f32 %v11771_v60, %v12710_v48 }
 0x253   : > { %v4798_v28 = vadd.f32 %v4719_v22, %v4438_v2  ;;  %7854 = vst.msk [vmem:[%s10399_s10 + $0x124] sm:$0xf] %vm6190_vm7, %v8017_v27  ;;  %v6556_v59 = vmax.f32 %v6524_v50, 0.0  ;;  %v6493_v32 = vmul.f32 %v11821_v13, %v5093_v16  ;;  %v5098_v58 = vadd.f32 %v8738_v7, %v4800_v25  ;;  %v12711_v7 = vld [vmem:[#allocation67_spill] sm:$0xff] }
 0x254   : > { %v8705_v43 = vpop.f32.mrf.mxu0  ;;  %v8022_v39 = vpack.c.bf16 %v6558_v0, %v6558_v0  ;;  %v6527_v46 = vadd.f32 %v11831_v15, %v6495_v51  ;;  %v5017_v11 = vpop.f32.mrf.mxu1 }
 0x255   : > { %v4801_v14 = vadd.f32 %v8705_v43, %v4449_v38  ;;  %v8020_v45 = vpack.c.bf16 %v6556_v59, %v6556_v59  ;;  %v6525_v34 = vadd.f32 %v11831_v15, %v6493_v32  ;;  %v6498_v40 = vmul.f32 %v11821_v13, %v5098_v58 }
 0x256   : > { %v4722_v12 = vpop.f32.mrf.mxu0  ;;  %7859 = vst.msk [vmem:[%s10399_s10 + $0x138] sm:$0xf] %vm6190_vm7, %v8022_v39  ;;  %v5096_v31 = vadd.f32 %v5017_v11, %v4798_v28  ;;  %v6559_v62 = vmax.f32 %v6527_v46, 0.0  ;;  %v8739_v30 = vpop.f32.mrf.mxu1  ;;  %v4470_v39 = vadd.f32 %v11785_v56, %v11768_v47 }
 0x257   : > { %v4799_v1 = vadd.f32 %v4722_v12, %v4441_v42  ;;  %7857 = vst.msk [vmem:[%s10399_s10 + $0x130] sm:$0xf] %vm6190_vm7, %v8020_v45  ;;  %v6557_v5 = vmax.f32 %v6525_v34, 0.0  ;;  %v6530_v35 = vadd.f32 %v11831_v15, %v6498_v40  ;;  %v5099_v10 = vadd.f32 %v8739_v30, %v4801_v14 }
 0x258   : > { %v8708_v8 = vpop.f32.mrf.mxu0  ;;  %v6496_v26 = vmul.f32 %v11821_v13, %v5096_v31  ;;  %v8023_v18 = vpack.c.bf16 %v6559_v62, %v6559_v62  ;;  %v5020_v55 = vpop.f32.mrf.mxu1  ;;  %v4478_v14 = vadd.f32 %v11775_v20, %v12711_v7 }
 0x259   : > { %v4804_v29 = vadd.f32 %v8708_v8, %v4462_v4  ;;  %v8021_v23 = vpack.c.bf16 %v6557_v5, %v6557_v5  ;;  %v6562_v2 = vmax.f32 %v6530_v35, 0.0  ;;  %v6499_v37 = vmul.f32 %v11821_v13, %v5099_v10  ;;  %v12712_v8 = vld [vmem:[#allocation32_spill] sm:$0xff] }
 0x25a   : > { %v4735_v21 = vpop.f32.mrf.mxu0  ;;  %v6528_v24 = vadd.f32 %v11831_v15, %v6496_v26  ;;  %7860 = vst.msk [vmem:[%s10399_s10 + $0x13c] sm:$0xf] %vm6190_vm7, %v8023_v18  ;;  %v8742_v52 = vpop.f32.mrf.mxu1  ;;  %v5097_v57 = vadd.f32 %v5020_v55, %v4799_v1  ;;  %v4481_v4 = vadd.f32 %v11791_v19, %v11773_v61  ;;  %v12713_v26 = vld [vmem:[#allocation69_spill] sm:$0xff]  ;;  %v12714_v10 = vld [vmem:[#allocation72_spill] sm:$0xff] }
 0x25b   : > { %v4802_v41 = vadd.f32 %v4735_v21, %v4454_v33  ;;  %7858 = vst.msk [vmem:[%s10399_s10 + $0x134] sm:$0xf] %vm6190_vm7, %v8021_v23  ;;  %v8026_v53 = vpack.c.bf16 %v6562_v2, %v6562_v2  ;;  %v6531_v38 = vadd.f32 %v11831_v15, %v6499_v37  ;;  %v5102_v54 = vadd.f32 %v8742_v52, %v4804_v29 }
 0x25c   : > { %v8709_v25 = vpop.f32.mrf.mxu0  ;;  %v6560_v3 = vmax.f32 %v6528_v24, 0.0  ;;  %v6497_v28 = vmul.f32 %v11821_v13, %v5097_v57  ;;  %v5033_v27 = vpop.f32.mrf.mxu1  ;;  %v4473_v33 = vadd.f32 %v12712_v8, %v11783_v17  ;;  %v4494_v21 = vadd.f32 %v12714_v10, %v12713_v26 }
 0x25d   : > { %v4805_v22 = vadd.f32 %v8709_v25, %v4465_v36  ;;  %7863 = vst.msk [vmem:[%s10399_s10 + $0x148] sm:$0xf] %vm6190_vm7, %v8026_v53  ;;  %v6563_v50 = vmax.f32 %v6531_v38, 0.0  ;;  %v6502_v16 = vmul.f32 %v11821_v13, %v5102_v54  ;;  %v5100_v43 = vadd.f32 %v5033_v27, %v4802_v41  ;;  %v12716_v38 = vld [vmem:[#allocation33_spill] sm:$0xff] }
 0x25e   : > { %v4738_v44 = vpop.f32.mrf.mxu0  ;;  %v8024_v60 = vpack.c.bf16 %v6560_v3, %v6560_v3  ;;  %v6529_v59 = vadd.f32 %v11831_v15, %v6497_v28  ;;  %v8743_v32 = vpop.f32.mrf.mxu1  ;;  %v12715_v3 = vld [vmem:[#allocation28_spill] sm:$0xff] }
 0x25f   : > { %v4803_v0 = vadd.f32 %v4738_v44, %v4457_v63  ;;  %v8027_v58 = vpack.c.bf16 %v6563_v50, %v6563_v50  ;;  %v6534_v12 = vadd.f32 %v11831_v15, %v6502_v16  ;;  %v6500_v9 = vmul.f32 %v11821_v13, %v5100_v43  ;;  %v12717_v44 = vld [vmem:[#allocation71_spill] sm:$0xff]  ;;  %v12718_v28 = vld [vmem:[#allocation36_spill] sm:$0xff] }
 0x260   : > { %v8712_v51 = vpop.f32.mrf.mxu0  ;;  %7861 = vst.msk [vmem:[%s10399_s10 + $0x140] sm:$0xf] %vm6190_vm7, %v8024_v60  ;;  %v5103_v42 = vadd.f32 %v8743_v32, %v4805_v22  ;;  %v6561_v46 = vmax.f32 %v6529_v59, 0.0  ;;  %v5036_v20 = vpop.f32.mrf.mxu1  ;;  %v4486_v54 = vadd.f32 %v12716_v38, %v12715_v3  ;;  %v4497_v27 = vadd.f32 %v12718_v28, %v12717_v44 }
 0x261   : > { %v4808_v11 = vadd.f32 %v8712_v51, %v4478_v14  ;;  %7864 = vst.msk [vmem:[%s10399_s10 + $0x14c] sm:$0xf] %vm6190_vm7, %v8027_v58  ;;  %v6566_v47 = vmax.f32 %v6534_v12, 0.0  ;;  %v6532_v56 = vadd.f32 %v11831_v15, %v6500_v9  ;;  %v5101_v40 = vadd.f32 %v5036_v20, %v4803_v0  ;;  %v12719_v14 = vld [vmem:[#allocation73_spill] sm:$0xff] }
 0x262   : > { %v4751_v49 = vpop.f32.mrf.mxu0  ;;  %v6503_v34 = vmul.f32 %v11821_v13, %v5103_v42  ;;  %v8025_v62 = vpack.c.bf16 %v6561_v46, %v6561_v46  ;;  %v8746_v61 = vpop.f32.mrf.mxu1 }
 0x263   : > { %v4806_v45 = vadd.f32 %v4751_v49, %v4470_v39  ;;  %v8030_v30 = vpack.c.bf16 %v6566_v47, %v6566_v47  ;;  %v6564_v1 = vmax.f32 %v6532_v56, 0.0  ;;  %v6501_v5 = vmul.f32 %v11821_v13, %v5101_v40 }
 0x264   : > { %v8713_v31 = vpop.f32.mrf.mxu0  ;;  %v6535_v29 = vadd.f32 %v11831_v15, %v6503_v34  ;;  %7862 = vst.msk [vmem:[%s10399_s10 + $0x144] sm:$0xf] %vm6190_vm7, %v8025_v62  ;;  %v5049_v36 = vpop.f32.mrf.mxu1  ;;  %v5106_v18 = vadd.f32 %v8746_v61, %v4808_v11  ;;  %v4489_v39 = vadd.f32 %v11812_v6, %v12719_v14 }
 0x265   : > { %v4809_v19 = vadd.f32 %v8713_v31, %v4481_v4  ;;  %7867 = vst.msk [vmem:[%s10399_s10 + $0x158] sm:$0xf] %vm6190_vm7, %v8030_v30  ;;  %v8028_v17 = vpack.c.bf16 %v6564_v1, %v6564_v1  ;;  %v6533_v23 = vadd.f32 %v11831_v15, %v6501_v5  ;;  %v5104_v2 = vadd.f32 %v5049_v36, %v4806_v45 }
 0x266   : > { %v4754_v35 = vpop.f32.mrf.mxu0  ;;  %v6567_v41 = vmax.f32 %v6535_v29, 0.0  ;;  %v6506_v37 = vmul.f32 %v11821_v13, %v5106_v18  ;;  %v8747_v25 = vpop.f32.mrf.mxu1 }
 0x267   : > { %v4807_v55 = vadd.f32 %v4754_v35, %v4473_v33  ;;  %7865 = vst.msk [vmem:[%s10399_s10 + $0x150] sm:$0xf] %vm6190_vm7, %v8028_v17  ;;  %v6565_v52 = vmax.f32 %v6533_v23, 0.0  ;;  %v6504_v57 = vmul.f32 %v11821_v13, %v5104_v2  ;;  %v5107_v22 = vadd.f32 %v8747_v25, %v4809_v19 }
 0x268   : > { %v8716_v24 = vpop.f32.mrf.mxu0  ;;  %v8031_v63 = vpack.c.bf16 %v6567_v41, %v6567_v41  ;;  %v6538_v0 = vadd.f32 %v11831_v15, %v6506_v37  ;;  %v5052_v60 = vpop.f32.mrf.mxu1 }
 0x269   : > { %v4812_v48 = vadd.f32 %v8716_v24, %v4494_v21  ;;  %v8029_v50 = vpack.c.bf16 %v6565_v52, %v6565_v52  ;;  %v6536_v16 = vadd.f32 %v11831_v15, %v6504_v57  ;;  %v6507_v43 = vmul.f32 %v11821_v13, %v5107_v22 }
 0x26a   : > { %v4767_v53 = vpop.f32.mrf.mxu0  ;;  %7868 = vst.msk [vmem:[%s10399_s10 + $0x15c] sm:$0xf] %vm6190_vm7, %v8031_v63  ;;  %v5105_v51 = vadd.f32 %v5052_v60, %v4807_v55  ;;  %v6570_v59 = vmax.f32 %v6538_v0, 0.0  ;;  %v8750_v32 = vpop.f32.mrf.mxu1 }
 0x26b   : > { %v4810_v58 = vadd.f32 %v4767_v53, %v4486_v54  ;;  %7866 = vst.msk [vmem:[%s10399_s10 + $0x154] sm:$0xf] %vm6190_vm7, %v8029_v50  ;;  %v6568_v9 = vmax.f32 %v6536_v16, 0.0  ;;  %v6539_v42 = vadd.f32 %v11831_v15, %v6507_v43  ;;  %v5110_v4 = vadd.f32 %v8750_v32, %v4812_v48 }
 0x26c   : > { %v8717_v7 = vpop.f32.mrf.mxu0  ;;  %v6505_v49 = vmul.f32 %v11821_v13, %v5105_v51  ;;  %v8034_v20 = vpack.c.bf16 %v6570_v59, %v6570_v59  ;;  %v5065_v11 = vpop.f32.mrf.mxu1 }
 0x26d   : > { %v4813_v12 = vadd.f32 %v8717_v7, %v4497_v27  ;;  %v8032_v47 = vpack.c.bf16 %v6568_v9, %v6568_v9  ;;  %v6571_v6 = vmax.f32 %v6539_v42, 0.0  ;;  %v6510_v34 = vmul.f32 %v11821_v13, %v5110_v4 }
 0x26e   : > { %v4770_v46 = vpop.f32.mrf.mxu0  ;;  %v6537_v56 = vadd.f32 %v11831_v15, %v6505_v49  ;;  %7871 = vst.msk [vmem:[%s10399_s10 + $0x168] sm:$0xf] %vm6190_vm7, %v8034_v20  ;;  %v8751_v31 = vpop.f32.mrf.mxu1  ;;  %v5108_v8 = vadd.f32 %v5065_v11, %v4810_v58 }
 0x26f   : > { %v4811_v45 = vadd.f32 %v4770_v46, %v4489_v39  ;;  %7869 = vst.msk [vmem:[%s10399_s10 + $0x160] sm:$0xf] %vm6190_vm7, %v8032_v47  ;;  %v8035_v33 = vpack.c.bf16 %v6571_v6, %v6571_v6  ;;  %v6542_v61 = vadd.f32 %v11831_v15, %v6510_v34  ;;  %v5111_v19 = vadd.f32 %v8751_v31, %v4813_v12 }
 0x270   : > { %v11989_v40 = vpop.f32.mrf.mxu0  ;;  %v6569_v62 = vmax.f32 %v6537_v56, 0.0  ;;  %v6508_v1 = vmul.f32 %v11821_v13, %v5108_v8  ;;  %v5068_v29 = vpop.f32.mrf.mxu1 }
 0x271   : > { %7872 = vst.msk [vmem:[%s10399_s10 + $0x16c] sm:$0xf] %vm6190_vm7, %v8035_v33  ;;  %v6574_v35 = vmax.f32 %v6542_v61, 0.0  ;;  %v6511_v26 = vmul.f32 %v11821_v13, %v5111_v19  ;;  %v5109_v10 = vadd.f32 %v5068_v29, %v4811_v45 }
 0x272   : > { %v11996_v30 = vpop.f32.mrf.mxu0  ;;  %v8033_v5 = vpack.c.bf16 %v6569_v62, %v6569_v62  ;;  %v6540_v36 = vadd.f32 %v11831_v15, %v6508_v1  ;;  %v12005_v18 = vpop.f32.mrf.mxu1 }
 0x273   : > { %v8038_v55 = vpack.c.bf16 %v6574_v35, %v6574_v35  ;;  %v6543_v17 = vadd.f32 %v11831_v15, %v6511_v26  ;;  %v6509_v41 = vmul.f32 %v11821_v13, %v5109_v10 }
 0x274   : > { %v12002_v21 = vpop.f32.mrf.mxu0  ;;  %7870 = vst.msk [vmem:[%s10399_s10 + $0x164] sm:$0xf] %vm6190_vm7, %v8033_v5  ;;  %v6572_v2 = vmax.f32 %v6540_v36, 0.0  ;;  %v12013_v24 = vpop.f32.mrf.mxu1 }
 0x275   : > { %7875 = vst.msk [vmem:[%s10399_s10 + $0x178] sm:$0xf] %vm6190_vm7, %v8038_v55  ;;  %v6575_v37 = vmax.f32 %v6543_v17, 0.0  ;;  %v6541_v25 = vadd.f32 %v11831_v15, %v6509_v41 }
 0x276   : > { %v12011_v23 = vpop.f32.mrf.mxu0  ;;  %v8036_v63 = vpack.c.bf16 %v6572_v2, %v6572_v2  ;;  %v12020_v52 = vpop.f32.mrf.mxu1 }
 0x277   : > { %v8039_v57 = vpack.c.bf16 %v6575_v37, %v6575_v37  ;;  %v6573_v22 = vmax.f32 %v6541_v25, 0.0 }
 0x278   : > { %v12018_v48 = vpop.f32.mrf.mxu0  ;;  %7873 = vst.msk [vmem:[%s10399_s10 + $0x170] sm:$0xf] %vm6190_vm7, %v8036_v63  ;;  %v12026_v3 = vpop.f32.mrf.mxu1 }
 0x279   : > { %7876 = vst.msk [vmem:[%s10399_s10 + $0x17c] sm:$0xf] %vm6190_vm7, %v8039_v57  ;;  %v8037_v38 = vpack.c.bf16 %v6573_v22, %v6573_v22 }
 0x27a   : > { %v12022_v53 = vpop.f32.mrf.mxu0  ;;  %v12032_v44 = vpop.f32.mrf.mxu1 }
 0x27b   : > { %7874 = vst.msk [vmem:[%s10399_s10 + $0x174] sm:$0xf] %vm6190_vm7, %v8037_v38 }
 0x27c   : > { %v12030_v54 = vpop.f32.mrf.mxu0  ;;  %v12038_v27 = vpop.f32.mrf.mxu1 }
 0x27e   : > { %v12036_v28 = vpop.f32.mrf.mxu0  ;;  %v12042_v60 = vpop.f32.mrf.mxu1 }
 0x280   : > { %v12040_v0 = vpop.f32.mrf.mxu0  ;;  %v12046_v16 = vpop.f32.mrf.mxu1 }
 0x282   : > { %v12044_v50 = vpop.f32.mrf.mxu0  ;;  %v12050_v51 = vpop.f32.mrf.mxu1 }
 0x284   : > { %v12048_v43 = vpop.f32.mrf.mxu0  ;;  %v12054_v14 = vpop.f32.mrf.mxu1 }
 0x286   : > { %v12052_v7 = vpop.f32.mrf.mxu0  ;;  %v12058_v59 = vpop.f32.mrf.mxu1 }
 0x288   : > { %v12056_v39 = vpop.f32.mrf.mxu0  ;;  %v12062_v58 = vpop.f32.mrf.mxu1 }
 0x28a   : > { %v12060_v32 = vpop.f32.mrf.mxu0  ;;  %v12066_v9 = vpop.f32.mrf.mxu1 }
 0x28c   : > { %v12064_v12 = vpop.f32.mrf.mxu0  ;;  %v12070_v49 = vpop.f32.mrf.mxu1 }
 0x28e   : > { %v12068_v42 = vpop.f32.mrf.mxu0  ;;  %v12074_v46 = vpop.f32.mrf.mxu1 }
 0x290   : > { %v12072_v4 = vpop.f32.mrf.mxu0  ;;  %v12078_v11 = vpop.f32.mrf.mxu1 }
 0x292   : > { %v12076_v20 = vpop.f32.mrf.mxu0  ;;  %v12082_v47 = vpop.f32.mrf.mxu1 }
 0x294   : > { %v12080_v45 = vpop.f32.mrf.mxu0  ;;  %v12086_v56 = vpop.f32.mrf.mxu1 }
 0x296   : > { %v12084_v6 = vpop.f32.mrf.mxu0  ;;  %v12090_v31 = vpop.f32.mrf.mxu1 }
 0x298   : > { %v12088_v34 = vpop.f32.mrf.mxu0  ;;  %v12094_v33 = vpop.f32.mrf.mxu1 }
 0x29a   : > { %v12092_v8 = vpop.f32.mrf.mxu0  ;;  %v12098_v61 = vpop.f32.mrf.mxu1 }
 0x29c   : > { %v12096_v62 = vpop.f32.mrf.mxu0  ;;  %v12102_v1 = vpop.f32.mrf.mxu1 }
 0x29e   : > { %v12100_v19 = vpop.f32.mrf.mxu0  ;;  %v12106_v5 = vpop.f32.mrf.mxu1 }
 0x2a0   : > { %v12104_v29 = vpop.f32.mrf.mxu0  ;;  %v12110_v26 = vpop.f32.mrf.mxu1 }
 0x2a1   : > { %12720 = vst [vmem:[#allocation37_spill] sm:$0xff] %v12104_v29 }
 0x2a2   : > { %v12108_v35 = vpop.f32.mrf.mxu0  ;;  %v12114_v36 = vpop.f32.mrf.mxu1 }
 0x2a3   : > { %12721 = vst [vmem:[#allocation44_spill] sm:$0xff] %v12108_v35  ;;  %12723 = vst [vmem:[#allocation47_spill] sm:$0xff] %v12114_v36 }
 0x2a4   : > { %v12112_v10 = vpop.f32.mrf.mxu0  ;;  %v12118_v17 = vpop.f32.mrf.mxu1 }
 0x2a5   : > { %12722 = vst [vmem:[#allocation46_spill] sm:$0xff] %v12112_v10  ;;  %12725 = vst [vmem:[#allocation53_spill] sm:$0xff] %v12118_v17 }
 0x2a6   : > { %v12116_v55 = vpop.f32.mrf.mxu0  ;;  %v12122_v2 = vpop.f32.mrf.mxu1 }
 0x2a7   : > { %12724 = vst [vmem:[#allocation51_spill] sm:$0xff] %v12116_v55  ;;  %12727 = vst [vmem:[#allocation9_spill] sm:$0xff] %v12122_v2  ;;  %v5334_v55 = vadd.f32 %v12005_v18, %v11989_v40 }
 0x2a8   : > { %v12120_v41 = vpop.f32.mrf.mxu0  ;;  %v12126_v25 = vpop.f32.mrf.mxu1 }
 0x2a9   : > { %12726 = vst [vmem:[#allocation6_spill] sm:$0xff] %v12120_v41  ;;  %12729 = vst [vmem:[#allocation59_spill] sm:$0xff] %v12126_v25  ;;  %v5326_v41 = vadd.f32 %v12013_v24, %v11996_v30 }
 0x2aa   : > { %v12124_v37 = vpop.f32.mrf.mxu0  ;;  %v12130_v57 = vpop.f32.mrf.mxu1 }
 0x2ab   : > { %12728 = vst [vmem:[#allocation48_spill] sm:$0xff] %v12124_v37  ;;  %12731 = vst [vmem:[#allocation45_spill] sm:$0xff] %v12130_v57 }
 0x2ac   : > { %v12128_v63 = vpop.f32.mrf.mxu0  ;;  %v12134_v38 = vpop.f32.mrf.mxu1 }
 0x2ad   : > { %12730 = vst [vmem:[#allocation61_spill] sm:$0xff] %v12128_v63  ;;  %12733 = vst [vmem:[#allocation57_spill] sm:$0xff] %v12134_v38  ;;  %v5337_v63 = vadd.f32 %v12020_v52, %v12002_v21  ;;  %v5329_v38 = vadd.f32 %v12026_v3, %v12011_v23  ;;  %v5342_v21 = vadd.f32 %v12038_v27, %v12022_v53 }
 0x2ae   : > { %v12132_v22 = vpop.f32.mrf.mxu0  ;;  %v12138_v17 = vpop.f32.mrf.mxu1  ;;  %v5345_v27 = vadd.f32 %v12046_v16, %v12036_v28 }
 0x2af   : > { %12732 = vst [vmem:[#allocation49_spill] sm:$0xff] %v12132_v22  ;;  %12734 = vst [vmem:[#allocation50_spill] sm:$0xff] %v12138_v17 }
 0x2b0   : > { %v8824_v10 = vpop.f32.mrf.mxu0  ;;  %v12142_v25 = vpop.f32.mrf.mxu1 }
 0x2b1   : > { %v5624_v37 = vadd.f32 %v8824_v10, %v5334_v55  ;;  %v5350_v55 = vadd.f32 %v12032_v44, %v12018_v48 }
 0x2b2   : > { %v5495_v2 = vpop.f32.mrf.mxu0  ;;  %v8858_v35 = vpop.f32.mrf.mxu1 }
 0x2b3   : > { %v5622_v57 = vadd.f32 %v5495_v2, %v5326_v41  ;;  %v5922_v40 = vadd.f32 %v8858_v35, %v5624_v37  ;;  %v5353_v2 = vadd.f32 %v12042_v60, %v12030_v54 }
 0x2b4   : > { %v8825_v22 = vpop.f32.mrf.mxu0  ;;  %v5793_v17 = vpop.f32.mrf.mxu1 }
 0x2b5   : > { %v5625_v18 = vadd.f32 %v8825_v22, %v5337_v63  ;;  %v6739_v29 = vmul.f32 %v11821_v13, %v5922_v40  ;;  %v5920_v30 = vadd.f32 %v5793_v17, %v5622_v57 }
 0x2b6   : > { %v5498_v36 = vpop.f32.mrf.mxu0  ;;  %v8859_v52 = vpop.f32.mrf.mxu1 }
 0x2b7   : > { %v5623_v24 = vadd.f32 %v5498_v36, %v5329_v38  ;;  %v6771_v41 = vadd.f32 %v11831_v15, %v6739_v29  ;;  %v6737_v23 = vmul.f32 %v11821_v13, %v5920_v30  ;;  %v5923_v3 = vadd.f32 %v8859_v52, %v5625_v18 }
 0x2b8   : > { %v8828_v10 = vpop.f32.mrf.mxu0  ;;  %v5796_v37 = vpop.f32.mrf.mxu1  ;;  %v5366_v30 = vadd.f32 %v12050_v51, %v12040_v0 }
 0x2b9   : > { %v5628_v17 = vadd.f32 %v8828_v10, %v5350_v55  ;;  %v6803_v63 = vmax.f32 %v6771_v41, 0.0  ;;  %v6769_v57 = vadd.f32 %v11831_v15, %v6737_v23  ;;  %v6740_v48 = vmul.f32 %v11821_v13, %v5923_v3 }
 0x2ba   : > { %v5511_v35 = vpop.f32.mrf.mxu0  ;;  %v5921_v53 = vadd.f32 %v5796_v37, %v5623_v24  ;;  %v8862_v29 = vpop.f32.mrf.mxu1 }
 0x2bb   : > { %v5626_v36 = vadd.f32 %v5511_v35, %v5342_v21  ;;  %v8042_v38 = vpack.c.bf16 %v6803_v63, %v6803_v63  ;;  %v6801_v40 = vmax.f32 %v6769_v57, 0.0  ;;  %v6772_v54 = vadd.f32 %v11831_v15, %v6740_v48 }
 0x2bc   : > { %v8829_v44 = vpop.f32.mrf.mxu0  ;;  %v6738_v60 = vmul.f32 %v11821_v13, %v5921_v53  ;;  %v5809_v10 = vpop.f32.mrf.mxu1  ;;  %v5926_v55 = vadd.f32 %v8862_v29, %v5628_v17  ;;  %v5358_v63 = vadd.f32 %v12054_v14, %v12044_v50 }
 0x2bd   : > { %v5629_v22 = vadd.f32 %v8829_v44, %v5353_v2  ;;  %7911 = vst.msk [vmem:[%s10399_s10 + $0x188] sm:$0xf] %vm6190_vm7, %v8042_v38  ;;  %v8040_v21 = vpack.c.bf16 %v6801_v40, %v6801_v40  ;;  %v6804_v28 = vmax.f32 %v6772_v54, 0.0  ;;  %v5924_v52 = vadd.f32 %v5809_v10, %v5626_v36 }
 0x2be   : > { %v5514_v18 = vpop.f32.mrf.mxu0  ;;  %v6770_v16 = vadd.f32 %v11831_v15, %v6738_v60  ;;  %v6743_v23 = vmul.f32 %v11821_v13, %v5926_v55  ;;  %v8863_v3 = vpop.f32.mrf.mxu1  ;;  %v5369_v36 = vadd.f32 %v12058_v59, %v12048_v43  ;;  %v5361_v38 = vadd.f32 %v12062_v58, %v12052_v7 }
 0x2bf   : > { %v5627_v24 = vadd.f32 %v5514_v18, %v5345_v27  ;;  %7909 = vst.msk [vmem:[%s10399_s10 + $0x180] sm:$0xf] %vm6190_vm7, %v8040_v21  ;;  %v8043_v2 = vpack.c.bf16 %v6804_v28, %v6804_v28  ;;  %v6741_v51 = vmul.f32 %v11821_v13, %v5924_v52  ;;  %v5927_v37 = vadd.f32 %v8863_v3, %v5629_v22 }
 0x2c0   : > { %v8832_v41 = vpop.f32.mrf.mxu0  ;;  %v6802_v0 = vmax.f32 %v6770_v16, 0.0  ;;  %v6775_v57 = vadd.f32 %v11831_v15, %v6743_v23  ;;  %v5812_v48 = vpop.f32.mrf.mxu1  ;;  %v5382_v10 = vadd.f32 %v12066_v9, %v12056_v39 }
 0x2c1   : > { %v5632_v35 = vadd.f32 %v8832_v41, %v5366_v30  ;;  %7912 = vst.msk [vmem:[%s10399_s10 + $0x18c] sm:$0xf] %vm6190_vm7, %v8043_v2  ;;  %v6773_v44 = vadd.f32 %v11831_v15, %v6741_v51  ;;  %v6744_v27 = vmul.f32 %v11821_v13, %v5927_v37  ;;  %v5925_v29 = vadd.f32 %v5812_v48, %v5627_v24 }
 0x2c2   : > { %v5527_v17 = vpop.f32.mrf.mxu0  ;;  %v8041_v53 = vpack.c.bf16 %v6802_v0, %v6802_v0  ;;  %v6807_v40 = vmax.f32 %v6775_v57, 0.0  ;;  %v8866_v50 = vpop.f32.mrf.mxu1  ;;  %v5374_v41 = vadd.f32 %v12070_v49, %v12060_v32 }
 0x2c3   : > { %v5630_v14 = vadd.f32 %v5527_v17, %v5358_v63  ;;  %v6805_v43 = vmax.f32 %v6773_v44, 0.0  ;;  %v6776_v59 = vadd.f32 %v11831_v15, %v6744_v27  ;;  %v6742_v60 = vmul.f32 %v11821_v13, %v5925_v29 }
 0x2c4   : > { %v8833_v22 = vpop.f32.mrf.mxu0  ;;  %7910 = vst.msk [vmem:[%s10399_s10 + $0x184] sm:$0xf] %vm6190_vm7, %v8041_v53  ;;  %v5930_v18 = vadd.f32 %v8866_v50, %v5632_v35  ;;  %v8046_v55 = vpack.c.bf16 %v6807_v40, %v6807_v40  ;;  %v5825_v7 = vpop.f32.mrf.mxu1  ;;  %v5385_v53 = vadd.f32 %v12074_v46, %v12064_v12  ;;  %v5377_v44 = vadd.f32 %v12078_v11, %v12068_v42 }
 0x2c5   : > { %v5633_v54 = vadd.f32 %v8833_v22, %v5369_v36  ;;  %v8044_v24 = vpack.c.bf16 %v6805_v43, %v6805_v43  ;;  %v6808_v21 = vmax.f32 %v6776_v59, 0.0  ;;  %v6774_v28 = vadd.f32 %v11831_v15, %v6742_v60 }
 0x2c6   : > { %v5530_v30 = vpop.f32.mrf.mxu0  ;;  %v6747_v16 = vmul.f32 %v11821_v13, %v5930_v18  ;;  %7915 = vst.msk [vmem:[%s10399_s10 + $0x198] sm:$0xf] %vm6190_vm7, %v8046_v55  ;;  %v8867_v23 = vpop.f32.mrf.mxu1  ;;  %v5928_v3 = vadd.f32 %v5825_v7, %v5630_v14 }
 0x2c7   : > { %v5631_v58 = vadd.f32 %v5530_v30, %v5361_v38  ;;  %7913 = vst.msk [vmem:[%s10399_s10 + $0x190] sm:$0xf] %vm6190_vm7, %v8044_v24  ;;  %v8047_v39 = vpack.c.bf16 %v6808_v21, %v6808_v21  ;;  %v6806_v9 = vmax.f32 %v6774_v28, 0.0  ;;  %v5931_v0 = vadd.f32 %v8867_v23, %v5633_v54 }
 0x2c8   : > { %v8836_v52 = vpop.f32.mrf.mxu0  ;;  %v6779_v2 = vadd.f32 %v11831_v15, %v6747_v16  ;;  %v6745_v37 = vmul.f32 %v11821_v13, %v5928_v3  ;;  %v5828_v17 = vpop.f32.mrf.mxu1  ;;  %v5398_v54 = vadd.f32 %v12082_v47, %v12072_v4  ;;  %v5401_v16 = vadd.f32 %v12090_v31, %v12080_v45  ;;  %v12236_v31 = vld [vmem:[%s12353_s2] ss:$0 sm:$0xff] }
 0x2c9   : > { %v5636_v35 = vadd.f32 %v8836_v52, %v5382_v10  ;;  %7916 = vst.msk [vmem:[%s10399_s10 + $0x19c] sm:$0xf] %vm6190_vm7, %v8047_v39  ;;  %v8045_v32 = vpack.c.bf16 %v6806_v9, %v6806_v9  ;;  %v6748_v36 = vmul.f32 %v11821_v13, %v5931_v0  ;;  %v5929_v57 = vadd.f32 %v5828_v17, %v5631_v58 }
 0x2ca   : > { %v5543_v51 = vpop.f32.mrf.mxu0  ;;  %v6811_v49 = vmax.f32 %v6779_v2, 0.0  ;;  %v6777_v27 = vadd.f32 %v11831_v15, %v6745_v37  ;;  %v8870_v29 = vpop.f32.mrf.mxu1  ;;  %v5390_v10 = vadd.f32 %v12086_v56, %v12076_v20 }
 0x2cb   : > { %v5634_v63 = vadd.f32 %v5543_v51, %v5374_v41  ;;  %7914 = vst.msk [vmem:[%s10399_s10 + $0x194] sm:$0xf] %vm6190_vm7, %v8045_v32  ;;  %v6780_v38 = vadd.f32 %v11831_v15, %v6748_v36  ;;  %v6746_v40 = vmul.f32 %v11821_v13, %v5929_v57  ;;  %v5934_v50 = vadd.f32 %v8870_v29, %v5636_v35 }
 0x2cc   : > { %v8837_v48 = vpop.f32.mrf.mxu0  ;;  %v8050_v22 = vpack.c.bf16 %v6811_v49, %v6811_v49  ;;  %v6809_v43 = vmax.f32 %v6777_v27, 0.0  ;;  %v5841_v12 = vpop.f32.mrf.mxu1  ;;  %v5414_v32 = vadd.f32 %v12098_v61, %v12088_v34  ;;  %v5406_v29 = vadd.f32 %v12102_v1, %v12092_v8 }
 0x2cd   : > { %v5637_v46 = vadd.f32 %v8837_v48, %v5385_v53  ;;  %v6812_v42 = vmax.f32 %v6780_v38, 0.0  ;;  %v6778_v11 = vadd.f32 %v11831_v15, %v6746_v40  ;;  %v6751_v60 = vmul.f32 %v11821_v13, %v5934_v50 }
 0x2ce   : > { %v5546_v14 = vpop.f32.mrf.mxu0  ;;  %7919 = vst.msk [vmem:[%s10399_s10 + $0x1a8] sm:$0xf] %vm6190_vm7, %v8050_v22  ;;  %v5932_v18 = vadd.f32 %v5841_v12, %v5634_v63  ;;  %v8048_v55 = vpack.c.bf16 %v6809_v43, %v6809_v43  ;;  %v8871_v4 = vpop.f32.mrf.mxu1  ;;  %v5393_v63 = vadd.f32 %v12094_v33, %v12084_v6 }
 0x2cf   : > { %v5635_v59 = vadd.f32 %v5546_v14, %v5377_v44  ;;  %v8051_v7 = vpack.c.bf16 %v6812_v42, %v6812_v42  ;;  %v6810_v58 = vmax.f32 %v6778_v11, 0.0  ;;  %v6783_v24 = vadd.f32 %v11831_v15, %v6751_v60  ;;  %v12230_v15 = vld [vmem:[%s12354_s3] ss:$0 sm:$0xff] }
 0x2d0   : > { %v8840_v30 = vpop.f32.mrf.mxu0  ;;  %v6749_v21 = vmul.f32 %v11821_v13, %v5932_v18  ;;  %7917 = vst.msk [vmem:[%s10399_s10 + $0x1a0] sm:$0xf] %vm6190_vm7, %v8048_v55  ;;  %v5844_v52 = vpop.f32.mrf.mxu1  ;;  %v5935_v41 = vadd.f32 %v8871_v4, %v5637_v46  ;;  %v5409_v60 = vadd.f32 %v12110_v26, %v12100_v19 }
 0x2d1   : > { %v5640_v47 = vadd.f32 %v8840_v30, %v5398_v54  ;;  %7920 = vst.msk [vmem:[%s10399_s10 + $0x1ac] sm:$0xf] %vm6190_vm7, %v8051_v7  ;;  %v8049_v20 = vpack.c.bf16 %v6810_v58, %v6810_v58  ;;  %v6815_v56 = vmax.f32 %v6783_v24, 0.0  ;;  %v5933_v3 = vadd.f32 %v5844_v52, %v5635_v59  ;;  %v12735_v52 = vld [vmem:[#allocation37_spill] sm:$0xff] }
 0x2d2   : > { %v5559_v28 = vpop.f32.mrf.mxu0  ;;  %v6781_v13 = vadd.f32 %v12230_v15, %v6749_v21  ;;  %v6752_v35 = vmul.f32 %v12236_v31, %v5935_v41  ;;  %v8874_v39 = vpop.f32.mrf.mxu1  ;;  %v5417_v54 = vadd.f32 %v12106_v5, %v12096_v62  ;;  %v12736_v41 = vld [vmem:[#allocation47_spill] sm:$0xff] }
 0x2d3   : > { %v5638_v23 = vadd.f32 %v5559_v28, %v5390_v10  ;;  %7918 = vst.msk [vmem:[%s10399_s10 + $0x1a4] sm:$0xf] %vm6190_vm7, %v8049_v20  ;;  %v8054_v2 = vpack.c.bf16 %v6815_v56, %v6815_v56  ;;  %v6750_v51 = vmul.f32 %v12236_v31, %v5933_v3  ;;  %v5938_v37 = vadd.f32 %v8874_v39, %v5640_v47  ;;  %v12737_v20 = vld [vmem:[#allocation44_spill] sm:$0xff]  ;;  %v12738_v56 = vld [vmem:[#allocation53_spill] sm:$0xff] }
 0x2d4   : > { %v8841_v45 = vpop.f32.mrf.mxu0  ;;  %v6813_v0 = vmax.f32 %v6781_v13, 0.0  ;;  %v6784_v49 = vadd.f32 %v12230_v15, %v6752_v35  ;;  %v5857_v36 = vpop.f32.mrf.mxu1  ;;  %v5422_v13 = vadd.f32 %v12738_v56, %v12737_v20 }
 0x2d5   : > { %v5641_v9 = vadd.f32 %v8841_v45, %v5401_v16  ;;  %7923 = vst.msk [vmem:[%s10399_s10 + $0x1b8] sm:$0xf] %vm6190_vm7, %v8054_v2  ;;  %v6782_v48 = vadd.f32 %v12230_v15, %v6750_v51  ;;  %v6755_v53 = vmul.f32 %v12236_v31, %v5938_v37  ;;  %v5936_v44 = vadd.f32 %v5857_v36, %v5638_v23  ;;  %v12739_v51 = vld [vmem:[#allocation46_spill] sm:$0xff]  ;;  %v12740_v37 = vld [vmem:[#allocation9_spill] sm:$0xff] }
 0x2d6   : > { %v5562_v17 = vpop.f32.mrf.mxu0  ;;  %v8052_v57 = vpack.c.bf16 %v6813_v0, %v6813_v0  ;;  %v6816_v22 = vmax.f32 %v6784_v49, 0.0  ;;  %v8875_v6 = vpop.f32.mrf.mxu1  ;;  %v5430_v23 = vadd.f32 %v12736_v41, %v12735_v52 }
 0x2d7   : > { %v5639_v33 = vadd.f32 %v5562_v17, %v5393_v63  ;;  %v6814_v34 = vmax.f32 %v6782_v48, 0.0  ;;  %v6787_v61 = vadd.f32 %v12230_v15, %v6755_v53  ;;  %v6753_v40 = vmul.f32 %v12236_v31, %v5936_v44 }
 0x2d8   : > { %v8844_v27 = vpop.f32.mrf.mxu0  ;;  %7921 = vst.msk [vmem:[%s10399_s10 + $0x1b0] sm:$0xf] %vm6190_vm7, %v8052_v57  ;;  %v5939_v50 = vadd.f32 %v8875_v6, %v5641_v9  ;;  %v8055_v43 = vpack.c.bf16 %v6816_v22, %v6816_v22  ;;  %v5860_v8 = vpop.f32.mrf.mxu1  ;;  %v5433_v17 = vadd.f32 %v12740_v37, %v12739_v51  ;;  %v12742_v22 = vld [vmem:[#allocation59_spill] sm:$0xff] }
 0x2d9   : > { %v5644_v38 = vadd.f32 %v8844_v27, %v5414_v32  ;;  %v8053_v12 = vpack.c.bf16 %v6814_v34, %v6814_v34  ;;  %v6819_v46 = vmax.f32 %v6787_v61, 0.0  ;;  %v6785_v59 = vadd.f32 %v12230_v15, %v6753_v40 }
 0x2da   : > { %v5575_v14 = vpop.f32.mrf.mxu0  ;;  %v6756_v42 = vmul.f32 %v12236_v31, %v5939_v50  ;;  %7924 = vst.msk [vmem:[%s10399_s10 + $0x1bc] sm:$0xf] %vm6190_vm7, %v8055_v43  ;;  %v8878_v18 = vpop.f32.mrf.mxu1  ;;  %v5937_v30 = vadd.f32 %v5860_v8, %v5639_v33  ;;  %v12743_v43 = vld [vmem:[#allocation6_spill] sm:$0xff]  ;;  %v12744_v8 = vld [vmem:[#allocation45_spill] sm:$0xff] }
 0x2db   : > { %v5642_v1 = vadd.f32 %v5575_v14, %v5406_v29  ;;  %7922 = vst.msk [vmem:[%s10399_s10 + $0x1b4] sm:$0xf] %vm6190_vm7, %v8053_v12  ;;  %v8058_v62 = vpack.c.bf16 %v6819_v46, %v6819_v46  ;;  %v6817_v5 = vmax.f32 %v6785_v59, 0.0  ;;  %v5942_v4 = vadd.f32 %v8878_v18, %v5644_v38  ;;  %v12741_v29 = vld [vmem:[#allocation51_spill] sm:$0xff] }
 0x2dc   : > { %v8845_v11 = vpop.f32.mrf.mxu0  ;;  %v6788_v55 = vadd.f32 %v12230_v15, %v6756_v42  ;;  %v6754_v7 = vmul.f32 %v12236_v31, %v5937_v30  ;;  %v5873_v58 = vpop.f32.mrf.mxu1  ;;  %v5425_v6 = vadd.f32 %v12742_v22, %v12741_v29 }
 0x2dd   : > { %v5645_v10 = vadd.f32 %v8845_v11, %v5417_v54  ;;  %7927 = vst.msk [vmem:[%s10399_s10 + $0x1c8] sm:$0xf] %vm6190_vm7, %v8058_v62  ;;  %v8056_v19 = vpack.c.bf16 %v6817_v5, %v6817_v5  ;;  %v6759_v21 = vmul.f32 %v12236_v31, %v5942_v4  ;;  %v5940_v28 = vadd.f32 %v5873_v58, %v5642_v1 }
 0x2de   : > { %v5578_v47 = vpop.f32.mrf.mxu0  ;;  %v6820_v26 = vmax.f32 %v6788_v55, 0.0  ;;  %v6786_v3 = vadd.f32 %v12230_v15, %v6754_v7  ;;  %v8879_v45 = vpop.f32.mrf.mxu1  ;;  %v5446_v1 = vadd.f32 %v12744_v8, %v12743_v43 }
 0x2df   : > { %v5643_v24 = vadd.f32 %v5578_v47, %v5409_v60  ;;  %7925 = vst.msk [vmem:[%s10399_s10 + $0x1c0] sm:$0xf] %vm6190_vm7, %v8056_v19  ;;  %v6791_v39 = vadd.f32 %v12230_v15, %v6759_v21  ;;  %v6757_v9 = vmul.f32 %v12236_v31, %v5940_v28  ;;  %v5943_v2 = vadd.f32 %v8879_v45, %v5645_v10  ;;  %v12746_v19 = vld [vmem:[#allocation57_spill] sm:$0xff]  ;;  %v12748_v28 = vld [vmem:[#allocation50_spill] sm:$0xff] }
 0x2e0   : > { %v8848_v16 = vpop.f32.mrf.mxu0  ;;  %v8059_v35 = vpack.c.bf16 %v6820_v26, %v6820_v26  ;;  %v6818_v63 = vmax.f32 %v6786_v3, 0.0  ;;  %v5876_v32 = vpop.f32.mrf.mxu1  ;;  %v12747_v21 = vld [vmem:[#allocation61_spill] sm:$0xff] }
 0x2e1   : > { %v5648_v49 = vadd.f32 %v8848_v16, %v5430_v23  ;;  %v6823_v57 = vmax.f32 %v6791_v39, 0.0  ;;  %v6789_v48 = vadd.f32 %v12230_v15, %v6757_v9  ;;  %v6760_v53 = vmul.f32 %v12236_v31, %v5943_v2  ;;  %v12749_v45 = vld [vmem:[#allocation49_spill] sm:$0xff] }
 0x2e2   : > { %v5591_v0 = vpop.f32.mrf.mxu0  ;;  %7928 = vst.msk [vmem:[%s10399_s10 + $0x1cc] sm:$0xf] %vm6190_vm7, %v8059_v35  ;;  %v5941_v44 = vadd.f32 %v5876_v32, %v5643_v24  ;;  %v8057_v33 = vpack.c.bf16 %v6818_v63, %v6818_v63  ;;  %v8882_v38 = vpop.f32.mrf.mxu1  ;;  %v12745_v24 = vld [vmem:[#allocation48_spill] sm:$0xff]  ;;  %v5449_v16 = vadd.f32 %v12748_v28, %v12747_v21  ;;  %v5441_v35 = vadd.f32 %v12142_v25, %v12749_v45 }
 0x2e3   : > { %v5646_v36 = vadd.f32 %v5591_v0, %v5422_v13  ;;  %v8062_v61 = vpack.c.bf16 %v6823_v57, %v6823_v57  ;;  %v6821_v40 = vmax.f32 %v6789_v48, 0.0  ;;  %v6792_v50 = vadd.f32 %v12230_v15, %v6760_v53 }
 0x2e4   : > { %v8849_v27 = vpop.f32.mrf.mxu0  ;;  %v6758_v14 = vmul.f32 %v12236_v31, %v5941_v44  ;;  %7926 = vst.msk [vmem:[%s10399_s10 + $0x1c4] sm:$0xf] %vm6190_vm7, %v8057_v33  ;;  %v5889_v12 = vpop.f32.mrf.mxu1  ;;  %v5946_v46 = vadd.f32 %v8882_v38, %v5648_v49  ;;  %v5438_v26 = vadd.f32 %v12746_v19, %v12745_v24 }
 0x2e5   : > { %v5649_v34 = vadd.f32 %v8849_v27, %v5433_v17  ;;  %7931 = vst.msk [vmem:[%s10399_s10 + $0x1d8] sm:$0xf] %vm6190_vm7, %v8062_v61  ;;  %v8060_v42 = vpack.c.bf16 %v6821_v40, %v6821_v40  ;;  %v6824_v11 = vmax.f32 %v6792_v50, 0.0  ;;  %v5944_v18 = vadd.f32 %v5889_v12, %v5646_v36 }
 0x2e6   : > { %v5594_v54 = vpop.f32.mrf.mxu0  ;;  %v6790_v60 = vadd.f32 %v12230_v15, %v6758_v14  ;;  %v6763_v10 = vmul.f32 %v12236_v31, %v5946_v46  ;;  %v8883_v62 = vpop.f32.mrf.mxu1 }
 0x2e7   : > { %v5647_v59 = vadd.f32 %v5594_v54, %v5425_v6  ;;  %7929 = vst.msk [vmem:[%s10399_s10 + $0x1d0] sm:$0xf] %vm6190_vm7, %v8060_v42  ;;  %v8063_v55 = vpack.c.bf16 %v6824_v11, %v6824_v11  ;;  %v6761_v47 = vmul.f32 %v12236_v31, %v5944_v18  ;;  %v5947_v7 = vadd.f32 %v8883_v62, %v5649_v34 }
 0x2e8   : > { %v8852_v30 = vpop.f32.mrf.mxu0  ;;  %v6822_v4 = vmax.f32 %v6790_v60, 0.0  ;;  %v6795_v52 = vadd.f32 %v12230_v15, %v6763_v10  ;;  %v5892_v41 = vpop.f32.mrf.mxu1 }
 0x2e9   : > { %v5652_v5 = vadd.f32 %v8852_v30, %v5446_v1  ;;  %7932 = vst.msk [vmem:[%s10399_s10 + $0x1dc] sm:$0xf] %vm6190_vm7, %v8063_v55  ;;  %v6793_v20 = vadd.f32 %v12230_v15, %v6761_v47  ;;  %v6764_v56 = vmul.f32 %v12236_v31, %v5947_v7  ;;  %v5945_v13 = vadd.f32 %v5892_v41, %v5647_v59 }
 0x2ea   : > { %v5607_v58 = vpop.f32.mrf.mxu0  ;;  %v8061_v23 = vpack.c.bf16 %v6822_v4, %v6822_v4  ;;  %v6827_v39 = vmax.f32 %v6795_v52, 0.0  ;;  %v8886_v9 = vpop.f32.mrf.mxu1 }
 0x2eb   : > { %v5650_v2 = vadd.f32 %v5607_v58, %v5438_v26  ;;  %v6825_v51 = vmax.f32 %v6793_v20, 0.0  ;;  %v6796_v37 = vadd.f32 %v12230_v15, %v6764_v56  ;;  %v6762_v17 = vmul.f32 %v12236_v31, %v5945_v13 }
 0x2ec   : > { %v8853_v3 = vpop.f32.mrf.mxu0  ;;  %7930 = vst.msk [vmem:[%s10399_s10 + $0x1d4] sm:$0xf] %vm6190_vm7, %v8061_v23  ;;  %v5950_v63 = vadd.f32 %v8886_v9, %v5652_v5  ;;  %v8066_v49 = vpack.c.bf16 %v6827_v39, %v6827_v39  ;;  %v5905_v36 = vpop.f32.mrf.mxu1 }
 0x2ed   : > { %v5653_v0 = vadd.f32 %v8853_v3, %v5449_v16  ;;  %v8064_v25 = vpack.c.bf16 %v6825_v51, %v6825_v51  ;;  %v6828_v48 = vmax.f32 %v6796_v37, 0.0  ;;  %v6794_v53 = vadd.f32 %v12230_v15, %v6762_v17 }
 0x2ee   : > { %v5610_v32 = vpop.f32.mrf.mxu0  ;;  %v6767_v44 = vmul.f32 %v12236_v31, %v5950_v63  ;;  %7935 = vst.msk [vmem:[%s10399_s10 + $0x1e8] sm:$0xf] %vm6190_vm7, %v8066_v49  ;;  %v8887_v27 = vpop.f32.mrf.mxu1  ;;  %v5948_v29 = vadd.f32 %v5905_v36, %v5650_v2 }
 0x2ef   : > { %v5651_v57 = vadd.f32 %v5610_v32, %v5441_v35  ;;  %7933 = vst.msk [vmem:[%s10399_s10 + $0x1e0] sm:$0xf] %vm6190_vm7, %v8064_v25  ;;  %v8067_v22 = vpack.c.bf16 %v6828_v48, %v6828_v48  ;;  %v6826_v6 = vmax.f32 %v6794_v53, 0.0  ;;  %v5951_v38 = vadd.f32 %v8887_v27, %v5653_v0 }
 0x2f0   : > { %v6799_v33 = vadd.f32 %v12230_v15, %v6767_v44  ;;  %v6765_v34 = vmul.f32 %v12236_v31, %v5948_v29  ;;  %v5908_v61 = vpop.f32.mrf.mxu1 }
 0x2f1   : > { %7936 = vst.msk [vmem:[%s10399_s10 + $0x1ec] sm:$0xf] %vm6190_vm7, %v8067_v22  ;;  %v8065_v40 = vpack.c.bf16 %v6826_v6, %v6826_v6  ;;  %v6768_v14 = vmul.f32 %v12236_v31, %v5951_v38  ;;  %v5949_v54 = vadd.f32 %v5908_v61, %v5651_v57 }
 0x2f2   : > { %v6831_v50 = vmax.f32 %v6799_v33, 0.0  ;;  %v6797_v43 = vadd.f32 %v12230_v15, %v6765_v34 }
 0x2f3   : > { %7934 = vst.msk [vmem:[%s10399_s10 + $0x1e4] sm:$0xf] %vm6190_vm7, %v8065_v40  ;;  %v6800_v1 = vadd.f32 %v12230_v15, %v6768_v14  ;;  %v6766_v12 = vmul.f32 %v12236_v31, %v5949_v54 }
 0x2f4   : > { %v8070_v8 = vpack.c.bf16 %v6831_v50, %v6831_v50  ;;  %v6829_v46 = vmax.f32 %v6797_v43, 0.0 }
 0x2f5   : > { %v6832_v59 = vmax.f32 %v6800_v1, 0.0  ;;  %v6798_v42 = vadd.f32 %v12230_v15, %v6766_v12 }
 0x2f6   : > { %7939 = vst.msk [vmem:[%s10399_s10 + $0x1f8] sm:$0xf] %vm6190_vm7, %v8070_v8  ;;  %v8068_v11 = vpack.c.bf16 %v6829_v46, %v6829_v46 }
 0x2f7   : > { %v8071_v60 = vpack.c.bf16 %v6832_v59, %v6832_v59  ;;  %v6830_v18 = vmax.f32 %v6798_v42, 0.0 }
 0x2f8   : > { %7937 = vst.msk [vmem:[%s10399_s10 + $0x1f0] sm:$0xf] %vm6190_vm7, %v8068_v11 }
 0x2f9   : > { %7940 = vst.msk [vmem:[%s10399_s10 + $0x1fc] sm:$0xf] %vm6190_vm7, %v8071_v60  ;;  %v8069_v30 = vpack.c.bf16 %v6830_v18, %v6830_v18 }
 0x2fb   : > { %7938 = vst.msk [vmem:[%s10399_s10 + $0x1f4] sm:$0xf] %vm6190_vm7, %v8069_v30 }
 0x2fc PF: > { %s14_s17 = sadd.s32 1, %s9080_s17   ;;  %s12750_s15 = smov %s9076_s16 }
 0x2fd   : > { %p11_p5 = scmp.ge.s32.totalorder %s14_s17, 4   ;;  %s12751_s16 = smov %s12753_s18 }
 0x2ff   :  { %13 = sbr.rel (!%p11_p5) target bundleno = 2 (0x2), region = 87 }

</bundles_post_ra>
